<compile_context>
chip_gen: v5e
topology: v5e:2x2
jax: 0.10.0
libtpu: 0.0.40
codegen_flags: <defaults>
</compile_context>

<pallas_src>
import numpy as np
import jax
import jax.numpy as jnp
from jax.experimental import pallas as pl
from jax.experimental import pallas as pallas  # noqa: F401 (kept for clarity of imports)
from jax.experimental.pallas import tpu as pltpu  # noqa: F401  (no TPU-specific ops needed)

# ----------------------- small, module-consistent config -----------------------
B  = 2        # batch
T  = 16       # encoder sequence length
D  = 32       # hidden_state_dim
H  = 4        # num attention heads
DH = D // H   # per-head dim
K  = 10       # conv_out_channel of the location-aware attention
C  = 16       # num_classes
LQ = 8        # raw target length  -> decoder runs L = LQ - 1 steps
L  = LQ - 1
BT = B * T
PAD_ID, SOS_ID, EOS_ID = 0, 1, 2


# --------------------------------- Pallas kernel --------------------------------
def _decoder_kernel(
    emb_ref, enc_ref, shl_ref, shr_ref,
    wq_ref, qb_ref, wv_ref,
    wll_ref, wlc_ref, wlr_ref, bloc_ref,
    wsel_ref, rep_ref,
    wl0_ref, bl0_ref, wl1_ref, bl1_ref,
    wf1_ref, bf1_ref, wf2_ref, bf2_ref,
    logp_ref, attn_ref,
):
    f32 = jnp.float32

    emb = emb_ref[...]                       # (L, B, D)
    shl = shl_ref[...]                       # (BT, BT)  shift t -> t-1 (per batch row block)
    shr = shr_ref[...]                       # (BT, BT)  shift t -> t+1
    wq = wq_ref[...]; qb = qb_ref[...]       # (D, D), (1, D)  (qb = tiled att_bias)
    wll = wll_ref[...]; wlc = wlc_ref[...]; wlr = wlr_ref[...]   # (H, D) each
    bloc = bloc_ref[...]                     # (1, D)
    wsel = wsel_ref[...]                     # (D, H) block-diag score weights
    rep = rep_ref[...]                       # (H, D) head-repeat matrix
    wl0 = wl0_ref[...]; bl0 = bl0_ref[...]   # (3D, 4D), (1, 4D)
    wl1 = wl1_ref[...]; bl1 = bl1_ref[...]   # (2D, 4D), (1, 4D)
    wf1 = wf1_ref[...]; bf1 = bf1_ref[...]   # (2D, D), (1, D)
    wf2 = wf2_ref[...]; bf2 = bf2_ref[...]   # (D, C), (1, C)

    # encoder value projection: one (B*T, D) @ (D, D) MXU push, done once.
    vp = jnp.dot(enc_ref[...].reshape(BT, D), wv_ref[...],
                 preferred_element_type=f32)                     # (BT, D)
    vp3 = vp.reshape(B, T, D)

    h0 = jnp.zeros((B, D), f32); c0 = jnp.zeros((B, D), f32)
    h1 = jnp.zeros((B, D), f32); c1 = jnp.zeros((B, D), f32)
    la = jnp.zeros((BT, H), f32)             # last attention map, (batch*time, heads)

    for t in range(L):                       # static unroll of the short decode recurrence
        q = emb[t]                                                # (B, D)
        qp = jnp.dot(q, wq, preferred_element_type=f32) + qb      # (B, D), att_bias folded in

        # ---------------- multi-head location-aware attention ----------------
        # conv1d(H->K,k=3,p=1) + Linear(K->DH) folded into three (H, D) matrices;
        # the time shifts of last_attn are constant shift-matrix matmuls.
        tap_l = jnp.dot(shl, la, preferred_element_type=f32)      # (BT, H) = la shifted to t-1
        tap_r = jnp.dot(shr, la, preferred_element_type=f32)      # (BT, H) = la shifted to t+1
        loc = jnp.tanh(jnp.dot(tap_l, wll, preferred_element_type=f32)
                       + jnp.dot(la, wlc, preferred_element_type=f32)
                       + jnp.dot(tap_r, wlr, preferred_element_type=f32)
                       + bloc)                                    # (BT, D), head-tiled

        energy = jnp.tanh(vp3 + qp[:, None, :] + loc.reshape(B, T, D))      # (B, T, D)
        score = jnp.dot(energy.reshape(BT, D), wsel,
                        preferred_element_type=f32).reshape(B, T, H)        # (B, T, H)
        m = jnp.max(score, axis=1, keepdims=True)
        e = jnp.exp(score - m)
        a = e * pl.reciprocal(jnp.sum(e, axis=1, keepdims=True), approx=True)  # softmax over T

        la = a.reshape(BT, H)
        a_rep = jnp.dot(la, rep, preferred_element_type=f32)      # (BT, D) head-repeated weights
        context = jnp.sum(a_rep.reshape(B, T, D) * vp3, axis=1)   # (B, D)

        attn_ref[t] = a                                           # (B, T, H)

        # ---------------- 2-layer LSTM, fused gate matmuls (gate order i, f, g, o) ----------------
        g0 = jnp.dot(jnp.concatenate([q, context, h0], axis=-1), wl0,
                     preferred_element_type=f32) + bl0            # (B, 4D)
        i0 = jax.nn.sigmoid(g0[:, 0 * D:1 * D])
        f0 = jax.nn.sigmoid(g0[:, 1 * D:2 * D])
        n0 = jnp.tanh(g0[:, 2 * D:3 * D])
        o0 = jax.nn.sigmoid(g0[:, 3 * D:4 * D])
        c0 = f0 * c0 + i0 * n0
        h0 = o0 * jnp.tanh(c0)

        g1 = jnp.dot(jnp.concatenate([h0, h1], axis=-1), wl1,
                     preferred_element_type=f32) + bl1            # (B, 4D)
        i1 = jax.nn.sigmoid(g1[:, 0 * D:1 * D])
        f1 = jax.nn.sigmoid(g1[:, 1 * D:2 * D])
        n1 = jnp.tanh(g1[:, 2 * D:3 * D])
        o1 = jax.nn.sigmoid(g1[:, 3 * D:4 * D])
        c1 = f1 * c1 + i1 * n1
        h1 = o1 * jnp.tanh(c1)

        # ---------------- fc head + log_softmax ----------------
        z = jnp.tanh(jnp.dot(jnp.concatenate([h1, context], axis=-1), wf1,
                             preferred_element_type=f32) + bf1)
        logits = jnp.dot(z, wf2, preferred_element_type=f32) + bf2
        mx = jnp.max(logits, axis=-1, keepdims=True)
        lse = jnp.log(jnp.sum(jnp.exp(logits - mx), axis=-1, keepdims=True)) + mx
        logp_ref[t] = logits - lse                                # (B, C)


def decoder_pallas(emb_seq, enc, ka):
    """emb_seq: (L, B, D), enc: (B, T, D), ka: fused kernel-layout params."""
    return pl.pallas_call(
        _decoder_kernel,
        out_shape=(jax.ShapeDtypeStruct((L, B, C), jnp.float32),
                   jax.ShapeDtypeStruct((L, B, T, H), jnp.float32)),
    )(emb_seq, enc,
      ka['shl'], ka['shr'],
      ka['wq'], ka['qb'], ka['wv'],
      ka['wll'], ka['wlc'], ka['wlr'], ka['bloc'],
      ka['wsel'], ka['rep'],
      ka['wl0'], ka['bl0'], ka['wl1'], ka['bl1'],
      ka['wf1'], ka['bf1'], ka['wf2'], ka['bf2'])


# ------------------------------ parameters (deterministic) ------------------------------
def build_params(key):
    def u(k, shape, scale=0.1):
        return jax.random.uniform(k, shape, jnp.float32, -scale, scale)
    ks = jax.random.split(key, 24)
    p = {}
    p['embedding'] = u(ks[0], (C, D), 0.5)
    # MultiHeadLocationAwareAttention
    p['conv_w'] = u(ks[1], (K, H, 3))        # torch Conv1d weight (out_ch, in_ch, kernel)
    p['conv_b'] = u(ks[2], (K,))
    p['loc_w'] = u(ks[3], (DH, K))           # Linear(K -> DH), no bias
    p['q_w'] = u(ks[4], (D, D))              # Linear(D -> D), no bias
    p['v_w'] = u(ks[5], (D, D))
    p['score_w'] = u(ks[6], (1, DH))         # Linear(DH -> 1)
    p['score_b'] = u(ks[7], (1,))
    p['att_bias'] = u(ks[8], (DH,))
    # LSTM layer 0 / 1 (PyTorch shapes)
    p['w_ih0'] = u(ks[9], (4 * D, 2 * D))
    p['w_hh0'] = u(ks[10], (4 * D, D))
    p['b_ih0'] = u(ks[11], (4 * D,))
    p['b_hh0'] = u(ks[12], (4 * D,))
    p['w_ih1'] = u(ks[13], (4 * D, D))
    p['w_hh1'] = u(ks[14], (4 * D, D))
    p['b_ih1'] = u(ks[15], (4 * D,))
    p['b_hh1'] = u(ks[16], (4 * D,))
    # fc: Linear(2D -> D), Tanh, View, Linear(D -> C)
    p['fc1_w'] = u(ks[17], (D, 2 * D))
    p['fc1_b'] = u(ks[18], (D,))
    p['fc2_w'] = u(ks[19], (C, D))
    p['fc2_b'] = u(ks[20], (C,))
    return p


def kernel_args(p):
    """Host-side fusion of the module weights into MXU-friendly matrices."""
    f32 = jnp.float32
    # conv1d(H->K,k=3,p=1) followed by Linear(K->DH): fold into one (3H, D) matrix
    # (head-tiled so it can be added directly to the (B*T, D) energy term).
    wc_stack = jnp.transpose(p['conv_w'], (2, 1, 0)).reshape(3 * H, K)   # [j*H+h, k]
    wl_tiled = jnp.tile(p['loc_w'].T, (1, H))                            # (K, D)
    wloc = wc_stack @ wl_tiled                                           # (3H, D)
    bloc = (p['conv_b'] @ wl_tiled)[None, :]                             # (1, D)  (conv bias folded)
    # per-head score reduction as a block-diagonal (D, H) matmul; head-repeat matrix (H, D).
    wsel = jnp.kron(jnp.eye(H, dtype=f32), p['score_w'][0][:, None])     # (D, H)
    rep = jnp.kron(jnp.eye(H, dtype=f32), jnp.ones((1, DH), f32))        # (H, D)
    # NOTE: score_b is a uniform pre-softmax shift -> dropped exactly.

    # constant shift matrices over the flattened (batch*time) axis for the conv taps.
    shl_np = np.zeros((BT, BT), np.float32)
    for i in range(BT):
        if i % T != 0:
            shl_np[i, i - 1] = 1.0          # row i reads time step t-1 of the same batch
    shl = jnp.asarray(shl_np)
    shr = jnp.asarray(shl_np.T)             # reads time step t+1

    return dict(
        shl=shl, shr=shr,
        wq=p['q_w'].T,
        qb=jnp.tile(p['att_bias'], H)[None, :],          # att_bias folded into the query bias
        wv=p['v_w'].T,
        wll=wloc[0 * H:1 * H], wlc=wloc[1 * H:2 * H], wlr=wloc[2 * H:3 * H],
        bloc=bloc, wsel=wsel, rep=rep,
        wl0=jnp.concatenate([p['w_ih0'].T, p['w_hh0'].T], axis=0),       # (3D, 4D)
        bl0=(p['b_ih0'] + p['b_hh0'])[None, :],
        wl1=jnp.concatenate([p['w_ih1'].T, p['w_hh1'].T], axis=0),       # (2D, 4D)
        bl1=(p['b_ih1'] + p['b_hh1'])[None, :],
        wf1=p['fc1_w'].T, bf1=p['fc1_b'][None, :],
        wf2=p['fc2_w'].T, bf2=p['fc2_b'][None, :],
    )


# ------------------------------ module-level forward ------------------------------
def decoder_arnn_forward(params, targets_np, encoder_outputs):
    # teacher_forcing_ratio = 1.0  =>  random.random() < 1.0 is always True.
    # `targets[targets != eos_id].view(batch_size, -1)` is data-dependent -> host side.
    batch_size = encoder_outputs.shape[0]
    max_length = targets_np.shape[1] - 1
    filt = targets_np[targets_np != EOS_ID].reshape(batch_size, -1)
    tokens = jnp.asarray(filt[:, :max_length])                   # (B, L)
    embedded = params['embedding'][tokens]                       # (B, L, D); dropout = identity (eval)
    emb_seq = jnp.transpose(embedded, (1, 0, 2))                 # (L, B, D)
    logp, attns = decoder_pallas(emb_seq, encoder_outputs, kernel_args(params))
    predicted_log_probs = jnp.transpose(logp, (1, 0, 2))         # (B, L, C)
    # kernel attn layout is (L, B, T, H) -> torch's stack(dim=1).permute(0,2,1,3) -> (B, H, L, T)
    attns_out = jnp.transpose(attns, (1, 3, 0, 2))
    return predicted_log_probs, attns_out


# ------------------------------ pure-JAX reference ------------------------------
def reference_forward(params, tokens, enc):
    emb = params['embedding'][tokens]
    vp = jnp.einsum('btd,de->bte', enc, params['v_w'].T)
    h = jnp.zeros((2, B, D)); c = jnp.zeros((2, B, D))
    last_attn = jnp.zeros((B, H, T))
    logps, attns = [], []
    for di in range(tokens.shape[1]):
        q = emb[:, di, :]
        qp = q @ params['q_w'].T
        pad = jnp.pad(last_attn, ((0, 0), (0, 0), (1, 1)))
        conv = jnp.zeros((B, K, T)) + params['conv_b'][None, :, None]
        for j in range(3):
            conv = conv + jnp.einsum('bht,kh->bkt', pad[:, :, j:j + T], params['conv_w'][:, :, j])
        loc = jnp.tanh(jnp.einsum('bkt,dk->btd', conv, params['loc_w']))
        ctxs, ats = [], []
        for hh in range(H):
            qh = qp[:, hh * DH:(hh + 1) * DH][:, None, :]
            vh = vp[:, :, hh * DH:(hh + 1) * DH]
            energy = jnp.tanh(vh + qh + loc + params['att_bias'][None, None, :])
            score = jnp.einsum('btd,d->bt', energy, params['score_w'][0]) + params['score_b'][0]
            a = jax.nn.softmax(score, axis=-1)
            ats.append(a)
            ctxs.append(jnp.einsum('bt,btd->bd', a, vh))
        last_attn = jnp.stack(ats, axis=1)
        context = jnp.concatenate(ctxs, axis=-1)
        x = jnp.concatenate([q, context], axis=-1)

        def cell(xx, h_, c_, wih, whh, bih, bhh):
            g = xx @ wih.T + h_ @ whh.T + bih + bhh
            i = jax.nn.sigmoid(g[:, :D]); f = jax.nn.sigmoid(g[:, D:2 * D])
            gg = jnp.tanh(g[:, 2 * D:3 * D]); o = jax.nn.sigmoid(g[:, 3 * D:])
            cn = f * c_ + i * gg
            return o * jnp.tanh(cn), cn

        h0, c0 = cell(x, h[0], c[0], params['w_ih0'], params['w_hh0'], params['b_ih0'], params['b_hh0'])
        h1, c1 = cell(h0, h[1], c[1], params['w_ih1'], params['w_hh1'], params['b_ih1'], params['b_hh1'])
        h = jnp.stack([h0, h1]); c = jnp.stack([c0, c1])
        oc = jnp.concatenate([h1, context], axis=-1)
        z = jnp.tanh(oc @ params['fc1_w'].T + params['fc1_b'])
        logits = z @ params['fc2_w'].T + params['fc2_b']
        logps.append(jax.nn.log_softmax(logits, axis=-1))
        attns.append(last_attn)
    return jnp.stack(logps, axis=1), jnp.transpose(jnp.stack(attns, axis=1), (0, 2, 1, 3))


if __name__ == "__main__":
    key = jax.random.PRNGKey(0)
    pkey, ekey, tkey = jax.random.split(key, 3)
    params = build_params(pkey)
    encoder_outputs = jax.random.normal(ekey, (B, T, D), jnp.float32)

    # targets: (B, LQ); tokens in [3, C) (no eos/sos/pad mid-sequence), eos appended last,
    # so the `targets != eos_id` filter removes exactly one token per row.
    body = np.asarray(jax.random.randint(tkey, (B, LQ - 1), 3, C))
    targets_np = np.concatenate([body, np.full((B, 1), EOS_ID)], axis=1).astype(np.int32)

    logp, attns = decoder_arnn_forward(params, targets_np, encoder_outputs)
    logp, attns = jax.block_until_ready((logp, attns))

    # cross-check against a pure-JAX reference of the same math
    tokens = jnp.asarray(targets_np[targets_np != EOS_ID].reshape(B, -1)[:, :L])
    ref_logp, ref_attns = reference_forward(params, tokens, encoder_outputs)
    err1 = float(jnp.max(jnp.abs(logp - ref_logp)))
    err2 = float(jnp.max(jnp.abs(attns - ref_attns)))
    assert err1 < 5e-2 and err2 < 5e-2, (err1, err2)
    print("KERNEL_OK")
</pallas_src>

<mosaic_0001>
module attributes {stable_mosaic.version = 11 : i64} {
  func.func @_decoder_kernel(%arg0: memref<7x2x32xf32, #tpu.memory_space<vmem>>, %arg1: memref<2x16x32xf32, #tpu.memory_space<vmem>>, %arg2: memref<32x32xf32, #tpu.memory_space<vmem>>, %arg3: memref<32x32xf32, #tpu.memory_space<vmem>>, %arg4: memref<32x32xf32, #tpu.memory_space<vmem>>, %arg5: memref<1x32xf32, #tpu.memory_space<vmem>>, %arg6: memref<32x32xf32, #tpu.memory_space<vmem>>, %arg7: memref<4x32xf32, #tpu.memory_space<vmem>>, %arg8: memref<4x32xf32, #tpu.memory_space<vmem>>, %arg9: memref<4x32xf32, #tpu.memory_space<vmem>>, %arg10: memref<1x32xf32, #tpu.memory_space<vmem>>, %arg11: memref<32x4xf32, #tpu.memory_space<vmem>>, %arg12: memref<4x32xf32, #tpu.memory_space<vmem>>, %arg13: memref<96x128xf32, #tpu.memory_space<vmem>>, %arg14: memref<1x128xf32, #tpu.memory_space<vmem>>, %arg15: memref<64x128xf32, #tpu.memory_space<vmem>>, %arg16: memref<1x128xf32, #tpu.memory_space<vmem>>, %arg17: memref<64x32xf32, #tpu.memory_space<vmem>>, %arg18: memref<1x32xf32, #tpu.memory_space<vmem>>, %arg19: memref<32x16xf32, #tpu.memory_space<vmem>>, %arg20: memref<1x16xf32, #tpu.memory_space<vmem>>, %arg21: memref<7x2x16xf32, #tpu.memory_space<vmem>>, %arg22: memref<7x2x16x4xf32, #tpu.memory_space<vmem>>) attributes {dimension_semantics = [], scalar_prefetch = 0 : i64, scratch_operands = 0 : i64, tpu.core_type = #tpu.core_type<tc>} {
    %c0 = arith.constant 0 : index
    %c0_0 = arith.constant 0 : index
    %c0_1 = arith.constant 0 : index
    %0 = vector.load %arg0[%c0, %c0_0, %c0_1] : memref<7x2x32xf32, #tpu.memory_space<vmem>>, vector<7x2x32xf32>
    %c0_2 = arith.constant 0 : index
    %c0_3 = arith.constant 0 : index
    %1 = vector.load %arg2[%c0_2, %c0_3] : memref<32x32xf32, #tpu.memory_space<vmem>>, vector<32x32xf32>
    %c0_4 = arith.constant 0 : index
    %c0_5 = arith.constant 0 : index
    %2 = vector.load %arg3[%c0_4, %c0_5] : memref<32x32xf32, #tpu.memory_space<vmem>>, vector<32x32xf32>
    %c0_6 = arith.constant 0 : index
    %c0_7 = arith.constant 0 : index
    %3 = vector.load %arg4[%c0_6, %c0_7] : memref<32x32xf32, #tpu.memory_space<vmem>>, vector<32x32xf32>
    %c0_8 = arith.constant 0 : index
    %c0_9 = arith.constant 0 : index
    %4 = vector.load %arg5[%c0_8, %c0_9] : memref<1x32xf32, #tpu.memory_space<vmem>>, vector<1x32xf32>
    %c0_10 = arith.constant 0 : index
    %c0_11 = arith.constant 0 : index
    %5 = vector.load %arg7[%c0_10, %c0_11] : memref<4x32xf32, #tpu.memory_space<vmem>>, vector<4x32xf32>
    %c0_12 = arith.constant 0 : index
    %c0_13 = arith.constant 0 : index
    %6 = vector.load %arg8[%c0_12, %c0_13] : memref<4x32xf32, #tpu.memory_space<vmem>>, vector<4x32xf32>
    %c0_14 = arith.constant 0 : index
    %c0_15 = arith.constant 0 : index
    %7 = vector.load %arg9[%c0_14, %c0_15] : memref<4x32xf32, #tpu.memory_space<vmem>>, vector<4x32xf32>
    %c0_16 = arith.constant 0 : index
    %c0_17 = arith.constant 0 : index
    %8 = vector.load %arg10[%c0_16, %c0_17] : memref<1x32xf32, #tpu.memory_space<vmem>>, vector<1x32xf32>
    %c0_18 = arith.constant 0 : index
    %c0_19 = arith.constant 0 : index
    %9 = vector.load %arg11[%c0_18, %c0_19] : memref<32x4xf32, #tpu.memory_space<vmem>>, vector<32x4xf32>
    %c0_20 = arith.constant 0 : index
    %c0_21 = arith.constant 0 : index
    %10 = vector.load %arg12[%c0_20, %c0_21] : memref<4x32xf32, #tpu.memory_space<vmem>>, vector<4x32xf32>
    %c0_22 = arith.constant 0 : index
    %c0_23 = arith.constant 0 : index
    %11 = vector.load %arg13[%c0_22, %c0_23] : memref<96x128xf32, #tpu.memory_space<vmem>>, vector<96x128xf32>
    %c0_24 = arith.constant 0 : index
    %c0_25 = arith.constant 0 : index
    %12 = vector.load %arg14[%c0_24, %c0_25] : memref<1x128xf32, #tpu.memory_space<vmem>>, vector<1x128xf32>
    %c0_26 = arith.constant 0 : index
    %c0_27 = arith.constant 0 : index
    %13 = vector.load %arg15[%c0_26, %c0_27] : memref<64x128xf32, #tpu.memory_space<vmem>>, vector<64x128xf32>
    %c0_28 = arith.constant 0 : index
    %c0_29 = arith.constant 0 : index
    %14 = vector.load %arg16[%c0_28, %c0_29] : memref<1x128xf32, #tpu.memory_space<vmem>>, vector<1x128xf32>
    %c0_30 = arith.constant 0 : index
    %c0_31 = arith.constant 0 : index
    %15 = vector.load %arg17[%c0_30, %c0_31] : memref<64x32xf32, #tpu.memory_space<vmem>>, vector<64x32xf32>
    %c0_32 = arith.constant 0 : index
    %c0_33 = arith.constant 0 : index
    %16 = vector.load %arg18[%c0_32, %c0_33] : memref<1x32xf32, #tpu.memory_space<vmem>>, vector<1x32xf32>
    %c0_34 = arith.constant 0 : index
    %c0_35 = arith.constant 0 : index
    %17 = vector.load %arg19[%c0_34, %c0_35] : memref<32x16xf32, #tpu.memory_space<vmem>>, vector<32x16xf32>
    %c0_36 = arith.constant 0 : index
    %c0_37 = arith.constant 0 : index
    %18 = vector.load %arg20[%c0_36, %c0_37] : memref<1x16xf32, #tpu.memory_space<vmem>>, vector<1x16xf32>
    %c0_38 = arith.constant 0 : index
    %c0_39 = arith.constant 0 : index
    %c0_40 = arith.constant 0 : index
    %19 = vector.load %arg1[%c0_38, %c0_39, %c0_40] : memref<2x16x32xf32, #tpu.memory_space<vmem>>, vector<2x16x32xf32>
    %20 = vector.shape_cast %19 : vector<2x16x32xf32> to vector<32x32xf32>
    %c0_41 = arith.constant 0 : index
    %c0_42 = arith.constant 0 : index
    %21 = vector.load %arg6[%c0_41, %c0_42] : memref<32x32xf32, #tpu.memory_space<vmem>>, vector<32x32xf32>
    %cst = arith.constant dense<0.000000e+00> : vector<32x32xf32>
    %22 = tpu.matmul %20, %21, %cst {dimension_numbers = #tpu.dot_dimension_numbers<[1], [0], [0], [1], [0, 0, 1, 1], [], []>} : vector<32x32xf32>, vector<32x32xf32>, vector<32x32xf32> -> vector<32x32xf32>
    %23 = vector.shape_cast %22 : vector<32x32xf32> to vector<2x16x32xf32>
    %cst_43 = arith.constant 0.000000e+00 : f32
    %24 = vector.broadcast %cst_43 : f32 to vector<2x32xf32>
    %cst_44 = arith.constant 0.000000e+00 : f32
    %25 = vector.broadcast %cst_44 : f32 to vector<2x32xf32>
    %cst_45 = arith.constant 0.000000e+00 : f32
    %26 = vector.broadcast %cst_45 : f32 to vector<2x32xf32>
    %cst_46 = arith.constant 0.000000e+00 : f32
    %27 = vector.broadcast %cst_46 : f32 to vector<2x32xf32>
    %cst_47 = arith.constant 0.000000e+00 : f32
    %28 = vector.broadcast %cst_47 : f32 to vector<32x4xf32>
    %29 = vector.extract_strided_slice %0 {offsets = [0, 0, 0], sizes = [1, 2, 32], strides = [1, 1, 1]} : vector<7x2x32xf32> to vector<1x2x32xf32>
    %30 = vector.shape_cast %29 : vector<1x2x32xf32> to vector<2x32xf32>
    %cst_48 = arith.constant dense<0.000000e+00> : vector<2x32xf32>
    %31 = tpu.matmul %30, %3, %cst_48 {dimension_numbers = #tpu.dot_dimension_numbers<[1], [0], [0], [1], [0, 0, 1, 1], [], []>} : vector<2x32xf32>, vector<32x32xf32>, vector<2x32xf32> -> vector<2x32xf32>
    %32 = vector.broadcast %4 : vector<1x32xf32> to vector<2x32xf32>
    %33 = arith.addf %31, %32 : vector<2x32xf32>
    %cst_49 = arith.constant dense<0.000000e+00> : vector<32x4xf32>
    %34 = tpu.matmul %1, %28, %cst_49 {dimension_numbers = #tpu.dot_dimension_numbers<[1], [0], [0], [1], [0, 0, 1, 1], [], []>} : vector<32x32xf32>, vector<32x4xf32>, vector<32x4xf32> -> vector<32x4xf32>
    %cst_50 = arith.constant dense<0.000000e+00> : vector<32x4xf32>
    %35 = tpu.matmul %2, %28, %cst_50 {dimension_numbers = #tpu.dot_dimension_numbers<[1], [0], [0], [1], [0, 0, 1, 1], [], []>} : vector<32x32xf32>, vector<32x4xf32>, vector<32x4xf32> -> vector<32x4xf32>
    %cst_51 = arith.constant dense<0.000000e+00> : vector<32x32xf32>
    %36 = tpu.matmul %34, %5, %cst_51 {dimension_numbers = #tpu.dot_dimension_numbers<[1], [0], [0], [1], [0, 0, 1, 1], [], []>} : vector<32x4xf32>, vector<4x32xf32>, vector<32x32xf32> -> vector<32x32xf32>
    %cst_52 = arith.constant dense<0.000000e+00> : vector<32x32xf32>
    %37 = tpu.matmul %28, %6, %cst_52 {dimension_numbers = #tpu.dot_dimension_numbers<[1], [0], [0], [1], [0, 0, 1, 1], [], []>} : vector<32x4xf32>, vector<4x32xf32>, vector<32x32xf32> -> vector<32x32xf32>
    %38 = arith.addf %36, %37 : vector<32x32xf32>
    %cst_53 = arith.constant dense<0.000000e+00> : vector<32x32xf32>
    %39 = tpu.matmul %35, %7, %cst_53 {dimension_numbers = #tpu.dot_dimension_numbers<[1], [0], [0], [1], [0, 0, 1, 1], [], []>} : vector<32x4xf32>, vector<4x32xf32>, vector<32x32xf32> -> vector<32x32xf32>
    %40 = arith.addf %38, %39 : vector<32x32xf32>
    %41 = vector.broadcast %8 : vector<1x32xf32> to vector<32x32xf32>
    %42 = arith.addf %40, %41 : vector<32x32xf32>
    %43 = math.tanh %42 : vector<32x32xf32>
    %44 = vector.shape_cast %33 : vector<2x32xf32> to vector<2x1x32xf32>
    %45 = vector.broadcast %44 : vector<2x1x32xf32> to vector<2x16x32xf32>
    %46 = arith.addf %23, %45 : vector<2x16x32xf32>
    %47 = vector.shape_cast %43 : vector<32x32xf32> to vector<2x16x32xf32>
    %48 = arith.addf %46, %47 : vector<2x16x32xf32>
    %49 = math.tanh %48 : vector<2x16x32xf32>
    %50 = vector.shape_cast %49 : vector<2x16x32xf32> to vector<32x32xf32>
    %cst_54 = arith.constant dense<0.000000e+00> : vector<32x4xf32>
    %51 = tpu.matmul %50, %9, %cst_54 {dimension_numbers = #tpu.dot_dimension_numbers<[1], [0], [0], [1], [0, 0, 1, 1], [], []>} : vector<32x32xf32>, vector<32x4xf32>, vector<32x4xf32> -> vector<32x4xf32>
    %52 = vector.shape_cast %51 : vector<32x4xf32> to vector<2x16x4xf32>
    %cst_55 = arith.constant dense<0xFF800000> : vector<2x4xf32>
    %53 = vector.multi_reduction <maximumf>, %52, %cst_55 [1] : vector<2x16x4xf32> to vector<2x4xf32>
    %54 = vector.shape_cast %53 : vector<2x4xf32> to vector<2x1x4xf32>
    %55 = vector.broadcast %54 : vector<2x1x4xf32> to vector<2x16x4xf32>
    %56 = arith.subf %52, %55 : vector<2x16x4xf32>
    %57 = math.exp %56 : vector<2x16x4xf32>
    %cst_56 = arith.constant dense<0.000000e+00> : vector<2x4xf32>
    %58 = vector.multi_reduction <add>, %57, %cst_56 [1] : vector<2x16x4xf32> to vector<2x4xf32>
    %59 = vector.shape_cast %58 : vector<2x4xf32> to vector<2x1x4xf32>
    %60 = tpu.reciprocal %59 {approx = true} : vector<2x1x4xf32> -> vector<2x1x4xf32>
    %61 = vector.broadcast %60 : vector<2x1x4xf32> to vector<2x16x4xf32>
    %62 = arith.mulf %57, %61 : vector<2x16x4xf32>
    %63 = vector.shape_cast %62 : vector<2x16x4xf32> to vector<32x4xf32>
    %cst_57 = arith.constant dense<0.000000e+00> : vector<32x32xf32>
    %64 = tpu.matmul %63, %10, %cst_57 {dimension_numbers = #tpu.dot_dimension_numbers<[1], [0], [0], [1], [0, 0, 1, 1], [], []>} : vector<32x4xf32>, vector<4x32xf32>, vector<32x32xf32> -> vector<32x32xf32>
    %65 = vector.shape_cast %64 : vector<32x32xf32> to vector<2x16x32xf32>
    %66 = arith.mulf %65, %23 : vector<2x16x32xf32>
    %cst_58 = arith.constant dense<0.000000e+00> : vector<2x32xf32>
    %67 = vector.multi_reduction <add>, %66, %cst_58 [1] : vector<2x16x32xf32> to vector<2x32xf32>
    %c0_59 = arith.constant 0 : index
    %c0_60 = arith.constant 0 : index
    %c0_61 = arith.constant 0 : index
    %c0_62 = arith.constant 0 : index
    %68 = vector.load %arg22[%c0_59, %c0_60, %c0_61, %c0_62] : memref<7x2x16x4xf32, #tpu.memory_space<vmem>>, vector<1x2x16x4xf32>
    %69 = vector.shape_cast %68 : vector<1x2x16x4xf32> to vector<2x16x4xf32>
    %70 = vector.shape_cast %62 : vector<2x16x4xf32> to vector<1x2x16x4xf32>
    tpu.vector_store %arg22[%c0_59, %c0_60, %c0_61, %c0_62], %70 {strides = array<i32>} : memref<7x2x16x4xf32, #tpu.memory_space<vmem>>, vector<1x2x16x4xf32>,
    %71 = tpu.concatenate %30, %67, %24 in 1 : vector<2x32xf32>, vector<2x32xf32>, vector<2x32xf32> -> vector<2x96xf32>
    %cst_63 = arith.constant dense<0.000000e+00> : vector<2x128xf32>
    %72 = tpu.matmul %71, %11, %cst_63 {dimension_numbers = #tpu.dot_dimension_numbers<[1], [0], [0], [1], [0, 0, 1, 1], [], []>} : vector<2x96xf32>, vector<96x128xf32>, vector<2x128xf32> -> vector<2x128xf32>
    %73 = vector.broadcast %12 : vector<1x128xf32> to vector<2x128xf32>
    %74 = arith.addf %72, %73 : vector<2x128xf32>
    %75 = vector.extract_strided_slice %74 {offsets = [0, 0], sizes = [2, 32], strides = [1, 1]} : vector<2x128xf32> to vector<2x32xf32>
    %76 = arith.negf %75 : vector<2x32xf32>
    %77 = math.exp %76 : vector<2x32xf32>
    %cst_64 = arith.constant 1.000000e+00 : f32
    %78 = vector.broadcast %cst_64 : f32 to vector<2x32xf32>
    %79 = arith.addf %78, %77 : vector<2x32xf32>
    %80 = arith.divf %78, %79 : vector<2x32xf32>
    %81 = vector.extract_strided_slice %74 {offsets = [0, 32], sizes = [2, 32], strides = [1, 1]} : vector<2x128xf32> to vector<2x32xf32>
    %82 = arith.negf %81 : vector<2x32xf32>
    %83 = math.exp %82 : vector<2x32xf32>
    %cst_65 = arith.constant 1.000000e+00 : f32
    %84 = vector.broadcast %cst_65 : f32 to vector<2x32xf32>
    %85 = arith.addf %84, %83 : vector<2x32xf32>
    %86 = arith.divf %84, %85 : vector<2x32xf32>
    %87 = vector.extract_strided_slice %74 {offsets = [0, 64], sizes = [2, 32], strides = [1, 1]} : vector<2x128xf32> to vector<2x32xf32>
    %88 = math.tanh %87 : vector<2x32xf32>
    %89 = vector.extract_strided_slice %74 {offsets = [0, 96], sizes = [2, 32], strides = [1, 1]} : vector<2x128xf32> to vector<2x32xf32>
    %90 = arith.negf %89 : vector<2x32xf32>
    %91 = math.exp %90 : vector<2x32xf32>
    %cst_66 = arith.constant 1.000000e+00 : f32
    %92 = vector.broadcast %cst_66 : f32 to vector<2x32xf32>
    %93 = arith.addf %92, %91 : vector<2x32xf32>
    %94 = arith.divf %92, %93 : vector<2x32xf32>
    %95 = arith.mulf %86, %25 : vector<2x32xf32>
    %96 = arith.mulf %80, %88 : vector<2x32xf32>
    %97 = arith.addf %95, %96 : vector<2x32xf32>
    %98 = math.tanh %97 : vector<2x32xf32>
    %99 = arith.mulf %94, %98 : vector<2x32xf32>
    %100 = tpu.concatenate %99, %26 in 1 : vector<2x32xf32>, vector<2x32xf32> -> vector<2x64xf32>
    %cst_67 = arith.constant dense<0.000000e+00> : vector<2x128xf32>
    %101 = tpu.matmul %100, %13, %cst_67 {dimension_numbers = #tpu.dot_dimension_numbers<[1], [0], [0], [1], [0, 0, 1, 1], [], []>} : vector<2x64xf32>, vector<64x128xf32>, vector<2x128xf32> -> vector<2x128xf32>
    %102 = vector.broadcast %14 : vector<1x128xf32> to vector<2x128xf32>
    %103 = arith.addf %101, %102 : vector<2x128xf32>
    %104 = vector.extract_strided_slice %103 {offsets = [0, 0], sizes = [2, 32], strides = [1, 1]} : vector<2x128xf32> to vector<2x32xf32>
    %105 = arith.negf %104 : vector<2x32xf32>
    %106 = math.exp %105 : vector<2x32xf32>
    %cst_68 = arith.constant 1.000000e+00 : f32
    %107 = vector.broadcast %cst_68 : f32 to vector<2x32xf32>
    %108 = arith.addf %107, %106 : vector<2x32xf32>
    %109 = arith.divf %107, %108 : vector<2x32xf32>
    %110 = vector.extract_strided_slice %103 {offsets = [0, 32], sizes = [2, 32], strides = [1, 1]} : vector<2x128xf32> to vector<2x32xf32>
    %111 = arith.negf %110 : vector<2x32xf32>
    %112 = math.exp %111 : vector<2x32xf32>
    %cst_69 = arith.constant 1.000000e+00 : f32
    %113 = vector.broadcast %cst_69 : f32 to vector<2x32xf32>
    %114 = arith.addf %113, %112 : vector<2x32xf32>
    %115 = arith.divf %113, %114 : vector<2x32xf32>
    %116 = vector.extract_strided_slice %103 {offsets = [0, 64], sizes = [2, 32], strides = [1, 1]} : vector<2x128xf32> to vector<2x32xf32>
    %117 = math.tanh %116 : vector<2x32xf32>
    %118 = vector.extract_strided_slice %103 {offsets = [0, 96], sizes = [2, 32], strides = [1, 1]} : vector<2x128xf32> to vector<2x32xf32>
    %119 = arith.negf %118 : vector<2x32xf32>
    %120 = math.exp %119 : vector<2x32xf32>
    %cst_70 = arith.constant 1.000000e+00 : f32
    %121 = vector.broadcast %cst_70 : f32 to vector<2x32xf32>
    %122 = arith.addf %121, %120 : vector<2x32xf32>
    %123 = arith.divf %121, %122 : vector<2x32xf32>
    %124 = arith.mulf %115, %27 : vector<2x32xf32>
    %125 = arith.mulf %109, %117 : vector<2x32xf32>
    %126 = arith.addf %124, %125 : vector<2x32xf32>
    %127 = math.tanh %126 : vector<2x32xf32>
    %128 = arith.mulf %123, %127 : vector<2x32xf32>
    %129 = tpu.concatenate %128, %67 in 1 : vector<2x32xf32>, vector<2x32xf32> -> vector<2x64xf32>
    %cst_71 = arith.constant dense<0.000000e+00> : vector<2x32xf32>
    %130 = tpu.matmul %129, %15, %cst_71 {dimension_numbers = #tpu.dot_dimension_numbers<[1], [0], [0], [1], [0, 0, 1, 1], [], []>} : vector<2x64xf32>, vector<64x32xf32>, vector<2x32xf32> -> vector<2x32xf32>
    %131 = vector.broadcast %16 : vector<1x32xf32> to vector<2x32xf32>
    %132 = arith.addf %130, %131 : vector<2x32xf32>
    %133 = math.tanh %132 : vector<2x32xf32>
    %cst_72 = arith.constant dense<0.000000e+00> : vector<2x16xf32>
    %134 = tpu.matmul %133, %17, %cst_72 {dimension_numbers = #tpu.dot_dimension_numbers<[1], [0], [0], [1], [0, 0, 1, 1], [], []>} : vector<2x32xf32>, vector<32x16xf32>, vector<2x16xf32> -> vector<2x16xf32>
    %135 = vector.broadcast %18 : vector<1x16xf32> to vector<2x16xf32>
    %136 = arith.addf %134, %135 : vector<2x16xf32>
    %cst_73 = arith.constant dense<0xFF800000> : vector<2xf32>
    %137 = vector.multi_reduction <maximumf>, %136, %cst_73 [1] : vector<2x16xf32> to vector<2xf32>
    %138 = vector.shape_cast %137 : vector<2xf32> to vector<2x1xf32>
    %139 = vector.broadcast %138 : vector<2x1xf32> to vector<2x16xf32>
    %140 = arith.subf %136, %139 : vector<2x16xf32>
    %141 = math.exp %140 : vector<2x16xf32>
    %cst_74 = arith.constant dense<0.000000e+00> : vector<2xf32>
    %142 = vector.multi_reduction <add>, %141, %cst_74 [1] : vector<2x16xf32> to vector<2xf32>
    %143 = vector.shape_cast %142 : vector<2xf32> to vector<2x1xf32>
    %144 = math.log %143 : vector<2x1xf32>
    %145 = arith.addf %144, %138 : vector<2x1xf32>
    %146 = vector.broadcast %145 : vector<2x1xf32> to vector<2x16xf32>
    %147 = arith.subf %136, %146 : vector<2x16xf32>
    %c0_75 = arith.constant 0 : index
    %c0_76 = arith.constant 0 : index
    %c0_77 = arith.constant 0 : index
    %148 = vector.load %arg21[%c0_75, %c0_76, %c0_77] : memref<7x2x16xf32, #tpu.memory_space<vmem>>, vector<1x2x16xf32>
    %149 = vector.shape_cast %148 : vector<1x2x16xf32> to vector<2x16xf32>
    %150 = vector.shape_cast %147 : vector<2x16xf32> to vector<1x2x16xf32>
    tpu.vector_store %arg21[%c0_75, %c0_76, %c0_77], %150 {strides = array<i32>} : memref<7x2x16xf32, #tpu.memory_space<vmem>>, vector<1x2x16xf32>,
    %151 = vector.extract_strided_slice %0 {offsets = [1, 0, 0], sizes = [1, 2, 32], strides = [1, 1, 1]} : vector<7x2x32xf32> to vector<1x2x32xf32>
    %152 = vector.shape_cast %151 : vector<1x2x32xf32> to vector<2x32xf32>
    %cst_78 = arith.constant dense<0.000000e+00> : vector<2x32xf32>
    %153 = tpu.matmul %152, %3, %cst_78 {dimension_numbers = #tpu.dot_dimension_numbers<[1], [0], [0], [1], [0, 0, 1, 1], [], []>} : vector<2x32xf32>, vector<32x32xf32>, vector<2x32xf32> -> vector<2x32xf32>
    %154 = vector.broadcast %4 : vector<1x32xf32> to vector<2x32xf32>
    %155 = arith.addf %153, %154 : vector<2x32xf32>
    %cst_79 = arith.constant dense<0.000000e+00> : vector<32x4xf32>
    %156 = tpu.matmul %1, %63, %cst_79 {dimension_numbers = #tpu.dot_dimension_numbers<[1], [0], [0], [1], [0, 0, 1, 1], [], []>} : vector<32x32xf32>, vector<32x4xf32>, vector<32x4xf32> -> vector<32x4xf32>
    %cst_80 = arith.constant dense<0.000000e+00> : vector<32x4xf32>
    %157 = tpu.matmul %2, %63, %cst_80 {dimension_numbers = #tpu.dot_dimension_numbers<[1], [0], [0], [1], [0, 0, 1, 1], [], []>} : vector<32x32xf32>, vector<32x4xf32>, vector<32x4xf32> -> vector<32x4xf32>
    %cst_81 = arith.constant dense<0.000000e+00> : vector<32x32xf32>
    %158 = tpu.matmul %156, %5, %cst_81 {dimension_numbers = #tpu.dot_dimension_numbers<[1], [0], [0], [1], [0, 0, 1, 1], [], []>} : vector<32x4xf32>, vector<4x32xf32>, vector<32x32xf32> -> vector<32x32xf32>
    %cst_82 = arith.constant dense<0.000000e+00> : vector<32x32xf32>
    %159 = tpu.matmul %63, %6, %cst_82 {dimension_numbers = #tpu.dot_dimension_numbers<[1], [0], [0], [1], [0, 0, 1, 1], [], []>} : vector<32x4xf32>, vector<4x32xf32>, vector<32x32xf32> -> vector<32x32xf32>
    %160 = arith.addf %158, %159 : vector<32x32xf32>
    %cst_83 = arith.constant dense<0.000000e+00> : vector<32x32xf32>
    %161 = tpu.matmul %157, %7, %cst_83 {dimension_numbers = #tpu.dot_dimension_numbers<[1], [0], [0], [1], [0, 0, 1, 1], [], []>} : vector<32x4xf32>, vector<4x32xf32>, vector<32x32xf32> -> vector<32x32xf32>
    %162 = arith.addf %160, %161 : vector<32x32xf32>
    %163 = vector.broadcast %8 : vector<1x32xf32> to vector<32x32xf32>
    %164 = arith.addf %162, %163 : vector<32x32xf32>
    %165 = math.tanh %164 : vector<32x32xf32>
    %166 = vector.shape_cast %155 : vector<2x32xf32> to vector<2x1x32xf32>
    %167 = vector.broadcast %166 : vector<2x1x32xf32> to vector<2x16x32xf32>
    %168 = arith.addf %23, %167 : vector<2x16x32xf32>
    %169 = vector.shape_cast %165 : vector<32x32xf32> to vector<2x16x32xf32>
    %170 = arith.addf %168, %169 : vector<2x16x32xf32>
    %171 = math.tanh %170 : vector<2x16x32xf32>
    %172 = vector.shape_cast %171 : vector<2x16x32xf32> to vector<32x32xf32>
    %cst_84 = arith.constant dense<0.000000e+00> : vector<32x4xf32>
    %173 = tpu.matmul %172, %9, %cst_84 {dimension_numbers = #tpu.dot_dimension_numbers<[1], [0], [0], [1], [0, 0, 1, 1], [], []>} : vector<32x32xf32>, vector<32x4xf32>, vector<32x4xf32> -> vector<32x4xf32>
    %174 = vector.shape_cast %173 : vector<32x4xf32> to vector<2x16x4xf32>
    %cst_85 = arith.constant dense<0xFF800000> : vector<2x4xf32>
    %175 = vector.multi_reduction <maximumf>, %174, %cst_85 [1] : vector<2x16x4xf32> to vector<2x4xf32>
    %176 = vector.shape_cast %175 : vector<2x4xf32> to vector<2x1x4xf32>
    %177 = vector.broadcast %176 : vector<2x1x4xf32> to vector<2x16x4xf32>
    %178 = arith.subf %174, %177 : vector<2x16x4xf32>
    %179 = math.exp %178 : vector<2x16x4xf32>
    %cst_86 = arith.constant dense<0.000000e+00> : vector<2x4xf32>
    %180 = vector.multi_reduction <add>, %179, %cst_86 [1] : vector<2x16x4xf32> to vector<2x4xf32>
    %181 = vector.shape_cast %180 : vector<2x4xf32> to vector<2x1x4xf32>
    %182 = tpu.reciprocal %181 {approx = true} : vector<2x1x4xf32> -> vector<2x1x4xf32>
    %183 = vector.broadcast %182 : vector<2x1x4xf32> to vector<2x16x4xf32>
    %184 = arith.mulf %179, %183 : vector<2x16x4xf32>
    %185 = vector.shape_cast %184 : vector<2x16x4xf32> to vector<32x4xf32>
    %cst_87 = arith.constant dense<0.000000e+00> : vector<32x32xf32>
    %186 = tpu.matmul %185, %10, %cst_87 {dimension_numbers = #tpu.dot_dimension_numbers<[1], [0], [0], [1], [0, 0, 1, 1], [], []>} : vector<32x4xf32>, vector<4x32xf32>, vector<32x32xf32> -> vector<32x32xf32>
    %187 = vector.shape_cast %186 : vector<32x32xf32> to vector<2x16x32xf32>
    %188 = arith.mulf %187, %23 : vector<2x16x32xf32>
    %cst_88 = arith.constant dense<0.000000e+00> : vector<2x32xf32>
    %189 = vector.multi_reduction <add>, %188, %cst_88 [1] : vector<2x16x32xf32> to vector<2x32xf32>
    %c1 = arith.constant 1 : index
    %c0_89 = arith.constant 0 : index
    %c0_90 = arith.constant 0 : index
    %c0_91 = arith.constant 0 : index
    %190 = vector.load %arg22[%c1, %c0_89, %c0_90, %c0_91] : memref<7x2x16x4xf32, #tpu.memory_space<vmem>>, vector<1x2x16x4xf32>
    %191 = vector.shape_cast %190 : vector<1x2x16x4xf32> to vector<2x16x4xf32>
    %192 = vector.shape_cast %184 : vector<2x16x4xf32> to vector<1x2x16x4xf32>
    tpu.vector_store %arg22[%c1, %c0_89, %c0_90, %c0_91], %192 {strides = array<i32>} : memref<7x2x16x4xf32, #tpu.memory_space<vmem>>, vector<1x2x16x4xf32>,
    %193 = tpu.concatenate %152, %189, %99 in 1 : vector<2x32xf32>, vector<2x32xf32>, vector<2x32xf32> -> vector<2x96xf32>
    %cst_92 = arith.constant dense<0.000000e+00> : vector<2x128xf32>
    %194 = tpu.matmul %193, %11, %cst_92 {dimension_numbers = #tpu.dot_dimension_numbers<[1], [0], [0], [1], [0, 0, 1, 1], [], []>} : vector<2x96xf32>, vector<96x128xf32>, vector<2x128xf32> -> vector<2x128xf32>
    %195 = vector.broadcast %12 : vector<1x128xf32> to vector<2x128xf32>
    %196 = arith.addf %194, %195 : vector<2x128xf32>
    %197 = vector.extract_strided_slice %196 {offsets = [0, 0], sizes = [2, 32], strides = [1, 1]} : vector<2x128xf32> to vector<2x32xf32>
    %198 = arith.negf %197 : vector<2x32xf32>
    %199 = math.exp %198 : vector<2x32xf32>
    %cst_93 = arith.constant 1.000000e+00 : f32
    %200 = vector.broadcast %cst_93 : f32 to vector<2x32xf32>
    %201 = arith.addf %200, %199 : vector<2x32xf32>
    %202 = arith.divf %200, %201 : vector<2x32xf32>
    %203 = vector.extract_strided_slice %196 {offsets = [0, 32], sizes = [2, 32], strides = [1, 1]} : vector<2x128xf32> to vector<2x32xf32>
    %204 = arith.negf %203 : vector<2x32xf32>
    %205 = math.exp %204 : vector<2x32xf32>
    %cst_94 = arith.constant 1.000000e+00 : f32
    %206 = vector.broadcast %cst_94 : f32 to vector<2x32xf32>
    %207 = arith.addf %206, %205 : vector<2x32xf32>
    %208 = arith.divf %206, %207 : vector<2x32xf32>
    %209 = vector.extract_strided_slice %196 {offsets = [0, 64], sizes = [2, 32], strides = [1, 1]} : vector<2x128xf32> to vector<2x32xf32>
    %210 = math.tanh %209 : vector<2x32xf32>
    %211 = vector.extract_strided_slice %196 {offsets = [0, 96], sizes = [2, 32], strides = [1, 1]} : vector<2x128xf32> to vector<2x32xf32>
    %212 = arith.negf %211 : vector<2x32xf32>
    %213 = math.exp %212 : vector<2x32xf32>
    %cst_95 = arith.constant 1.000000e+00 : f32
    %214 = vector.broadcast %cst_95 : f32 to vector<2x32xf32>
    %215 = arith.addf %214, %213 : vector<2x32xf32>
    %216 = arith.divf %214, %215 : vector<2x32xf32>
    %217 = arith.mulf %208, %97 : vector<2x32xf32>
    %218 = arith.mulf %202, %210 : vector<2x32xf32>
    %219 = arith.addf %217, %218 : vector<2x32xf32>
    %220 = math.tanh %219 : vector<2x32xf32>
    %221 = arith.mulf %216, %220 : vector<2x32xf32>
    %222 = tpu.concatenate %221, %128 in 1 : vector<2x32xf32>, vector<2x32xf32> -> vector<2x64xf32>
    %cst_96 = arith.constant dense<0.000000e+00> : vector<2x128xf32>
    %223 = tpu.matmul %222, %13, %cst_96 {dimension_numbers = #tpu.dot_dimension_numbers<[1], [0], [0], [1], [0, 0, 1, 1], [], []>} : vector<2x64xf32>, vector<64x128xf32>, vector<2x128xf32> -> vector<2x128xf32>
    %224 = vector.broadcast %14 : vector<1x128xf32> to vector<2x128xf32>
    %225 = arith.addf %223, %224 : vector<2x128xf32>
    %226 = vector.extract_strided_slice %225 {offsets = [0, 0], sizes = [2, 32], strides = [1, 1]} : vector<2x128xf32> to vector<2x32xf32>
    %227 = arith.negf %226 : vector<2x32xf32>
    %228 = math.exp %227 : vector<2x32xf32>
    %cst_97 = arith.constant 1.000000e+00 : f32
    %229 = vector.broadcast %cst_97 : f32 to vector<2x32xf32>
    %230 = arith.addf %229, %228 : vector<2x32xf32>
    %231 = arith.divf %229, %230 : vector<2x32xf32>
    %232 = vector.extract_strided_slice %225 {offsets = [0, 32], sizes = [2, 32], strides = [1, 1]} : vector<2x128xf32> to vector<2x32xf32>
    %233 = arith.negf %232 : vector<2x32xf32>
    %234 = math.exp %233 : vector<2x32xf32>
    %cst_98 = arith.constant 1.000000e+00 : f32
    %235 = vector.broadcast %cst_98 : f32 to vector<2x32xf32>
    %236 = arith.addf %235, %234 : vector<2x32xf32>
    %237 = arith.divf %235, %236 : vector<2x32xf32>
    %238 = vector.extract_strided_slice %225 {offsets = [0, 64], sizes = [2, 32], strides = [1, 1]} : vector<2x128xf32> to vector<2x32xf32>
    %239 = math.tanh %238 : vector<2x32xf32>
    %240 = vector.extract_strided_slice %225 {offsets = [0, 96], sizes = [2, 32], strides = [1, 1]} : vector<2x128xf32> to vector<2x32xf32>
    %241 = arith.negf %240 : vector<2x32xf32>
    %242 = math.exp %241 : vector<2x32xf32>
    %cst_99 = arith.constant 1.000000e+00 : f32
    %243 = vector.broadcast %cst_99 : f32 to vector<2x32xf32>
    %244 = arith.addf %243, %242 : vector<2x32xf32>
    %245 = arith.divf %243, %244 : vector<2x32xf32>
    %246 = arith.mulf %237, %126 : vector<2x32xf32>
    %247 = arith.mulf %231, %239 : vector<2x32xf32>
    %248 = arith.addf %246, %247 : vector<2x32xf32>
    %249 = math.tanh %248 : vector<2x32xf32>
    %250 = arith.mulf %245, %249 : vector<2x32xf32>
    %251 = tpu.concatenate %250, %189 in 1 : vector<2x32xf32>, vector<2x32xf32> -> vector<2x64xf32>
    %cst_100 = arith.constant dense<0.000000e+00> : vector<2x32xf32>
    %252 = tpu.matmul %251, %15, %cst_100 {dimension_numbers = #tpu.dot_dimension_numbers<[1], [0], [0], [1], [0, 0, 1, 1], [], []>} : vector<2x64xf32>, vector<64x32xf32>, vector<2x32xf32> -> vector<2x32xf32>
    %253 = vector.broadcast %16 : vector<1x32xf32> to vector<2x32xf32>
    %254 = arith.addf %252, %253 : vector<2x32xf32>
    %255 = math.tanh %254 : vector<2x32xf32>
    %cst_101 = arith.constant dense<0.000000e+00> : vector<2x16xf32>
    %256 = tpu.matmul %255, %17, %cst_101 {dimension_numbers = #tpu.dot_dimension_numbers<[1], [0], [0], [1], [0, 0, 1, 1], [], []>} : vector<2x32xf32>, vector<32x16xf32>, vector<2x16xf32> -> vector<2x16xf32>
    %257 = vector.broadcast %18 : vector<1x16xf32> to vector<2x16xf32>
    %258 = arith.addf %256, %257 : vector<2x16xf32>
    %cst_102 = arith.constant dense<0xFF800000> : vector<2xf32>
    %259 = vector.multi_reduction <maximumf>, %258, %cst_102 [1] : vector<2x16xf32> to vector<2xf32>
    %260 = vector.shape_cast %259 : vector<2xf32> to vector<2x1xf32>
    %261 = vector.broadcast %260 : vector<2x1xf32> to vector<2x16xf32>
    %262 = arith.subf %258, %261 : vector<2x16xf32>
    %263 = math.exp %262 : vector<2x16xf32>
    %cst_103 = arith.constant dense<0.000000e+00> : vector<2xf32>
    %264 = vector.multi_reduction <add>, %263, %cst_103 [1] : vector<2x16xf32> to vector<2xf32>
    %265 = vector.shape_cast %264 : vector<2xf32> to vector<2x1xf32>
    %266 = math.log %265 : vector<2x1xf32>
    %267 = arith.addf %266, %260 : vector<2x1xf32>
    %268 = vector.broadcast %267 : vector<2x1xf32> to vector<2x16xf32>
    %269 = arith.subf %258, %268 : vector<2x16xf32>
    %c1_104 = arith.constant 1 : index
    %c0_105 = arith.constant 0 : index
    %c0_106 = arith.constant 0 : index
    %270 = vector.load %arg21[%c1_104, %c0_105, %c0_106] : memref<7x2x16xf32, #tpu.memory_space<vmem>>, vector<1x2x16xf32>
    %271 = vector.shape_cast %270 : vector<1x2x16xf32> to vector<2x16xf32>
    %272 = vector.shape_cast %269 : vector<2x16xf32> to vector<1x2x16xf32>
    tpu.vector_store %arg21[%c1_104, %c0_105, %c0_106], %272 {strides = array<i32>} : memref<7x2x16xf32, #tpu.memory_space<vmem>>, vector<1x2x16xf32>,
    %273 = vector.extract_strided_slice %0 {offsets = [2, 0, 0], sizes = [1, 2, 32], strides = [1, 1, 1]} : vector<7x2x32xf32> to vector<1x2x32xf32>
    %274 = vector.shape_cast %273 : vector<1x2x32xf32> to vector<2x32xf32>
    %cst_107 = arith.constant dense<0.000000e+00> : vector<2x32xf32>
    %275 = tpu.matmul %274, %3, %cst_107 {dimension_numbers = #tpu.dot_dimension_numbers<[1], [0], [0], [1], [0, 0, 1, 1], [], []>} : vector<2x32xf32>, vector<32x32xf32>, vector<2x32xf32> -> vector<2x32xf32>
    %276 = vector.broadcast %4 : vector<1x32xf32> to vector<2x32xf32>
    %277 = arith.addf %275, %276 : vector<2x32xf32>
    %cst_108 = arith.constant dense<0.000000e+00> : vector<32x4xf32>
    %278 = tpu.matmul %1, %185, %cst_108 {dimension_numbers = #tpu.dot_dimension_numbers<[1], [0], [0], [1], [0, 0, 1, 1], [], []>} : vector<32x32xf32>, vector<32x4xf32>, vector<32x4xf32> -> vector<32x4xf32>
    %cst_109 = arith.constant dense<0.000000e+00> : vector<32x4xf32>
    %279 = tpu.matmul %2, %185, %cst_109 {dimension_numbers = #tpu.dot_dimension_numbers<[1], [0], [0], [1], [0, 0, 1, 1], [], []>} : vector<32x32xf32>, vector<32x4xf32>, vector<32x4xf32> -> vector<32x4xf32>
    %cst_110 = arith.constant dense<0.000000e+00> : vector<32x32xf32>
    %280 = tpu.matmul %278, %5, %cst_110 {dimension_numbers = #tpu.dot_dimension_numbers<[1], [0], [0], [1], [0, 0, 1, 1], [], []>} : vector<32x4xf32>, vector<4x32xf32>, vector<32x32xf32> -> vector<32x32xf32>
    %cst_111 = arith.constant dense<0.000000e+00> : vector<32x32xf32>
    %281 = tpu.matmul %185, %6, %cst_111 {dimension_numbers = #tpu.dot_dimension_numbers<[1], [0], [0], [1], [0, 0, 1, 1], [], []>} : vector<32x4xf32>, vector<4x32xf32>, vector<32x32xf32> -> vector<32x32xf32>
    %282 = arith.addf %280, %281 : vector<32x32xf32>
    %cst_112 = arith.constant dense<0.000000e+00> : vector<32x32xf32>
    %283 = tpu.matmul %279, %7, %cst_112 {dimension_numbers = #tpu.dot_dimension_numbers<[1], [0], [0], [1], [0, 0, 1, 1], [], []>} : vector<32x4xf32>, vector<4x32xf32>, vector<32x32xf32> -> vector<32x32xf32>
    %284 = arith.addf %282, %283 : vector<32x32xf32>
    %285 = vector.broadcast %8 : vector<1x32xf32> to vector<32x32xf32>
    %286 = arith.addf %284, %285 : vector<32x32xf32>
    %287 = math.tanh %286 : vector<32x32xf32>
    %288 = vector.shape_cast %277 : vector<2x32xf32> to vector<2x1x32xf32>
    %289 = vector.broadcast %288 : vector<2x1x32xf32> to vector<2x16x32xf32>
    %290 = arith.addf %23, %289 : vector<2x16x32xf32>
    %291 = vector.shape_cast %287 : vector<32x32xf32> to vector<2x16x32xf32>
    %292 = arith.addf %290, %291 : vector<2x16x32xf32>
    %293 = math.tanh %292 : vector<2x16x32xf32>
    %294 = vector.shape_cast %293 : vector<2x16x32xf32> to vector<32x32xf32>
    %cst_113 = arith.constant dense<0.000000e+00> : vector<32x4xf32>
    %295 = tpu.matmul %294, %9, %cst_113 {dimension_numbers = #tpu.dot_dimension_numbers<[1], [0], [0], [1], [0, 0, 1, 1], [], []>} : vector<32x32xf32>, vector<32x4xf32>, vector<32x4xf32> -> vector<32x4xf32>
    %296 = vector.shape_cast %295 : vector<32x4xf32> to vector<2x16x4xf32>
    %cst_114 = arith.constant dense<0xFF800000> : vector<2x4xf32>
    %297 = vector.multi_reduction <maximumf>, %296, %cst_114 [1] : vector<2x16x4xf32> to vector<2x4xf32>
    %298 = vector.shape_cast %297 : vector<2x4xf32> to vector<2x1x4xf32>
    %299 = vector.broadcast %298 : vector<2x1x4xf32> to vector<2x16x4xf32>
    %300 = arith.subf %296, %299 : vector<2x16x4xf32>
    %301 = math.exp %300 : vector<2x16x4xf32>
    %cst_115 = arith.constant dense<0.000000e+00> : vector<2x4xf32>
    %302 = vector.multi_reduction <add>, %301, %cst_115 [1] : vector<2x16x4xf32> to vector<2x4xf32>
    %303 = vector.shape_cast %302 : vector<2x4xf32> to vector<2x1x4xf32>
    %304 = tpu.reciprocal %303 {approx = true} : vector<2x1x4xf32> -> vector<2x1x4xf32>
    %305 = vector.broadcast %304 : vector<2x1x4xf32> to vector<2x16x4xf32>
    %306 = arith.mulf %301, %305 : vector<2x16x4xf32>
    %307 = vector.shape_cast %306 : vector<2x16x4xf32> to vector<32x4xf32>
    %cst_116 = arith.constant dense<0.000000e+00> : vector<32x32xf32>
    %308 = tpu.matmul %307, %10, %cst_116 {dimension_numbers = #tpu.dot_dimension_numbers<[1], [0], [0], [1], [0, 0, 1, 1], [], []>} : vector<32x4xf32>, vector<4x32xf32>, vector<32x32xf32> -> vector<32x32xf32>
    %309 = vector.shape_cast %308 : vector<32x32xf32> to vector<2x16x32xf32>
    %310 = arith.mulf %309, %23 : vector<2x16x32xf32>
    %cst_117 = arith.constant dense<0.000000e+00> : vector<2x32xf32>
    %311 = vector.multi_reduction <add>, %310, %cst_117 [1] : vector<2x16x32xf32> to vector<2x32xf32>
    %c2 = arith.constant 2 : index
    %c0_118 = arith.constant 0 : index
    %c0_119 = arith.constant 0 : index
    %c0_120 = arith.constant 0 : index
    %312 = vector.load %arg22[%c2, %c0_118, %c0_119, %c0_120] : memref<7x2x16x4xf32, #tpu.memory_space<vmem>>, vector<1x2x16x4xf32>
    %313 = vector.shape_cast %312 : vector<1x2x16x4xf32> to vector<2x16x4xf32>
    %314 = vector.shape_cast %306 : vector<2x16x4xf32> to vector<1x2x16x4xf32>
    tpu.vector_store %arg22[%c2, %c0_118, %c0_119, %c0_120], %314 {strides = array<i32>} : memref<7x2x16x4xf32, #tpu.memory_space<vmem>>, vector<1x2x16x4xf32>,
    %315 = tpu.concatenate %274, %311, %221 in 1 : vector<2x32xf32>, vector<2x32xf32>, vector<2x32xf32> -> vector<2x96xf32>
    %cst_121 = arith.constant dense<0.000000e+00> : vector<2x128xf32>
    %316 = tpu.matmul %315, %11, %cst_121 {dimension_numbers = #tpu.dot_dimension_numbers<[1], [0], [0], [1], [0, 0, 1, 1], [], []>} : vector<2x96xf32>, vector<96x128xf32>, vector<2x128xf32> -> vector<2x128xf32>
    %317 = vector.broadcast %12 : vector<1x128xf32> to vector<2x128xf32>
    %318 = arith.addf %316, %317 : vector<2x128xf32>
    %319 = vector.extract_strided_slice %318 {offsets = [0, 0], sizes = [2, 32], strides = [1, 1]} : vector<2x128xf32> to vector<2x32xf32>
    %320 = arith.negf %319 : vector<2x32xf32>
    %321 = math.exp %320 : vector<2x32xf32>
    %cst_122 = arith.constant 1.000000e+00 : f32
    %322 = vector.broadcast %cst_122 : f32 to vector<2x32xf32>
    %323 = arith.addf %322, %321 : vector<2x32xf32>
    %324 = arith.divf %322, %323 : vector<2x32xf32>
    %325 = vector.extract_strided_slice %318 {offsets = [0, 32], sizes = [2, 32], strides = [1, 1]} : vector<2x128xf32> to vector<2x32xf32>
    %326 = arith.negf %325 : vector<2x32xf32>
    %327 = math.exp %326 : vector<2x32xf32>
    %cst_123 = arith.constant 1.000000e+00 : f32
    %328 = vector.broadcast %cst_123 : f32 to vector<2x32xf32>
    %329 = arith.addf %328, %327 : vector<2x32xf32>
    %330 = arith.divf %328, %329 : vector<2x32xf32>
    %331 = vector.extract_strided_slice %318 {offsets = [0, 64], sizes = [2, 32], strides = [1, 1]} : vector<2x128xf32> to vector<2x32xf32>
    %332 = math.tanh %331 : vector<2x32xf32>
    %333 = vector.extract_strided_slice %318 {offsets = [0, 96], sizes = [2, 32], strides = [1, 1]} : vector<2x128xf32> to vector<2x32xf32>
    %334 = arith.negf %333 : vector<2x32xf32>
    %335 = math.exp %334 : vector<2x32xf32>
    %cst_124 = arith.constant 1.000000e+00 : f32
    %336 = vector.broadcast %cst_124 : f32 to vector<2x32xf32>
    %337 = arith.addf %336, %335 : vector<2x32xf32>
    %338 = arith.divf %336, %337 : vector<2x32xf32>
    %339 = arith.mulf %330, %219 : vector<2x32xf32>
    %340 = arith.mulf %324, %332 : vector<2x32xf32>
    %341 = arith.addf %339, %340 : vector<2x32xf32>
    %342 = math.tanh %341 : vector<2x32xf32>
    %343 = arith.mulf %338, %342 : vector<2x32xf32>
    %344 = tpu.concatenate %343, %250 in 1 : vector<2x32xf32>, vector<2x32xf32> -> vector<2x64xf32>
    %cst_125 = arith.constant dense<0.000000e+00> : vector<2x128xf32>
    %345 = tpu.matmul %344, %13, %cst_125 {dimension_numbers = #tpu.dot_dimension_numbers<[1], [0], [0], [1], [0, 0, 1, 1], [], []>} : vector<2x64xf32>, vector<64x128xf32>, vector<2x128xf32> -> vector<2x128xf32>
    %346 = vector.broadcast %14 : vector<1x128xf32> to vector<2x128xf32>
    %347 = arith.addf %345, %346 : vector<2x128xf32>
    %348 = vector.extract_strided_slice %347 {offsets = [0, 0], sizes = [2, 32], strides = [1, 1]} : vector<2x128xf32> to vector<2x32xf32>
    %349 = arith.negf %348 : vector<2x32xf32>
    %350 = math.exp %349 : vector<2x32xf32>
    %cst_126 = arith.constant 1.000000e+00 : f32
    %351 = vector.broadcast %cst_126 : f32 to vector<2x32xf32>
    %352 = arith.addf %351, %350 : vector<2x32xf32>
    %353 = arith.divf %351, %352 : vector<2x32xf32>
    %354 = vector.extract_strided_slice %347 {offsets = [0, 32], sizes = [2, 32], strides = [1, 1]} : vector<2x128xf32> to vector<2x32xf32>
    %355 = arith.negf %354 : vector<2x32xf32>
    %356 = math.exp %355 : vector<2x32xf32>
    %cst_127 = arith.constant 1.000000e+00 : f32
    %357 = vector.broadcast %cst_127 : f32 to vector<2x32xf32>
    %358 = arith.addf %357, %356 : vector<2x32xf32>
    %359 = arith.divf %357, %358 : vector<2x32xf32>
    %360 = vector.extract_strided_slice %347 {offsets = [0, 64], sizes = [2, 32], strides = [1, 1]} : vector<2x128xf32> to vector<2x32xf32>
    %361 = math.tanh %360 : vector<2x32xf32>
    %362 = vector.extract_strided_slice %347 {offsets = [0, 96], sizes = [2, 32], strides = [1, 1]} : vector<2x128xf32> to vector<2x32xf32>
    %363 = arith.negf %362 : vector<2x32xf32>
    %364 = math.exp %363 : vector<2x32xf32>
    %cst_128 = arith.constant 1.000000e+00 : f32
    %365 = vector.broadcast %cst_128 : f32 to vector<2x32xf32>
    %366 = arith.addf %365, %364 : vector<2x32xf32>
    %367 = arith.divf %365, %366 : vector<2x32xf32>
    %368 = arith.mulf %359, %248 : vector<2x32xf32>
    %369 = arith.mulf %353, %361 : vector<2x32xf32>
    %370 = arith.addf %368, %369 : vector<2x32xf32>
    %371 = math.tanh %370 : vector<2x32xf32>
    %372 = arith.mulf %367, %371 : vector<2x32xf32>
    %373 = tpu.concatenate %372, %311 in 1 : vector<2x32xf32>, vector<2x32xf32> -> vector<2x64xf32>
    %cst_129 = arith.constant dense<0.000000e+00> : vector<2x32xf32>
    %374 = tpu.matmul %373, %15, %cst_129 {dimension_numbers = #tpu.dot_dimension_numbers<[1], [0], [0], [1], [0, 0, 1, 1], [], []>} : vector<2x64xf32>, vector<64x32xf32>, vector<2x32xf32> -> vector<2x32xf32>
    %375 = vector.broadcast %16 : vector<1x32xf32> to vector<2x32xf32>
    %376 = arith.addf %374, %375 : vector<2x32xf32>
    %377 = math.tanh %376 : vector<2x32xf32>
    %cst_130 = arith.constant dense<0.000000e+00> : vector<2x16xf32>
    %378 = tpu.matmul %377, %17, %cst_130 {dimension_numbers = #tpu.dot_dimension_numbers<[1], [0], [0], [1], [0, 0, 1, 1], [], []>} : vector<2x32xf32>, vector<32x16xf32>, vector<2x16xf32> -> vector<2x16xf32>
    %379 = vector.broadcast %18 : vector<1x16xf32> to vector<2x16xf32>
    %380 = arith.addf %378, %379 : vector<2x16xf32>
    %cst_131 = arith.constant dense<0xFF800000> : vector<2xf32>
    %381 = vector.multi_reduction <maximumf>, %380, %cst_131 [1] : vector<2x16xf32> to vector<2xf32>
    %382 = vector.shape_cast %381 : vector<2xf32> to vector<2x1xf32>
    %383 = vector.broadcast %382 : vector<2x1xf32> to vector<2x16xf32>
    %384 = arith.subf %380, %383 : vector<2x16xf32>
    %385 = math.exp %384 : vector<2x16xf32>
    %cst_132 = arith.constant dense<0.000000e+00> : vector<2xf32>
    %386 = vector.multi_reduction <add>, %385, %cst_132 [1] : vector<2x16xf32> to vector<2xf32>
    %387 = vector.shape_cast %386 : vector<2xf32> to vector<2x1xf32>
    %388 = math.log %387 : vector<2x1xf32>
    %389 = arith.addf %388, %382 : vector<2x1xf32>
    %390 = vector.broadcast %389 : vector<2x1xf32> to vector<2x16xf32>
    %391 = arith.subf %380, %390 : vector<2x16xf32>
    %c2_133 = arith.constant 2 : index
    %c0_134 = arith.constant 0 : index
    %c0_135 = arith.constant 0 : index
    %392 = vector.load %arg21[%c2_133, %c0_134, %c0_135] : memref<7x2x16xf32, #tpu.memory_space<vmem>>, vector<1x2x16xf32>
    %393 = vector.shape_cast %392 : vector<1x2x16xf32> to vector<2x16xf32>
    %394 = vector.shape_cast %391 : vector<2x16xf32> to vector<1x2x16xf32>
    tpu.vector_store %arg21[%c2_133, %c0_134, %c0_135], %394 {strides = array<i32>} : memref<7x2x16xf32, #tpu.memory_space<vmem>>, vector<1x2x16xf32>,
    %395 = vector.extract_strided_slice %0 {offsets = [3, 0, 0], sizes = [1, 2, 32], strides = [1, 1, 1]} : vector<7x2x32xf32> to vector<1x2x32xf32>
    %396 = vector.shape_cast %395 : vector<1x2x32xf32> to vector<2x32xf32>
    %cst_136 = arith.constant dense<0.000000e+00> : vector<2x32xf32>
    %397 = tpu.matmul %396, %3, %cst_136 {dimension_numbers = #tpu.dot_dimension_numbers<[1], [0], [0], [1], [0, 0, 1, 1], [], []>} : vector<2x32xf32>, vector<32x32xf32>, vector<2x32xf32> -> vector<2x32xf32>
    %398 = vector.broadcast %4 : vector<1x32xf32> to vector<2x32xf32>
    %399 = arith.addf %397, %398 : vector<2x32xf32>
    %cst_137 = arith.constant dense<0.000000e+00> : vector<32x4xf32>
    %400 = tpu.matmul %1, %307, %cst_137 {dimension_numbers = #tpu.dot_dimension_numbers<[1], [0], [0], [1], [0, 0, 1, 1], [], []>} : vector<32x32xf32>, vector<32x4xf32>, vector<32x4xf32> -> vector<32x4xf32>
    %cst_138 = arith.constant dense<0.000000e+00> : vector<32x4xf32>
    %401 = tpu.matmul %2, %307, %cst_138 {dimension_numbers = #tpu.dot_dimension_numbers<[1], [0], [0], [1], [0, 0, 1, 1], [], []>} : vector<32x32xf32>, vector<32x4xf32>, vector<32x4xf32> -> vector<32x4xf32>
    %cst_139 = arith.constant dense<0.000000e+00> : vector<32x32xf32>
    %402 = tpu.matmul %400, %5, %cst_139 {dimension_numbers = #tpu.dot_dimension_numbers<[1], [0], [0], [1], [0, 0, 1, 1], [], []>} : vector<32x4xf32>, vector<4x32xf32>, vector<32x32xf32> -> vector<32x32xf32>
    %cst_140 = arith.constant dense<0.000000e+00> : vector<32x32xf32>
    %403 = tpu.matmul %307, %6, %cst_140 {dimension_numbers = #tpu.dot_dimension_numbers<[1], [0], [0], [1], [0, 0, 1, 1], [], []>} : vector<32x4xf32>, vector<4x32xf32>, vector<32x32xf32> -> vector<32x32xf32>
    %404 = arith.addf %402, %403 : vector<32x32xf32>
    %cst_141 = arith.constant dense<0.000000e+00> : vector<32x32xf32>
    %405 = tpu.matmul %401, %7, %cst_141 {dimension_numbers = #tpu.dot_dimension_numbers<[1], [0], [0], [1], [0, 0, 1, 1], [], []>} : vector<32x4xf32>, vector<4x32xf32>, vector<32x32xf32> -> vector<32x32xf32>
    %406 = arith.addf %404, %405 : vector<32x32xf32>
    %407 = vector.broadcast %8 : vector<1x32xf32> to vector<32x32xf32>
    %408 = arith.addf %406, %407 : vector<32x32xf32>
    %409 = math.tanh %408 : vector<32x32xf32>
    %410 = vector.shape_cast %399 : vector<2x32xf32> to vector<2x1x32xf32>
    %411 = vector.broadcast %410 : vector<2x1x32xf32> to vector<2x16x32xf32>
    %412 = arith.addf %23, %411 : vector<2x16x32xf32>
    %413 = vector.shape_cast %409 : vector<32x32xf32> to vector<2x16x32xf32>
    %414 = arith.addf %412, %413 : vector<2x16x32xf32>
    %415 = math.tanh %414 : vector<2x16x32xf32>
    %416 = vector.shape_cast %415 : vector<2x16x32xf32> to vector<32x32xf32>
    %cst_142 = arith.constant dense<0.000000e+00> : vector<32x4xf32>
    %417 = tpu.matmul %416, %9, %cst_142 {dimension_numbers = #tpu.dot_dimension_numbers<[1], [0], [0], [1], [0, 0, 1, 1], [], []>} : vector<32x32xf32>, vector<32x4xf32>, vector<32x4xf32> -> vector<32x4xf32>
    %418 = vector.shape_cast %417 : vector<32x4xf32> to vector<2x16x4xf32>
    %cst_143 = arith.constant dense<0xFF800000> : vector<2x4xf32>
    %419 = vector.multi_reduction <maximumf>, %418, %cst_143 [1] : vector<2x16x4xf32> to vector<2x4xf32>
    %420 = vector.shape_cast %419 : vector<2x4xf32> to vector<2x1x4xf32>
    %421 = vector.broadcast %420 : vector<2x1x4xf32> to vector<2x16x4xf32>
    %422 = arith.subf %418, %421 : vector<2x16x4xf32>
    %423 = math.exp %422 : vector<2x16x4xf32>
    %cst_144 = arith.constant dense<0.000000e+00> : vector<2x4xf32>
    %424 = vector.multi_reduction <add>, %423, %cst_144 [1] : vector<2x16x4xf32> to vector<2x4xf32>
    %425 = vector.shape_cast %424 : vector<2x4xf32> to vector<2x1x4xf32>
    %426 = tpu.reciprocal %425 {approx = true} : vector<2x1x4xf32> -> vector<2x1x4xf32>
    %427 = vector.broadcast %426 : vector<2x1x4xf32> to vector<2x16x4xf32>
    %428 = arith.mulf %423, %427 : vector<2x16x4xf32>
    %429 = vector.shape_cast %428 : vector<2x16x4xf32> to vector<32x4xf32>
    %cst_145 = arith.constant dense<0.000000e+00> : vector<32x32xf32>
    %430 = tpu.matmul %429, %10, %cst_145 {dimension_numbers = #tpu.dot_dimension_numbers<[1], [0], [0], [1], [0, 0, 1, 1], [], []>} : vector<32x4xf32>, vector<4x32xf32>, vector<32x32xf32> -> vector<32x32xf32>
    %431 = vector.shape_cast %430 : vector<32x32xf32> to vector<2x16x32xf32>
    %432 = arith.mulf %431, %23 : vector<2x16x32xf32>
    %cst_146 = arith.constant dense<0.000000e+00> : vector<2x32xf32>
    %433 = vector.multi_reduction <add>, %432, %cst_146 [1] : vector<2x16x32xf32> to vector<2x32xf32>
    %c3 = arith.constant 3 : index
    %c0_147 = arith.constant 0 : index
    %c0_148 = arith.constant 0 : index
    %c0_149 = arith.constant 0 : index
    %434 = vector.load %arg22[%c3, %c0_147, %c0_148, %c0_149] : memref<7x2x16x4xf32, #tpu.memory_space<vmem>>, vector<1x2x16x4xf32>
    %435 = vector.shape_cast %434 : vector<1x2x16x4xf32> to vector<2x16x4xf32>
    %436 = vector.shape_cast %428 : vector<2x16x4xf32> to vector<1x2x16x4xf32>
    tpu.vector_store %arg22[%c3, %c0_147, %c0_148, %c0_149], %436 {strides = array<i32>} : memref<7x2x16x4xf32, #tpu.memory_space<vmem>>, vector<1x2x16x4xf32>,
    %437 = tpu.concatenate %396, %433, %343 in 1 : vector<2x32xf32>, vector<2x32xf32>, vector<2x32xf32> -> vector<2x96xf32>
    %cst_150 = arith.constant dense<0.000000e+00> : vector<2x128xf32>
    %438 = tpu.matmul %437, %11, %cst_150 {dimension_numbers = #tpu.dot_dimension_numbers<[1], [0], [0], [1], [0, 0, 1, 1], [], []>} : vector<2x96xf32>, vector<96x128xf32>, vector<2x128xf32> -> vector<2x128xf32>
    %439 = vector.broadcast %12 : vector<1x128xf32> to vector<2x128xf32>
    %440 = arith.addf %438, %439 : vector<2x128xf32>
    %441 = vector.extract_strided_slice %440 {offsets = [0, 0], sizes = [2, 32], strides = [1, 1]} : vector<2x128xf32> to vector<2x32xf32>
    %442 = arith.negf %441 : vector<2x32xf32>
    %443 = math.exp %442 : vector<2x32xf32>
    %cst_151 = arith.constant 1.000000e+00 : f32
    %444 = vector.broadcast %cst_151 : f32 to vector<2x32xf32>
    %445 = arith.addf %444, %443 : vector<2x32xf32>
    %446 = arith.divf %444, %445 : vector<2x32xf32>
    %447 = vector.extract_strided_slice %440 {offsets = [0, 32], sizes = [2, 32], strides = [1, 1]} : vector<2x128xf32> to vector<2x32xf32>
    %448 = arith.negf %447 : vector<2x32xf32>
    %449 = math.exp %448 : vector<2x32xf32>
    %cst_152 = arith.constant 1.000000e+00 : f32
    %450 = vector.broadcast %cst_152 : f32 to vector<2x32xf32>
    %451 = arith.addf %450, %449 : vector<2x32xf32>
    %452 = arith.divf %450, %451 : vector<2x32xf32>
    %453 = vector.extract_strided_slice %440 {offsets = [0, 64], sizes = [2, 32], strides = [1, 1]} : vector<2x128xf32> to vector<2x32xf32>
    %454 = math.tanh %453 : vector<2x32xf32>
    %455 = vector.extract_strided_slice %440 {offsets = [0, 96], sizes = [2, 32], strides = [1, 1]} : vector<2x128xf32> to vector<2x32xf32>
    %456 = arith.negf %455 : vector<2x32xf32>
    %457 = math.exp %456 : vector<2x32xf32>
    %cst_153 = arith.constant 1.000000e+00 : f32
    %458 = vector.broadcast %cst_153 : f32 to vector<2x32xf32>
    %459 = arith.addf %458, %457 : vector<2x32xf32>
    %460 = arith.divf %458, %459 : vector<2x32xf32>
    %461 = arith.mulf %452, %341 : vector<2x32xf32>
    %462 = arith.mulf %446, %454 : vector<2x32xf32>
    %463 = arith.addf %461, %462 : vector<2x32xf32>
    %464 = math.tanh %463 : vector<2x32xf32>
    %465 = arith.mulf %460, %464 : vector<2x32xf32>
    %466 = tpu.concatenate %465, %372 in 1 : vector<2x32xf32>, vector<2x32xf32> -> vector<2x64xf32>
    %cst_154 = arith.constant dense<0.000000e+00> : vector<2x128xf32>
    %467 = tpu.matmul %466, %13, %cst_154 {dimension_numbers = #tpu.dot_dimension_numbers<[1], [0], [0], [1], [0, 0, 1, 1], [], []>} : vector<2x64xf32>, vector<64x128xf32>, vector<2x128xf32> -> vector<2x128xf32>
    %468 = vector.broadcast %14 : vector<1x128xf32> to vector<2x128xf32>
    %469 = arith.addf %467, %468 : vector<2x128xf32>
    %470 = vector.extract_strided_slice %469 {offsets = [0, 0], sizes = [2, 32], strides = [1, 1]} : vector<2x128xf32> to vector<2x32xf32>
    %471 = arith.negf %470 : vector<2x32xf32>
    %472 = math.exp %471 : vector<2x32xf32>
    %cst_155 = arith.constant 1.000000e+00 : f32
    %473 = vector.broadcast %cst_155 : f32 to vector<2x32xf32>
    %474 = arith.addf %473, %472 : vector<2x32xf32>
    %475 = arith.divf %473, %474 : vector<2x32xf32>
    %476 = vector.extract_strided_slice %469 {offsets = [0, 32], sizes = [2, 32], strides = [1, 1]} : vector<2x128xf32> to vector<2x32xf32>
    %477 = arith.negf %476 : vector<2x32xf32>
    %478 = math.exp %477 : vector<2x32xf32>
    %cst_156 = arith.constant 1.000000e+00 : f32
    %479 = vector.broadcast %cst_156 : f32 to vector<2x32xf32>
    %480 = arith.addf %479, %478 : vector<2x32xf32>
    %481 = arith.divf %479, %480 : vector<2x32xf32>
    %482 = vector.extract_strided_slice %469 {offsets = [0, 64], sizes = [2, 32], strides = [1, 1]} : vector<2x128xf32> to vector<2x32xf32>
    %483 = math.tanh %482 : vector<2x32xf32>
    %484 = vector.extract_strided_slice %469 {offsets = [0, 96], sizes = [2, 32], strides = [1, 1]} : vector<2x128xf32> to vector<2x32xf32>
    %485 = arith.negf %484 : vector<2x32xf32>
    %486 = math.exp %485 : vector<2x32xf32>
    %cst_157 = arith.constant 1.000000e+00 : f32
    %487 = vector.broadcast %cst_157 : f32 to vector<2x32xf32>
    %488 = arith.addf %487, %486 : vector<2x32xf32>
    %489 = arith.divf %487, %488 : vector<2x32xf32>
    %490 = arith.mulf %481, %370 : vector<2x32xf32>
    %491 = arith.mulf %475, %483 : vector<2x32xf32>
    %492 = arith.addf %490, %491 : vector<2x32xf32>
    %493 = math.tanh %492 : vector<2x32xf32>
    %494 = arith.mulf %489, %493 : vector<2x32xf32>
    %495 = tpu.concatenate %494, %433 in 1 : vector<2x32xf32>, vector<2x32xf32> -> vector<2x64xf32>
    %cst_158 = arith.constant dense<0.000000e+00> : vector<2x32xf32>
    %496 = tpu.matmul %495, %15, %cst_158 {dimension_numbers = #tpu.dot_dimension_numbers<[1], [0], [0], [1], [0, 0, 1, 1], [], []>} : vector<2x64xf32>, vector<64x32xf32>, vector<2x32xf32> -> vector<2x32xf32>
    %497 = vector.broadcast %16 : vector<1x32xf32> to vector<2x32xf32>
    %498 = arith.addf %496, %497 : vector<2x32xf32>
    %499 = math.tanh %498 : vector<2x32xf32>
    %cst_159 = arith.constant dense<0.000000e+00> : vector<2x16xf32>
    %500 = tpu.matmul %499, %17, %cst_159 {dimension_numbers = #tpu.dot_dimension_numbers<[1], [0], [0], [1], [0, 0, 1, 1], [], []>} : vector<2x32xf32>, vector<32x16xf32>, vector<2x16xf32> -> vector<2x16xf32>
    %501 = vector.broadcast %18 : vector<1x16xf32> to vector<2x16xf32>
    %502 = arith.addf %500, %501 : vector<2x16xf32>
    %cst_160 = arith.constant dense<0xFF800000> : vector<2xf32>
    %503 = vector.multi_reduction <maximumf>, %502, %cst_160 [1] : vector<2x16xf32> to vector<2xf32>
    %504 = vector.shape_cast %503 : vector<2xf32> to vector<2x1xf32>
    %505 = vector.broadcast %504 : vector<2x1xf32> to vector<2x16xf32>
    %506 = arith.subf %502, %505 : vector<2x16xf32>
    %507 = math.exp %506 : vector<2x16xf32>
    %cst_161 = arith.constant dense<0.000000e+00> : vector<2xf32>
    %508 = vector.multi_reduction <add>, %507, %cst_161 [1] : vector<2x16xf32> to vector<2xf32>
    %509 = vector.shape_cast %508 : vector<2xf32> to vector<2x1xf32>
    %510 = math.log %509 : vector<2x1xf32>
    %511 = arith.addf %510, %504 : vector<2x1xf32>
    %512 = vector.broadcast %511 : vector<2x1xf32> to vector<2x16xf32>
    %513 = arith.subf %502, %512 : vector<2x16xf32>
    %c3_162 = arith.constant 3 : index
    %c0_163 = arith.constant 0 : index
    %c0_164 = arith.constant 0 : index
    %514 = vector.load %arg21[%c3_162, %c0_163, %c0_164] : memref<7x2x16xf32, #tpu.memory_space<vmem>>, vector<1x2x16xf32>
    %515 = vector.shape_cast %514 : vector<1x2x16xf32> to vector<2x16xf32>
    %516 = vector.shape_cast %513 : vector<2x16xf32> to vector<1x2x16xf32>
    tpu.vector_store %arg21[%c3_162, %c0_163, %c0_164], %516 {strides = array<i32>} : memref<7x2x16xf32, #tpu.memory_space<vmem>>, vector<1x2x16xf32>,
    %517 = vector.extract_strided_slice %0 {offsets = [4, 0, 0], sizes = [1, 2, 32], strides = [1, 1, 1]} : vector<7x2x32xf32> to vector<1x2x32xf32>
    %518 = vector.shape_cast %517 : vector<1x2x32xf32> to vector<2x32xf32>
    %cst_165 = arith.constant dense<0.000000e+00> : vector<2x32xf32>
    %519 = tpu.matmul %518, %3, %cst_165 {dimension_numbers = #tpu.dot_dimension_numbers<[1], [0], [0], [1], [0, 0, 1, 1], [], []>} : vector<2x32xf32>, vector<32x32xf32>, vector<2x32xf32> -> vector<2x32xf32>
    %520 = vector.broadcast %4 : vector<1x32xf32> to vector<2x32xf32>
    %521 = arith.addf %519, %520 : vector<2x32xf32>
    %cst_166 = arith.constant dense<0.000000e+00> : vector<32x4xf32>
    %522 = tpu.matmul %1, %429, %cst_166 {dimension_numbers = #tpu.dot_dimension_numbers<[1], [0], [0], [1], [0, 0, 1, 1], [], []>} : vector<32x32xf32>, vector<32x4xf32>, vector<32x4xf32> -> vector<32x4xf32>
    %cst_167 = arith.constant dense<0.000000e+00> : vector<32x4xf32>
    %523 = tpu.matmul %2, %429, %cst_167 {dimension_numbers = #tpu.dot_dimension_numbers<[1], [0], [0], [1], [0, 0, 1, 1], [], []>} : vector<32x32xf32>, vector<32x4xf32>, vector<32x4xf32> -> vector<32x4xf32>
    %cst_168 = arith.constant dense<0.000000e+00> : vector<32x32xf32>
    %524 = tpu.matmul %522, %5, %cst_168 {dimension_numbers = #tpu.dot_dimension_numbers<[1], [0], [0], [1], [0, 0, 1, 1], [], []>} : vector<32x4xf32>, vector<4x32xf32>, vector<32x32xf32> -> vector<32x32xf32>
    %cst_169 = arith.constant dense<0.000000e+00> : vector<32x32xf32>
    %525 = tpu.matmul %429, %6, %cst_169 {dimension_numbers = #tpu.dot_dimension_numbers<[1], [0], [0], [1], [0, 0, 1, 1], [], []>} : vector<32x4xf32>, vector<4x32xf32>, vector<32x32xf32> -> vector<32x32xf32>
    %526 = arith.addf %524, %525 : vector<32x32xf32>
    %cst_170 = arith.constant dense<0.000000e+00> : vector<32x32xf32>
    %527 = tpu.matmul %523, %7, %cst_170 {dimension_numbers = #tpu.dot_dimension_numbers<[1], [0], [0], [1], [0, 0, 1, 1], [], []>} : vector<32x4xf32>, vector<4x32xf32>, vector<32x32xf32> -> vector<32x32xf32>
    %528 = arith.addf %526, %527 : vector<32x32xf32>
    %529 = vector.broadcast %8 : vector<1x32xf32> to vector<32x32xf32>
    %530 = arith.addf %528, %529 : vector<32x32xf32>
    %531 = math.tanh %530 : vector<32x32xf32>
    %532 = vector.shape_cast %521 : vector<2x32xf32> to vector<2x1x32xf32>
    %533 = vector.broadcast %532 : vector<2x1x32xf32> to vector<2x16x32xf32>
    %534 = arith.addf %23, %533 : vector<2x16x32xf32>
    %535 = vector.shape_cast %531 : vector<32x32xf32> to vector<2x16x32xf32>
    %536 = arith.addf %534, %535 : vector<2x16x32xf32>
    %537 = math.tanh %536 : vector<2x16x32xf32>
    %538 = vector.shape_cast %537 : vector<2x16x32xf32> to vector<32x32xf32>
    %cst_171 = arith.constant dense<0.000000e+00> : vector<32x4xf32>
    %539 = tpu.matmul %538, %9, %cst_171 {dimension_numbers = #tpu.dot_dimension_numbers<[1], [0], [0], [1], [0, 0, 1, 1], [], []>} : vector<32x32xf32>, vector<32x4xf32>, vector<32x4xf32> -> vector<32x4xf32>
    %540 = vector.shape_cast %539 : vector<32x4xf32> to vector<2x16x4xf32>
    %cst_172 = arith.constant dense<0xFF800000> : vector<2x4xf32>
    %541 = vector.multi_reduction <maximumf>, %540, %cst_172 [1] : vector<2x16x4xf32> to vector<2x4xf32>
    %542 = vector.shape_cast %541 : vector<2x4xf32> to vector<2x1x4xf32>
    %543 = vector.broadcast %542 : vector<2x1x4xf32> to vector<2x16x4xf32>
    %544 = arith.subf %540, %543 : vector<2x16x4xf32>
    %545 = math.exp %544 : vector<2x16x4xf32>
    %cst_173 = arith.constant dense<0.000000e+00> : vector<2x4xf32>
    %546 = vector.multi_reduction <add>, %545, %cst_173 [1] : vector<2x16x4xf32> to vector<2x4xf32>
    %547 = vector.shape_cast %546 : vector<2x4xf32> to vector<2x1x4xf32>
    %548 = tpu.reciprocal %547 {approx = true} : vector<2x1x4xf32> -> vector<2x1x4xf32>
    %549 = vector.broadcast %548 : vector<2x1x4xf32> to vector<2x16x4xf32>
    %550 = arith.mulf %545, %549 : vector<2x16x4xf32>
    %551 = vector.shape_cast %550 : vector<2x16x4xf32> to vector<32x4xf32>
    %cst_174 = arith.constant dense<0.000000e+00> : vector<32x32xf32>
    %552 = tpu.matmul %551, %10, %cst_174 {dimension_numbers = #tpu.dot_dimension_numbers<[1], [0], [0], [1], [0, 0, 1, 1], [], []>} : vector<32x4xf32>, vector<4x32xf32>, vector<32x32xf32> -> vector<32x32xf32>
    %553 = vector.shape_cast %552 : vector<32x32xf32> to vector<2x16x32xf32>
    %554 = arith.mulf %553, %23 : vector<2x16x32xf32>
    %cst_175 = arith.constant dense<0.000000e+00> : vector<2x32xf32>
    %555 = vector.multi_reduction <add>, %554, %cst_175 [1] : vector<2x16x32xf32> to vector<2x32xf32>
    %c4 = arith.constant 4 : index
    %c0_176 = arith.constant 0 : index
    %c0_177 = arith.constant 0 : index
    %c0_178 = arith.constant 0 : index
    %556 = vector.load %arg22[%c4, %c0_176, %c0_177, %c0_178] : memref<7x2x16x4xf32, #tpu.memory_space<vmem>>, vector<1x2x16x4xf32>
    %557 = vector.shape_cast %556 : vector<1x2x16x4xf32> to vector<2x16x4xf32>
    %558 = vector.shape_cast %550 : vector<2x16x4xf32> to vector<1x2x16x4xf32>
    tpu.vector_store %arg22[%c4, %c0_176, %c0_177, %c0_178], %558 {strides = array<i32>} : memref<7x2x16x4xf32, #tpu.memory_space<vmem>>, vector<1x2x16x4xf32>,
    %559 = tpu.concatenate %518, %555, %465 in 1 : vector<2x32xf32>, vector<2x32xf32>, vector<2x32xf32> -> vector<2x96xf32>
    %cst_179 = arith.constant dense<0.000000e+00> : vector<2x128xf32>
    %560 = tpu.matmul %559, %11, %cst_179 {dimension_numbers = #tpu.dot_dimension_numbers<[1], [0], [0], [1], [0, 0, 1, 1], [], []>} : vector<2x96xf32>, vector<96x128xf32>, vector<2x128xf32> -> vector<2x128xf32>
    %561 = vector.broadcast %12 : vector<1x128xf32> to vector<2x128xf32>
    %562 = arith.addf %560, %561 : vector<2x128xf32>
    %563 = vector.extract_strided_slice %562 {offsets = [0, 0], sizes = [2, 32], strides = [1, 1]} : vector<2x128xf32> to vector<2x32xf32>
    %564 = arith.negf %563 : vector<2x32xf32>
    %565 = math.exp %564 : vector<2x32xf32>
    %cst_180 = arith.constant 1.000000e+00 : f32
    %566 = vector.broadcast %cst_180 : f32 to vector<2x32xf32>
    %567 = arith.addf %566, %565 : vector<2x32xf32>
    %568 = arith.divf %566, %567 : vector<2x32xf32>
    %569 = vector.extract_strided_slice %562 {offsets = [0, 32], sizes = [2, 32], strides = [1, 1]} : vector<2x128xf32> to vector<2x32xf32>
    %570 = arith.negf %569 : vector<2x32xf32>
    %571 = math.exp %570 : vector<2x32xf32>
    %cst_181 = arith.constant 1.000000e+00 : f32
    %572 = vector.broadcast %cst_181 : f32 to vector<2x32xf32>
    %573 = arith.addf %572, %571 : vector<2x32xf32>
    %574 = arith.divf %572, %573 : vector<2x32xf32>
    %575 = vector.extract_strided_slice %562 {offsets = [0, 64], sizes = [2, 32], strides = [1, 1]} : vector<2x128xf32> to vector<2x32xf32>
    %576 = math.tanh %575 : vector<2x32xf32>
    %577 = vector.extract_strided_slice %562 {offsets = [0, 96], sizes = [2, 32], strides = [1, 1]} : vector<2x128xf32> to vector<2x32xf32>
    %578 = arith.negf %577 : vector<2x32xf32>
    %579 = math.exp %578 : vector<2x32xf32>
    %cst_182 = arith.constant 1.000000e+00 : f32
    %580 = vector.broadcast %cst_182 : f32 to vector<2x32xf32>
    %581 = arith.addf %580, %579 : vector<2x32xf32>
    %582 = arith.divf %580, %581 : vector<2x32xf32>
    %583 = arith.mulf %574, %463 : vector<2x32xf32>
    %584 = arith.mulf %568, %576 : vector<2x32xf32>
    %585 = arith.addf %583, %584 : vector<2x32xf32>
    %586 = math.tanh %585 : vector<2x32xf32>
    %587 = arith.mulf %582, %586 : vector<2x32xf32>
    %588 = tpu.concatenate %587, %494 in 1 : vector<2x32xf32>, vector<2x32xf32> -> vector<2x64xf32>
    %cst_183 = arith.constant dense<0.000000e+00> : vector<2x128xf32>
    %589 = tpu.matmul %588, %13, %cst_183 {dimension_numbers = #tpu.dot_dimension_numbers<[1], [0], [0], [1], [0, 0, 1, 1], [], []>} : vector<2x64xf32>, vector<64x128xf32>, vector<2x128xf32> -> vector<2x128xf32>
    %590 = vector.broadcast %14 : vector<1x128xf32> to vector<2x128xf32>
    %591 = arith.addf %589, %590 : vector<2x128xf32>
    %592 = vector.extract_strided_slice %591 {offsets = [0, 0], sizes = [2, 32], strides = [1, 1]} : vector<2x128xf32> to vector<2x32xf32>
    %593 = arith.negf %592 : vector<2x32xf32>
    %594 = math.exp %593 : vector<2x32xf32>
    %cst_184 = arith.constant 1.000000e+00 : f32
    %595 = vector.broadcast %cst_184 : f32 to vector<2x32xf32>
    %596 = arith.addf %595, %594 : vector<2x32xf32>
    %597 = arith.divf %595, %596 : vector<2x32xf32>
    %598 = vector.extract_strided_slice %591 {offsets = [0, 32], sizes = [2, 32], strides = [1, 1]} : vector<2x128xf32> to vector<2x32xf32>
    %599 = arith.negf %598 : vector<2x32xf32>
    %600 = math.exp %599 : vector<2x32xf32>
    %cst_185 = arith.constant 1.000000e+00 : f32
    %601 = vector.broadcast %cst_185 : f32 to vector<2x32xf32>
    %602 = arith.addf %601, %600 : vector<2x32xf32>
    %603 = arith.divf %601, %602 : vector<2x32xf32>
    %604 = vector.extract_strided_slice %591 {offsets = [0, 64], sizes = [2, 32], strides = [1, 1]} : vector<2x128xf32> to vector<2x32xf32>
    %605 = math.tanh %604 : vector<2x32xf32>
    %606 = vector.extract_strided_slice %591 {offsets = [0, 96], sizes = [2, 32], strides = [1, 1]} : vector<2x128xf32> to vector<2x32xf32>
    %607 = arith.negf %606 : vector<2x32xf32>
    %608 = math.exp %607 : vector<2x32xf32>
    %cst_186 = arith.constant 1.000000e+00 : f32
    %609 = vector.broadcast %cst_186 : f32 to vector<2x32xf32>
    %610 = arith.addf %609, %608 : vector<2x32xf32>
    %611 = arith.divf %609, %610 : vector<2x32xf32>
    %612 = arith.mulf %603, %492 : vector<2x32xf32>
    %613 = arith.mulf %597, %605 : vector<2x32xf32>
    %614 = arith.addf %612, %613 : vector<2x32xf32>
    %615 = math.tanh %614 : vector<2x32xf32>
    %616 = arith.mulf %611, %615 : vector<2x32xf32>
    %617 = tpu.concatenate %616, %555 in 1 : vector<2x32xf32>, vector<2x32xf32> -> vector<2x64xf32>
    %cst_187 = arith.constant dense<0.000000e+00> : vector<2x32xf32>
    %618 = tpu.matmul %617, %15, %cst_187 {dimension_numbers = #tpu.dot_dimension_numbers<[1], [0], [0], [1], [0, 0, 1, 1], [], []>} : vector<2x64xf32>, vector<64x32xf32>, vector<2x32xf32> -> vector<2x32xf32>
    %619 = vector.broadcast %16 : vector<1x32xf32> to vector<2x32xf32>
    %620 = arith.addf %618, %619 : vector<2x32xf32>
    %621 = math.tanh %620 : vector<2x32xf32>
    %cst_188 = arith.constant dense<0.000000e+00> : vector<2x16xf32>
    %622 = tpu.matmul %621, %17, %cst_188 {dimension_numbers = #tpu.dot_dimension_numbers<[1], [0], [0], [1], [0, 0, 1, 1], [], []>} : vector<2x32xf32>, vector<32x16xf32>, vector<2x16xf32> -> vector<2x16xf32>
    %623 = vector.broadcast %18 : vector<1x16xf32> to vector<2x16xf32>
    %624 = arith.addf %622, %623 : vector<2x16xf32>
    %cst_189 = arith.constant dense<0xFF800000> : vector<2xf32>
    %625 = vector.multi_reduction <maximumf>, %624, %cst_189 [1] : vector<2x16xf32> to vector<2xf32>
    %626 = vector.shape_cast %625 : vector<2xf32> to vector<2x1xf32>
    %627 = vector.broadcast %626 : vector<2x1xf32> to vector<2x16xf32>
    %628 = arith.subf %624, %627 : vector<2x16xf32>
    %629 = math.exp %628 : vector<2x16xf32>
    %cst_190 = arith.constant dense<0.000000e+00> : vector<2xf32>
    %630 = vector.multi_reduction <add>, %629, %cst_190 [1] : vector<2x16xf32> to vector<2xf32>
    %631 = vector.shape_cast %630 : vector<2xf32> to vector<2x1xf32>
    %632 = math.log %631 : vector<2x1xf32>
    %633 = arith.addf %632, %626 : vector<2x1xf32>
    %634 = vector.broadcast %633 : vector<2x1xf32> to vector<2x16xf32>
    %635 = arith.subf %624, %634 : vector<2x16xf32>
    %c4_191 = arith.constant 4 : index
    %c0_192 = arith.constant 0 : index
    %c0_193 = arith.constant 0 : index
    %636 = vector.load %arg21[%c4_191, %c0_192, %c0_193] : memref<7x2x16xf32, #tpu.memory_space<vmem>>, vector<1x2x16xf32>
    %637 = vector.shape_cast %636 : vector<1x2x16xf32> to vector<2x16xf32>
    %638 = vector.shape_cast %635 : vector<2x16xf32> to vector<1x2x16xf32>
    tpu.vector_store %arg21[%c4_191, %c0_192, %c0_193], %638 {strides = array<i32>} : memref<7x2x16xf32, #tpu.memory_space<vmem>>, vector<1x2x16xf32>,
    %639 = vector.extract_strided_slice %0 {offsets = [5, 0, 0], sizes = [1, 2, 32], strides = [1, 1, 1]} : vector<7x2x32xf32> to vector<1x2x32xf32>
    %640 = vector.shape_cast %639 : vector<1x2x32xf32> to vector<2x32xf32>
    %cst_194 = arith.constant dense<0.000000e+00> : vector<2x32xf32>
    %641 = tpu.matmul %640, %3, %cst_194 {dimension_numbers = #tpu.dot_dimension_numbers<[1], [0], [0], [1], [0, 0, 1, 1], [], []>} : vector<2x32xf32>, vector<32x32xf32>, vector<2x32xf32> -> vector<2x32xf32>
    %642 = vector.broadcast %4 : vector<1x32xf32> to vector<2x32xf32>
    %643 = arith.addf %641, %642 : vector<2x32xf32>
    %cst_195 = arith.constant dense<0.000000e+00> : vector<32x4xf32>
    %644 = tpu.matmul %1, %551, %cst_195 {dimension_numbers = #tpu.dot_dimension_numbers<[1], [0], [0], [1], [0, 0, 1, 1], [], []>} : vector<32x32xf32>, vector<32x4xf32>, vector<32x4xf32> -> vector<32x4xf32>
    %cst_196 = arith.constant dense<0.000000e+00> : vector<32x4xf32>
    %645 = tpu.matmul %2, %551, %cst_196 {dimension_numbers = #tpu.dot_dimension_numbers<[1], [0], [0], [1], [0, 0, 1, 1], [], []>} : vector<32x32xf32>, vector<32x4xf32>, vector<32x4xf32> -> vector<32x4xf32>
    %cst_197 = arith.constant dense<0.000000e+00> : vector<32x32xf32>
    %646 = tpu.matmul %644, %5, %cst_197 {dimension_numbers = #tpu.dot_dimension_numbers<[1], [0], [0], [1], [0, 0, 1, 1], [], []>} : vector<32x4xf32>, vector<4x32xf32>, vector<32x32xf32> -> vector<32x32xf32>
    %cst_198 = arith.constant dense<0.000000e+00> : vector<32x32xf32>
    %647 = tpu.matmul %551, %6, %cst_198 {dimension_numbers = #tpu.dot_dimension_numbers<[1], [0], [0], [1], [0, 0, 1, 1], [], []>} : vector<32x4xf32>, vector<4x32xf32>, vector<32x32xf32> -> vector<32x32xf32>
    %648 = arith.addf %646, %647 : vector<32x32xf32>
    %cst_199 = arith.constant dense<0.000000e+00> : vector<32x32xf32>
    %649 = tpu.matmul %645, %7, %cst_199 {dimension_numbers = #tpu.dot_dimension_numbers<[1], [0], [0], [1], [0, 0, 1, 1], [], []>} : vector<32x4xf32>, vector<4x32xf32>, vector<32x32xf32> -> vector<32x32xf32>
    %650 = arith.addf %648, %649 : vector<32x32xf32>
    %651 = vector.broadcast %8 : vector<1x32xf32> to vector<32x32xf32>
    %652 = arith.addf %650, %651 : vector<32x32xf32>
    %653 = math.tanh %652 : vector<32x32xf32>
    %654 = vector.shape_cast %643 : vector<2x32xf32> to vector<2x1x32xf32>
    %655 = vector.broadcast %654 : vector<2x1x32xf32> to vector<2x16x32xf32>
    %656 = arith.addf %23, %655 : vector<2x16x32xf32>
    %657 = vector.shape_cast %653 : vector<32x32xf32> to vector<2x16x32xf32>
    %658 = arith.addf %656, %657 : vector<2x16x32xf32>
    %659 = math.tanh %658 : vector<2x16x32xf32>
    %660 = vector.shape_cast %659 : vector<2x16x32xf32> to vector<32x32xf32>
    %cst_200 = arith.constant dense<0.000000e+00> : vector<32x4xf32>
    %661 = tpu.matmul %660, %9, %cst_200 {dimension_numbers = #tpu.dot_dimension_numbers<[1], [0], [0], [1], [0, 0, 1, 1], [], []>} : vector<32x32xf32>, vector<32x4xf32>, vector<32x4xf32> -> vector<32x4xf32>
    %662 = vector.shape_cast %661 : vector<32x4xf32> to vector<2x16x4xf32>
    %cst_201 = arith.constant dense<0xFF800000> : vector<2x4xf32>
    %663 = vector.multi_reduction <maximumf>, %662, %cst_201 [1] : vector<2x16x4xf32> to vector<2x4xf32>
    %664 = vector.shape_cast %663 : vector<2x4xf32> to vector<2x1x4xf32>
    %665 = vector.broadcast %664 : vector<2x1x4xf32> to vector<2x16x4xf32>
    %666 = arith.subf %662, %665 : vector<2x16x4xf32>
    %667 = math.exp %666 : vector<2x16x4xf32>
    %cst_202 = arith.constant dense<0.000000e+00> : vector<2x4xf32>
    %668 = vector.multi_reduction <add>, %667, %cst_202 [1] : vector<2x16x4xf32> to vector<2x4xf32>
    %669 = vector.shape_cast %668 : vector<2x4xf32> to vector<2x1x4xf32>
    %670 = tpu.reciprocal %669 {approx = true} : vector<2x1x4xf32> -> vector<2x1x4xf32>
    %671 = vector.broadcast %670 : vector<2x1x4xf32> to vector<2x16x4xf32>
    %672 = arith.mulf %667, %671 : vector<2x16x4xf32>
    %673 = vector.shape_cast %672 : vector<2x16x4xf32> to vector<32x4xf32>
    %cst_203 = arith.constant dense<0.000000e+00> : vector<32x32xf32>
    %674 = tpu.matmul %673, %10, %cst_203 {dimension_numbers = #tpu.dot_dimension_numbers<[1], [0], [0], [1], [0, 0, 1, 1], [], []>} : vector<32x4xf32>, vector<4x32xf32>, vector<32x32xf32> -> vector<32x32xf32>
    %675 = vector.shape_cast %674 : vector<32x32xf32> to vector<2x16x32xf32>
    %676 = arith.mulf %675, %23 : vector<2x16x32xf32>
    %cst_204 = arith.constant dense<0.000000e+00> : vector<2x32xf32>
    %677 = vector.multi_reduction <add>, %676, %cst_204 [1] : vector<2x16x32xf32> to vector<2x32xf32>
    %c5 = arith.constant 5 : index
    %c0_205 = arith.constant 0 : index
    %c0_206 = arith.constant 0 : index
    %c0_207 = arith.constant 0 : index
    %678 = vector.load %arg22[%c5, %c0_205, %c0_206, %c0_207] : memref<7x2x16x4xf32, #tpu.memory_space<vmem>>, vector<1x2x16x4xf32>
    %679 = vector.shape_cast %678 : vector<1x2x16x4xf32> to vector<2x16x4xf32>
    %680 = vector.shape_cast %672 : vector<2x16x4xf32> to vector<1x2x16x4xf32>
    tpu.vector_store %arg22[%c5, %c0_205, %c0_206, %c0_207], %680 {strides = array<i32>} : memref<7x2x16x4xf32, #tpu.memory_space<vmem>>, vector<1x2x16x4xf32>,
    %681 = tpu.concatenate %640, %677, %587 in 1 : vector<2x32xf32>, vector<2x32xf32>, vector<2x32xf32> -> vector<2x96xf32>
    %cst_208 = arith.constant dense<0.000000e+00> : vector<2x128xf32>
    %682 = tpu.matmul %681, %11, %cst_208 {dimension_numbers = #tpu.dot_dimension_numbers<[1], [0], [0], [1], [0, 0, 1, 1], [], []>} : vector<2x96xf32>, vector<96x128xf32>, vector<2x128xf32> -> vector<2x128xf32>
    %683 = vector.broadcast %12 : vector<1x128xf32> to vector<2x128xf32>
    %684 = arith.addf %682, %683 : vector<2x128xf32>
    %685 = vector.extract_strided_slice %684 {offsets = [0, 0], sizes = [2, 32], strides = [1, 1]} : vector<2x128xf32> to vector<2x32xf32>
    %686 = arith.negf %685 : vector<2x32xf32>
    %687 = math.exp %686 : vector<2x32xf32>
    %cst_209 = arith.constant 1.000000e+00 : f32
    %688 = vector.broadcast %cst_209 : f32 to vector<2x32xf32>
    %689 = arith.addf %688, %687 : vector<2x32xf32>
    %690 = arith.divf %688, %689 : vector<2x32xf32>
    %691 = vector.extract_strided_slice %684 {offsets = [0, 32], sizes = [2, 32], strides = [1, 1]} : vector<2x128xf32> to vector<2x32xf32>
    %692 = arith.negf %691 : vector<2x32xf32>
    %693 = math.exp %692 : vector<2x32xf32>
    %cst_210 = arith.constant 1.000000e+00 : f32
    %694 = vector.broadcast %cst_210 : f32 to vector<2x32xf32>
    %695 = arith.addf %694, %693 : vector<2x32xf32>
    %696 = arith.divf %694, %695 : vector<2x32xf32>
    %697 = vector.extract_strided_slice %684 {offsets = [0, 64], sizes = [2, 32], strides = [1, 1]} : vector<2x128xf32> to vector<2x32xf32>
    %698 = math.tanh %697 : vector<2x32xf32>
    %699 = vector.extract_strided_slice %684 {offsets = [0, 96], sizes = [2, 32], strides = [1, 1]} : vector<2x128xf32> to vector<2x32xf32>
    %700 = arith.negf %699 : vector<2x32xf32>
    %701 = math.exp %700 : vector<2x32xf32>
    %cst_211 = arith.constant 1.000000e+00 : f32
    %702 = vector.broadcast %cst_211 : f32 to vector<2x32xf32>
    %703 = arith.addf %702, %701 : vector<2x32xf32>
    %704 = arith.divf %702, %703 : vector<2x32xf32>
    %705 = arith.mulf %696, %585 : vector<2x32xf32>
    %706 = arith.mulf %690, %698 : vector<2x32xf32>
    %707 = arith.addf %705, %706 : vector<2x32xf32>
    %708 = math.tanh %707 : vector<2x32xf32>
    %709 = arith.mulf %704, %708 : vector<2x32xf32>
    %710 = tpu.concatenate %709, %616 in 1 : vector<2x32xf32>, vector<2x32xf32> -> vector<2x64xf32>
    %cst_212 = arith.constant dense<0.000000e+00> : vector<2x128xf32>
    %711 = tpu.matmul %710, %13, %cst_212 {dimension_numbers = #tpu.dot_dimension_numbers<[1], [0], [0], [1], [0, 0, 1, 1], [], []>} : vector<2x64xf32>, vector<64x128xf32>, vector<2x128xf32> -> vector<2x128xf32>
    %712 = vector.broadcast %14 : vector<1x128xf32> to vector<2x128xf32>
    %713 = arith.addf %711, %712 : vector<2x128xf32>
    %714 = vector.extract_strided_slice %713 {offsets = [0, 0], sizes = [2, 32], strides = [1, 1]} : vector<2x128xf32> to vector<2x32xf32>
    %715 = arith.negf %714 : vector<2x32xf32>
    %716 = math.exp %715 : vector<2x32xf32>
    %cst_213 = arith.constant 1.000000e+00 : f32
    %717 = vector.broadcast %cst_213 : f32 to vector<2x32xf32>
    %718 = arith.addf %717, %716 : vector<2x32xf32>
    %719 = arith.divf %717, %718 : vector<2x32xf32>
    %720 = vector.extract_strided_slice %713 {offsets = [0, 32], sizes = [2, 32], strides = [1, 1]} : vector<2x128xf32> to vector<2x32xf32>
    %721 = arith.negf %720 : vector<2x32xf32>
    %722 = math.exp %721 : vector<2x32xf32>
    %cst_214 = arith.constant 1.000000e+00 : f32
    %723 = vector.broadcast %cst_214 : f32 to vector<2x32xf32>
    %724 = arith.addf %723, %722 : vector<2x32xf32>
    %725 = arith.divf %723, %724 : vector<2x32xf32>
    %726 = vector.extract_strided_slice %713 {offsets = [0, 64], sizes = [2, 32], strides = [1, 1]} : vector<2x128xf32> to vector<2x32xf32>
    %727 = math.tanh %726 : vector<2x32xf32>
    %728 = vector.extract_strided_slice %713 {offsets = [0, 96], sizes = [2, 32], strides = [1, 1]} : vector<2x128xf32> to vector<2x32xf32>
    %729 = arith.negf %728 : vector<2x32xf32>
    %730 = math.exp %729 : vector<2x32xf32>
    %cst_215 = arith.constant 1.000000e+00 : f32
    %731 = vector.broadcast %cst_215 : f32 to vector<2x32xf32>
    %732 = arith.addf %731, %730 : vector<2x32xf32>
    %733 = arith.divf %731, %732 : vector<2x32xf32>
    %734 = arith.mulf %725, %614 : vector<2x32xf32>
    %735 = arith.mulf %719, %727 : vector<2x32xf32>
    %736 = arith.addf %734, %735 : vector<2x32xf32>
    %737 = math.tanh %736 : vector<2x32xf32>
    %738 = arith.mulf %733, %737 : vector<2x32xf32>
    %739 = tpu.concatenate %738, %677 in 1 : vector<2x32xf32>, vector<2x32xf32> -> vector<2x64xf32>
    %cst_216 = arith.constant dense<0.000000e+00> : vector<2x32xf32>
    %740 = tpu.matmul %739, %15, %cst_216 {dimension_numbers = #tpu.dot_dimension_numbers<[1], [0], [0], [1], [0, 0, 1, 1], [], []>} : vector<2x64xf32>, vector<64x32xf32>, vector<2x32xf32> -> vector<2x32xf32>
    %741 = vector.broadcast %16 : vector<1x32xf32> to vector<2x32xf32>
    %742 = arith.addf %740, %741 : vector<2x32xf32>
    %743 = math.tanh %742 : vector<2x32xf32>
    %cst_217 = arith.constant dense<0.000000e+00> : vector<2x16xf32>
    %744 = tpu.matmul %743, %17, %cst_217 {dimension_numbers = #tpu.dot_dimension_numbers<[1], [0], [0], [1], [0, 0, 1, 1], [], []>} : vector<2x32xf32>, vector<32x16xf32>, vector<2x16xf32> -> vector<2x16xf32>
    %745 = vector.broadcast %18 : vector<1x16xf32> to vector<2x16xf32>
    %746 = arith.addf %744, %745 : vector<2x16xf32>
    %cst_218 = arith.constant dense<0xFF800000> : vector<2xf32>
    %747 = vector.multi_reduction <maximumf>, %746, %cst_218 [1] : vector<2x16xf32> to vector<2xf32>
    %748 = vector.shape_cast %747 : vector<2xf32> to vector<2x1xf32>
    %749 = vector.broadcast %748 : vector<2x1xf32> to vector<2x16xf32>
    %750 = arith.subf %746, %749 : vector<2x16xf32>
    %751 = math.exp %750 : vector<2x16xf32>
    %cst_219 = arith.constant dense<0.000000e+00> : vector<2xf32>
    %752 = vector.multi_reduction <add>, %751, %cst_219 [1] : vector<2x16xf32> to vector<2xf32>
    %753 = vector.shape_cast %752 : vector<2xf32> to vector<2x1xf32>
    %754 = math.log %753 : vector<2x1xf32>
    %755 = arith.addf %754, %748 : vector<2x1xf32>
    %756 = vector.broadcast %755 : vector<2x1xf32> to vector<2x16xf32>
    %757 = arith.subf %746, %756 : vector<2x16xf32>
    %c5_220 = arith.constant 5 : index
    %c0_221 = arith.constant 0 : index
    %c0_222 = arith.constant 0 : index
    %758 = vector.load %arg21[%c5_220, %c0_221, %c0_222] : memref<7x2x16xf32, #tpu.memory_space<vmem>>, vector<1x2x16xf32>
    %759 = vector.shape_cast %758 : vector<1x2x16xf32> to vector<2x16xf32>
    %760 = vector.shape_cast %757 : vector<2x16xf32> to vector<1x2x16xf32>
    tpu.vector_store %arg21[%c5_220, %c0_221, %c0_222], %760 {strides = array<i32>} : memref<7x2x16xf32, #tpu.memory_space<vmem>>, vector<1x2x16xf32>,
    %761 = vector.extract_strided_slice %0 {offsets = [6, 0, 0], sizes = [1, 2, 32], strides = [1, 1, 1]} : vector<7x2x32xf32> to vector<1x2x32xf32>
    %762 = vector.shape_cast %761 : vector<1x2x32xf32> to vector<2x32xf32>
    %cst_223 = arith.constant dense<0.000000e+00> : vector<2x32xf32>
    %763 = tpu.matmul %762, %3, %cst_223 {dimension_numbers = #tpu.dot_dimension_numbers<[1], [0], [0], [1], [0, 0, 1, 1], [], []>} : vector<2x32xf32>, vector<32x32xf32>, vector<2x32xf32> -> vector<2x32xf32>
    %764 = vector.broadcast %4 : vector<1x32xf32> to vector<2x32xf32>
    %765 = arith.addf %763, %764 : vector<2x32xf32>
    %cst_224 = arith.constant dense<0.000000e+00> : vector<32x4xf32>
    %766 = tpu.matmul %1, %673, %cst_224 {dimension_numbers = #tpu.dot_dimension_numbers<[1], [0], [0], [1], [0, 0, 1, 1], [], []>} : vector<32x32xf32>, vector<32x4xf32>, vector<32x4xf32> -> vector<32x4xf32>
    %cst_225 = arith.constant dense<0.000000e+00> : vector<32x4xf32>
    %767 = tpu.matmul %2, %673, %cst_225 {dimension_numbers = #tpu.dot_dimension_numbers<[1], [0], [0], [1], [0, 0, 1, 1], [], []>} : vector<32x32xf32>, vector<32x4xf32>, vector<32x4xf32> -> vector<32x4xf32>
    %cst_226 = arith.constant dense<0.000000e+00> : vector<32x32xf32>
    %768 = tpu.matmul %766, %5, %cst_226 {dimension_numbers = #tpu.dot_dimension_numbers<[1], [0], [0], [1], [0, 0, 1, 1], [], []>} : vector<32x4xf32>, vector<4x32xf32>, vector<32x32xf32> -> vector<32x32xf32>
    %cst_227 = arith.constant dense<0.000000e+00> : vector<32x32xf32>
    %769 = tpu.matmul %673, %6, %cst_227 {dimension_numbers = #tpu.dot_dimension_numbers<[1], [0], [0], [1], [0, 0, 1, 1], [], []>} : vector<32x4xf32>, vector<4x32xf32>, vector<32x32xf32> -> vector<32x32xf32>
    %770 = arith.addf %768, %769 : vector<32x32xf32>
    %cst_228 = arith.constant dense<0.000000e+00> : vector<32x32xf32>
    %771 = tpu.matmul %767, %7, %cst_228 {dimension_numbers = #tpu.dot_dimension_numbers<[1], [0], [0], [1], [0, 0, 1, 1], [], []>} : vector<32x4xf32>, vector<4x32xf32>, vector<32x32xf32> -> vector<32x32xf32>
    %772 = arith.addf %770, %771 : vector<32x32xf32>
    %773 = vector.broadcast %8 : vector<1x32xf32> to vector<32x32xf32>
    %774 = arith.addf %772, %773 : vector<32x32xf32>
    %775 = math.tanh %774 : vector<32x32xf32>
    %776 = vector.shape_cast %765 : vector<2x32xf32> to vector<2x1x32xf32>
    %777 = vector.broadcast %776 : vector<2x1x32xf32> to vector<2x16x32xf32>
    %778 = arith.addf %23, %777 : vector<2x16x32xf32>
    %779 = vector.shape_cast %775 : vector<32x32xf32> to vector<2x16x32xf32>
    %780 = arith.addf %778, %779 : vector<2x16x32xf32>
    %781 = math.tanh %780 : vector<2x16x32xf32>
    %782 = vector.shape_cast %781 : vector<2x16x32xf32> to vector<32x32xf32>
    %cst_229 = arith.constant dense<0.000000e+00> : vector<32x4xf32>
    %783 = tpu.matmul %782, %9, %cst_229 {dimension_numbers = #tpu.dot_dimension_numbers<[1], [0], [0], [1], [0, 0, 1, 1], [], []>} : vector<32x32xf32>, vector<32x4xf32>, vector<32x4xf32> -> vector<32x4xf32>
    %784 = vector.shape_cast %783 : vector<32x4xf32> to vector<2x16x4xf32>
    %cst_230 = arith.constant dense<0xFF800000> : vector<2x4xf32>
    %785 = vector.multi_reduction <maximumf>, %784, %cst_230 [1] : vector<2x16x4xf32> to vector<2x4xf32>
    %786 = vector.shape_cast %785 : vector<2x4xf32> to vector<2x1x4xf32>
    %787 = vector.broadcast %786 : vector<2x1x4xf32> to vector<2x16x4xf32>
    %788 = arith.subf %784, %787 : vector<2x16x4xf32>
    %789 = math.exp %788 : vector<2x16x4xf32>
    %cst_231 = arith.constant dense<0.000000e+00> : vector<2x4xf32>
    %790 = vector.multi_reduction <add>, %789, %cst_231 [1] : vector<2x16x4xf32> to vector<2x4xf32>
    %791 = vector.shape_cast %790 : vector<2x4xf32> to vector<2x1x4xf32>
    %792 = tpu.reciprocal %791 {approx = true} : vector<2x1x4xf32> -> vector<2x1x4xf32>
    %793 = vector.broadcast %792 : vector<2x1x4xf32> to vector<2x16x4xf32>
    %794 = arith.mulf %789, %793 : vector<2x16x4xf32>
    %795 = vector.shape_cast %794 : vector<2x16x4xf32> to vector<32x4xf32>
    %cst_232 = arith.constant dense<0.000000e+00> : vector<32x32xf32>
    %796 = tpu.matmul %795, %10, %cst_232 {dimension_numbers = #tpu.dot_dimension_numbers<[1], [0], [0], [1], [0, 0, 1, 1], [], []>} : vector<32x4xf32>, vector<4x32xf32>, vector<32x32xf32> -> vector<32x32xf32>
    %797 = vector.shape_cast %796 : vector<32x32xf32> to vector<2x16x32xf32>
    %798 = arith.mulf %797, %23 : vector<2x16x32xf32>
    %cst_233 = arith.constant dense<0.000000e+00> : vector<2x32xf32>
    %799 = vector.multi_reduction <add>, %798, %cst_233 [1] : vector<2x16x32xf32> to vector<2x32xf32>
    %c6 = arith.constant 6 : index
    %c0_234 = arith.constant 0 : index
    %c0_235 = arith.constant 0 : index
    %c0_236 = arith.constant 0 : index
    %800 = vector.load %arg22[%c6, %c0_234, %c0_235, %c0_236] : memref<7x2x16x4xf32, #tpu.memory_space<vmem>>, vector<1x2x16x4xf32>
    %801 = vector.shape_cast %800 : vector<1x2x16x4xf32> to vector<2x16x4xf32>
    %802 = vector.shape_cast %794 : vector<2x16x4xf32> to vector<1x2x16x4xf32>
    tpu.vector_store %arg22[%c6, %c0_234, %c0_235, %c0_236], %802 {strides = array<i32>} : memref<7x2x16x4xf32, #tpu.memory_space<vmem>>, vector<1x2x16x4xf32>,
    %803 = tpu.concatenate %762, %799, %709 in 1 : vector<2x32xf32>, vector<2x32xf32>, vector<2x32xf32> -> vector<2x96xf32>
    %cst_237 = arith.constant dense<0.000000e+00> : vector<2x128xf32>
    %804 = tpu.matmul %803, %11, %cst_237 {dimension_numbers = #tpu.dot_dimension_numbers<[1], [0], [0], [1], [0, 0, 1, 1], [], []>} : vector<2x96xf32>, vector<96x128xf32>, vector<2x128xf32> -> vector<2x128xf32>
    %805 = vector.broadcast %12 : vector<1x128xf32> to vector<2x128xf32>
    %806 = arith.addf %804, %805 : vector<2x128xf32>
    %807 = vector.extract_strided_slice %806 {offsets = [0, 0], sizes = [2, 32], strides = [1, 1]} : vector<2x128xf32> to vector<2x32xf32>
    %808 = arith.negf %807 : vector<2x32xf32>
    %809 = math.exp %808 : vector<2x32xf32>
    %cst_238 = arith.constant 1.000000e+00 : f32
    %810 = vector.broadcast %cst_238 : f32 to vector<2x32xf32>
    %811 = arith.addf %810, %809 : vector<2x32xf32>
    %812 = arith.divf %810, %811 : vector<2x32xf32>
    %813 = vector.extract_strided_slice %806 {offsets = [0, 32], sizes = [2, 32], strides = [1, 1]} : vector<2x128xf32> to vector<2x32xf32>
    %814 = arith.negf %813 : vector<2x32xf32>
    %815 = math.exp %814 : vector<2x32xf32>
    %cst_239 = arith.constant 1.000000e+00 : f32
    %816 = vector.broadcast %cst_239 : f32 to vector<2x32xf32>
    %817 = arith.addf %816, %815 : vector<2x32xf32>
    %818 = arith.divf %816, %817 : vector<2x32xf32>
    %819 = vector.extract_strided_slice %806 {offsets = [0, 64], sizes = [2, 32], strides = [1, 1]} : vector<2x128xf32> to vector<2x32xf32>
    %820 = math.tanh %819 : vector<2x32xf32>
    %821 = vector.extract_strided_slice %806 {offsets = [0, 96], sizes = [2, 32], strides = [1, 1]} : vector<2x128xf32> to vector<2x32xf32>
    %822 = arith.negf %821 : vector<2x32xf32>
    %823 = math.exp %822 : vector<2x32xf32>
    %cst_240 = arith.constant 1.000000e+00 : f32
    %824 = vector.broadcast %cst_240 : f32 to vector<2x32xf32>
    %825 = arith.addf %824, %823 : vector<2x32xf32>
    %826 = arith.divf %824, %825 : vector<2x32xf32>
    %827 = arith.mulf %818, %707 : vector<2x32xf32>
    %828 = arith.mulf %812, %820 : vector<2x32xf32>
    %829 = arith.addf %827, %828 : vector<2x32xf32>
    %830 = math.tanh %829 : vector<2x32xf32>
    %831 = arith.mulf %826, %830 : vector<2x32xf32>
    %832 = tpu.concatenate %831, %738 in 1 : vector<2x32xf32>, vector<2x32xf32> -> vector<2x64xf32>
    %cst_241 = arith.constant dense<0.000000e+00> : vector<2x128xf32>
    %833 = tpu.matmul %832, %13, %cst_241 {dimension_numbers = #tpu.dot_dimension_numbers<[1], [0], [0], [1], [0, 0, 1, 1], [], []>} : vector<2x64xf32>, vector<64x128xf32>, vector<2x128xf32> -> vector<2x128xf32>
    %834 = vector.broadcast %14 : vector<1x128xf32> to vector<2x128xf32>
    %835 = arith.addf %833, %834 : vector<2x128xf32>
    %836 = vector.extract_strided_slice %835 {offsets = [0, 0], sizes = [2, 32], strides = [1, 1]} : vector<2x128xf32> to vector<2x32xf32>
    %837 = arith.negf %836 : vector<2x32xf32>
    %838 = math.exp %837 : vector<2x32xf32>
    %cst_242 = arith.constant 1.000000e+00 : f32
    %839 = vector.broadcast %cst_242 : f32 to vector<2x32xf32>
    %840 = arith.addf %839, %838 : vector<2x32xf32>
    %841 = arith.divf %839, %840 : vector<2x32xf32>
    %842 = vector.extract_strided_slice %835 {offsets = [0, 32], sizes = [2, 32], strides = [1, 1]} : vector<2x128xf32> to vector<2x32xf32>
    %843 = arith.negf %842 : vector<2x32xf32>
    %844 = math.exp %843 : vector<2x32xf32>
    %cst_243 = arith.constant 1.000000e+00 : f32
    %845 = vector.broadcast %cst_243 : f32 to vector<2x32xf32>
    %846 = arith.addf %845, %844 : vector<2x32xf32>
    %847 = arith.divf %845, %846 : vector<2x32xf32>
    %848 = vector.extract_strided_slice %835 {offsets = [0, 64], sizes = [2, 32], strides = [1, 1]} : vector<2x128xf32> to vector<2x32xf32>
    %849 = math.tanh %848 : vector<2x32xf32>
    %850 = vector.extract_strided_slice %835 {offsets = [0, 96], sizes = [2, 32], strides = [1, 1]} : vector<2x128xf32> to vector<2x32xf32>
    %851 = arith.negf %850 : vector<2x32xf32>
    %852 = math.exp %851 : vector<2x32xf32>
    %cst_244 = arith.constant 1.000000e+00 : f32
    %853 = vector.broadcast %cst_244 : f32 to vector<2x32xf32>
    %854 = arith.addf %853, %852 : vector<2x32xf32>
    %855 = arith.divf %853, %854 : vector<2x32xf32>
    %856 = arith.mulf %847, %736 : vector<2x32xf32>
    %857 = arith.mulf %841, %849 : vector<2x32xf32>
    %858 = arith.addf %856, %857 : vector<2x32xf32>
    %859 = math.tanh %858 : vector<2x32xf32>
    %860 = arith.mulf %855, %859 : vector<2x32xf32>
    %861 = tpu.concatenate %860, %799 in 1 : vector<2x32xf32>, vector<2x32xf32> -> vector<2x64xf32>
    %cst_245 = arith.constant dense<0.000000e+00> : vector<2x32xf32>
    %862 = tpu.matmul %861, %15, %cst_245 {dimension_numbers = #tpu.dot_dimension_numbers<[1], [0], [0], [1], [0, 0, 1, 1], [], []>} : vector<2x64xf32>, vector<64x32xf32>, vector<2x32xf32> -> vector<2x32xf32>
    %863 = vector.broadcast %16 : vector<1x32xf32> to vector<2x32xf32>
    %864 = arith.addf %862, %863 : vector<2x32xf32>
    %865 = math.tanh %864 : vector<2x32xf32>
    %cst_246 = arith.constant dense<0.000000e+00> : vector<2x16xf32>
    %866 = tpu.matmul %865, %17, %cst_246 {dimension_numbers = #tpu.dot_dimension_numbers<[1], [0], [0], [1], [0, 0, 1, 1], [], []>} : vector<2x32xf32>, vector<32x16xf32>, vector<2x16xf32> -> vector<2x16xf32>
    %867 = vector.broadcast %18 : vector<1x16xf32> to vector<2x16xf32>
    %868 = arith.addf %866, %867 : vector<2x16xf32>
    %cst_247 = arith.constant dense<0xFF800000> : vector<2xf32>
    %869 = vector.multi_reduction <maximumf>, %868, %cst_247 [1] : vector<2x16xf32> to vector<2xf32>
    %870 = vector.shape_cast %869 : vector<2xf32> to vector<2x1xf32>
    %871 = vector.broadcast %870 : vector<2x1xf32> to vector<2x16xf32>
    %872 = arith.subf %868, %871 : vector<2x16xf32>
    %873 = math.exp %872 : vector<2x16xf32>
    %cst_248 = arith.constant dense<0.000000e+00> : vector<2xf32>
    %874 = vector.multi_reduction <add>, %873, %cst_248 [1] : vector<2x16xf32> to vector<2xf32>
    %875 = vector.shape_cast %874 : vector<2xf32> to vector<2x1xf32>
    %876 = math.log %875 : vector<2x1xf32>
    %877 = arith.addf %876, %870 : vector<2x1xf32>
    %878 = vector.broadcast %877 : vector<2x1xf32> to vector<2x16xf32>
    %879 = arith.subf %868, %878 : vector<2x16xf32>
    %c6_249 = arith.constant 6 : index
    %c0_250 = arith.constant 0 : index
    %c0_251 = arith.constant 0 : index
    %880 = vector.load %arg21[%c6_249, %c0_250, %c0_251] : memref<7x2x16xf32, #tpu.memory_space<vmem>>, vector<1x2x16xf32>
    %881 = vector.shape_cast %880 : vector<1x2x16xf32> to vector<2x16xf32>
    %882 = vector.shape_cast %879 : vector<2x16xf32> to vector<1x2x16xf32>
    tpu.vector_store %arg21[%c6_249, %c0_250, %c0_251], %882 {strides = array<i32>} : memref<7x2x16xf32, #tpu.memory_space<vmem>>, vector<1x2x16xf32>,
    return
  }
}

</mosaic_0001>

<bundles_post_ra>
// kernel: tpu_custom_call.1
= control target key start
LH: loop header
LB: loop body
LE: loop exit
PB: predicated region body
PF: predicated region fallthrough
CT: control target
= control target key end

     0   :  { %s7858_s0 = inlined_call_operand.hbm [shape: f32[7,2,32], index: 0, kind: input, shape index: {}]   ;;  %s7859_s1 = inlined_call_operand.vmem [shape: f32[2,16,32], index: 1, kind: input, shape index: {}]   ;;  %s7860_s2 = inlined_call_operand.hbm [shape: f32[32,32], index: 2, kind: input, shape index: {}]   ;;  %s7861_s3 = inlined_call_operand.hbm [shape: f32[32,32], index: 3, kind: input, shape index: {}]   ;;  %s7862_s4 = inlined_call_operand.hbm [shape: f32[32,32], index: 4, kind: input, shape index: {}]   ;;  %s7863_s5 = inlined_call_operand.vmem [shape: f32[1,32], index: 5, kind: input, shape index: {}]   ;;  %s7864_s6 = inlined_call_operand.hbm [shape: f32[32,32], index: 6, kind: input, shape index: {}]   ;;  %s7865_s7 = inlined_call_operand.vmem [shape: f32[4,32], index: 7, kind: input, shape index: {}]   ;;  %s7866_s8 = inlined_call_operand.hbm [shape: f32[4,32], index: 8, kind: input, shape index: {}]   ;;  %s7867_s9 = inlined_call_operand.hbm [shape: f32[4,32], index: 9, kind: input, shape index: {}]   ;;  %s7868_s10 = inlined_call_operand.hbm [shape: f32[1,32], index: 10, kind: input, shape index: {}]   ;;  %s7869_s11 = inlined_call_operand.vmem [shape: f32[32,4], index: 11, kind: input, shape index: {}]   ;;  %s7870_s12 = inlined_call_operand.vmem [shape: f32[4,32], index: 12, kind: input, shape index: {}]   ;;  %s7871_s13 = inlined_call_operand.vmem [shape: f32[96,128], index: 13, kind: input, shape index: {}]   ;;  %s7872_s14 = inlined_call_operand.vmem [shape: f32[1,128], index: 14, kind: input, shape index: {}]   ;;  %s7873_s15 = inlined_call_operand.hbm [shape: f32[64,128], index: 15, kind: input, shape index: {}]   ;;  %s7874_s16 = inlined_call_operand.vmem [shape: f32[1,128], index: 16, kind: input, shape index: {}]   ;;  %s7875_s17 = inlined_call_operand.vmem [shape: f32[64,32], index: 17, kind: input, shape index: {}]   ;;  %s7876_s18 = inlined_call_operand.vmem [shape: f32[1,32], index: 18, kind: input, shape index: {}]   ;;  %s7877_s19 = inlined_call_operand.vmem [shape: f32[32,16], index: 19, kind: input, shape index: {}]   ;;  %s7878_s20 = inlined_call_operand.vmem [shape: f32[1,16], index: 20, kind: input, shape index: {}]   ;;  %s7879_s21 = inlined_call_operand.hbm [shape: f32[7,2,16], index: 21, kind: output, shape index: {0}]   ;;  %s7880_s22 = inlined_call_operand.vmem [shape: f32[7,2,16,4], index: 22, kind: output, shape index: {1}]  }
   0x1   :  { %7902 = sst [smem:[#allocation35_spill]] %s7858_s0 }
   0x2   :  { %7903 = sst [smem:[#allocation36_spill]] %s7859_s1 }
   0x3   :  { %7904 = sst [smem:[#allocation37_spill]] %s7860_s2 }
   0x4   :  { %7905 = sst [smem:[#allocation38_spill]] %s7861_s3 }
   0x5   :  { %7906 = sst [smem:[#allocation39_spill]] %s7862_s4 }
   0x6   :  { %7907 = sst [smem:[#allocation40_spill]] %s7863_s5 }
   0x7   :  { %7908 = sst [smem:[#allocation41_spill]] %s7864_s6 }
   0x8   :  { %7909 = sst [smem:[#allocation42_spill]] %s7879_s21 }
   0x9   :  { %28 = vsyncpa [#allocation3], 0 }
   0xa   :  { %29 = vsyncpa [#allocation6], 0 }
   0xb   :  { %30 = vsyncpa [#allocation9], 0 }
   0xc   :  { %31 = vsyncpa [#allocation12], 0 }
   0xd   :  { %32 = vsyncpa [#allocation15], 0  ;;  %s7910_s29 = sld [smem:[#allocation37_spill]] }
  0x13   :  { %s53_s30 = sshll.u32 %s7910_s29, 4  ;;  %s54_s30 = int_to_ptr.hbm [resolvable:$true] %s53_s30 }
  0x14   :  { %33 = vsyncpa [#allocation4], 0  ;;  %s5599_s4 = smov [#allocation5]   ;;  %s7911_s5 = sld [smem:[#allocation39_spill]] }
  0x15   :  { %s55_s0 = sshll.u32 %s5599_s4, 4  ;;  %s7883_s6 = smov 128   ;;  %s56_s0 = int_to_ptr.vmem [resolvable:$true] %s55_s0 }
  0x16   :  { %s5601_s25 = smov 8   ;;  %s5602_s26 = smov [#allocation8]  }
  0x17   :  { %61 = dma.hbm_to_vmem [thread:$0]  %s54_s30, 512, %s56_s0, [#allocation6], %s7883_s6, %s7883_s6, %s5601_s25  }
  0x18   :  { %s81_s2 = sshll.u32 %s5602_s26, 4  ;;  %s110_s28 = sshll.u32 %s7866_s8, 4  ;;  %s82_s2 = int_to_ptr.vmem [resolvable:$true] %s81_s2  ;;  %s111_s28 = int_to_ptr.hbm [resolvable:$true] %s110_s28 }
  0x19   :  { %s132_s23 = sshll.u32 %s7868_s10, 4  ;;  %s5603_s1 = smov [#allocation11]   ;;  %s133_s23 = int_to_ptr.hbm [resolvable:$true] %s132_s23 }
  0x1a   :  { %s79_s24 = sshll.u32 %s7911_s5, 4  ;;  %s112_s5 = sshll.u32 %s5603_s1, 4  ;;  %s80_s24 = int_to_ptr.hbm [resolvable:$true] %s79_s24  ;;  %s113_s5 = int_to_ptr.vmem [resolvable:$true] %s112_s5 }
  0x1b   :  { %87 = dma.hbm_to_vmem [thread:$0]  %s80_s24, 512, %s82_s2, [#allocation9], %s7883_s6, %s7883_s6, %s5601_s25  }
  0x1c   :  { %115 = dma.hbm_to_vmem [thread:$0]  %s111_s28, 64, %s113_s5, [#allocation12]  }
  0x1d   :  { %s5604_s30 = smov [#allocation14]   ;;  %s7912_s8 = sld [smem:[#allocation35_spill]] }
  0x1e   :  { %s134_s0 = sshll.u32 %s5604_s30, 4  ;;  %s5605_s21 = smov [#allocation2]   ;;  %s135_s0 = int_to_ptr.vmem [resolvable:$true] %s134_s0 }
  0x1f   :  { %137 = dma.hbm_to_vmem [thread:$0]  %s133_s23, 16, %s135_s0, [#allocation15]  }
  0x20   :  { %s40_s24 = sshll.u32 %s5605_s21, 4  ;;  %s7913_s10 = sld [smem:[#allocation38_spill]]  ;;  %s41_s24 = int_to_ptr.vmem [resolvable:$true] %s40_s24 }
  0x21   :  { %s5606_s1 = smov 32   ;;  %s5607_s6 = smov 2  }
  0x22   :  { %s5608_s28 = smov [#allocation7]   ;;  %s7914_s27 = sld [smem:[#allocation41_spill]] }
  0x23   :  { %s38_s3 = sshll.u32 %s7912_s8, 4  ;;  %s68_s5 = sshll.u32 %s5608_s28, 4  ;;  %s39_s3 = int_to_ptr.hbm [resolvable:$true] %s38_s3  ;;  %s69_s5 = int_to_ptr.vmem [resolvable:$true] %s68_s5 }
  0x24   :  { %46 = dma.hbm_to_vmem [thread:$0]  %s39_s3, 224, %s41_s24, [#allocation3], %s5606_s1, %s5606_s1, %s5607_s6  }
  0x25   :  { %s7915_s21 = smov 128   ;;  %s121_s2 = sshll.u32 %s7867_s9, 4  ;;  %s122_s2 = int_to_ptr.hbm [resolvable:$true] %s121_s2 }
  0x26   :  { %s66_s4 = sshll.u32 %s7913_s10, 4  ;;  %s5609_s29 = smov [#allocation10]   ;;  %s67_s4 = int_to_ptr.hbm [resolvable:$true] %s66_s4 }
  0x27   :  { %74 = dma.hbm_to_vmem [thread:$0]  %s67_s4, 512, %s69_s5, [#allocation6], %s7915_s21, %s7915_s21, %s5601_s25  }
  0x28   :  { %s94_s23 = sshll.u32 %s7914_s27, 4  ;;  %s96_s10 = sshll.u32 %s5609_s29, 4  ;;  %s95_s23 = int_to_ptr.hbm [resolvable:$true] %s94_s23  ;;  %s97_s10 = int_to_ptr.vmem [resolvable:$true] %s96_s10 }
  0x29   :  { %102 = dma.hbm_to_vmem [thread:$0]  %s95_s23, 512, %s97_s10, [#allocation9], %s7915_s21, %s7915_s21, %s5601_s25  }
  0x2a   :  { %s5610_s3 = smov [#allocation13]   ;;  %s150_s26 = sshll.u32 %s7873_s15, 4  ;;  %s151_s26 = int_to_ptr.hbm [resolvable:$true] %s150_s26 }
  0x2b   :  { %s123_s24 = sshll.u32 %s5610_s3, 4  ;;  %s5611_s4 = smov [#allocation16]   ;;  %s124_s24 = int_to_ptr.vmem [resolvable:$true] %s123_s24 }
  0x2c   :  { %126 = dma.hbm_to_vmem [thread:$0]  %s122_s2, 64, %s124_s24, [#allocation12]  }
  0x2d   :  { %s152_s5 = sshll.u32 %s5611_s4, 4  ;;  %s153_s5 = int_to_ptr.vmem [resolvable:$true] %s152_s5 }
  0x2e   :  { %158 = dma.hbm_to_vmem [thread:$0]  %s151_s26, 1024, %s153_s5, [#allocation15], %s7915_s21, %s7915_s21, %s5601_s25  }
  0x2f   :  { %5587 = dma.done.wait [#allocation3], 224  }
  0x30   :  { %5588 = vsyncadd [#allocation3], 4294967072 }
  0x31   :  { %5589 = dma.done.wait [#allocation6], 1024  }
  0x32   :  { %5590 = vsyncadd [#allocation6], 4294966272 }
  0x33   :  { %5591 = dma.done.wait [#allocation9], 1024  }
  0x34   :  { %5592 = vsyncadd [#allocation9], 4294966272 }
  0x35   :  { %5593 = dma.done.wait [#allocation12], 128  }
  0x36   :  { %5594 = vsyncadd [#allocation12], 4294967168 }
  0x37   :  { %5595 = dma.done.wait [#allocation15], 1040  }
  0x38   :  { %5596 = vsyncadd [#allocation15], 4294966256  ;;  %v5612_v0 = vmov 0.0   ;;  %vm278_vm0 = vcmask 261120   ;;  %v5776_v1 = vld [vmem:[#allocation5] sm:$0xff]  ;;  %vm432_vm1 = vcmask 1043456  }
  0x39   :  { %373 = vmatpush.msra.mxu2 %v5612_v0  ;;  %414 = vmatpush.msra.mxu3 %v5612_v0  ;;  %v5778_v2 = vld [vmem:[#allocation7] sm:$0xff]  ;;  %v5787_v3 = vld [vmem:[%s7865_s7] sm:$0xf]  ;;  %v277_v5 = vld [vmem:[#allocation10 + $0x18] sm:$0xff]  ;;  %s7916_s23 = sld [smem:[#allocation36_spill]]  ;;  %vm428_vm2 = vcmask 31744  }
  0x3a   :  { %4544 = vmatmul.msk.f32.vlgmr.msra.gmra.mxu2 %vm278_vm0, %v5776_v1  ;;  %4548 = vmatmul.msk.f32.vlgmr.msra.gmra.mxu3 %vm278_vm0, %v5778_v2  ;;  %v5791_v4 = vld [vmem:[#allocation13] sm:$0xf]  ;;  %v276_v6 = vld [vmem:[#allocation10 + $0x10] sm:$0xff]  ;;  %v275_v7 = vld [vmem:[#allocation10 + $0x8] sm:$0xff]  ;;  %s7917_s27 = sld [smem:[#allocation40_spill]]  ;;  %vm753_vm3 = vcmask 1041409  }
  0x3b   :  { %4553 = vmatpush.msk.msrb.mxu2 %vm432_vm1, %v5787_v3  ;;  %4558 = vmatpush.msk.msrb.mxu3 %vm432_vm1, %v5791_v4  ;;  %v5795_v8 = vld [vmem:[#allocation8 + $0x18] sm:$0xff]  ;;  %v5797_v9 = vld [vmem:[#allocation8 + $0x10] sm:$0xff]  ;;  %v5799_v10 = vld [vmem:[#allocation5 + $0x8] sm:$0xff]  ;;  %vm759_vm4 = vcmask 523264   ;;  %vm764_vm5 = vcmask 785408   ;;  %s5613_s21 = smov 64  }
  0x3c   :  { %303 = vmatpush.msra.mxu0 %v277_v5  ;;  %v5801_v11 = vld [vmem:[#allocation7 + $0x8] sm:$0xff]  ;;  %v274_v12 = vld [vmem:[#allocation10] sm:$0xff]  ;;  %338 = vmatpush.msra.mxu1 %v5795_v8  ;;  %v5817_v16 = vld [vmem:[#allocation2] sm:$0x3]  ;;  %s5614_s2 = smov 96   ;;  %s7960_s9 = sld [smem:[#allocation42_spill]] }
  0x3d   :  { %v5807_v14 = vld [vmem:[#allocation8 + $0x8] sm:$0xff]  ;;  %v5814_v15 = vld [vmem:[#allocation8] sm:$0xff]  ;;  %v5825_v18 = vld [vmem:[#allocation5 + $0x10] sm:$0xff] }
  0x3e   :  { %304 = vmatpush.msra.mxu0 %v276_v6  ;;  %339 = vmatpush.msra.mxu1 %v5797_v9  ;;  %v5820_v17 = vld [vmem:[#allocation11] sm:$0xf]  ;;  %v5827_v19 = vld [vmem:[#allocation7 + $0x10] sm:$0xff]  ;;  %v5839_v21 = vld [vmem:[#allocation5 + $0x18] sm:$0xff] }
  0x3f   :  { %v270_v13 = vld [vmem:[%s7916_s23] sm:$0xff]  ;;  %v271_v20 = vld [vmem:[%s7916_s23 + $0x8] sm:$0xff]  ;;  %v272_v23 = vld [vmem:[%s7916_s23 + $0x10] sm:$0xff] }
  0x40   :  { %305 = vmatpush.msra.mxu0 %v275_v7  ;;  %340 = vmatpush.msra.mxu1 %v5807_v14  ;;  %v5841_v22 = vld [vmem:[#allocation7 + $0x18] sm:$0xff]  ;;  %v273_v24 = vld [vmem:[%s7916_s23 + $0x18] sm:$0xff]  ;;  %v5872_v34 = vld [vmem:[%s7869_s11 + $0x10] sm:$0xff] }
  0x41   :  { %v5858_v25 = vld [vmem:[%s7869_s11 + $0x18] sm:$0xff]  ;;  %v5878_v36 = vld [vmem:[%s7869_s11 + $0x8] sm:$0xff]  ;;  %v5884_v37 = vld [vmem:[%s7869_s11] sm:$0xff] }
  0x42   :  { %4545 = vmatmul.msk.f32.gmra.mxu2 %vm278_vm0, %v5799_v10  ;;  %4549 = vmatmul.msk.f32.gmra.mxu3 %vm278_vm0, %v5801_v11  ;;  %v5890_v39 = vld [vmem:[%s7917_s27] ss:$0 sm:$0xff]  ;;  %v5892_v43 = vld [vmem:[#allocation14] ss:$0 sm:$0xff] }
  0x43   :  { %306 = vmatpush.msra.mxu0 %v274_v12  ;;  %341 = vmatpush.msra.mxu1 %v5814_v15 }
  0x44   :  { %4539 = vmatmul.msk.f32.vlgmr.msra.gmra.mxu0 %vm278_vm0, %v270_v13  ;;  %4543 = vmatmul.msk.f32.vlgmr.msra.gmra.mxu1 %vm278_vm0, %v5817_v16 }
  0x45   :  { %4552 = vmatpush.msk.msrb.mxu1 %vm432_vm1, %v5820_v17  ;;  %610 = vmatpush.msrb.mxu0 %v5858_v25 }
  0x47   :  { %611 = vmatpush.msrb.mxu0 %v5872_v34 }
  0x49   :  { %612 = vmatpush.msrb.mxu0 %v5878_v36 }
  0x4a   :  { %4546 = vmatmul.msk.f32.gmra.mxu2 %vm278_vm0, %v5825_v18  ;;  %4550 = vmatmul.msk.f32.gmra.mxu3 %vm278_vm0, %v5827_v19 }
  0x4b   :  { %613 = vmatpush.msrb.mxu0 %v5884_v37 }
  0x4c   :  { %4540 = vmatmul.msk.f32.gmra.mxu0 %vm278_vm0, %v271_v20  ;;  %452 = vmatmul.f32.vlgmr.msrb.gmra.mxu1 %v5612_v0 }
  0x52   :  { %4547 = vmatmul.msk.f32.gmra.mxu2 %vm278_vm0, %v5839_v21  ;;  %4551 = vmatmul.msk.f32.gmra.mxu3 %vm278_vm0, %v5841_v22 }
  0x54   :  { %4541 = vmatmul.msk.f32.gmra.mxu0 %vm278_vm0, %v272_v23  ;;  %455 = vmatmul.f32.gmra.mxu1 %v5612_v0 }
  0x5c   :  { %458 = vmatmul.f32.gmra.mxu1 %v5612_v0  ;;  %4542 = vmatmul.msk.f32.gmra.mxu0 %vm278_vm0, %v273_v24 }
  0x64   :  { %461 = vmatmul.f32.gmra.mxu1 %v5612_v0 }
  0xbd   :  { %v375_v26 = vpop.f32.mrf.mxu2  ;;  %v416_v27 = vpop.f32.mrf.mxu3 }
  0xbe   :  { %4554 = vmatmul.msk.f32.vlgmr.msrb.gmra.mxu2 %vm428_vm2, %v375_v26  ;;  %4559 = vmatmul.msk.f32.vlgmr.msrb.gmra.mxu3 %vm428_vm2, %v416_v27 }
  0xc1   :  { %v343_v35 = vpop.f32.mrf.mxu1  ;;  %v5894_v45 = vpop.f32.mrf.mxu0 }
  0xc2   :  { %v344_v47 = vadd.f32 %v5890_v39, %v343_v35 }
  0xc4   :  { %v570_v49 = vperm.slane %v344_v47, 0  ;;  %v569_v0 = vrot.slane %v344_v47, 1 }
  0xc5   :  { %v378_v28 = vpop.f32.mrf.mxu2  ;;  %v419_v29 = vpop.f32.mrf.mxu3 }
  0xc6   :  { %4555 = vmatmul.msk.f32.gmra.mxu2 %vm428_vm2, %v378_v28  ;;  %4560 = vmatmul.msk.f32.gmra.mxu3 %vm428_vm2, %v419_v29  ;;  %v574_v54 = vadd.f32 %v570_v49, %v5894_v45  ;;  %v571_v24 = vperm.slane %v569_v0, 0 }
  0xc9   :  { %v453_v38 = vpop.f32.mrf.mxu1  ;;  %v5899_v57 = vpop.f32.mrf.mxu0 }
  0xca   :  { %v575_v5 = vadd.f32 %v570_v49, %v5899_v57 }
  0xcd   :  { %v381_v30 = vpop.f32.mrf.mxu2  ;;  %v422_v31 = vpop.f32.mrf.mxu3 }
  0xce   :  { %4556 = vmatmul.msk.f32.gmra.mxu2 %vm428_vm2, %v381_v30  ;;  %4561 = vmatmul.msk.f32.gmra.mxu3 %vm428_vm2, %v422_v31 }
  0xd1   :  { %v456_v44 = vpop.f32.mrf.mxu1  ;;  %v5904_v23 = vpop.f32.mrf.mxu0 }
  0xd2   :  { %v576_v30 = vadd.f32 %v571_v24, %v5904_v23 }
  0xd5   :  { %v384_v32 = vpop.f32.mrf.mxu2  ;;  %v425_v33 = vpop.f32.mrf.mxu3 }
  0xd6   :  { %4557 = vmatmul.msk.f32.gmra.mxu2 %vm428_vm2, %v384_v32  ;;  %4562 = vmatmul.msk.f32.gmra.mxu3 %vm428_vm2, %v425_v33 }
  0xd9   :  { %v459_v55 = vpop.f32.mrf.mxu1 }
  0xe1   :  { %v462_v20 = vpop.f32.mrf.mxu1 }
 0x141   :  { %v497_v40 = vpop.f32.mrf.mxu2  ;;  %v541_v41 = vpop.f32.mrf.mxu3 }
 0x142   :  { %v498_v42 = vadd.f32 %v497_v40, %v453_v38  ;;  %v5910_v38 = vpop.f32.mrf.mxu0 }
 0x143   :  { %v577_v40 = vadd.f32 %v571_v24, %v5910_v38 }
 0x144   :  { %v553_v46 = vadd.f32 %v541_v41, %v498_v42 }
 0x146   :  { %v560_v48 = vadd.f32 %v5892_v43, %v553_v46 }
 0x148   :  { %4859 = vtanh.f32 %v560_v48 }
 0x149   :  { %v500_v50 = vpop.f32.mrf.mxu2  ;;  %v544_v51 = vpop.f32.mrf.mxu3 }
 0x14a   :  { %v501_v52 = vadd.f32 %v500_v50, %v456_v44 }
 0x14c   :  { %v554_v53 = vadd.f32 %v544_v51, %v501_v52 }
 0x14e   :  { %v4860_v56 = vpop.eup %4859  ;;  %v561_v58 = vadd.f32 %v5892_v43, %v554_v53 }
 0x14f   :  { %v578_v59 = vadd.f32 %v4860_v56, %v574_v54 }
 0x150   :  { %4861 = vtanh.f32 %v561_v58 }
 0x151   :  { %4863 = vtanh.f32 %v578_v59  ;;  %v503_v60 = vpop.f32.mrf.mxu2  ;;  %v547_v61 = vpop.f32.mrf.mxu3 }
 0x152   :  { %v504_v62 = vadd.f32 %v503_v60, %v459_v55 }
 0x154   :  { %v555_v63 = vadd.f32 %v547_v61, %v504_v62 }
 0x156   :  { %v4862_v6 = vpop.eup %4861  ;;  %v562_v7 = vadd.f32 %v5892_v43, %v555_v63 }
 0x157   :  { %v4864_v12 = vpop.eup %4863  ;;  %v579_v13 = vadd.f32 %v4862_v6, %v575_v5 }
 0x158   :  { %4865 = vtanh.f32 %v562_v7  ;;  %4563 = vmatmul.msk.f32.vlgmr.msrb.gmra.mxu0 %vm278_vm0, %v4864_v12  ;;  %v5922_v12 = vld [vmem:[%s7870_s12] sm:$0xf] }
 0x159   :  { %4867 = vtanh.f32 %v579_v13  ;;  %v506_v26 = vpop.f32.mrf.mxu2  ;;  %v550_v27 = vpop.f32.mrf.mxu3  ;;  %4567 = vmatpush.msk.msra.mxu1 %vm432_vm1, %v5922_v12 }
 0x15a   :  { %v507_v28 = vadd.f32 %v506_v26, %v462_v20  ;;  %v5929_v20 = vld [vmem:[%s7875_s17 + $0x38] sm:$0xff]  ;;  %v5935_v26 = vld [vmem:[%s7875_s17 + $0x30] sm:$0xff] }
 0x15b   :  { %912 = vmatpush.msra.mxu0 %v5929_v20 }
 0x15c   :  { %v556_v29 = vadd.f32 %v550_v27, %v507_v28  ;;  %v5941_v28 = vld [vmem:[%s7875_s17 + $0x28] sm:$0xff] }
 0x15d   :  { %913 = vmatpush.msra.mxu0 %v5935_v26 }
 0x15e   :  { %v4866_v31 = vpop.eup %4865  ;;  %v563_v32 = vadd.f32 %v5892_v43, %v556_v29 }
 0x15f   :  { %v4868_v33 = vpop.eup %4867  ;;  %v580_v35 = vadd.f32 %v4866_v31, %v576_v30  ;;  %914 = vmatpush.msra.mxu0 %v5941_v28 }
 0x160   :  { %4869 = vtanh.f32 %v563_v32  ;;  %4564 = vmatmul.msk.f32.gmra.mxu0 %vm278_vm0, %v4868_v33  ;;  %v5948_v33 = vld [vmem:[%s7875_s17 + $0x20] sm:$0xff] }
 0x161   :  { %4871 = vtanh.f32 %v580_v35  ;;  %915 = vmatpush.msra.mxu0 %v5948_v33 }
 0x166   :  { %v4870_v41 = vpop.eup %4869 }
 0x167   :  { %v4872_v42 = vpop.eup %4871  ;;  %v581_v44 = vadd.f32 %v4870_v41, %v577_v40 }
 0x168   :  { %4565 = vmatmul.msk.f32.gmra.mxu0 %vm278_vm0, %v4872_v42  ;;  %v5955_v42 = vld [vmem:[%s7875_s17 + $0x18] sm:$0xff] }
 0x169   :  { %4873 = vtanh.f32 %v581_v44  ;;  %916 = vmatpush.msra.mxu0 %v5955_v42 }
 0x16f   :  { %v4874_v46 = vpop.eup %4873 }
 0x170   :  { %4566 = vmatmul.msk.f32.gmra.mxu0 %vm278_vm0, %v4874_v46 }
 0x1d5   :  { %v615_v47 = vpop.f32.mrf.mxu0 }
 0x1d6   :  { %v627_v49 = vsel %vm428_vm2, %v615_v47, -inf }
 0x1dd   :  { %v618_v48 = vpop.f32.mrf.mxu0 }
 0x1de   :  { %v628_v50 = vsel %vm428_vm2, %v618_v48, -inf }
 0x1df   :  { %v629_v51 = vmax.f32 %v627_v49, %v628_v50 }
 0x1e1   :  { %v630_v52 = vrot.slane %v629_v51, 4 }
 0x1e3   :  { %v631_v53 = vmax.f32 %v629_v51, %v630_v52  ;;  %v5967_v51 = vld [vmem:[%s7875_s17 + $0x8] sm:$0xff] }
 0x1e5   :  { %v632_v54 = vrot.slane %v631_v53, 2  ;;  %v621_v55 = vpop.f32.mrf.mxu0 }
 0x1e6   :  { %v636_v63 = vsel %vm428_vm2, %v621_v55, -inf }
 0x1e7   :  { %v633_v56 = vmax.f32 %v631_v53, %v632_v54 }
 0x1e9   :  { %v634_v58 = vrot.slane %v633_v56, 1 }
 0x1eb   :  { %v635_v59 = vmax.f32 %v633_v56, %v634_v58  ;;  %v5973_v56 = vld [vmem:[%s7875_s17] sm:$0xff] }
 0x1ed   :  { %v645_v60 = vsub.f32 %v615_v47, %v635_v59  ;;  %v646_v61 = vsub.f32 %v618_v48, %v635_v59  ;;  %v624_v62 = vpop.f32.mrf.mxu0  ;;  %v5961_v47 = vld [vmem:[%s7875_s17 + $0x10] sm:$0xff] }
 0x1ee   :  { %v637_v0 = vsel %vm428_vm2, %v624_v62, -inf  ;;  %917 = vmatpush.msra.mxu0 %v5961_v47 }
 0x1ef   :  { %v649_v5 = vmul.f32 1.442695, %v645_v60  ;;  %v651_v6 = vmul.f32 1.442695, %v646_v61  ;;  %v638_v7 = vmax.f32 %v636_v63, %v637_v0 }
 0x1f0   :  { %918 = vmatpush.msra.mxu0 %v5967_v51 }
 0x1f1   :  { %4875 = vpow2.f32 %v649_v5  ;;  %v639_v13 = vrot.slane %v638_v7, 4 }
 0x1f2   :  { %4877 = vpow2.f32 %v651_v6  ;;  %919 = vmatpush.msra.mxu0 %v5973_v56 }
 0x1f3   :  { %v640_v24 = vmax.f32 %v638_v7, %v639_v13 }
 0x1f5   :  { %v641_v27 = vrot.slane %v640_v24, 2 }
 0x1f7   :  { %v4876_v29 = vpop.eup %4875  ;;  %v642_v30 = vmax.f32 %v640_v24, %v641_v27 }
 0x1f8   :  { %v4878_v31 = vpop.eup %4877  ;;  %v657_v32 = vsel %vm428_vm2, %v4876_v29, 0.0 }
 0x1f9   :  { %v658_v35 = vsel %vm428_vm2, %v4878_v31, 0.0  ;;  %v643_v40 = vrot.slane %v642_v30, 1 }
 0x1fa   :  { %v659_v41 = vadd.f32 %v658_v35, %v657_v32 }
 0x1fb   :  { %v644_v44 = vmax.f32 %v642_v30, %v643_v40 }
 0x1fc   :  { %v660_v46 = vrot.slane %v659_v41, 4 }
 0x1fd   :  { %v647_v48 = vsub.f32 %v621_v55, %v644_v44  ;;  %v648_v49 = vsub.f32 %v624_v62, %v644_v44  ;;  %v6062_v44 = vld [vmem:[%s7871_s13 + $0x40] sm:$0xff] }
 0x1fe   :  { %v661_v50 = vadd.f32 %v660_v46, %v659_v41 }
 0x1ff   :  { %v653_v52 = vmul.f32 1.442695, %v647_v48  ;;  %v655_v53 = vmul.f32 1.442695, %v648_v49  ;;  %v6068_v49 = vld [vmem:[%s7871_s13 + $0x38] sm:$0xff] }
 0x200   :  { %v662_v54 = vrot.slane %v661_v50, 2 }
 0x201   :  { %4879 = vpow2.f32 %v653_v52 }
 0x202   :  { %v663_v55 = vadd.f32 %v662_v54, %v661_v50  ;;  %4881 = vpow2.f32 %v655_v53  ;;  %v6074_v50 = vld [vmem:[%s7871_s13 + $0x30] sm:$0xff]  ;;  %v6080_v53 = vld [vmem:[%s7871_s13 + $0x28] sm:$0xff] }
 0x204   :  { %v664_v58 = vrot.slane %v663_v55, 1 }
 0x206   :  { %v665_v59 = vadd.f32 %v664_v58, %v663_v55  ;;  %v6087_v55 = vld [vmem:[%s7871_s13 + $0x20] sm:$0xff] }
 0x207   :  { %v4880_v60 = vpop.eup %4879 }
 0x208   :  { %v4882_v61 = vpop.eup %4881  ;;  %4883 = vrcp.f32 %v665_v59  ;;  %v666_v62 = vsel %vm428_vm2, %v4880_v60, 0.0 }
 0x209   :  { %v667_v63 = vsel %vm428_vm2, %v4882_v61, 0.0 }
 0x20a   :  { %v668_v0 = vadd.f32 %v667_v63, %v666_v62 }
 0x20c   :  { %v669_v5 = vrot.slane %v668_v0, 4 }
 0x20e   :  { %v4884_v6 = vpop.eup %4883  ;;  %v670_v7 = vadd.f32 %v669_v5, %v668_v0  ;;  %v6102_v0 = vld [vmem:[%s7871_s13 + $0x10] sm:$0xff] }
 0x20f   :  { %v5978_v13 = vmul.f32 %v4884_v6, %v4878_v31  ;;  %v5980_v24 = vmul.f32 %v4884_v6, %v4876_v29 }
 0x210   :  { %v671_v27 = vrot.slane %v670_v7, 2 }
 0x211   :  { %748 = vst.msk [vmem:[%s7880_s22 + $0x8] sm:$0xff] %vm428_vm2, %v5978_v13  ;;  %4568 = vmatmul.msk.f32.vlgmr.msra.gmra.mxu1 %vm428_vm2, %v5980_v24 }
 0x212   :  { %v672_v30 = vadd.f32 %v671_v27, %v670_v7  ;;  %747 = vst.msk [vmem:[%s7880_s22] sm:$0xff] %vm428_vm2, %v5980_v24  ;;  %v6108_v7 = vld [vmem:[%s7871_s13 + $0x8] sm:$0xff] }
 0x214   :  { %v673_v31 = vrot.slane %v672_v30, 1 }
 0x216   :  { %v674_v29 = vadd.f32 %v673_v31, %v672_v30 }
 0x218   :  { %4885 = vrcp.f32 %v674_v29 }
 0x219   :  { %4569 = vmatmul.msk.f32.gmra.mxu1 %vm428_vm2, %v5978_v13 }
 0x21e   :  { %v4886_v32 = vpop.eup %4885 }
 0x21f   :  { %v5996_v35 = vmul.f32 %v4886_v32, %v4882_v61  ;;  %v5998_v40 = vmul.f32 %v4886_v32, %v4880_v60  ;;  %v6094_v61 = vld [vmem:[%s7871_s13 + $0x18] sm:$0xff] }
 0x221   :  { %750 = vst.msk [vmem:[%s7880_s22 + $0x18] sm:$0xff] %vm428_vm2, %v5996_v35  ;;  %4570 = vmatmul.msk.f32.gmra.mxu1 %vm428_vm2, %v5998_v40  ;;  %1001 = vmatpush.msrb.mxu0 %v5996_v35 }
 0x222   :  { %749 = vst.msk [vmem:[%s7880_s22 + $0x10] sm:$0xff] %vm428_vm2, %v5998_v40  ;;  %1030 = vmatpush.msrb.mxu1 %v5996_v35 }
 0x223   :  { %1002 = vmatpush.msrb.mxu0 %v5998_v40 }
 0x224   :  { %1031 = vmatpush.msrb.mxu1 %v5998_v40 }
 0x225   :  { %1003 = vmatpush.msrb.mxu0 %v5978_v13 }
 0x226   :  { %1032 = vmatpush.msrb.mxu1 %v5978_v13 }
 0x227   :  { %1004 = vmatpush.msrb.mxu0 %v5980_v24 }
 0x228   :  { %1033 = vmatpush.msrb.mxu1 %v5980_v24 }
 0x229   :  { %4571 = vmatmul.msk.f32.gmra.mxu1 %vm428_vm2, %v5996_v35 }
 0x22a   :  { %1212 = vmatpush.msra.mxu1 %v5858_v25 }
 0x22c   :  { %1213 = vmatpush.msra.mxu1 %v5872_v34 }
 0x22e   :  { %1214 = vmatpush.msra.mxu1 %v5878_v36 }
 0x230   :  { %1215 = vmatpush.msra.mxu1 %v5884_v37  ;;  %v6043_v37 = vld [vmem:[%s7871_s13 + $0x58] sm:$0xff] }
 0x231   :  { %4583 = vmatmul.msk.f32.vlgmr.msrb.gmra.mxu1 %vm278_vm0, %v5778_v2  ;;  %772 = vmatpush.msra.mxu2 %v6043_v37 }
 0x232   :  { %1572 = vmatpush.msrb.mxu1 %v5795_v8 }
 0x234   :  { %1573 = vmatpush.msrb.mxu1 %v5797_v9 }
 0x236   :  { %1574 = vmatpush.msrb.mxu1 %v5807_v14 }
 0x238   :  { %1575 = vmatpush.msrb.mxu1 %v5814_v15 }
 0x239   :  { %4584 = vmatmul.msk.f32.gmra.mxu1 %vm278_vm0, %v5801_v11  ;;  %v6048_v11 = vld [vmem:[%s7871_s13 + $0x50] sm:$0xff] }
 0x23a   :  { %773 = vmatpush.msra.mxu2 %v6048_v11 }
 0x241   :  { %4585 = vmatmul.msk.f32.gmra.mxu1 %vm278_vm0, %v5827_v19 }
 0x249   :  { %4586 = vmatmul.msk.f32.gmra.mxu1 %vm278_vm0, %v5841_v22  ;;  %v6055_v22 = vld [vmem:[%s7871_s13 + $0x48] sm:$0xff] }
 0x24a   :  { %774 = vmatpush.msra.mxu2 %v6055_v22 }
 0x24c   :  { %775 = vmatpush.msra.mxu2 %v6062_v44 }
 0x24e   :  { %776 = vmatpush.msra.mxu2 %v6068_v49 }
 0x250   :  { %777 = vmatpush.msra.mxu2 %v6074_v50 }
 0x252   :  { %778 = vmatpush.msra.mxu2 %v6080_v53 }
 0x254   :  { %779 = vmatpush.msra.mxu2 %v6087_v55 }
 0x256   :  { %780 = vmatpush.msra.mxu2 %v6094_v61 }
 0x258   :  { %781 = vmatpush.msra.mxu2 %v6102_v0 }
 0x25a   :  { %782 = vmatpush.msra.mxu2 %v6108_v7 }
 0x28e   :  { %v713_v25 = vpop.f32.mrf.mxu1 }
 0x28f   :  { %v725_v36 = vmul.f32 %v713_v25, %v5894_v45 }
 0x291   :  { %v729_v41 = vsel %vm278_vm0, %v725_v36, 0.0 }
 0x296   :  { %v716_v34 = vpop.f32.mrf.mxu1 }
 0x297   :  { %v726_v2 = vmul.f32 %v716_v34, %v5899_v57 }
 0x299   :  { %v730_v19 = vsel %vm278_vm0, %v726_v2, 0.0 }
 0x29a   :  { %v731_v46 = vadd.f32 %v730_v19, %v729_v41  ;;  %v6117_v41 = vld [vmem:[%s7871_s13] sm:$0xff] }
 0x29b   :  { %783 = vmatpush.msra.mxu2 %v6117_v41 }
 0x29c   :  { %v732_v52 = vrot.slane %v731_v46, 4 }
 0x29e   :  { %v719_v48 = vpop.f32.mrf.mxu1  ;;  %v733_v58 = vadd.f32 %v732_v52, %v731_v46 }
 0x29f   :  { %v727_v54 = vmul.f32 %v719_v48, %v5904_v23 }
 0x2a0   :  { %v734_v6 = vrot.slane %v733_v58, 2 }
 0x2a1   :  { %v738_v62 = vsel %vm278_vm0, %v727_v54, 0.0  ;;  %v6130_v54 = vld [vmem:[%s7872_s14] ss:$0 sm:$0xff] }
 0x2a2   :  { %v735_v31 = vadd.f32 %v734_v6, %v733_v58  ;;  %7918 = vst [vmem:[#allocation24_spill] sm:$0xff] %v6130_v54 }
 0x2a4   :  { %v736_v32 = vrot.slane %v735_v31, 1 }
 0x2a6   :  { %v722_v59 = vpop.f32.mrf.mxu1  ;;  %v737_v2 = vadd.f32 %v736_v32, %v735_v31 }
 0x2a7   :  { %v728_v60 = vmul.f32 %v722_v59, %v5910_v38 }
 0x2a9   :  { %v739_v63 = vsel %vm278_vm0, %v728_v60, 0.0 }
 0x2aa   :  { %v740_v5 = vadd.f32 %v739_v63, %v738_v62 }
 0x2ac   :  { %v741_v27 = vrot.slane %v740_v5, 4 }
 0x2ae   :  { %v742_v30 = vadd.f32 %v741_v27, %v740_v5 }
 0x2b0   :  { %v743_v29 = vrot.slane %v742_v30, 2 }
 0x2b2   :  { %v744_v25 = vadd.f32 %v743_v29, %v742_v30 }
 0x2b4   :  { %v745_v34 = vrot.slane %v744_v25, 1 }
 0x2b6   :  { %v746_v36 = vadd.f32 %v745_v34, %v744_v25 }
 0x2b8   :  { %v754_v19 = vsel %vm753_vm3, %v746_v36, %v737_v2 }
 0x2b9   :  { %755 = vrot.lane.b32.xlu0 %v754_v19, %s5606_s1 }
 0x32b   :  { %v6120_v46 = vpop.permute.xlu0 %755 }
 0x32c   :  { %v758_v48 = vsel %vm278_vm0, %v5817_v16, %v6120_v46 }
 0x32d   :  { %v760_v52 = vsel %vm759_vm4, %v758_v48, 0.0 }
 0x32e   :  { %4572 = vmatmul.msk.f32.vlgmr.msra.gmra.mxu2 %vm764_vm5, %v760_v52 }
 0x3b1   :  { %v785_v58 = vpop.f32.mrf.mxu2 }
 0x3b2   :  { %v786_v59 = vadd.f32 %v6130_v54, %v785_v58 }
 0x3b4   :  { %4887 = vtanh.f32 %v786_v59  ;;  %v4573_v62 = vmul.f32 -1.442695, %v786_v59 }
 0x3b6   :  { %4889 = vpow2.f32 %v4573_v62  ;;  %v6141_v62 = vld [vmem:[#allocation16 + $0x30] sm:$0xff] }
 0x3ba   :  { %v4888_v60 = vpop.eup %4887 }
 0x3bb   :  { %810 = vrot.lane.b32.xlu0 %v4888_v60, %s5613_s21  ;;  %v6139_v60 = vld [vmem:[#allocation16 + $0x38] sm:$0xff] }
 0x3bc   :  { %v4890_v16 = vpop.eup %4889  ;;  %844 = vmatpush.msra.mxu3 %v6139_v60 }
 0x3bd   :  { %v791_v63 = vadd.f32 1.0, %v4890_v16  ;;  %v6144_v16 = vld [vmem:[#allocation16 + $0x28] sm:$0xff] }
 0x3be   :  { %845 = vmatpush.msra.mxu3 %v6141_v62 }
 0x3bf   :  { %4891 = vrcp.f32 %v791_v63  ;;  %v803_v29 = vand.u32 2147483648, %v791_v63  ;;  %vm797_vm7 = vweird.f32 %v791_v63  ;;  %v801_v32 = vand.u32 2147483647, %v791_v63 }
 0x3c0   :  { %846 = vmatpush.msra.mxu3 %v6144_v16 }
 0x3c1   :  { %v804_v34 = vor.u32 1.1754944e-38, %v803_v29  ;;  %vm802_vm9 = vcmp.eq.f32.partialorder %v801_v32, 8.507059e+37 }
 0x3c5   :  { %v4892_v5 = vpop.eup %4891 }
 0x3c6   :  { %v793_v6 = vmul.f32 %v4892_v5, %v791_v63  ;;  %vm798_vm6 = vweird.f32 %v4892_v5  ;;  %v6147_v63 = vld [vmem:[#allocation16 + $0x20] sm:$0xff] }
 0x3c7   :  { %vm799_vm8 = vmor %vm797_vm7, %vm798_vm6  ;;  %847 = vmatpush.msra.mxu3 %v6147_v63 }
 0x3c8   :  { %v794_v27 = vsub.f32 1.0, %v793_v6  ;;  %v6153_v6 = vld [vmem:[#allocation16 + $0x10] sm:$0xff] }
 0x3ca   :  { %v795_v30 = vmul.f32 %v4892_v5, %v794_v27  ;;  %v6156_v27 = vld [vmem:[#allocation16 + $0x8] sm:$0xff] }
 0x3cc   :  { %v796_v31 = vadd.f32 %v4892_v5, %v795_v30  ;;  %v6159_v30 = vld [vmem:[#allocation16] sm:$0xff] }
 0x3ce   :  { %v800_v25 = vsel %vm799_vm8, %v4892_v5, %v796_v31  ;;  %v6150_v5 = vld [vmem:[#allocation16 + $0x18] sm:$0xff] }
 0x3cf   :  { %v805_v36 = vsel %vm802_vm9, %v804_v34, %v800_v25  ;;  %848 = vmatpush.msra.mxu3 %v6150_v5  ;;  %v6172_v34 = vld [vmem:[#allocation2 + $0x2] sm:$0x3] }
 0x3d0   :  { %v808_v48 = vmul.f32 0.0, %v805_v36 }
 0x3d1   :  { %849 = vmatpush.msra.mxu3 %v6153_v6 }
 0x3d3   :  { %850 = vmatpush.msra.mxu3 %v6156_v27 }
 0x3d5   :  { %851 = vmatpush.msra.mxu3 %v6159_v30 }
 0x3d7   :  { %981 = vmatpush.msrb.mxu3 %v5795_v8 }
 0x3d9   :  { %982 = vmatpush.msrb.mxu3 %v5797_v9 }
 0x3db   :  { %983 = vmatpush.msrb.mxu3 %v5807_v14 }
 0x3dd   :  { %984 = vmatpush.msrb.mxu3 %v5814_v15 }
 0x42d   :  { %v811_v2 = vpop.permute.xlu0 %810 }
 0x42e   :  { %v813_v19 = vmul.f32 %v811_v2, %v805_v36 }
 0x430   :  { %815 = vrot.lane.b32.xlu1 %v813_v19, %s5606_s1 }
 0x4a2   :  { %v816_v52 = vpop.permute.xlu1 %815 }
 0x4a3   :  { %v6135_v58 = vadd.f32 %v816_v52, %v808_v48 }
 0x4a5   :  { %7919 = vst [vmem:[#allocation25_spill] sm:$0xff] %v6135_v58  ;;  %4893 = vtanh.f32 %v6135_v58 }
 0x4ab   :  { %v4894_v59 = vpop.eup %4893 }
 0x4ac   :  { %821 = vrot.lane.b32.xlu1 %v4894_v59, %s5613_s21 }
 0x51e   :  { %v822_v31 = vpop.permute.xlu1 %821 }
 0x51f   :  { %v824_v29 = vmul.f32 %v822_v31, %v805_v36 }
 0x521   :  { %826 = vrot.lane.b32.xlu2 %v824_v29, %s5606_s1 }
 0x57b   :  { %v827_v32 = vpop.permute.xlu2 %826 }
 0x57c   :  { %v829_v25 = vsel %vm278_vm0, %v827_v32, 0.0 }
 0x57d   :  { %4574 = vmatmul.msk.f32.vlgmr.msra.gmra.mxu3 %vm759_vm4, %v829_v25 }
 0x57e   :  { %4592 = vmatpush.msk.msra.mxu3 %vm432_vm1, %v5787_v3  ;;  %v6191_v3 = vld [vmem:[%s7874_s16] ss:$0 sm:$0xff] }
 0x57f   :  { %7920 = vst [vmem:[#allocation26_spill] sm:$0xff] %v6191_v3 }
 0x585   :  { %4578 = vmatmul.msk.f32.vlgmr.msrb.gmra.mxu3 %vm278_vm0, %v6172_v34 }
 0x586   :  { %1369 = vmatpush.msrb.mxu3 %v6043_v37 }
 0x588   :  { %1370 = vmatpush.msrb.mxu3 %v6048_v11 }
 0x58a   :  { %1371 = vmatpush.msrb.mxu3 %v6055_v22 }
 0x58c   :  { %1372 = vmatpush.msrb.mxu3 %v6062_v44 }
 0x58e   :  { %1373 = vmatpush.msrb.mxu3 %v6068_v49 }
 0x590   :  { %1374 = vmatpush.msrb.mxu3 %v6074_v50 }
 0x592   :  { %1375 = vmatpush.msrb.mxu3 %v6080_v53 }
 0x594   :  { %1376 = vmatpush.msrb.mxu3 %v6087_v55 }
 0x596   :  { %1377 = vmatpush.msrb.mxu3 %v6094_v61 }
 0x598   :  { %1378 = vmatpush.msrb.mxu3 %v6102_v0 }
 0x59a   :  { %1379 = vmatpush.msrb.mxu3 %v6108_v7 }
 0x59c   :  { %1380 = vmatpush.msrb.mxu3 %v6117_v41 }
 0x600   :  { %v853_v8 = vpop.f32.mrf.mxu3 }
 0x601   :  { %v854_v9 = vadd.f32 %v6191_v3, %v853_v8 }
 0x603   :  { %4895 = vtanh.f32 %v854_v9  ;;  %v4575_v15 = vmul.f32 -1.442695, %v854_v9 }
 0x605   :  { %4897 = vpow2.f32 %v4575_v15 }
 0x609   :  { %v4896_v14 = vpop.eup %4895 }
 0x60a   :  { %878 = vrot.lane.b32.xlu2 %v4896_v14, %s5613_s21 }
 0x60b   :  { %v4898_v2 = vpop.eup %4897 }
 0x60c   :  { %v859_v36 = vadd.f32 1.0, %v4898_v2 }
 0x60e   :  { %4899 = vrcp.f32 %v859_v36  ;;  %v871_v32 = vand.u32 2147483648, %v859_v36  ;;  %vm865_vm11 = vweird.f32 %v859_v36  ;;  %v869_v25 = vand.u32 2147483647, %v859_v36 }
 0x610   :  { %v872_v3 = vor.u32 1.1754944e-38, %v871_v32  ;;  %vm870_vm13 = vcmp.eq.f32.partialorder %v869_v25, 8.507059e+37 }
 0x614   :  { %v4900_v19 = vpop.eup %4899 }
 0x615   :  { %v861_v48 = vmul.f32 %v4900_v19, %v859_v36  ;;  %vm866_vm10 = vweird.f32 %v4900_v19 }
 0x616   :  { %vm867_vm12 = vmor %vm865_vm11, %vm866_vm10 }
 0x617   :  { %v862_v52 = vsub.f32 1.0, %v861_v48 }
 0x619   :  { %v863_v59 = vmul.f32 %v4900_v19, %v862_v52 }
 0x61b   :  { %v864_v31 = vadd.f32 %v4900_v19, %v863_v59 }
 0x61d   :  { %v868_v8 = vsel %vm867_vm12, %v4900_v19, %v864_v31 }
 0x61e   :  { %v873_v14 = vsel %vm870_vm13, %v872_v3, %v868_v8 }
 0x61f   :  { %v876_v15 = vmul.f32 0.0, %v873_v14 }
 0x664   :  { %v879_v58 = vpop.permute.xlu2 %878 }
 0x665   :  { %v881_v9 = vmul.f32 %v879_v58, %v873_v14 }
 0x667   :  { %883 = vrot.lane.b32.xlu0 %v881_v9, %s5606_s1 }
 0x6d9   :  { %v884_v2 = vpop.permute.xlu0 %883 }
 0x6da   :  { %v6196_v54 = vadd.f32 %v884_v2, %v876_v15 }
 0x6dc   :  { %4901 = vtanh.f32 %v6196_v54 }
 0x6e2   :  { %v4902_v48 = vpop.eup %4901 }
 0x6e3   :  { %889 = vrot.lane.b32.xlu1 %v4902_v48, %s5613_s21 }
 0x6eb   :  { %1357 = vrot.lane.b32.xlu1 %v824_v29, %s5614_s2  ;;  %v6259_v29 = vld [vmem:[%s7876_s18] ss:$0 sm:$0xff] }
 0x755   :  { %v890_v36 = vpop.permute.xlu1 %889 }
 0x756   :  { %v6201_v19 = vmul.f32 %v890_v36, %v873_v14 }
 0x758   :  { %894 = vrot.lane.b32.xlu2 %v6201_v19, %s5606_s1 }
 0x7b2   :  { %v895_v58 = vpop.permute.xlu2 %894 }
 0x7b3   :  { %v897_v3 = vsel %vm278_vm0, %v895_v58, %v6120_v46 }
 0x7b4   :  { %4576 = vmatmul.msk.f32.vlgmr.msra.gmra.mxu0 %vm759_vm4, %v897_v3 }
 0x7b5   :  { %4597 = vmatpush.msk.msra.mxu0 %vm432_vm1, %v5791_v4  ;;  %v6234_v4 = vld [vmem:[%s7877_s19 + $0x10] sm:$0xff] }
 0x7bc   :  { %4579 = vmatmul.msk.f32.vlgmr.msrb.gmra.mxu0 %vm278_vm0, %v5776_v1  ;;  %v6229_v1 = vld [vmem:[%s7877_s19 + $0x18] sm:$0xff] }
 0x7bd   :  { %1506 = vmatpush.msrb.mxu0 %v5929_v20  ;;  %943 = vmatpush.msrb.mxu2 %v6229_v1 }
 0x7bf   :  { %1507 = vmatpush.msrb.mxu0 %v5935_v26  ;;  %944 = vmatpush.msrb.mxu2 %v6234_v4 }
 0x7c1   :  { %1508 = vmatpush.msrb.mxu0 %v5941_v28 }
 0x7c3   :  { %1509 = vmatpush.msrb.mxu0 %v5948_v33 }
 0x7c4   :  { %4580 = vmatmul.msk.f32.gmra.mxu0 %vm278_vm0, %v5799_v10  ;;  %v6240_v10 = vld [vmem:[%s7877_s19 + $0x8] sm:$0xff] }
 0x7c5   :  { %1510 = vmatpush.msrb.mxu0 %v5955_v42  ;;  %945 = vmatpush.msrb.mxu2 %v6240_v10 }
 0x7c7   :  { %1511 = vmatpush.msrb.mxu0 %v5961_v47 }
 0x7c9   :  { %1512 = vmatpush.msrb.mxu0 %v5967_v51 }
 0x7cb   :  { %1513 = vmatpush.msrb.mxu0 %v5973_v56 }
 0x7cc   :  { %4581 = vmatmul.msk.f32.gmra.mxu0 %vm278_vm0, %v5825_v18  ;;  %v6246_v18 = vld [vmem:[%s7877_s19] sm:$0xff] }
 0x7cd   :  { %946 = vmatpush.msrb.mxu2 %v6246_v18 }
 0x7cf   :  { %4587 = vmatpush.msk.msra.mxu2 %vm432_vm1, %v5820_v17 }
 0x7d4   :  { %4582 = vmatmul.msk.f32.gmra.mxu0 %vm278_vm0, %v5839_v21  ;;  %v1035_v21 = vpop.f32.mrf.mxu1 }
 0x7dc   :  { %4598 = vmatmul.msk.f32.vlgmr.msra.gmra.mxu0 %vm428_vm2, %v1035_v21  ;;  %v1038_v46 = vpop.f32.mrf.mxu1 }
 0x7dd   :  { %4630 = vmatpush.msk.msra.mxu0 %vm432_vm1, %v5820_v17 }
 0x7e4   :  { %4599 = vmatmul.msk.f32.gmra.mxu0 %vm428_vm2, %v1038_v46  ;;  %v1041_v31 = vpop.f32.mrf.mxu1 }
 0x7ec   :  { %4600 = vmatmul.msk.f32.gmra.mxu0 %vm428_vm2, %v1041_v31  ;;  %v1044_v17 = vpop.f32.mrf.mxu1 }
 0x7f4   :  { %4601 = vmatmul.msk.f32.gmra.mxu0 %vm428_vm2, %v1044_v17 }
 0x831   :  { %v921_v52 = vpop.f32.mrf.mxu0 }
 0x832   :  { %v922_v59 = vadd.f32 %v6259_v29, %v921_v52 }
 0x834   :  { %4903 = vtanh.f32 %v922_v59 }
 0x839   :  { %v1006_v32 = vpop.f32.mrf.mxu0 }
 0x83a   :  { %v4904_v25 = vpop.eup %4903  ;;  %4593 = vmatmul.msk.f32.vlgmr.msra.gmra.mxu3 %vm428_vm2, %v1006_v32 }
 0x83b   :  { %4577 = vmatmul.msk.f32.vlgmr.msrb.gmra.mxu2 %vm278_vm0, %v4904_v25  ;;  %1441 = vmatpush.msra.mxu3 %v6139_v60 }
 0x83c   :  { %4606 = vmatpush.msk.msrb.mxu2 %vm432_vm1, %v5922_v12 }
 0x83d   :  { %1442 = vmatpush.msra.mxu3 %v6141_v62 }
 0x83f   :  { %1443 = vmatpush.msra.mxu3 %v6144_v16 }
 0x841   :  { %v1009_v8 = vpop.f32.mrf.mxu0  ;;  %1444 = vmatpush.msra.mxu3 %v6147_v63 }
 0x842   :  { %4594 = vmatmul.msk.f32.gmra.mxu3 %vm428_vm2, %v1009_v8 }
 0x843   :  { %4588 = vmatmul.msk.f32.vlgmr.msra.gmra.mxu2 %vm428_vm2, %v5980_v24  ;;  %1445 = vmatpush.msra.mxu3 %v6150_v5  ;;  %v986_v24 = vpop.f32.mrf.mxu3 }
 0x845   :  { %1446 = vmatpush.msra.mxu3 %v6153_v6 }
 0x847   :  { %1447 = vmatpush.msra.mxu3 %v6156_v27 }
 0x849   :  { %v1012_v14 = vpop.f32.mrf.mxu0  ;;  %1448 = vmatpush.msra.mxu3 %v6159_v30 }
 0x84a   :  { %4595 = vmatmul.msk.f32.gmra.mxu3 %vm428_vm2, %v1012_v14 }
 0x84b   :  { %4589 = vmatmul.msk.f32.gmra.mxu2 %vm428_vm2, %v5978_v13  ;;  %v987_v13 = vadd.f32 %v5890_v39, %v986_v24 }
 0x84d   :  { %v1172_v52 = vperm.slane %v987_v13, 0 }
 0x851   :  { %v1015_v12 = vpop.f32.mrf.mxu0 }
 0x852   :  { %4596 = vmatmul.msk.f32.gmra.mxu3 %vm428_vm2, %v1015_v12 }
 0x853   :  { %4590 = vmatmul.msk.f32.gmra.mxu2 %vm428_vm2, %v5998_v40 }
 0x859   :  { %v1146_v2 = vpop.f32.mrf.mxu0 }
 0x85b   :  { %4591 = vmatmul.msk.f32.gmra.mxu2 %vm428_vm2, %v5996_v35  ;;  %v1176_v35 = vadd.f32 %v1172_v52, %v5894_v45 }
 0x861   :  { %v1149_v21 = vpop.f32.mrf.mxu0 }
 0x869   :  { %v1152_v14 = vpop.f32.mrf.mxu0 }
 0x8bd   :  { %v1105_v15 = vpop.f32.mrf.mxu3 }
 0x8be   :  { %v6287_v9 = vpop.f32.mrf.mxu2 }
 0x8bf   :  { %7921 = vst [vmem:[#allocation27_spill] sm:$0xff] %v6287_v9 }
 0x8c5   :  { %v1108_v58 = vpop.f32.mrf.mxu3 }
 0x8c6   :  { %v1064_v48 = vpop.f32.mrf.mxu2 }
 0x8c7   :  { %v1106_v36 = vadd.f32 %v1105_v15, %v1064_v48  ;;  %v1171_v15 = vrot.slane %v987_v13, 1 }
 0x8c9   :  { %v1158_v3 = vadd.f32 %v1146_v2, %v1106_v36  ;;  %v1177_v2 = vadd.f32 %v1172_v52, %v5899_v57 }
 0x8cb   :  { %v1162_v46 = vadd.f32 %v5892_v43, %v1158_v3 }
 0x8cd   :  { %4905 = vtanh.f32 %v1162_v46  ;;  %v1111_v32 = vpop.f32.mrf.mxu3  ;;  %v1173_v46 = vperm.slane %v1171_v15, 0 }
 0x8ce   :  { %v1067_v40 = vpop.f32.mrf.mxu2 }
 0x8cf   :  { %v1109_v59 = vadd.f32 %v1108_v58, %v1067_v40 }
 0x8d1   :  { %v1159_v31 = vadd.f32 %v1149_v21, %v1109_v59  ;;  %v1155_v59 = vpop.f32.mrf.mxu0 }
 0x8d3   :  { %v4906_v25 = vpop.eup %4905  ;;  %v1163_v17 = vadd.f32 %v5892_v43, %v1159_v31  ;;  %v6299_v31 = vld [vmem:[%s7865_s7] sm:$0xf] }
 0x8d4   :  { %v1180_v8 = vadd.f32 %v4906_v25, %v1176_v35  ;;  %v1178_v35 = vadd.f32 %v1173_v46, %v5904_v23 }
 0x8d5   :  { %4907 = vtanh.f32 %v1163_v17  ;;  %v1114_v21 = vpop.f32.mrf.mxu3 }
 0x8d6   :  { %4909 = vtanh.f32 %v1180_v8  ;;  %v1070_v12 = vpop.f32.mrf.mxu2 }
 0x8d7   :  { %v1112_v39 = vadd.f32 %v1111_v32, %v1070_v12 }
 0x8d9   :  { %v1160_v24 = vadd.f32 %v1152_v14, %v1112_v39  ;;  %v1179_v14 = vadd.f32 %v1173_v46, %v5910_v38 }
 0x8db   :  { %v4908_v48 = vpop.eup %4907  ;;  %v1164_v36 = vadd.f32 %v5892_v43, %v1160_v24 }
 0x8dc   :  { %v4910_v58 = vpop.eup %4909  ;;  %v1181_v3 = vadd.f32 %v4908_v48, %v1177_v2  ;;  %v6309_v2 = vld [vmem:[#allocation2 + $0x4] sm:$0x3] }
 0x8dd   :  { %4911 = vtanh.f32 %v1164_v36  ;;  %4602 = vmatmul.msk.f32.vlgmr.msra.gmra.mxu1 %vm278_vm0, %v4910_v58 }
 0x8de   :  { %4913 = vtanh.f32 %v1181_v3  ;;  %v1073_v40 = vpop.f32.mrf.mxu2  ;;  %4635 = vmatpush.msk.msra.mxu1 %vm432_vm1, %v6299_v31 }
 0x8df   :  { %v1115_v13 = vadd.f32 %v1114_v21, %v1073_v40 }
 0x8e1   :  { %v1161_v52 = vadd.f32 %v1155_v59, %v1115_v13 }
 0x8e3   :  { %v4912_v32 = vpop.eup %4911  ;;  %v1165_v25 = vadd.f32 %v5892_v43, %v1161_v52 }
 0x8e4   :  { %v4914_v17 = vpop.eup %4913  ;;  %v1182_v8 = vadd.f32 %v4912_v32, %v1178_v35 }
 0x8e5   :  { %4915 = vtanh.f32 %v1165_v25  ;;  %4603 = vmatmul.msk.f32.gmra.mxu1 %vm278_vm0, %v4914_v17 }
 0x8e6   :  { %4917 = vtanh.f32 %v1182_v8 }
 0x8eb   :  { %v4916_v12 = vpop.eup %4915 }
 0x8ec   :  { %v4918_v39 = vpop.eup %4917  ;;  %v1183_v24 = vadd.f32 %v4916_v12, %v1179_v14 }
 0x8ed   :  { %4604 = vmatmul.msk.f32.gmra.mxu1 %vm278_vm0, %v4918_v39 }
 0x8ee   :  { %4919 = vtanh.f32 %v1183_v24 }
 0x8f4   :  { %v4920_v15 = vpop.eup %4919 }
 0x8f5   :  { %4605 = vmatmul.msk.f32.gmra.mxu1 %vm278_vm0, %v4920_v15 }
 0x8fd   :  { %4621 = vmatmul.msk.f32.vlgmr.msrb.gmra.mxu1 %vm278_vm0, %v6309_v2 }
 0x8fe   :  { %1960 = vmatpush.msrb.mxu1 %v6043_v37 }
 0x900   :  { %1961 = vmatpush.msrb.mxu1 %v6048_v11 }
 0x902   :  { %1962 = vmatpush.msrb.mxu1 %v6055_v22 }
 0x904   :  { %1963 = vmatpush.msrb.mxu1 %v6062_v44 }
 0x906   :  { %1964 = vmatpush.msrb.mxu1 %v6068_v49 }
 0x908   :  { %1965 = vmatpush.msrb.mxu1 %v6074_v50 }
 0x90a   :  { %1966 = vmatpush.msrb.mxu1 %v6080_v53 }
 0x90c   :  { %1967 = vmatpush.msrb.mxu1 %v6087_v55 }
 0x90e   :  { %1968 = vmatpush.msrb.mxu1 %v6094_v61 }
 0x910   :  { %1969 = vmatpush.msrb.mxu1 %v6102_v0 }
 0x912   :  { %1970 = vmatpush.msrb.mxu1 %v6108_v7 }
 0x914   :  { %1971 = vmatpush.msrb.mxu1 %v6117_v41 }
 0x95a   :  { %v1217_v43 = vpop.f32.mrf.mxu1 }
 0x95b   :  { %v1229_v11 = vsel %vm428_vm2, %v1217_v43, -inf }
 0x962   :  { %v1220_v37 = vpop.f32.mrf.mxu1 }
 0x963   :  { %v1230_v22 = vsel %vm428_vm2, %v1220_v37, -inf }
 0x964   :  { %v1231_v44 = vmax.f32 %v1229_v11, %v1230_v22 }
 0x966   :  { %v1232_v49 = vrot.slane %v1231_v44, 4 }
 0x968   :  { %v1233_v50 = vmax.f32 %v1231_v44, %v1232_v49 }
 0x96a   :  { %v1234_v53 = vrot.slane %v1233_v50, 2  ;;  %v1223_v48 = vpop.f32.mrf.mxu1 }
 0x96b   :  { %v1238_v7 = vsel %vm428_vm2, %v1223_v48, -inf }
 0x96c   :  { %v1235_v55 = vmax.f32 %v1233_v50, %v1234_v53 }
 0x96e   :  { %v1236_v36 = vrot.slane %v1235_v55, 1 }
 0x970   :  { %v1237_v61 = vmax.f32 %v1235_v55, %v1236_v36 }
 0x972   :  { %v1247_v58 = vsub.f32 %v1217_v43, %v1237_v61  ;;  %v1248_v0 = vsub.f32 %v1220_v37, %v1237_v61  ;;  %v1226_v3 = vpop.f32.mrf.mxu1 }
 0x973   :  { %v1239_v41 = vsel %vm428_vm2, %v1226_v3, -inf }
 0x974   :  { %v1251_v21 = vmul.f32 1.442695, %v1247_v58  ;;  %v1253_v46 = vmul.f32 1.442695, %v1248_v0  ;;  %v1240_v40 = vmax.f32 %v1238_v7, %v1239_v41 }
 0x976   :  { %4921 = vpow2.f32 %v1251_v21  ;;  %v1241_v59 = vrot.slane %v1240_v40, 4 }
 0x977   :  { %4923 = vpow2.f32 %v1253_v46 }
 0x978   :  { %v1242_v13 = vmax.f32 %v1240_v40, %v1241_v59 }
 0x97a   :  { %v1243_v52 = vrot.slane %v1242_v13, 2 }
 0x97c   :  { %v4922_v35 = vpop.eup %4921  ;;  %v1244_v32 = vmax.f32 %v1242_v13, %v1243_v52 }
 0x97d   :  { %v4924_v25 = vpop.eup %4923  ;;  %v1259_v17 = vsel %vm428_vm2, %v4922_v35, 0.0 }
 0x97e   :  { %v1260_v8 = vsel %vm428_vm2, %v4924_v25, 0.0  ;;  %v1245_v14 = vrot.slane %v1244_v32, 1 }
 0x97f   :  { %v1261_v12 = vadd.f32 %v1260_v8, %v1259_v17  ;;  %v6377_v17 = vld [vmem:[#allocation5] sm:$0xff]  ;;  %v6385_v8 = vld [vmem:[#allocation5 + $0x8] sm:$0xff] }
 0x980   :  { %v1246_v39 = vmax.f32 %v1244_v32, %v1245_v14 }
 0x981   :  { %v1262_v24 = vrot.slane %v1261_v12, 4 }
 0x982   :  { %v1249_v15 = vsub.f32 %v1223_v48, %v1246_v39  ;;  %v1250_v43 = vsub.f32 %v1226_v3, %v1246_v39 }
 0x983   :  { %v1263_v37 = vadd.f32 %v1262_v24, %v1261_v12 }
 0x984   :  { %v1255_v11 = vmul.f32 1.442695, %v1249_v15  ;;  %v1257_v22 = vmul.f32 1.442695, %v1250_v43 }
 0x985   :  { %v1264_v44 = vrot.slane %v1263_v37, 2 }
 0x986   :  { %4925 = vpow2.f32 %v1255_v11 }
 0x987   :  { %v1265_v49 = vadd.f32 %v1264_v44, %v1263_v37  ;;  %4927 = vpow2.f32 %v1257_v22 }
 0x989   :  { %v1266_v50 = vrot.slane %v1265_v49, 1 }
 0x98b   :  { %v1267_v53 = vadd.f32 %v1266_v50, %v1265_v49 }
 0x98c   :  { %v4926_v55 = vpop.eup %4925 }
 0x98d   :  { %v4928_v36 = vpop.eup %4927  ;;  %4929 = vrcp.f32 %v1267_v53  ;;  %v1268_v61 = vsel %vm428_vm2, %v4926_v55, 0.0 }
 0x98e   :  { %v1269_v58 = vsel %vm428_vm2, %v4928_v36, 0.0 }
 0x98f   :  { %v1270_v0 = vadd.f32 %v1269_v58, %v1268_v61 }
 0x991   :  { %v1271_v7 = vrot.slane %v1270_v0, 4 }
 0x993   :  { %v4930_v48 = vpop.eup %4929  ;;  %v1272_v3 = vadd.f32 %v1271_v7, %v1270_v0 }
 0x994   :  { %v6333_v41 = vmul.f32 %v4930_v48, %v4924_v25  ;;  %v6335_v21 = vmul.f32 %v4930_v48, %v4922_v35  ;;  %v6373_v25 = vld [vmem:[#allocation13] sm:$0xf] }
 0x995   :  { %v1273_v46 = vrot.slane %v1272_v3, 2 }
 0x996   :  { %4612 = vst.msk [vmem:[%s7880_s22 + $0x28] sm:$0xff] %vm428_vm2, %v6333_v41  ;;  %4607 = vmatmul.msk.f32.vlgmr.msrb.gmra.mxu2 %vm428_vm2, %v6335_v21 }
 0x997   :  { %v1274_v40 = vadd.f32 %v1273_v46, %v1272_v3  ;;  %4611 = vst.msk [vmem:[%s7880_s22 + $0x20] sm:$0xff] %vm428_vm2, %v6335_v21 }
 0x999   :  { %v1275_v59 = vrot.slane %v1274_v40, 1 }
 0x99b   :  { %v1276_v13 = vadd.f32 %v1275_v59, %v1274_v40  ;;  %v1358_v40 = vpop.permute.xlu1 %1357 }
 0x99d   :  { %4931 = vrcp.f32 %v1276_v13 }
 0x99e   :  { %4608 = vmatmul.msk.f32.gmra.mxu2 %vm428_vm2, %v6333_v41 }
 0x9a3   :  { %v4932_v52 = vpop.eup %4931 }
 0x9a4   :  { %v6351_v35 = vmul.f32 %v4932_v52, %v4928_v36  ;;  %v6353_v32 = vmul.f32 %v4932_v52, %v4926_v55 }
 0x9a6   :  { %4614 = vst.msk [vmem:[%s7880_s22 + $0x38] sm:$0xff] %vm428_vm2, %v6351_v35  ;;  %4609 = vmatmul.msk.f32.gmra.mxu2 %vm428_vm2, %v6353_v32 }
 0x9a7   :  { %4613 = vst.msk [vmem:[%s7880_s22 + $0x30] sm:$0xff] %vm428_vm2, %v6353_v32  ;;  %1592 = vmatpush.msra.mxu2 %v6351_v35 }
 0x9a9   :  { %1593 = vmatpush.msra.mxu2 %v6353_v32 }
 0x9ab   :  { %1594 = vmatpush.msra.mxu2 %v6333_v41 }
 0x9ad   :  { %1595 = vmatpush.msra.mxu2 %v6335_v21 }
 0x9ae   :  { %4610 = vmatmul.msk.f32.gmra.mxu2 %vm428_vm2, %v6351_v35 }
 0x9af   :  { %4640 = vmatpush.msk.msrb.mxu2 %vm432_vm1, %v6373_v25 }
 0x9b6   :  { %4622 = vmatmul.msk.f32.vlgmr.msra.gmra.mxu2 %vm278_vm0, %v6377_v17 }
 0x9b7   :  { %2097 = vmatpush.msra.mxu2 %v5929_v20  ;;  %v6393_v20 = vld [vmem:[#allocation5 + $0x10] sm:$0xff] }
 0x9b9   :  { %2098 = vmatpush.msra.mxu2 %v5935_v26  ;;  %v6397_v26 = vld [vmem:[#allocation5 + $0x18] sm:$0xff] }
 0x9bb   :  { %2099 = vmatpush.msra.mxu2 %v5941_v28 }
 0x9bd   :  { %2100 = vmatpush.msra.mxu2 %v5948_v33 }
 0x9be   :  { %4623 = vmatmul.msk.f32.gmra.mxu2 %vm278_vm0, %v6385_v8 }
 0x9bf   :  { %2101 = vmatpush.msra.mxu2 %v5955_v42 }
 0x9c1   :  { %2102 = vmatpush.msra.mxu2 %v5961_v47 }
 0x9c3   :  { %2103 = vmatpush.msra.mxu2 %v5967_v51 }
 0x9c5   :  { %2104 = vmatpush.msra.mxu2 %v5973_v56 }
 0x9c6   :  { %4624 = vmatmul.msk.f32.gmra.mxu2 %vm278_vm0, %v6393_v20 }
 0x9ce   :  { %4625 = vmatmul.msk.f32.gmra.mxu2 %vm278_vm0, %v6397_v26 }
 0xa19   :  { %v1312_v28 = vpop.f32.mrf.mxu2 }
 0xa1a   :  { %v1324_v47 = vmul.f32 %v1312_v28, %v5894_v45  ;;  %v7922_v28 = vld [vmem:[#allocation24_spill] sm:$0xff] }
 0xa1c   :  { %v1328_v56 = vsel %vm278_vm0, %v1324_v47, 0.0 }
 0xa21   :  { %v1315_v33 = vpop.f32.mrf.mxu2 }
 0xa22   :  { %v1325_v42 = vmul.f32 %v1315_v33, %v5899_v57 }
 0xa24   :  { %v1329_v51 = vsel %vm278_vm0, %v1325_v42, 0.0 }
 0xa25   :  { %v1330_v14 = vadd.f32 %v1329_v51, %v1328_v56 }
 0xa27   :  { %v1331_v39 = vrot.slane %v1330_v14, 4 }
 0xa29   :  { %v1318_v12 = vpop.f32.mrf.mxu2  ;;  %v1332_v15 = vadd.f32 %v1331_v39, %v1330_v14 }
 0xa2a   :  { %v1326_v24 = vmul.f32 %v1318_v12, %v5904_v23 }
 0xa2b   :  { %v1333_v44 = vrot.slane %v1332_v15, 2 }
 0xa2c   :  { %v1337_v11 = vsel %vm278_vm0, %v1326_v24, 0.0 }
 0xa2d   :  { %v1334_v55 = vadd.f32 %v1333_v44, %v1332_v15 }
 0xa2f   :  { %v1335_v61 = vrot.slane %v1334_v55, 1 }
 0xa31   :  { %v1321_v43 = vpop.f32.mrf.mxu2  ;;  %v1336_v7 = vadd.f32 %v1335_v61, %v1334_v55 }
 0xa32   :  { %v1327_v37 = vmul.f32 %v1321_v43, %v5910_v38 }
 0xa34   :  { %v1338_v22 = vsel %vm278_vm0, %v1327_v37, 0.0 }
 0xa35   :  { %v1339_v49 = vadd.f32 %v1338_v22, %v1337_v11  ;;  %v7923_v11 = vld [vmem:[#allocation25_spill] sm:$0xff] }
 0xa37   :  { %v1340_v50 = vrot.slane %v1339_v49, 4 }
 0xa39   :  { %v1341_v53 = vadd.f32 %v1340_v50, %v1339_v49 }
 0xa3b   :  { %v1342_v36 = vrot.slane %v1341_v53, 2 }
 0xa3d   :  { %v1343_v58 = vadd.f32 %v1342_v36, %v1341_v53 }
 0xa3f   :  { %v1344_v0 = vrot.slane %v1343_v58, 1 }
 0xa41   :  { %v1345_v48 = vadd.f32 %v1344_v0, %v1343_v58  ;;  %v7924_v0 = vld [vmem:[#allocation26_spill] sm:$0xff] }
 0xa43   :  { %v1353_v3 = vsel %vm753_vm3, %v1345_v48, %v1336_v7 }
 0xa44   :  { %1354 = vrot.lane.b32.xlu0 %v1353_v3, %s5606_s1 }
 0xab6   :  { %v6411_v46 = vpop.permute.xlu0 %1354 }
 0xab7   :  { %v1360_v59 = vsel %vm278_vm0, %v6172_v34, %v6411_v46 }
 0xab8   :  { %v1361_v13 = vsel %vm759_vm4, %v1360_v59, %v1358_v40 }
 0xab9   :  { %4615 = vmatmul.msk.f32.vlgmr.msrb.gmra.mxu3 %vm764_vm5, %v1361_v13 }
 0xaba   :  { %1534 = vmatpush.msrb.mxu3 %v6229_v1 }
 0xabc   :  { %1535 = vmatpush.msrb.mxu3 %v6234_v4 }
 0xabe   :  { %1536 = vmatpush.msrb.mxu3 %v6240_v10 }
 0xac0   :  { %1537 = vmatpush.msrb.mxu3 %v6246_v18 }
 0xb3c   :  { %v1382_v52 = vpop.f32.mrf.mxu3 }
 0xb3d   :  { %v1383_v33 = vadd.f32 %v7922_v28, %v1382_v52 }
 0xb3f   :  { %4933 = vtanh.f32 %v1383_v33  ;;  %v4616_v34 = vmul.f32 -1.442695, %v1383_v33 }
 0xb41   :  { %4935 = vpow2.f32 %v4616_v34 }
 0xb45   :  { %v4934_v42 = vpop.eup %4933 }
 0xb46   :  { %1407 = vrot.lane.b32.xlu2 %v4934_v42, %s5613_s21 }
 0xb47   :  { %v4936_v47 = vpop.eup %4935 }
 0xb48   :  { %v1388_v51 = vadd.f32 1.0, %v4936_v47 }
 0xb4a   :  { %4937 = vrcp.f32 %v1388_v51  ;;  %v1400_v10 = vand.u32 2147483648, %v1388_v51  ;;  %vm1394_vm15 = vweird.f32 %v1388_v51  ;;  %v1398_v18 = vand.u32 2147483647, %v1388_v51 }
 0xb4c   :  { %v1401_v24 = vor.u32 1.1754944e-38, %v1400_v10  ;;  %vm1399_vm7 = vcmp.eq.f32.partialorder %v1398_v18, 8.507059e+37 }
 0xb50   :  { %v4938_v56 = vpop.eup %4937 }
 0xb51   :  { %v1390_v1 = vmul.f32 %v4938_v56, %v1388_v51  ;;  %vm1395_vm14 = vweird.f32 %v4938_v56 }
 0xb52   :  { %vm1396_vm6 = vmor %vm1394_vm15, %vm1395_vm14 }
 0xb53   :  { %v1391_v14 = vsub.f32 1.0, %v1390_v1 }
 0xb55   :  { %v1392_v4 = vmul.f32 %v4938_v56, %v1391_v14 }
 0xb57   :  { %v1393_v12 = vadd.f32 %v4938_v56, %v1392_v4 }
 0xb59   :  { %v1397_v39 = vsel %vm1396_vm6, %v4938_v56, %v1393_v12 }
 0xb5a   :  { %v1402_v43 = vsel %vm1399_vm7, %v1401_v24, %v1397_v39 }
 0xb5b   :  { %v1405_v22 = vmul.f32 %v1402_v43, %v7923_v11  ;;  %v6518_v11 = vld [vmem:[#allocation8 + $0x8] sm:$0xff] }
 0xba0   :  { %v1408_v15 = vpop.permute.xlu2 %1407 }
 0xba1   :  { %v1410_v37 = vmul.f32 %v1408_v15, %v1402_v43 }
 0xba3   :  { %1412 = vrot.lane.b32.xlu0 %v1410_v37, %s5606_s1 }
 0xbab   :  { %1426 = vrot.lane.b32.xlu0 %v6201_v19, %s5613_s21 }
 0xc15   :  { %v1413_v44 = vpop.permute.xlu0 %1412 }
 0xc16   :  { %v6428_v49 = vadd.f32 %v1413_v44, %v1405_v22  ;;  %v6521_v22 = vld [vmem:[#allocation8] sm:$0xff]  ;;  %v6524_v44 = vld [vmem:[#allocation7 + $0x8] sm:$0xff] }
 0xc18   :  { %4939 = vtanh.f32 %v6428_v49 }
 0xc1d   :  { %v1427_v36 = vpop.permute.xlu0 %1426 }
 0xc1e   :  { %v4940_v50 = vpop.eup %4939 }
 0xc1f   :  { %1418 = vrot.lane.b32.xlu1 %v4940_v50, %s5613_s21  ;;  %v6528_v50 = vld [vmem:[#allocation7 + $0x10] sm:$0xff] }
 0xc91   :  { %v1419_v53 = vpop.permute.xlu1 %1418 }
 0xc92   :  { %v1421_v55 = vmul.f32 %v1419_v53, %v1402_v43  ;;  %v1597_v43 = vpop.f32.mrf.mxu2  ;;  %v6532_v53 = vld [vmem:[#allocation7 + $0x18] sm:$0xff] }
 0xc93   :  { %4636 = vmatmul.msk.f32.vlgmr.msra.gmra.mxu1 %vm428_vm2, %v1597_v43 }
 0xc94   :  { %1423 = vrot.lane.b32.xlu2 %v1421_v55, %s5606_s1  ;;  %2032 = vmatpush.msra.mxu1 %v6139_v60 }
 0xc96   :  { %2033 = vmatpush.msra.mxu1 %v6141_v62 }
 0xc98   :  { %2034 = vmatpush.msra.mxu1 %v6144_v16 }
 0xc9a   :  { %2035 = vmatpush.msra.mxu1 %v6147_v63  ;;  %v6470_v63 = vld [vmem:[%s7870_s12] sm:$0xf] }
 0xc9c   :  { %2036 = vmatpush.msra.mxu1 %v6150_v5 }
 0xc9e   :  { %2037 = vmatpush.msra.mxu1 %v6153_v6 }
 0xca0   :  { %2038 = vmatpush.msra.mxu1 %v6156_v27 }
 0xca2   :  { %2039 = vmatpush.msra.mxu1 %v6159_v30  ;;  %v6487_v30 = vld [vmem:[%s7869_s11 + $0x18] sm:$0xff] }
 0xcee   :  { %v1424_v61 = vpop.permute.xlu2 %1423 }
 0xcef   :  { %v1429_v58 = vsel %vm278_vm0, %v1424_v61, %v1427_v36  ;;  %v6539_v61 = vld [vmem:[#allocation11] sm:$0xf] }
 0xcf0   :  { %4617 = vmatmul.msk.f32.vlgmr.msra.gmra.mxu3 %vm759_vm4, %v1429_v58 }
 0xcf1   :  { %1621 = vmatpush.msra.mxu3 %v6351_v35 }
 0xcf3   :  { %1622 = vmatpush.msra.mxu3 %v6353_v32 }
 0xcf5   :  { %1623 = vmatpush.msra.mxu3 %v6333_v41 }
 0xcf7   :  { %1624 = vmatpush.msra.mxu3 %v6335_v21 }
 0xd73   :  { %v1450_v19 = vpop.f32.mrf.mxu3 }
 0xd74   :  { %v1451_v7 = vadd.f32 %v7924_v0, %v1450_v19 }
 0xd76   :  { %4941 = vtanh.f32 %v1451_v7  ;;  %v4618_v3 = vmul.f32 -1.442695, %v1451_v7  ;;  %v1577_v7 = vpop.f32.mrf.mxu1 }
 0xd78   :  { %4943 = vpow2.f32 %v4618_v3 }
 0xd7c   :  { %v4942_v48 = vpop.eup %4941 }
 0xd7d   :  { %1475 = vrot.lane.b32.xlu1 %v4942_v48, %s5613_s21 }
 0xd7e   :  { %v4944_v40 = vpop.eup %4943  ;;  %v1696_v48 = vpop.f32.mrf.mxu1 }
 0xd7f   :  { %v1456_v59 = vadd.f32 1.0, %v4944_v40 }
 0xd81   :  { %4945 = vrcp.f32 %v1456_v59  ;;  %v1468_v34 = vand.u32 2147483648, %v1456_v59  ;;  %vm1462_vm9 = vweird.f32 %v1456_v59  ;;  %v1466_v47 = vand.u32 2147483647, %v1456_v59 }
 0xd83   :  { %v1469_v56 = vor.u32 1.1754944e-38, %v1468_v34  ;;  %vm1467_vm11 = vcmp.eq.f32.partialorder %v1466_v47, 8.507059e+37  ;;  %v6552_v34 = vld [vmem:[#allocation14] ss:$0 sm:$0xff] }
 0xd87   :  { %v4946_v13 = vpop.eup %4945 }
 0xd88   :  { %v1458_v52 = vmul.f32 %v4946_v13, %v1456_v59  ;;  %vm1463_vm8 = vweird.f32 %v4946_v13 }
 0xd89   :  { %vm1464_vm10 = vmor %vm1462_vm9, %vm1463_vm8 }
 0xd8a   :  { %v1459_v28 = vsub.f32 1.0, %v1458_v52 }
 0xd8c   :  { %v1460_v33 = vmul.f32 %v4946_v13, %v1459_v28 }
 0xd8e   :  { %v1461_v42 = vadd.f32 %v4946_v13, %v1460_v33  ;;  %v6549_v33 = vld [vmem:[%s7917_s27] ss:$0 sm:$0xff] }
 0xd90   :  { %v1465_v51 = vsel %vm1464_vm10, %v4946_v13, %v1461_v42  ;;  %v1578_v42 = vadd.f32 %v6549_v33, %v1577_v7 }
 0xd91   :  { %v1470_v14 = vsel %vm1467_vm11, %v1469_v56, %v1465_v51 }
 0xd92   :  { %v1473_v12 = vmul.f32 %v1470_v14, %v6196_v54  ;;  %v1600_v54 = vpop.f32.mrf.mxu2  ;;  %v1763_v51 = vperm.slane %v1578_v42, 0 }
 0xd93   :  { %4637 = vmatmul.msk.f32.gmra.mxu1 %vm428_vm2, %v1600_v54 }
 0xd9a   :  { %v1603_v37 = vpop.f32.mrf.mxu2 }
 0xd9b   :  { %4638 = vmatmul.msk.f32.gmra.mxu1 %vm428_vm2, %v1603_v37 }
 0xda2   :  { %v1606_v60 = vpop.f32.mrf.mxu2 }
 0xda3   :  { %4639 = vmatmul.msk.f32.gmra.mxu1 %vm428_vm2, %v1606_v60 }
 0xdef   :  { %v1476_v1 = vpop.permute.xlu1 %1475 }
 0xdf0   :  { %v1478_v4 = vmul.f32 %v1476_v1, %v1470_v14 }
 0xdf2   :  { %1480 = vrot.lane.b32.xlu2 %v1478_v4, %s5606_s1  ;;  %v1767_v4 = vadd.f32 %v1763_v51, %v5894_v45 }
 0xe10   :  { %v1699_v59 = vpop.f32.mrf.mxu1 }
 0xe4c   :  { %v1481_v10 = vpop.permute.xlu2 %1480 }
 0xe4d   :  { %v6443_v18 = vadd.f32 %v1481_v10, %v1473_v12  ;;  %v1702_v10 = vpop.f32.mrf.mxu1 }
 0xe4f   :  { %4947 = vtanh.f32 %v6443_v18 }
 0xe55   :  { %v4948_v39 = vpop.eup %4947 }
 0xe56   :  { %1486 = vrot.lane.b32.xlu0 %v4948_v39, %s5613_s21 }
 0xe5e   :  { %1948 = vrot.lane.b32.xlu0 %v1421_v55, %s5614_s2 }
 0xec8   :  { %v1487_v24 = vpop.permute.xlu0 %1486 }
 0xec9   :  { %v6448_v15 = vmul.f32 %v1487_v24, %v1470_v14 }
 0xecb   :  { %1491 = vrot.lane.b32.xlu1 %v6448_v15, %s5606_s1 }
 0xf3d   :  { %v1492_v62 = vpop.permute.xlu1 %1491 }
 0xf3e   :  { %v1494_v16 = vsel %vm278_vm0, %v1492_v62, %v6411_v46  ;;  %v6515_v46 = vld [vmem:[#allocation8 + $0x10] sm:$0xff]  ;;  %v1762_v62 = vrot.slane %v1578_v42, 1 }
 0xf3f   :  { %4619 = vmatmul.msk.f32.vlgmr.msrb.gmra.mxu0 %vm759_vm4, %v1494_v16  ;;  %v1768_v16 = vadd.f32 %v1763_v51, %v5899_v57 }
 0xf40   :  { %4649 = vmatpush.msk.msrb.mxu0 %vm432_vm1, %v6470_v63 }
 0xf47   :  { %4631 = vmatmul.msk.f32.vlgmr.msra.gmra.mxu0 %vm428_vm2, %v6335_v21  ;;  %v6505_v21 = vld [vmem:[%s7869_s11] sm:$0xff] }
 0xf4f   :  { %4632 = vmatmul.msk.f32.gmra.mxu0 %vm428_vm2, %v6333_v41  ;;  %v6493_v41 = vld [vmem:[%s7869_s11 + $0x10] sm:$0xff] }
 0xf57   :  { %4633 = vmatmul.msk.f32.gmra.mxu0 %vm428_vm2, %v6353_v32  ;;  %v6512_v32 = vld [vmem:[#allocation8 + $0x18] sm:$0xff] }
 0xf5f   :  { %4634 = vmatmul.msk.f32.gmra.mxu0 %vm428_vm2, %v6351_v35  ;;  %v6508_v35 = vld [vmem:[#allocation7] sm:$0xff] }
 0xfbc   :  { %v1515_v5 = vpop.f32.mrf.mxu0 }
 0xfbd   :  { %v1516_v6 = vadd.f32 %v6259_v29, %v1515_v5  ;;  %v6499_v29 = vld [vmem:[%s7869_s11 + $0x8] sm:$0xff] }
 0xfbf   :  { %4949 = vtanh.f32 %v1516_v6 }
 0xfc4   :  { %v1655_v3 = vpop.f32.mrf.mxu0 }
 0xfc5   :  { %v4950_v27 = vpop.eup %4949  ;;  %v1697_v40 = vadd.f32 %v1696_v48, %v1655_v3 }
 0xfc6   :  { %4620 = vmatmul.msk.f32.vlgmr.msrb.gmra.mxu3 %vm278_vm0, %v4950_v27 }
 0xfc7   :  { %1803 = vmatpush.msrb.mxu3 %v6487_v30 }
 0xfc9   :  { %1804 = vmatpush.msrb.mxu3 %v6493_v41 }
 0xfcb   :  { %1805 = vmatpush.msrb.mxu3 %v6499_v29 }
 0xfcc   :  { %v1658_v13 = vpop.f32.mrf.mxu0 }
 0xfcd   :  { %1806 = vmatpush.msrb.mxu3 %v6505_v21  ;;  %v1700_v56 = vadd.f32 %v1699_v59, %v1658_v13 }
 0xfce   :  { %4626 = vmatmul.msk.f32.vlgmr.msra.gmra.mxu3 %vm278_vm0, %v6508_v35 }
 0xfcf   :  { %2163 = vmatpush.msra.mxu3 %v6512_v32 }
 0xfd1   :  { %2164 = vmatpush.msra.mxu3 %v6515_v46 }
 0xfd3   :  { %2165 = vmatpush.msra.mxu3 %v6518_v11 }
 0xfd4   :  { %v1661_v12 = vpop.f32.mrf.mxu0 }
 0xfd5   :  { %2166 = vmatpush.msra.mxu3 %v6521_v22  ;;  %v1703_v54 = vadd.f32 %v1702_v10, %v1661_v12  ;;  %v6587_v12 = vld [vmem:[%s7871_s13 + $0x48] sm:$0xff]  ;;  %v6593_v10 = vld [vmem:[%s7871_s13 + $0x40] sm:$0xff] }
 0xfd6   :  { %4627 = vmatmul.msk.f32.gmra.mxu3 %vm278_vm0, %v6524_v44 }
 0xfde   :  { %4628 = vmatmul.msk.f32.gmra.mxu3 %vm278_vm0, %v6528_v50 }
 0xfe6   :  { %4629 = vmatmul.msk.f32.gmra.mxu3 %vm278_vm0, %v6532_v53 }
0x1049   :  { %v6536_v55 = vpop.f32.mrf.mxu3 }
0x104a   :  { %7925 = vst [vmem:[#allocation24_spill] sm:$0xff] %v6536_v55 }
0x1051   :  { %v1626_v36 = vpop.f32.mrf.mxu3 }
0x1052   :  { %4641 = vmatmul.msk.f32.vlgmr.msrb.gmra.mxu2 %vm428_vm2, %v1626_v36  ;;  %v1664_v36 = vpop.f32.mrf.mxu0 }
0x1053   :  { %4673 = vmatpush.msk.msrb.mxu2 %vm432_vm1, %v6539_v61 }
0x1059   :  { %v1629_v58 = vpop.f32.mrf.mxu3 }
0x105a   :  { %4642 = vmatmul.msk.f32.gmra.mxu2 %vm428_vm2, %v1629_v58  ;;  %v1705_v58 = vpop.f32.mrf.mxu1 }
0x105b   :  { %v1706_v7 = vadd.f32 %v1705_v58, %v1664_v36 }
0x1061   :  { %v1632_v19 = vpop.f32.mrf.mxu3 }
0x1062   :  { %4643 = vmatmul.msk.f32.gmra.mxu2 %vm428_vm2, %v1632_v19 }
0x1069   :  { %v1635_v0 = vpop.f32.mrf.mxu3 }
0x106a   :  { %4644 = vmatmul.msk.f32.gmra.mxu2 %vm428_vm2, %v1635_v0  ;;  %v1764_v0 = vperm.slane %v1762_v62, 0  ;;  %v6635_v62 = vld [vmem:[%s7871_s13 + $0x8] sm:$0xff] }
0x106c   :  { %v1770_v42 = vadd.f32 %v1764_v0, %v5910_v38 }
0x10d5   :  { %v1737_v52 = vpop.f32.mrf.mxu2 }
0x10d6   :  { %v1749_v28 = vadd.f32 %v1737_v52, %v1697_v40  ;;  %v1769_v40 = vadd.f32 %v1764_v0, %v5904_v23 }
0x10d8   :  { %v1753_v47 = vadd.f32 %v6552_v34, %v1749_v28 }
0x10da   :  { %4951 = vtanh.f32 %v1753_v47 }
0x10dd   :  { %v1740_v1 = vpop.f32.mrf.mxu2 }
0x10de   :  { %v1750_v14 = vadd.f32 %v1740_v1, %v1700_v56  ;;  %v6568_v1 = vld [vmem:[#allocation2 + $0x6] sm:$0x3] }
0x10df   :  { %7926 = vst [vmem:[#allocation25_spill] sm:$0xff] %v6568_v1 }
0x10e0   :  { %v4952_v39 = vpop.eup %4951  ;;  %v1754_v24 = vadd.f32 %v6552_v34, %v1750_v14  ;;  %v6575_v14 = vld [vmem:[%s7871_s13 + $0x58] sm:$0xff] }
0x10e1   :  { %v1771_v43 = vadd.f32 %v4952_v39, %v1767_v4  ;;  %v6581_v4 = vld [vmem:[%s7871_s13 + $0x50] sm:$0xff]  ;;  %v6599_v39 = vld [vmem:[%s7871_s13 + $0x38] sm:$0xff] }
0x10e2   :  { %4953 = vtanh.f32 %v1754_v24  ;;  %v6605_v24 = vld [vmem:[%s7871_s13 + $0x30] sm:$0xff] }
0x10e3   :  { %4955 = vtanh.f32 %v1771_v43  ;;  %v6611_v43 = vld [vmem:[%s7871_s13 + $0x28] sm:$0xff] }
0x10e5   :  { %v1743_v37 = vpop.f32.mrf.mxu2 }
0x10e6   :  { %v1751_v60 = vadd.f32 %v1743_v37, %v1703_v54  ;;  %v6617_v54 = vld [vmem:[%s7871_s13 + $0x20] sm:$0xff]  ;;  %v6623_v37 = vld [vmem:[%s7871_s13 + $0x18] sm:$0xff] }
0x10e8   :  { %v4954_v5 = vpop.eup %4953  ;;  %v1755_v6 = vadd.f32 %v6552_v34, %v1751_v60  ;;  %v6629_v60 = vld [vmem:[%s7871_s13 + $0x10] sm:$0xff] }
0x10e9   :  { %v4956_v27 = vpop.eup %4955  ;;  %v1772_v19 = vadd.f32 %v4954_v5, %v1768_v16  ;;  %v6641_v16 = vld [vmem:[%s7871_s13] sm:$0xff] }
0x10ea   :  { %4957 = vtanh.f32 %v1755_v6  ;;  %4645 = vmatmul.msk.f32.vlgmr.msrb.gmra.mxu3 %vm278_vm0, %v4956_v27 }
0x10eb   :  { %4959 = vtanh.f32 %v1772_v19  ;;  %4678 = vmatpush.msk.msrb.mxu3 %vm432_vm1, %v6299_v31 }
0x10ed   :  { %v1746_v48 = vpop.f32.mrf.mxu2 }
0x10ee   :  { %v1752_v3 = vadd.f32 %v1746_v48, %v1706_v7 }
0x10f0   :  { %v4958_v59 = vpop.eup %4957  ;;  %v1756_v13 = vadd.f32 %v6552_v34, %v1752_v3 }
0x10f1   :  { %v4960_v52 = vpop.eup %4959  ;;  %v1773_v28 = vadd.f32 %v4958_v59, %v1769_v40 }
0x10f2   :  { %4961 = vtanh.f32 %v1756_v13  ;;  %4646 = vmatmul.msk.f32.gmra.mxu3 %vm278_vm0, %v4960_v52 }
0x10f3   :  { %4963 = vtanh.f32 %v1773_v28 }
0x10f8   :  { %v4962_v47 = vpop.eup %4961 }
0x10f9   :  { %v4964_v51 = vpop.eup %4963  ;;  %v1774_v56 = vadd.f32 %v4962_v47, %v1770_v42 }
0x10fa   :  { %4647 = vmatmul.msk.f32.gmra.mxu3 %vm278_vm0, %v4964_v51 }
0x10fb   :  { %4965 = vtanh.f32 %v1774_v56 }
0x1101   :  { %v4966_v31 = vpop.eup %4965 }
0x1102   :  { %4648 = vmatmul.msk.f32.gmra.mxu3 %vm278_vm0, %v4966_v31 }
0x110a   :  { %4664 = vmatmul.msk.f32.vlgmr.msra.gmra.mxu3 %vm278_vm0, %v6568_v1 }
0x110b   :  { %2551 = vmatpush.msra.mxu3 %v6575_v14 }
0x110d   :  { %2552 = vmatpush.msra.mxu3 %v6581_v4 }
0x110f   :  { %2553 = vmatpush.msra.mxu3 %v6587_v12 }
0x1111   :  { %2554 = vmatpush.msra.mxu3 %v6593_v10 }
0x1113   :  { %2555 = vmatpush.msra.mxu3 %v6599_v39 }
0x1115   :  { %2556 = vmatpush.msra.mxu3 %v6605_v24 }
0x1117   :  { %2557 = vmatpush.msra.mxu3 %v6611_v43 }
0x1119   :  { %2558 = vmatpush.msra.mxu3 %v6617_v54 }
0x111b   :  { %2559 = vmatpush.msra.mxu3 %v6623_v37 }
0x111d   :  { %2560 = vmatpush.msra.mxu3 %v6629_v60 }
0x111f   :  { %2561 = vmatpush.msra.mxu3 %v6635_v62 }
0x1121   :  { %2562 = vmatpush.msra.mxu3 %v6641_v16 }
0x116d   :  { %v1808_v5 = vpop.f32.mrf.mxu3 }
0x116e   :  { %v1820_v27 = vsel %vm428_vm2, %v1808_v5, -inf }
0x1175   :  { %v1811_v6 = vpop.f32.mrf.mxu3 }
0x1176   :  { %v1821_v36 = vsel %vm428_vm2, %v1811_v6, -inf }
0x1177   :  { %v1822_v58 = vmax.f32 %v1820_v27, %v1821_v36 }
0x1179   :  { %v1823_v19 = vrot.slane %v1822_v58, 4 }
0x117b   :  { %v1824_v0 = vmax.f32 %v1822_v58, %v1823_v19 }
0x117d   :  { %v1825_v7 = vrot.slane %v1824_v0, 2  ;;  %v1814_v48 = vpop.f32.mrf.mxu3 }
0x117e   :  { %v1829_v42 = vsel %vm428_vm2, %v1814_v48, -inf }
0x117f   :  { %v1826_v3 = vmax.f32 %v1824_v0, %v1825_v7 }
0x1181   :  { %v1827_v40 = vrot.slane %v1826_v3, 1 }
0x1183   :  { %v1828_v59 = vmax.f32 %v1826_v3, %v1827_v40 }
0x1185   :  { %v1838_v13 = vsub.f32 %v1808_v5, %v1828_v59  ;;  %v1839_v52 = vsub.f32 %v1811_v6, %v1828_v59  ;;  %v1817_v28 = vpop.f32.mrf.mxu3 }
0x1186   :  { %v1830_v47 = vsel %vm428_vm2, %v1817_v28, -inf }
0x1187   :  { %v1842_v51 = vmul.f32 1.442695, %v1838_v13  ;;  %v1844_v56 = vmul.f32 1.442695, %v1839_v52  ;;  %v1831_v31 = vmax.f32 %v1829_v42, %v1830_v47 }
0x1189   :  { %4967 = vpow2.f32 %v1842_v51  ;;  %v1832_v55 = vrot.slane %v1831_v31, 4 }
0x118a   :  { %4969 = vpow2.f32 %v1844_v56 }
0x118b   :  { %v1833_v27 = vmax.f32 %v1831_v31, %v1832_v55 }
0x118d   :  { %v1834_v36 = vrot.slane %v1833_v27, 2 }
0x118f   :  { %v4968_v58 = vpop.eup %4967  ;;  %v1835_v19 = vmax.f32 %v1833_v27, %v1834_v36 }
0x1190   :  { %v4970_v0 = vpop.eup %4969  ;;  %v1850_v7 = vsel %vm428_vm2, %v4968_v58, 0.0 }
0x1191   :  { %v1851_v5 = vsel %vm428_vm2, %v4970_v0, 0.0  ;;  %v1836_v6 = vrot.slane %v1835_v19, 1 }
0x1192   :  { %v1852_v3 = vadd.f32 %v1851_v5, %v1850_v7 }
0x1193   :  { %v1837_v40 = vmax.f32 %v1835_v19, %v1836_v6 }
0x1194   :  { %v1853_v59 = vrot.slane %v1852_v3, 4 }
0x1195   :  { %v1840_v9 = vsub.f32 %v1814_v48, %v1837_v40  ;;  %v1841_v13 = vsub.f32 %v1817_v28, %v1837_v40 }
0x1196   :  { %v1854_v52 = vadd.f32 %v1853_v59, %v1852_v3 }
0x1197   :  { %v1846_v42 = vmul.f32 1.442695, %v1840_v9  ;;  %v1848_v47 = vmul.f32 1.442695, %v1841_v13 }
0x1198   :  { %v1855_v51 = vrot.slane %v1854_v52, 2 }
0x1199   :  { %4971 = vpow2.f32 %v1846_v42  ;;  %v6705_v42 = vld [vmem:[%s7875_s17 + $0x30] sm:$0xff] }
0x119a   :  { %v1856_v55 = vadd.f32 %v1855_v51, %v1854_v52  ;;  %4973 = vpow2.f32 %v1848_v47  ;;  %v6699_v52 = vld [vmem:[%s7875_s17 + $0x38] sm:$0xff]  ;;  %v6731_v51 = vld [vmem:[%s7875_s17 + $0x10] sm:$0xff] }
0x119b   :  { %v6725_v47 = vld [vmem:[%s7875_s17 + $0x18] sm:$0xff]  ;;  %7928 = vst [vmem:[#allocation28_spill] sm:$0xff] %v6731_v51 }
0x119c   :  { %v1857_v56 = vrot.slane %v1856_v55, 1  ;;  %7927 = vst [vmem:[#allocation26_spill] sm:$0xff] %v6725_v47 }
0x119e   :  { %v1858_v31 = vadd.f32 %v1857_v56, %v1856_v55  ;;  %v6737_v55 = vld [vmem:[%s7875_s17 + $0x8] sm:$0xff] }
0x119f   :  { %v4972_v27 = vpop.eup %4971  ;;  %7929 = vst [vmem:[#allocation29_spill] sm:$0xff] %v6737_v55 }
0x11a0   :  { %v4974_v36 = vpop.eup %4973  ;;  %4975 = vrcp.f32 %v1858_v31  ;;  %v1859_v1 = vsel %vm428_vm2, %v4972_v27, 0.0 }
0x11a1   :  { %v1860_v7 = vsel %vm428_vm2, %v4974_v36, 0.0 }
0x11a2   :  { %v1861_v19 = vadd.f32 %v1860_v7, %v1859_v1 }
0x11a4   :  { %v1862_v5 = vrot.slane %v1861_v19, 4 }
0x11a6   :  { %v4976_v48 = vpop.eup %4975  ;;  %v1863_v28 = vadd.f32 %v1862_v5, %v1861_v19 }
0x11a7   :  { %v6652_v6 = vmul.f32 %v4976_v48, %v4970_v0  ;;  %v6654_v9 = vmul.f32 %v4976_v48, %v4968_v58 }
0x11a8   :  { %v1864_v3 = vrot.slane %v1863_v28, 2 }
0x11a9   :  { %4655 = vst.msk [vmem:[%s7880_s22 + $0x48] sm:$0xff] %vm428_vm2, %v6652_v6  ;;  %4650 = vmatmul.msk.f32.vlgmr.msrb.gmra.mxu0 %vm428_vm2, %v6654_v9 }
0x11aa   :  { %v1865_v40 = vadd.f32 %v1864_v3, %v1863_v28  ;;  %4654 = vst.msk [vmem:[%s7880_s22 + $0x40] sm:$0xff] %vm428_vm2, %v6654_v9 }
0x11ac   :  { %v1866_v1 = vrot.slane %v1865_v40, 1 }
0x11ae   :  { %v1867_v58 = vadd.f32 %v1866_v1, %v1865_v40 }
0x11b0   :  { %4977 = vrcp.f32 %v1867_v58 }
0x11b1   :  { %4651 = vmatmul.msk.f32.gmra.mxu0 %vm428_vm2, %v6652_v6 }
0x11b6   :  { %v4978_v0 = vpop.eup %4977 }
0x11b7   :  { %v6670_v59 = vmul.f32 %v4978_v0, %v4974_v36  ;;  %v6672_v13 = vmul.f32 %v4978_v0, %v4972_v27 }
0x11b9   :  { %4657 = vst.msk [vmem:[%s7880_s22 + $0x58] sm:$0xff] %vm428_vm2, %v6670_v59  ;;  %4652 = vmatmul.msk.f32.gmra.mxu0 %vm428_vm2, %v6672_v13 }
0x11ba   :  { %4656 = vst.msk [vmem:[%s7880_s22 + $0x50] sm:$0xff] %vm428_vm2, %v6672_v13  ;;  %2183 = vmatpush.msra.mxu0 %v6670_v59 }
0x11bc   :  { %2184 = vmatpush.msra.mxu0 %v6672_v13 }
0x11be   :  { %2185 = vmatpush.msra.mxu0 %v6652_v6 }
0x11c0   :  { %2186 = vmatpush.msra.mxu0 %v6654_v9 }
0x11c1   :  { %4653 = vmatmul.msk.f32.gmra.mxu0 %vm428_vm2, %v6670_v59 }
0x11c2   :  { %4683 = vmatpush.msk.msrb.mxu0 %vm432_vm1, %v6373_v25  ;;  %v6711_v25 = vld [vmem:[%s7875_s17 + $0x28] sm:$0xff] }
0x11c9   :  { %4665 = vmatmul.msk.f32.vlgmr.msra.gmra.mxu0 %vm278_vm0, %v6377_v17  ;;  %v6717_v17 = vld [vmem:[%s7875_s17 + $0x20] sm:$0xff] }
0x11ca   :  { %2688 = vmatpush.msra.mxu0 %v6699_v52 }
0x11cc   :  { %2689 = vmatpush.msra.mxu0 %v6705_v42 }
0x11ce   :  { %2690 = vmatpush.msra.mxu0 %v6711_v25 }
0x11d0   :  { %2691 = vmatpush.msra.mxu0 %v6717_v17 }
0x11d1   :  { %4666 = vmatmul.msk.f32.gmra.mxu0 %vm278_vm0, %v6385_v8  ;;  %v6743_v8 = vld [vmem:[%s7875_s17] sm:$0xff] }
0x11d2   :  { %2692 = vmatpush.msra.mxu0 %v6725_v47  ;;  %7930 = vst [vmem:[#allocation30_spill] sm:$0xff] %v6743_v8 }
0x11d4   :  { %2693 = vmatpush.msra.mxu0 %v6731_v51 }
0x11d6   :  { %2694 = vmatpush.msra.mxu0 %v6737_v55 }
0x11d8   :  { %2695 = vmatpush.msra.mxu0 %v6743_v8 }
0x11d9   :  { %4667 = vmatmul.msk.f32.gmra.mxu0 %vm278_vm0, %v6393_v20 }
0x11e1   :  { %4668 = vmatmul.msk.f32.gmra.mxu0 %vm278_vm0, %v6397_v26 }
0x1226   :  { %v1903_v56 = vpop.f32.mrf.mxu0 }
0x1227   :  { %v1915_v36 = vmul.f32 %v1903_v56, %v5894_v45 }
0x1229   :  { %v1919_v19 = vsel %vm278_vm0, %v1915_v36, 0.0 }
0x122e   :  { %v1906_v31 = vpop.f32.mrf.mxu0 }
0x122f   :  { %v1916_v27 = vmul.f32 %v1906_v31, %v5899_v57 }
0x1231   :  { %v1920_v7 = vsel %vm278_vm0, %v1916_v27, 0.0 }
0x1232   :  { %v1921_v5 = vadd.f32 %v1920_v7, %v1919_v19 }
0x1234   :  { %v1922_v28 = vrot.slane %v1921_v5, 4 }
0x1236   :  { %v1909_v48 = vpop.f32.mrf.mxu0  ;;  %v1923_v40 = vadd.f32 %v1922_v28, %v1921_v5  ;;  %v1949_v28 = vpop.permute.xlu0 %1948 }
0x1237   :  { %v1917_v3 = vmul.f32 %v1909_v48, %v5904_v23 }
0x1238   :  { %v1924_v0 = vrot.slane %v1923_v40, 2 }
0x1239   :  { %v1928_v26 = vsel %vm278_vm0, %v1917_v3, 0.0 }
0x123a   :  { %v1925_v27 = vadd.f32 %v1924_v0, %v1923_v40  ;;  %v6794_v40 = vld [vmem:[%s7872_s14] ss:$0 sm:$0xff] }
0x123c   :  { %v1926_v36 = vrot.slane %v1925_v27, 1 }
0x123e   :  { %v1912_v20 = vpop.f32.mrf.mxu0  ;;  %v1927_v51 = vadd.f32 %v1926_v36, %v1925_v27 }
0x123f   :  { %v1918_v1 = vmul.f32 %v1912_v20, %v5910_v38 }
0x1241   :  { %v1929_v58 = vsel %vm278_vm0, %v1918_v1, 0.0 }
0x1242   :  { %v1930_v31 = vadd.f32 %v1929_v58, %v1928_v26 }
0x1244   :  { %v1931_v56 = vrot.slane %v1930_v31, 4 }
0x1246   :  { %v1932_v8 = vadd.f32 %v1931_v56, %v1930_v31 }
0x1248   :  { %v1933_v55 = vrot.slane %v1932_v8, 2 }
0x124a   :  { %v1934_v7 = vadd.f32 %v1933_v55, %v1932_v8  ;;  %v6770_v55 = vld [vmem:[%s7877_s19 + $0x18] sm:$0xff] }
0x124c   :  { %v1935_v19 = vrot.slane %v1934_v7, 1 }
0x124e   :  { %v1936_v47 = vadd.f32 %v1935_v19, %v1934_v7 }
0x1250   :  { %v1944_v5 = vsel %vm753_vm3, %v1936_v47, %v1927_v51  ;;  %v6776_v47 = vld [vmem:[%s7877_s19 + $0x10] sm:$0xff]  ;;  %v6788_v51 = vld [vmem:[%s7877_s19] sm:$0xff] }
0x1251   :  { %1945 = vrot.lane.b32.xlu2 %v1944_v5, %s5606_s1 }
0x12ab   :  { %v6760_v48 = vpop.permute.xlu2 %1945 }
0x12ac   :  { %v1951_v3 = vsel %vm278_vm0, %v6309_v2, %v6760_v48  ;;  %v6782_v2 = vld [vmem:[%s7877_s19 + $0x8] sm:$0xff] }
0x12ad   :  { %v1952_v20 = vsel %vm759_vm4, %v1951_v3, %v1949_v28 }
0x12ae   :  { %4658 = vmatmul.msk.f32.vlgmr.msrb.gmra.mxu1 %vm764_vm5, %v1952_v20 }
0x12af   :  { %2125 = vmatpush.msrb.mxu1 %v6770_v55 }
0x12b1   :  { %2126 = vmatpush.msrb.mxu1 %v6776_v47 }
0x12b3   :  { %2127 = vmatpush.msrb.mxu1 %v6782_v2 }
0x12b5   :  { %2128 = vmatpush.msrb.mxu1 %v6788_v51 }
0x132b   :  { %v1973_v8 = vpop.f32.mrf.mxu1 }
0x132c   :  { %v1974_v1 = vadd.f32 %v6794_v40, %v1973_v8 }
0x132e   :  { %4979 = vtanh.f32 %v1974_v1  ;;  %v4659_v58 = vmul.f32 -1.442695, %v1974_v1 }
0x1330   :  { %4981 = vpow2.f32 %v4659_v58 }
0x1334   :  { %v4980_v26 = vpop.eup %4979 }
0x1335   :  { %1998 = vrot.lane.b32.xlu1 %v4980_v26, %s5613_s21 }
0x1336   :  { %v4982_v0 = vpop.eup %4981 }
0x1337   :  { %v1979_v31 = vadd.f32 1.0, %v4982_v0 }
0x1339   :  { %4983 = vrcp.f32 %v1979_v31  ;;  %v1991_v5 = vand.u32 2147483648, %v1979_v31  ;;  %vm1985_vm13 = vweird.f32 %v1979_v31  ;;  %v1989_v28 = vand.u32 2147483647, %v1979_v31 }
0x133b   :  { %v1992_v20 = vor.u32 1.1754944e-38, %v1991_v5  ;;  %vm1990_vm15 = vcmp.eq.f32.partialorder %v1989_v28, 8.507059e+37 }
0x133f   :  { %v4984_v56 = vpop.eup %4983 }
0x1340   :  { %v1981_v27 = vmul.f32 %v4984_v56, %v1979_v31  ;;  %vm1986_vm12 = vweird.f32 %v4984_v56 }
0x1341   :  { %vm1987_vm14 = vmor %vm1985_vm13, %vm1986_vm12 }
0x1342   :  { %v1982_v36 = vsub.f32 1.0, %v1981_v27 }
0x1344   :  { %v1983_v7 = vmul.f32 %v4984_v56, %v1982_v36 }
0x1346   :  { %v1984_v19 = vadd.f32 %v4984_v56, %v1983_v7 }
0x1348   :  { %v1988_v3 = vsel %vm1987_vm14, %v4984_v56, %v1984_v19 }
0x1349   :  { %v1993_v26 = vsel %vm1990_vm15, %v1992_v20, %v1988_v3 }
0x134a   :  { %v1996_v58 = vmul.f32 %v1993_v26, %v6428_v49 }
0x13a7   :  { %v1999_v8 = vpop.permute.xlu1 %1998 }
0x13a8   :  { %v2001_v1 = vmul.f32 %v1999_v8, %v1993_v26 }
0x13aa   :  { %2003 = vrot.lane.b32.xlu2 %v2001_v1, %s5606_s1 }
0x13b2   :  { %2017 = vrot.lane.b32.xlu2 %v6448_v15, %s5613_s21  ;;  %v6816_v15 = vld [vmem:[%s7874_s16] ss:$0 sm:$0xff] }
0x13b3   :  { %7932 = vst [vmem:[#allocation32_spill] sm:$0xff] %v6816_v15 }
0x1404   :  { %v2004_v0 = vpop.permute.xlu2 %2003 }
0x1405   :  { %v6802_v27 = vadd.f32 %v2004_v0, %v1996_v58 }
0x1407   :  { %7931 = vst [vmem:[#allocation31_spill] sm:$0xff] %v6802_v27  ;;  %4985 = vtanh.f32 %v6802_v27 }
0x140c   :  { %v2018_v7 = vpop.permute.xlu2 %2017 }
0x140d   :  { %v4986_v31 = vpop.eup %4985 }
0x140e   :  { %2009 = vrot.lane.b32.xlu0 %v4986_v31, %s5613_s21 }
0x1480   :  { %v2010_v56 = vpop.permute.xlu0 %2009 }
0x1481   :  { %v2012_v36 = vmul.f32 %v2010_v56, %v1993_v26 }
0x1483   :  { %2014 = vrot.lane.b32.xlu1 %v2012_v36, %s5606_s1 }
0x14f5   :  { %v2015_v19 = vpop.permute.xlu1 %2014 }
0x14f6   :  { %v2020_v5 = vsel %vm278_vm0, %v2015_v19, %v2018_v7 }
0x14f7   :  { %4660 = vmatmul.msk.f32.vlgmr.msra.gmra.mxu1 %vm759_vm4, %v2020_v5 }
0x14f8   :  { %2212 = vmatpush.msra.mxu1 %v6670_v59 }
0x14fa   :  { %2213 = vmatpush.msra.mxu1 %v6672_v13 }
0x14fc   :  { %2214 = vmatpush.msra.mxu1 %v6652_v6 }
0x14fe   :  { %2215 = vmatpush.msra.mxu1 %v6654_v9 }
0x1574   :  { %v2041_v49 = vpop.f32.mrf.mxu1 }
0x1575   :  { %v2042_v28 = vadd.f32 %v6816_v15, %v2041_v49 }
0x1577   :  { %4987 = vtanh.f32 %v2042_v28  ;;  %v4661_v20 = vmul.f32 -1.442695, %v2042_v28 }
0x1579   :  { %4989 = vpow2.f32 %v4661_v20 }
0x157d   :  { %v4988_v3 = vpop.eup %4987 }
0x157e   :  { %2066 = vrot.lane.b32.xlu0 %v4988_v3, %s5613_s21 }
0x157f   :  { %v4990_v8 = vpop.eup %4989 }
0x1580   :  { %v2047_v26 = vadd.f32 1.0, %v4990_v8 }
0x1582   :  { %4991 = vrcp.f32 %v2047_v26  ;;  %v2059_v7 = vand.u32 2147483648, %v2047_v26  ;;  %vm2053_vm7 = vweird.f32 %v2047_v26  ;;  %v2057_v19 = vand.u32 2147483647, %v2047_v26 }
0x1584   :  { %v2060_v49 = vor.u32 1.1754944e-38, %v2059_v7  ;;  %vm2058_vm9 = vcmp.eq.f32.partialorder %v2057_v19, 8.507059e+37  ;;  %v6845_v7 = vld [vmem:[#allocation16 + $0x18] sm:$0xff]  ;;  %v6848_v19 = vld [vmem:[#allocation16 + $0x10] sm:$0xff] }
0x1588   :  { %v4992_v1 = vpop.eup %4991 }
0x1589   :  { %v2049_v58 = vmul.f32 %v4992_v1, %v2047_v26  ;;  %vm2054_vm6 = vweird.f32 %v4992_v1 }
0x158a   :  { %vm2055_vm8 = vmor %vm2053_vm7, %vm2054_vm6 }
0x158b   :  { %v2050_v0 = vsub.f32 1.0, %v2049_v58 }
0x158d   :  { %v2051_v31 = vmul.f32 %v4992_v1, %v2050_v0  ;;  %v6835_v0 = vld [vmem:[#allocation16 + $0x30] sm:$0xff] }
0x158f   :  { %v2052_v56 = vadd.f32 %v4992_v1, %v2051_v31  ;;  %v6838_v31 = vld [vmem:[#allocation16 + $0x28] sm:$0xff] }
0x1591   :  { %v2056_v5 = vsel %vm2055_vm8, %v4992_v1, %v2052_v56  ;;  %v6841_v56 = vld [vmem:[#allocation16 + $0x20] sm:$0xff] }
0x1592   :  { %v2061_v3 = vsel %vm2058_vm9, %v2060_v49, %v2056_v5  ;;  %v6851_v5 = vld [vmem:[#allocation16 + $0x8] sm:$0xff] }
0x1593   :  { %v2064_v20 = vmul.f32 %v2061_v3, %v6443_v18  ;;  %v6832_v18 = vld [vmem:[#allocation16 + $0x38] sm:$0xff] }
0x15f0   :  { %v2067_v15 = vpop.permute.xlu0 %2066 }
0x15f1   :  { %v2069_v28 = vmul.f32 %v2067_v15, %v2061_v3  ;;  %v2188_v15 = vpop.f32.mrf.mxu0 }
0x15f2   :  { %4679 = vmatmul.msk.f32.vlgmr.msrb.gmra.mxu3 %vm428_vm2, %v2188_v15 }
0x15f3   :  { %2071 = vrot.lane.b32.xlu1 %v2069_v28, %s5606_s1  ;;  %2623 = vmatpush.msrb.mxu3 %v6832_v18 }
0x15f5   :  { %2624 = vmatpush.msrb.mxu3 %v6835_v0 }
0x15f7   :  { %2625 = vmatpush.msrb.mxu3 %v6838_v31 }
0x15f9   :  { %2626 = vmatpush.msrb.mxu3 %v6841_v56 }
0x15fb   :  { %2627 = vmatpush.msrb.mxu3 %v6845_v7 }
0x15fd   :  { %2628 = vmatpush.msrb.mxu3 %v6848_v19 }
0x15ff   :  { %2629 = vmatpush.msrb.mxu3 %v6851_v5 }
0x1665   :  { %v2072_v8 = vpop.permute.xlu1 %2071 }
0x1666   :  { %v6822_v27 = vadd.f32 %v2072_v8, %v2064_v20 }
0x1668   :  { %4993 = vtanh.f32 %v6822_v27 }
0x166e   :  { %v4994_v58 = vpop.eup %4993 }
0x166f   :  { %2077 = vrot.lane.b32.xlu2 %v4994_v58, %s5613_s21 }
0x1677   :  { %2539 = vrot.lane.b32.xlu2 %v2012_v36, %s5614_s2  ;;  %v2191_v36 = vpop.f32.mrf.mxu0 }
0x1678   :  { %4680 = vmatmul.msk.f32.gmra.mxu3 %vm428_vm2, %v2191_v36 }
0x167f   :  { %v2194_v49 = vpop.f32.mrf.mxu0 }
0x1680   :  { %4681 = vmatmul.msk.f32.gmra.mxu3 %vm428_vm2, %v2194_v49 }
0x1687   :  { %v2197_v28 = vpop.f32.mrf.mxu0 }
0x1688   :  { %4682 = vmatmul.msk.f32.gmra.mxu3 %vm428_vm2, %v2197_v28 }
0x16c9   :  { %v2078_v26 = vpop.permute.xlu2 %2077 }
0x16ca   :  { %v6827_v1 = vmul.f32 %v2078_v26, %v2061_v3  ;;  %v6854_v3 = vld [vmem:[#allocation16] sm:$0xff] }
0x16cb   :  { %2630 = vmatpush.msrb.mxu3 %v6854_v3 }
0x16cc   :  { %2082 = vrot.lane.b32.xlu0 %v6827_v1, %s5606_s1 }
0x173e   :  { %v2083_v20 = vpop.permute.xlu0 %2082 }
0x173f   :  { %v2085_v8 = vsel %vm278_vm0, %v2083_v20, %v6760_v48  ;;  %v6875_v48 = vld [vmem:[%s7876_s18] ss:$0 sm:$0xff] }
0x1740   :  { %4662 = vmatmul.msk.f32.vlgmr.msra.gmra.mxu2 %vm759_vm4, %v2085_v8 }
0x1741   :  { %4692 = vmatpush.msk.msra.mxu2 %vm432_vm1, %v6470_v63 }
0x1748   :  { %4674 = vmatmul.msk.f32.vlgmr.msrb.gmra.mxu2 %vm428_vm2, %v6654_v9 }
0x1750   :  { %4675 = vmatmul.msk.f32.gmra.mxu2 %vm428_vm2, %v6652_v6 }
0x1758   :  { %4676 = vmatmul.msk.f32.gmra.mxu2 %vm428_vm2, %v6672_v13 }
0x1760   :  { %4677 = vmatmul.msk.f32.gmra.mxu2 %vm428_vm2, %v6670_v59 }
0x17c3   :  { %v2106_v58 = vpop.f32.mrf.mxu2 }
0x17c4   :  { %v2107_v63 = vadd.f32 %v6875_v48, %v2106_v58 }
0x17c6   :  { %4995 = vtanh.f32 %v2107_v63 }
0x17cc   :  { %v4996_v26 = vpop.eup %4995 }
0x17cd   :  { %4663 = vmatmul.msk.f32.vlgmr.msrb.gmra.mxu1 %vm278_vm0, %v4996_v26 }
0x17ce   :  { %2394 = vmatpush.msrb.mxu1 %v6487_v30 }
0x17d0   :  { %2395 = vmatpush.msrb.mxu1 %v6493_v41 }
0x17d2   :  { %2396 = vmatpush.msrb.mxu1 %v6499_v29 }
0x17d4   :  { %2397 = vmatpush.msrb.mxu1 %v6505_v21 }
0x17d5   :  { %4669 = vmatmul.msk.f32.vlgmr.msra.gmra.mxu1 %vm278_vm0, %v6508_v35 }
0x17d6   :  { %2754 = vmatpush.msra.mxu1 %v6512_v32  ;;  %v2168_v32 = vpop.f32.mrf.mxu3 }
0x17d7   :  { %v2169_v9 = vadd.f32 %v6549_v33, %v2168_v32 }
0x17d8   :  { %2755 = vmatpush.msra.mxu1 %v6515_v46 }
0x17d9   :  { %v2354_v59 = vperm.slane %v2169_v9, 0 }
0x17da   :  { %2756 = vmatpush.msra.mxu1 %v6518_v11  ;;  %v2246_v11 = vpop.f32.mrf.mxu2 }
0x17db   :  { %v2358_v49 = vadd.f32 %v2354_v59, %v5894_v45 }
0x17dc   :  { %2757 = vmatpush.msra.mxu1 %v6521_v22 }
0x17dd   :  { %4670 = vmatmul.msk.f32.gmra.mxu1 %vm278_vm0, %v6524_v44 }
0x17de   :  { %v2287_v46 = vpop.f32.mrf.mxu3 }
0x17df   :  { %v2288_v22 = vadd.f32 %v2287_v46, %v2246_v11 }
0x17e5   :  { %4671 = vmatmul.msk.f32.gmra.mxu1 %vm278_vm0, %v6528_v50  ;;  %v2249_v50 = vpop.f32.mrf.mxu2 }
0x17e6   :  { %v2290_v44 = vpop.f32.mrf.mxu3 }
0x17e7   :  { %v2291_v13 = vadd.f32 %v2290_v44, %v2249_v50 }
0x17ed   :  { %4672 = vmatmul.msk.f32.gmra.mxu1 %vm278_vm0, %v6532_v53  ;;  %v2252_v28 = vpop.f32.mrf.mxu2 }
0x17ee   :  { %v2293_v20 = vpop.f32.mrf.mxu3 }
0x17ef   :  { %v2294_v26 = vadd.f32 %v2293_v20, %v2252_v28 }
0x17f5   :  { %v2255_v11 = vpop.f32.mrf.mxu2 }
0x184a   :  { %v6895_v30 = vpop.f32.mrf.mxu1 }
0x184b   :  { %7933 = vst [vmem:[#allocation33_spill] sm:$0xff] %v6895_v30 }
0x1852   :  { %v2217_v41 = vpop.f32.mrf.mxu1 }
0x1853   :  { %4684 = vmatmul.msk.f32.vlgmr.msrb.gmra.mxu0 %vm428_vm2, %v2217_v41 }
0x1854   :  { %4716 = vmatpush.msk.msrb.mxu0 %vm432_vm1, %v6539_v61 }
0x185a   :  { %v2220_v29 = vpop.f32.mrf.mxu1 }
0x185b   :  { %4685 = vmatmul.msk.f32.gmra.mxu0 %vm428_vm2, %v2220_v29  ;;  %v2353_v29 = vrot.slane %v2169_v9, 1 }
0x185d   :  { %v2355_v50 = vperm.slane %v2353_v29, 0 }
0x185f   :  { %v2361_v28 = vadd.f32 %v2355_v50, %v5910_v38 }
0x1862   :  { %v2223_v21 = vpop.f32.mrf.mxu1 }
0x1863   :  { %4686 = vmatmul.msk.f32.gmra.mxu0 %vm428_vm2, %v2223_v21  ;;  %v2359_v21 = vadd.f32 %v2354_v59, %v5899_v57  ;;  %v2360_v59 = vadd.f32 %v2355_v50, %v5904_v23 }
0x186a   :  { %v2226_v35 = vpop.f32.mrf.mxu1 }
0x186b   :  { %4687 = vmatmul.msk.f32.gmra.mxu0 %vm428_vm2, %v2226_v35 }
0x18d0   :  { %v2328_v53 = vpop.f32.mrf.mxu0 }
0x18d1   :  { %v2340_v6 = vadd.f32 %v2328_v53, %v2288_v22  ;;  %v2296_v22 = vpop.f32.mrf.mxu3  ;;  %v6913_v53 = vld [vmem:[%s7865_s7] sm:$0xf] }
0x18d3   :  { %v2344_v61 = vadd.f32 %v6552_v34, %v2340_v6  ;;  %v2297_v6 = vadd.f32 %v2296_v22, %v2255_v11 }
0x18d5   :  { %4997 = vtanh.f32 %v2344_v61 }
0x18d8   :  { %v2331_v15 = vpop.f32.mrf.mxu0 }
0x18d9   :  { %v2341_v36 = vadd.f32 %v2331_v15, %v2291_v13 }
0x18db   :  { %v4998_v8 = vpop.eup %4997  ;;  %v2345_v58 = vadd.f32 %v6552_v34, %v2341_v36 }
0x18dc   :  { %v2362_v63 = vadd.f32 %v4998_v8, %v2358_v49 }
0x18dd   :  { %4999 = vtanh.f32 %v2345_v58 }
0x18de   :  { %5001 = vtanh.f32 %v2362_v63 }
0x18e0   :  { %v2334_v41 = vpop.f32.mrf.mxu0 }
0x18e1   :  { %v2342_v33 = vadd.f32 %v2334_v41, %v2294_v26  ;;  %v6923_v26 = vld [vmem:[#allocation2 + $0x8] sm:$0x3] }
0x18e3   :  { %v5000_v35 = vpop.eup %4999  ;;  %v2346_v32 = vadd.f32 %v6552_v34, %v2342_v33 }
0x18e4   :  { %v5002_v46 = vpop.eup %5001  ;;  %v2363_v44 = vadd.f32 %v5000_v35, %v2359_v21 }
0x18e5   :  { %5003 = vtanh.f32 %v2346_v32  ;;  %4688 = vmatmul.msk.f32.vlgmr.msrb.gmra.mxu1 %vm278_vm0, %v5002_v46 }
0x18e6   :  { %5005 = vtanh.f32 %v2363_v44  ;;  %4721 = vmatpush.msk.msrb.mxu1 %vm432_vm1, %v6913_v53 }
0x18e8   :  { %v2337_v9 = vpop.f32.mrf.mxu0 }
0x18e9   :  { %v2343_v61 = vadd.f32 %v2337_v9, %v2297_v6 }
0x18eb   :  { %v5004_v13 = vpop.eup %5003  ;;  %v2347_v15 = vadd.f32 %v6552_v34, %v2343_v61 }
0x18ec   :  { %v5006_v36 = vpop.eup %5005  ;;  %v2364_v49 = vadd.f32 %v5004_v13, %v2360_v59 }
0x18ed   :  { %5007 = vtanh.f32 %v2347_v15  ;;  %4689 = vmatmul.msk.f32.gmra.mxu1 %vm278_vm0, %v5006_v36 }
0x18ee   :  { %5009 = vtanh.f32 %v2364_v49 }
0x18f3   :  { %v5008_v20 = vpop.eup %5007 }
0x18f4   :  { %v5010_v8 = vpop.eup %5009  ;;  %v2365_v58 = vadd.f32 %v5008_v20, %v2361_v28 }
0x18f5   :  { %4690 = vmatmul.msk.f32.gmra.mxu1 %vm278_vm0, %v5010_v8 }
0x18f6   :  { %5011 = vtanh.f32 %v2365_v58 }
0x18fc   :  { %v5012_v63 = vpop.eup %5011 }
0x18fd   :  { %4691 = vmatmul.msk.f32.gmra.mxu1 %vm278_vm0, %v5012_v63 }
0x1905   :  { %4707 = vmatmul.msk.f32.vlgmr.msra.gmra.mxu1 %vm278_vm0, %v6923_v26 }
0x1906   :  { %3142 = vmatpush.msra.mxu1 %v6575_v14 }
0x1908   :  { %3143 = vmatpush.msra.mxu1 %v6581_v4 }
0x190a   :  { %3144 = vmatpush.msra.mxu1 %v6587_v12 }
0x190c   :  { %3145 = vmatpush.msra.mxu1 %v6593_v10 }
0x190e   :  { %3146 = vmatpush.msra.mxu1 %v6599_v39 }
0x1910   :  { %3147 = vmatpush.msra.mxu1 %v6605_v24 }
0x1912   :  { %3148 = vmatpush.msra.mxu1 %v6611_v43 }
0x1914   :  { %3149 = vmatpush.msra.mxu1 %v6617_v54 }
0x1916   :  { %3150 = vmatpush.msra.mxu1 %v6623_v37 }
0x1918   :  { %3151 = vmatpush.msra.mxu1 %v6629_v60 }
0x191a   :  { %3152 = vmatpush.msra.mxu1 %v6635_v62 }
0x191c   :  { %3153 = vmatpush.msra.mxu1 %v6641_v16 }
0x1962   :  { %v2399_v34 = vpop.f32.mrf.mxu1 }
0x1963   :  { %v2411_v4 = vsel %vm428_vm2, %v2399_v34, -inf }
0x196a   :  { %v2402_v14 = vpop.f32.mrf.mxu1 }
0x196b   :  { %v2412_v12 = vsel %vm428_vm2, %v2402_v14, -inf }
0x196c   :  { %v2413_v10 = vmax.f32 %v2411_v4, %v2412_v12 }
0x196e   :  { %v2414_v39 = vrot.slane %v2413_v10, 4 }
0x1970   :  { %v2415_v24 = vmax.f32 %v2413_v10, %v2414_v39 }
0x1972   :  { %v2416_v43 = vrot.slane %v2415_v24, 2  ;;  %v2405_v41 = vpop.f32.mrf.mxu1 }
0x1973   :  { %v2420_v62 = vsel %vm428_vm2, %v2405_v41, -inf }
0x1974   :  { %v2417_v54 = vmax.f32 %v2415_v24, %v2416_v43 }
0x1976   :  { %v2418_v33 = vrot.slane %v2417_v54, 1 }
0x1978   :  { %v2419_v37 = vmax.f32 %v2417_v54, %v2418_v33 }
0x197a   :  { %v2429_v29 = vsub.f32 %v2399_v34, %v2419_v37  ;;  %v2430_v60 = vsub.f32 %v2402_v14, %v2419_v37  ;;  %v2408_v21 = vpop.f32.mrf.mxu1 }
0x197b   :  { %v2421_v16 = vsel %vm428_vm2, %v2408_v21, -inf }
0x197c   :  { %v2433_v35 = vmul.f32 1.442695, %v2429_v29  ;;  %v2435_v32 = vmul.f32 1.442695, %v2430_v60  ;;  %v2422_v46 = vmax.f32 %v2420_v62, %v2421_v16 }
0x197e   :  { %5013 = vpow2.f32 %v2433_v35  ;;  %v2423_v11 = vrot.slane %v2422_v46, 4 }
0x197f   :  { %5015 = vpow2.f32 %v2435_v32 }
0x1980   :  { %v2424_v22 = vmax.f32 %v2422_v46, %v2423_v11 }
0x1982   :  { %v2425_v44 = vrot.slane %v2424_v22, 2 }
0x1984   :  { %v5014_v50 = vpop.eup %5013  ;;  %v2426_v6 = vmax.f32 %v2424_v22, %v2425_v44  ;;  %v6987_v22 = vld [vmem:[#allocation13] sm:$0xf] }
0x1985   :  { %v5016_v9 = vpop.eup %5015  ;;  %v2441_v61 = vsel %vm428_vm2, %v5014_v50, 0.0  ;;  %v6991_v44 = vld [vmem:[#allocation5] sm:$0xff] }
0x1986   :  { %v2442_v59 = vsel %vm428_vm2, %v5016_v9, 0.0  ;;  %v2427_v13 = vrot.slane %v2426_v6, 1 }
0x1987   :  { %v2443_v15 = vadd.f32 %v2442_v59, %v2441_v61  ;;  %v7936_v61 = vld [vmem:[#allocation29_spill] sm:$0xff]  ;;  %v7937_v59 = vld [vmem:[#allocation30_spill] sm:$0xff] }
0x1988   :  { %v2428_v36 = vmax.f32 %v2426_v6, %v2427_v13  ;;  %v7934_v6 = vld [vmem:[#allocation26_spill] sm:$0xff] }
0x1989   :  { %v2444_v49 = vrot.slane %v2443_v15, 4 }
0x198a   :  { %v2431_v28 = vsub.f32 %v2405_v41, %v2428_v36  ;;  %v2432_v20 = vsub.f32 %v2408_v21, %v2428_v36 }
0x198b   :  { %v2445_v8 = vadd.f32 %v2444_v49, %v2443_v15 }
0x198c   :  { %v2437_v58 = vmul.f32 1.442695, %v2431_v28  ;;  %v2439_v63 = vmul.f32 1.442695, %v2432_v20 }
0x198d   :  { %v2446_v34 = vrot.slane %v2445_v8, 2 }
0x198e   :  { %5017 = vpow2.f32 %v2437_v58 }
0x198f   :  { %v2447_v14 = vadd.f32 %v2446_v34, %v2445_v8  ;;  %5019 = vpow2.f32 %v2439_v63 }
0x1991   :  { %v2448_v4 = vrot.slane %v2447_v14, 1 }
0x1993   :  { %v2449_v12 = vadd.f32 %v2448_v4, %v2447_v14 }
0x1994   :  { %v5018_v10 = vpop.eup %5017 }
0x1995   :  { %v5020_v39 = vpop.eup %5019  ;;  %5021 = vrcp.f32 %v2449_v12  ;;  %v2450_v24 = vsel %vm428_vm2, %v5018_v10, 0.0 }
0x1996   :  { %v2451_v43 = vsel %vm428_vm2, %v5020_v39, 0.0 }
0x1997   :  { %v2452_v54 = vadd.f32 %v2451_v43, %v2450_v24 }
0x1999   :  { %v2453_v33 = vrot.slane %v2452_v54, 4 }
0x199b   :  { %v5022_v41 = vpop.eup %5021  ;;  %v2454_v37 = vadd.f32 %v2453_v33, %v2452_v54 }
0x199c   :  { %v6947_v29 = vmul.f32 %v5022_v41, %v5014_v50  ;;  %v6949_v60 = vmul.f32 %v5022_v41, %v5016_v9  ;;  %v6999_v50 = vld [vmem:[#allocation5 + $0x8] sm:$0xff]  ;;  %v7935_v9 = vld [vmem:[#allocation28_spill] sm:$0xff] }
0x199d   :  { %v2455_v21 = vrot.slane %v2454_v37, 2 }
0x199e   :  { %4697 = vst.msk [vmem:[%s7880_s22 + $0x60] sm:$0xff] %vm428_vm2, %v6947_v29  ;;  %4693 = vmatmul.msk.f32.vlgmr.msra.gmra.mxu2 %vm428_vm2, %v6947_v29 }
0x199f   :  { %4698 = vst.msk [vmem:[%s7880_s22 + $0x68] sm:$0xff] %vm428_vm2, %v6949_v60  ;;  %v2456_v62 = vadd.f32 %v2455_v21, %v2454_v37 }
0x19a1   :  { %v2457_v16 = vrot.slane %v2456_v62, 1 }
0x19a3   :  { %v2458_v35 = vadd.f32 %v2457_v16, %v2456_v62 }
0x19a5   :  { %5023 = vrcp.f32 %v2458_v35 }
0x19a6   :  { %4694 = vmatmul.msk.f32.gmra.mxu2 %vm428_vm2, %v6949_v60 }
0x19ab   :  { %v5024_v32 = vpop.eup %5023 }
0x19ac   :  { %v6965_v46 = vmul.f32 %v5024_v32, %v5020_v39  ;;  %v6967_v11 = vmul.f32 %v5024_v32, %v5018_v10 }
0x19ae   :  { %4700 = vst.msk [vmem:[%s7880_s22 + $0x78] sm:$0xff] %vm428_vm2, %v6965_v46  ;;  %4695 = vmatmul.msk.f32.gmra.mxu2 %vm428_vm2, %v6967_v11 }
0x19af   :  { %4699 = vst.msk [vmem:[%s7880_s22 + $0x70] sm:$0xff] %vm428_vm2, %v6967_v11  ;;  %2774 = vmatpush.msrb.mxu2 %v6965_v46 }
0x19b1   :  { %2775 = vmatpush.msrb.mxu2 %v6967_v11 }
0x19b3   :  { %2776 = vmatpush.msrb.mxu2 %v6949_v60 }
0x19b5   :  { %2777 = vmatpush.msrb.mxu2 %v6947_v29 }
0x19b6   :  { %4696 = vmatmul.msk.f32.gmra.mxu2 %vm428_vm2, %v6965_v46 }
0x19b7   :  { %4726 = vmatpush.msk.msra.mxu2 %vm432_vm1, %v6987_v22 }
0x19be   :  { %4708 = vmatmul.msk.f32.vlgmr.msrb.gmra.mxu2 %vm278_vm0, %v6991_v44 }
0x19bf   :  { %3279 = vmatpush.msrb.mxu2 %v6699_v52  ;;  %v7007_v52 = vld [vmem:[#allocation5 + $0x10] sm:$0xff] }
0x19c1   :  { %3280 = vmatpush.msrb.mxu2 %v6705_v42  ;;  %v7011_v42 = vld [vmem:[#allocation5 + $0x18] sm:$0xff] }
0x19c3   :  { %3281 = vmatpush.msrb.mxu2 %v6711_v25 }
0x19c5   :  { %3282 = vmatpush.msrb.mxu2 %v6717_v17 }
0x19c6   :  { %4709 = vmatmul.msk.f32.gmra.mxu2 %vm278_vm0, %v6999_v50 }
0x19c7   :  { %3283 = vmatpush.msrb.mxu2 %v7934_v6  ;;  %v2540_v6 = vpop.permute.xlu2 %2539 }
0x19c9   :  { %3284 = vmatpush.msrb.mxu2 %v7935_v9  ;;  %v7938_v9 = vld [vmem:[#allocation25_spill] sm:$0xff] }
0x19cb   :  { %3285 = vmatpush.msrb.mxu2 %v7936_v61 }
0x19cd   :  { %3286 = vmatpush.msrb.mxu2 %v7937_v59 }
0x19ce   :  { %4710 = vmatmul.msk.f32.gmra.mxu2 %vm278_vm0, %v7007_v52 }
0x19d6   :  { %4711 = vmatmul.msk.f32.gmra.mxu2 %vm278_vm0, %v7011_v42 }
0x1a21   :  { %v2494_v25 = vpop.f32.mrf.mxu2 }
0x1a22   :  { %v2506_v15 = vmul.f32 %v2494_v25, %v5894_v45 }
0x1a24   :  { %v2510_v49 = vsel %vm278_vm0, %v2506_v15, 0.0 }
0x1a29   :  { %v2497_v17 = vpop.f32.mrf.mxu2 }
0x1a2a   :  { %v2507_v13 = vmul.f32 %v2497_v17, %v5899_v57 }
0x1a2c   :  { %v2511_v36 = vsel %vm278_vm0, %v2507_v13, 0.0 }
0x1a2d   :  { %v2512_v28 = vadd.f32 %v2511_v36, %v2510_v49 }
0x1a2f   :  { %v2513_v8 = vrot.slane %v2512_v28, 4 }
0x1a31   :  { %v2500_v20 = vpop.f32.mrf.mxu2  ;;  %v2514_v63 = vadd.f32 %v2513_v8, %v2512_v28 }
0x1a32   :  { %v2508_v58 = vmul.f32 %v2500_v20, %v5904_v23 }
0x1a33   :  { %v2515_v10 = vrot.slane %v2514_v63, 2 }
0x1a34   :  { %v2519_v4 = vsel %vm278_vm0, %v2508_v58, 0.0 }
0x1a35   :  { %v2516_v54 = vadd.f32 %v2515_v10, %v2514_v63 }
0x1a37   :  { %v2517_v41 = vrot.slane %v2516_v54, 1 }
0x1a39   :  { %v2503_v34 = vpop.f32.mrf.mxu2  ;;  %v2518_v62 = vadd.f32 %v2517_v41, %v2516_v54 }
0x1a3a   :  { %v2509_v14 = vmul.f32 %v2503_v34, %v5910_v38 }
0x1a3c   :  { %v2520_v12 = vsel %vm278_vm0, %v2509_v14, 0.0 }
0x1a3d   :  { %v2521_v39 = vadd.f32 %v2520_v12, %v2519_v4  ;;  %v7939_v4 = vld [vmem:[#allocation31_spill] sm:$0xff] }
0x1a3f   :  { %v2522_v24 = vrot.slane %v2521_v39, 4 }
0x1a41   :  { %v2523_v43 = vadd.f32 %v2522_v24, %v2521_v39 }
0x1a43   :  { %v2524_v33 = vrot.slane %v2523_v43, 2 }
0x1a45   :  { %v2525_v37 = vadd.f32 %v2524_v33, %v2523_v43 }
0x1a47   :  { %v2526_v21 = vrot.slane %v2525_v37, 1 }
0x1a49   :  { %v2527_v16 = vadd.f32 %v2526_v21, %v2525_v37  ;;  %v7940_v21 = vld [vmem:[#allocation32_spill] sm:$0xff] }
0x1a4b   :  { %v2535_v35 = vsel %vm753_vm3, %v2527_v16, %v2518_v62 }
0x1a4c   :  { %2536 = vrot.lane.b32.xlu1 %v2535_v35, %s5606_s1 }
0x1abe   :  { %v7025_v32 = vpop.permute.xlu1 %2536 }
0x1abf   :  { %v2542_v61 = vsel %vm278_vm0, %v7938_v9, %v7025_v32 }
0x1ac0   :  { %v2543_v59 = vsel %vm759_vm4, %v2542_v61, %v2540_v6 }
0x1ac1   :  { %4701 = vmatmul.msk.f32.vlgmr.msra.gmra.mxu3 %vm764_vm5, %v2543_v59 }
0x1ac2   :  { %2716 = vmatpush.msra.mxu3 %v6770_v55 }
0x1ac4   :  { %2717 = vmatpush.msra.mxu3 %v6776_v47 }
0x1ac6   :  { %2718 = vmatpush.msra.mxu3 %v6782_v2 }
0x1ac8   :  { %2719 = vmatpush.msra.mxu3 %v6788_v51 }
0x1b44   :  { %v2564_v25 = vpop.f32.mrf.mxu3 }
0x1b45   :  { %v2565_v17 = vadd.f32 %v6794_v40, %v2564_v25 }
0x1b47   :  { %5025 = vtanh.f32 %v2565_v17  ;;  %v4702_v15 = vmul.f32 -1.442695, %v2565_v17 }
0x1b49   :  { %5027 = vpow2.f32 %v4702_v15 }
0x1b4d   :  { %v5026_v13 = vpop.eup %5025 }
0x1b4e   :  { %2589 = vrot.lane.b32.xlu0 %v5026_v13, %s5613_s21 }
0x1b4f   :  { %v5028_v36 = vpop.eup %5027 }
0x1b50   :  { %v2570_v49 = vadd.f32 1.0, %v5028_v36 }
0x1b52   :  { %5029 = vrcp.f32 %v2570_v49  ;;  %v2582_v2 = vand.u32 2147483648, %v2570_v49  ;;  %vm2576_vm11 = vweird.f32 %v2570_v49  ;;  %v2580_v51 = vand.u32 2147483647, %v2570_v49 }
0x1b54   :  { %v2583_v58 = vor.u32 1.1754944e-38, %v2582_v2  ;;  %vm2581_vm13 = vcmp.eq.f32.partialorder %v2580_v51, 8.507059e+37 }
0x1b58   :  { %v5030_v28 = vpop.eup %5029 }
0x1b59   :  { %v2572_v55 = vmul.f32 %v5030_v28, %v2570_v49  ;;  %vm2577_vm10 = vweird.f32 %v5030_v28 }
0x1b5a   :  { %vm2578_vm12 = vmor %vm2576_vm11, %vm2577_vm10 }
0x1b5b   :  { %v2573_v20 = vsub.f32 1.0, %v2572_v55 }
0x1b5d   :  { %v2574_v47 = vmul.f32 %v5030_v28, %v2573_v20 }
0x1b5f   :  { %v2575_v8 = vadd.f32 %v5030_v28, %v2574_v47 }
0x1b61   :  { %v2579_v40 = vsel %vm2578_vm12, %v5030_v28, %v2575_v8 }
0x1b62   :  { %v2584_v34 = vsel %vm2581_vm13, %v2583_v58, %v2579_v40 }
0x1b63   :  { %v2587_v12 = vmul.f32 %v2584_v34, %v7939_v4  ;;  %v7132_v4 = vld [vmem:[#allocation8 + $0x8] sm:$0xff] }
0x1bc0   :  { %v2590_v63 = vpop.permute.xlu0 %2589 }
0x1bc1   :  { %v2592_v14 = vmul.f32 %v2590_v63, %v2584_v34 }
0x1bc3   :  { %2594 = vrot.lane.b32.xlu1 %v2592_v14, %s5606_s1 }
0x1bcb   :  { %2608 = vrot.lane.b32.xlu1 %v6827_v1, %s5613_s21 }
0x1c35   :  { %v2595_v10 = vpop.permute.xlu1 %2594 }
0x1c36   :  { %v7042_v39 = vadd.f32 %v2595_v10, %v2587_v12  ;;  %v7135_v12 = vld [vmem:[#allocation8] sm:$0xff]  ;;  %v7138_v10 = vld [vmem:[#allocation7 + $0x8] sm:$0xff] }
0x1c38   :  { %5031 = vtanh.f32 %v7042_v39 }
0x1c3d   :  { %v2609_v33 = vpop.permute.xlu1 %2608 }
0x1c3e   :  { %v5032_v24 = vpop.eup %5031 }
0x1c3f   :  { %2600 = vrot.lane.b32.xlu2 %v5032_v24, %s5613_s21  ;;  %v7142_v24 = vld [vmem:[#allocation7 + $0x10] sm:$0xff] }
0x1c99   :  { %v2601_v43 = vpop.permute.xlu2 %2600 }
0x1c9a   :  { %v2603_v54 = vmul.f32 %v2601_v43, %v2584_v34  ;;  %v2779_v34 = vpop.f32.mrf.mxu2  ;;  %v7146_v43 = vld [vmem:[#allocation7 + $0x18] sm:$0xff] }
0x1c9b   :  { %4722 = vmatmul.msk.f32.vlgmr.msrb.gmra.mxu1 %vm428_vm2, %v2779_v34 }
0x1c9c   :  { %2605 = vrot.lane.b32.xlu0 %v2603_v54, %s5606_s1  ;;  %3214 = vmatpush.msrb.mxu1 %v6832_v18 }
0x1c9e   :  { %3215 = vmatpush.msrb.mxu1 %v6835_v0 }
0x1ca0   :  { %3216 = vmatpush.msrb.mxu1 %v6838_v31 }
0x1ca2   :  { %3217 = vmatpush.msrb.mxu1 %v6841_v56  ;;  %v7084_v56 = vld [vmem:[%s7870_s12] sm:$0xf] }
0x1ca4   :  { %3218 = vmatpush.msrb.mxu1 %v6845_v7 }
0x1ca6   :  { %3219 = vmatpush.msrb.mxu1 %v6848_v19 }
0x1ca8   :  { %3220 = vmatpush.msrb.mxu1 %v6851_v5 }
0x1caa   :  { %3221 = vmatpush.msrb.mxu1 %v6854_v3  ;;  %v7101_v3 = vld [vmem:[%s7869_s11 + $0x18] sm:$0xff] }
0x1d0e   :  { %v2606_v41 = vpop.permute.xlu0 %2605 }
0x1d0f   :  { %v2611_v37 = vsel %vm278_vm0, %v2606_v41, %v2609_v33  ;;  %v7153_v41 = vld [vmem:[#allocation11] sm:$0xf] }
0x1d10   :  { %4703 = vmatmul.msk.f32.vlgmr.msrb.gmra.mxu3 %vm759_vm4, %v2611_v37 }
0x1d11   :  { %2803 = vmatpush.msrb.mxu3 %v6965_v46 }
0x1d13   :  { %2804 = vmatpush.msrb.mxu3 %v6967_v11 }
0x1d15   :  { %2805 = vmatpush.msrb.mxu3 %v6949_v60 }
0x1d17   :  { %2806 = vmatpush.msrb.mxu3 %v6947_v29 }
0x1d93   :  { %v2632_v1 = vpop.f32.mrf.mxu3 }
0x1d94   :  { %v2633_v62 = vadd.f32 %v7940_v21, %v2632_v1 }
0x1d96   :  { %5033 = vtanh.f32 %v2633_v62  ;;  %v4704_v35 = vmul.f32 -1.442695, %v2633_v62  ;;  %v2759_v62 = vpop.f32.mrf.mxu1 }
0x1d98   :  { %5035 = vpow2.f32 %v4704_v35 }
0x1d9c   :  { %v5034_v16 = vpop.eup %5033 }
0x1d9d   :  { %2657 = vrot.lane.b32.xlu2 %v5034_v16, %s5613_s21 }
0x1d9e   :  { %v5036_v6 = vpop.eup %5035  ;;  %v2878_v16 = vpop.f32.mrf.mxu1 }
0x1d9f   :  { %v2638_v9 = vadd.f32 1.0, %v5036_v6 }
0x1da1   :  { %5037 = vrcp.f32 %v2638_v9  ;;  %v2650_v15 = vand.u32 2147483648, %v2638_v9  ;;  %vm2644_vm15 = vweird.f32 %v2638_v9  ;;  %v2648_v36 = vand.u32 2147483647, %v2638_v9 }
0x1da3   :  { %v2651_v28 = vor.u32 1.1754944e-38, %v2650_v15  ;;  %vm2649_vm7 = vcmp.eq.f32.partialorder %v2648_v36, 8.507059e+37  ;;  %v7166_v15 = vld [vmem:[#allocation14] ss:$0 sm:$0xff] }
0x1da7   :  { %v5038_v61 = vpop.eup %5037 }
0x1da8   :  { %v2640_v59 = vmul.f32 %v5038_v61, %v2638_v9  ;;  %vm2645_vm14 = vweird.f32 %v5038_v61 }
0x1da9   :  { %vm2646_vm6 = vmor %vm2644_vm15, %vm2645_vm14 }
0x1daa   :  { %v2641_v25 = vsub.f32 1.0, %v2640_v59 }
0x1dac   :  { %v2642_v17 = vmul.f32 %v5038_v61, %v2641_v25 }
0x1dae   :  { %v2643_v13 = vadd.f32 %v5038_v61, %v2642_v17  ;;  %v7163_v17 = vld [vmem:[%s7917_s27] ss:$0 sm:$0xff] }
0x1db0   :  { %v2647_v49 = vsel %vm2646_vm6, %v5038_v61, %v2643_v13  ;;  %v2760_v13 = vadd.f32 %v7163_v17, %v2759_v62 }
0x1db1   :  { %v2652_v20 = vsel %vm2649_vm7, %v2651_v28, %v2647_v49 }
0x1db2   :  { %v2655_v8 = vmul.f32 %v2652_v20, %v6822_v27  ;;  %v2782_v27 = vpop.f32.mrf.mxu2  ;;  %v2945_v49 = vperm.slane %v2760_v13, 0 }
0x1db3   :  { %4723 = vmatmul.msk.f32.gmra.mxu1 %vm428_vm2, %v2782_v27 }
0x1dba   :  { %v2785_v14 = vpop.f32.mrf.mxu2 }
0x1dbb   :  { %4724 = vmatmul.msk.f32.gmra.mxu1 %vm428_vm2, %v2785_v14 }
0x1dc2   :  { %v2788_v18 = vpop.f32.mrf.mxu2 }
0x1dc3   :  { %4725 = vmatmul.msk.f32.gmra.mxu1 %vm428_vm2, %v2788_v18 }
0x1df7   :  { %v2658_v55 = vpop.permute.xlu2 %2657 }
0x1df8   :  { %v2660_v47 = vmul.f32 %v2658_v55, %v2652_v20 }
0x1dfa   :  { %2662 = vrot.lane.b32.xlu0 %v2660_v47, %s5606_s1  ;;  %v2949_v47 = vadd.f32 %v2945_v49, %v5894_v45 }
0x1e30   :  { %v2881_v9 = vpop.f32.mrf.mxu1 }
0x1e6c   :  { %v2663_v2 = vpop.permute.xlu0 %2662 }
0x1e6d   :  { %v7057_v51 = vadd.f32 %v2663_v2, %v2655_v8  ;;  %v2884_v2 = vpop.f32.mrf.mxu1 }
0x1e6f   :  { %5039 = vtanh.f32 %v7057_v51 }
0x1e75   :  { %v5040_v40 = vpop.eup %5039 }
0x1e76   :  { %2668 = vrot.lane.b32.xlu1 %v5040_v40, %s5613_s21 }
0x1e7e   :  { %3130 = vrot.lane.b32.xlu1 %v2603_v54, %s5614_s2 }
0x1ee8   :  { %v2669_v58 = vpop.permute.xlu1 %2668 }
0x1ee9   :  { %v7062_v63 = vmul.f32 %v2669_v58, %v2652_v20 }
0x1eeb   :  { %2673 = vrot.lane.b32.xlu2 %v7062_v63, %s5606_s1 }
0x1f45   :  { %v2674_v0 = vpop.permute.xlu2 %2673 }
0x1f46   :  { %v2676_v31 = vsel %vm278_vm0, %v2674_v0, %v7025_v32  ;;  %v7129_v32 = vld [vmem:[#allocation8 + $0x10] sm:$0xff]  ;;  %v2944_v0 = vrot.slane %v2760_v13, 1 }
0x1f47   :  { %4705 = vmatmul.msk.f32.vlgmr.msra.gmra.mxu0 %vm759_vm4, %v2676_v31  ;;  %v2950_v31 = vadd.f32 %v2945_v49, %v5899_v57 }
0x1f48   :  { %4735 = vmatpush.msk.msra.mxu0 %vm432_vm1, %v7084_v56 }
0x1f4f   :  { %4717 = vmatmul.msk.f32.vlgmr.msrb.gmra.mxu0 %vm428_vm2, %v6947_v29  ;;  %v7107_v29 = vld [vmem:[%s7869_s11 + $0x10] sm:$0xff] }
0x1f57   :  { %4718 = vmatmul.msk.f32.gmra.mxu0 %vm428_vm2, %v6949_v60  ;;  %v7119_v60 = vld [vmem:[%s7869_s11] sm:$0xff] }
0x1f5f   :  { %4719 = vmatmul.msk.f32.gmra.mxu0 %vm428_vm2, %v6967_v11  ;;  %v7126_v11 = vld [vmem:[#allocation8 + $0x18] sm:$0xff] }
0x1f67   :  { %4720 = vmatmul.msk.f32.gmra.mxu0 %vm428_vm2, %v6965_v46  ;;  %v7122_v46 = vld [vmem:[#allocation7] sm:$0xff] }
0x1fc4   :  { %v2697_v7 = vpop.f32.mrf.mxu0 }
0x1fc5   :  { %v2698_v19 = vadd.f32 %v6875_v48, %v2697_v7  ;;  %v7113_v48 = vld [vmem:[%s7869_s11 + $0x8] sm:$0xff] }
0x1fc7   :  { %5041 = vtanh.f32 %v2698_v19 }
0x1fcc   :  { %v2837_v35 = vpop.f32.mrf.mxu0 }
0x1fcd   :  { %v5042_v5 = vpop.eup %5041  ;;  %v2879_v6 = vadd.f32 %v2878_v16, %v2837_v35 }
0x1fce   :  { %4706 = vmatmul.msk.f32.vlgmr.msra.gmra.mxu3 %vm278_vm0, %v5042_v5 }
0x1fcf   :  { %2985 = vmatpush.msra.mxu3 %v7101_v3 }
0x1fd1   :  { %2986 = vmatpush.msra.mxu3 %v7107_v29 }
0x1fd3   :  { %2987 = vmatpush.msra.mxu3 %v7113_v48 }
0x1fd4   :  { %v2840_v61 = vpop.f32.mrf.mxu0 }
0x1fd5   :  { %2988 = vmatpush.msra.mxu3 %v7119_v60  ;;  %v2882_v28 = vadd.f32 %v2881_v9, %v2840_v61 }
0x1fd6   :  { %4712 = vmatmul.msk.f32.vlgmr.msrb.gmra.mxu3 %vm278_vm0, %v7122_v46 }
0x1fd7   :  { %3345 = vmatpush.msrb.mxu3 %v7126_v11 }
0x1fd9   :  { %3346 = vmatpush.msrb.mxu3 %v7129_v32 }
0x1fdb   :  { %3347 = vmatpush.msrb.mxu3 %v7132_v4 }
0x1fdc   :  { %v2843_v8 = vpop.f32.mrf.mxu0 }
0x1fdd   :  { %3348 = vmatpush.msrb.mxu3 %v7135_v12  ;;  %v2885_v27 = vadd.f32 %v2884_v2, %v2843_v8  ;;  %v7201_v8 = vld [vmem:[%s7871_s13 + $0x48] sm:$0xff]  ;;  %v7207_v2 = vld [vmem:[%s7871_s13 + $0x40] sm:$0xff] }
0x1fde   :  { %4713 = vmatmul.msk.f32.gmra.mxu3 %vm278_vm0, %v7138_v10 }
0x1fe6   :  { %4714 = vmatmul.msk.f32.gmra.mxu3 %vm278_vm0, %v7142_v24 }
0x1fee   :  { %4715 = vmatmul.msk.f32.gmra.mxu3 %vm278_vm0, %v7146_v43 }
0x2051   :  { %v7150_v54 = vpop.f32.mrf.mxu3 }
0x2052   :  { %7941 = vst [vmem:[#allocation26_spill] sm:$0xff] %v7150_v54 }
0x2059   :  { %v2808_v33 = vpop.f32.mrf.mxu3 }
0x205a   :  { %4727 = vmatmul.msk.f32.vlgmr.msra.gmra.mxu2 %vm428_vm2, %v2808_v33  ;;  %v2846_v33 = vpop.f32.mrf.mxu0 }
0x205b   :  { %4759 = vmatpush.msk.msra.mxu2 %vm432_vm1, %v7153_v41 }
0x2061   :  { %v2811_v37 = vpop.f32.mrf.mxu3 }
0x2062   :  { %4728 = vmatmul.msk.f32.gmra.mxu2 %vm428_vm2, %v2811_v37  ;;  %v2887_v37 = vpop.f32.mrf.mxu1 }
0x2063   :  { %v2888_v62 = vadd.f32 %v2887_v37, %v2846_v33 }
0x2069   :  { %v2814_v1 = vpop.f32.mrf.mxu3 }
0x206a   :  { %4729 = vmatmul.msk.f32.gmra.mxu2 %vm428_vm2, %v2814_v1 }
0x2071   :  { %v2817_v21 = vpop.f32.mrf.mxu3 }
0x2072   :  { %4730 = vmatmul.msk.f32.gmra.mxu2 %vm428_vm2, %v2817_v21  ;;  %v2946_v21 = vperm.slane %v2944_v0, 0  ;;  %v7249_v0 = vld [vmem:[%s7871_s13 + $0x8] sm:$0xff] }
0x2074   :  { %v2952_v13 = vadd.f32 %v2946_v21, %v5910_v38 }
0x20dd   :  { %v2919_v59 = vpop.f32.mrf.mxu2 }
0x20de   :  { %v2931_v25 = vadd.f32 %v2919_v59, %v2879_v6  ;;  %v2951_v6 = vadd.f32 %v2946_v21, %v5904_v23 }
0x20e0   :  { %v2935_v36 = vadd.f32 %v7166_v15, %v2931_v25 }
0x20e2   :  { %5043 = vtanh.f32 %v2935_v36 }
0x20e5   :  { %v2922_v55 = vpop.f32.mrf.mxu2 }
0x20e6   :  { %v2932_v20 = vadd.f32 %v2922_v55, %v2882_v28  ;;  %v7182_v55 = vld [vmem:[#allocation2 + $0xa] sm:$0x3] }
0x20e7   :  { %7942 = vst [vmem:[#allocation28_spill] sm:$0xff] %v7182_v55 }
0x20e8   :  { %v5044_v40 = vpop.eup %5043  ;;  %v2936_v58 = vadd.f32 %v7166_v15, %v2932_v20  ;;  %v7189_v20 = vld [vmem:[%s7871_s13 + $0x58] sm:$0xff] }
0x20e9   :  { %v2953_v34 = vadd.f32 %v5044_v40, %v2949_v47  ;;  %v7195_v47 = vld [vmem:[%s7871_s13 + $0x50] sm:$0xff]  ;;  %v7213_v40 = vld [vmem:[%s7871_s13 + $0x38] sm:$0xff] }
0x20ea   :  { %5045 = vtanh.f32 %v2936_v58  ;;  %v7219_v58 = vld [vmem:[%s7871_s13 + $0x30] sm:$0xff] }
0x20eb   :  { %5047 = vtanh.f32 %v2953_v34  ;;  %v7225_v34 = vld [vmem:[%s7871_s13 + $0x28] sm:$0xff] }
0x20ed   :  { %v2925_v14 = vpop.f32.mrf.mxu2 }
0x20ee   :  { %v2933_v18 = vadd.f32 %v2925_v14, %v2885_v27  ;;  %v7231_v27 = vld [vmem:[%s7871_s13 + $0x20] sm:$0xff]  ;;  %v7237_v14 = vld [vmem:[%s7871_s13 + $0x18] sm:$0xff] }
0x20f0   :  { %v5046_v7 = vpop.eup %5045  ;;  %v2937_v19 = vadd.f32 %v7166_v15, %v2933_v18  ;;  %v7243_v18 = vld [vmem:[%s7871_s13 + $0x10] sm:$0xff] }
0x20f1   :  { %v5048_v5 = vpop.eup %5047  ;;  %v2954_v1 = vadd.f32 %v5046_v7, %v2950_v31  ;;  %v7255_v31 = vld [vmem:[%s7871_s13] sm:$0xff] }
0x20f2   :  { %5049 = vtanh.f32 %v2937_v19  ;;  %4731 = vmatmul.msk.f32.vlgmr.msra.gmra.mxu3 %vm278_vm0, %v5048_v5 }
0x20f3   :  { %5051 = vtanh.f32 %v2954_v1  ;;  %4764 = vmatpush.msk.msra.mxu3 %vm432_vm1, %v6913_v53 }
0x20f5   :  { %v2928_v16 = vpop.f32.mrf.mxu2 }
0x20f6   :  { %v2934_v35 = vadd.f32 %v2928_v16, %v2888_v62 }
0x20f8   :  { %v5050_v9 = vpop.eup %5049  ;;  %v2938_v61 = vadd.f32 %v7166_v15, %v2934_v35 }
0x20f9   :  { %v5052_v59 = vpop.eup %5051  ;;  %v2955_v25 = vadd.f32 %v5050_v9, %v2951_v6 }
0x20fa   :  { %5053 = vtanh.f32 %v2938_v61  ;;  %4732 = vmatmul.msk.f32.gmra.mxu3 %vm278_vm0, %v5052_v59 }
0x20fb   :  { %5055 = vtanh.f32 %v2955_v25 }
0x2100   :  { %v5054_v36 = vpop.eup %5053 }
0x2101   :  { %v5056_v49 = vpop.eup %5055  ;;  %v2956_v28 = vadd.f32 %v5054_v36, %v2952_v13 }
0x2102   :  { %4733 = vmatmul.msk.f32.gmra.mxu3 %vm278_vm0, %v5056_v49 }
0x2103   :  { %5057 = vtanh.f32 %v2956_v28 }
0x2109   :  { %v5058_v53 = vpop.eup %5057 }
0x210a   :  { %4734 = vmatmul.msk.f32.gmra.mxu3 %vm278_vm0, %v5058_v53 }
0x2112   :  { %4750 = vmatmul.msk.f32.vlgmr.msrb.gmra.mxu3 %vm278_vm0, %v7182_v55 }
0x2113   :  { %3733 = vmatpush.msrb.mxu3 %v7189_v20 }
0x2115   :  { %3734 = vmatpush.msrb.mxu3 %v7195_v47 }
0x2117   :  { %3735 = vmatpush.msrb.mxu3 %v7201_v8 }
0x2119   :  { %3736 = vmatpush.msrb.mxu3 %v7207_v2 }
0x211b   :  { %3737 = vmatpush.msrb.mxu3 %v7213_v40 }
0x211d   :  { %3738 = vmatpush.msrb.mxu3 %v7219_v58 }
0x211f   :  { %3739 = vmatpush.msrb.mxu3 %v7225_v34 }
0x2121   :  { %3740 = vmatpush.msrb.mxu3 %v7231_v27 }
0x2123   :  { %3741 = vmatpush.msrb.mxu3 %v7237_v14 }
0x2125   :  { %3742 = vmatpush.msrb.mxu3 %v7243_v18 }
0x2127   :  { %3743 = vmatpush.msrb.mxu3 %v7249_v0 }
0x2129   :  { %3744 = vmatpush.msrb.mxu3 %v7255_v31 }
0x2175   :  { %v2990_v7 = vpop.f32.mrf.mxu3 }
0x2176   :  { %v3002_v5 = vsel %vm428_vm2, %v2990_v7, -inf }
0x217d   :  { %v2993_v19 = vpop.f32.mrf.mxu3 }
0x217e   :  { %v3003_v33 = vsel %vm428_vm2, %v2993_v19, -inf }
0x217f   :  { %v3004_v37 = vmax.f32 %v3002_v5, %v3003_v33 }
0x2181   :  { %v3005_v1 = vrot.slane %v3004_v37, 4 }
0x2183   :  { %v3006_v21 = vmax.f32 %v3004_v37, %v3005_v1 }
0x2185   :  { %v3007_v62 = vrot.slane %v3006_v21, 2  ;;  %v2996_v16 = vpop.f32.mrf.mxu3 }
0x2186   :  { %v3011_v13 = vsel %vm428_vm2, %v2996_v16, -inf }
0x2187   :  { %v3008_v35 = vmax.f32 %v3006_v21, %v3007_v62 }
0x2189   :  { %v3009_v6 = vrot.slane %v3008_v35, 1 }
0x218b   :  { %v3010_v9 = vmax.f32 %v3008_v35, %v3009_v6 }
0x218d   :  { %v3020_v61 = vsub.f32 %v2990_v7, %v3010_v9  ;;  %v3021_v59 = vsub.f32 %v2993_v19, %v3010_v9  ;;  %v2999_v25 = vpop.f32.mrf.mxu3 }
0x218e   :  { %v3012_v36 = vsel %vm428_vm2, %v2999_v25, -inf }
0x218f   :  { %v3024_v49 = vmul.f32 1.442695, %v3020_v61  ;;  %v3026_v28 = vmul.f32 1.442695, %v3021_v59  ;;  %v3013_v53 = vmax.f32 %v3011_v13, %v3012_v36 }
0x2191   :  { %5059 = vpow2.f32 %v3024_v49  ;;  %v3014_v54 = vrot.slane %v3013_v53, 4 }
0x2192   :  { %5061 = vpow2.f32 %v3026_v28 }
0x2193   :  { %v3015_v5 = vmax.f32 %v3013_v53, %v3014_v54 }
0x2195   :  { %v3016_v33 = vrot.slane %v3015_v5, 2 }
0x2197   :  { %v5060_v37 = vpop.eup %5059  ;;  %v3017_v1 = vmax.f32 %v3015_v5, %v3016_v33 }
0x2198   :  { %v5062_v21 = vpop.eup %5061  ;;  %v3032_v62 = vsel %vm428_vm2, %v5060_v37, 0.0 }
0x2199   :  { %v3033_v7 = vsel %vm428_vm2, %v5062_v21, 0.0  ;;  %v3018_v19 = vrot.slane %v3017_v1, 1 }
0x219a   :  { %v3034_v35 = vadd.f32 %v3033_v7, %v3032_v62 }
0x219b   :  { %v3019_v6 = vmax.f32 %v3017_v1, %v3018_v19 }
0x219c   :  { %v3035_v9 = vrot.slane %v3034_v35, 4 }
0x219d   :  { %v3022_v30 = vsub.f32 %v2996_v16, %v3019_v6  ;;  %v3023_v61 = vsub.f32 %v2999_v25, %v3019_v6 }
0x219e   :  { %v3036_v59 = vadd.f32 %v3035_v9, %v3034_v35 }
0x219f   :  { %v3028_v13 = vmul.f32 1.442695, %v3022_v30  ;;  %v3030_v36 = vmul.f32 1.442695, %v3023_v61 }
0x21a0   :  { %v3037_v49 = vrot.slane %v3036_v59, 2 }
0x21a1   :  { %5063 = vpow2.f32 %v3028_v13  ;;  %v7319_v13 = vld [vmem:[%s7875_s17 + $0x30] sm:$0xff] }
0x21a2   :  { %v3038_v54 = vadd.f32 %v3037_v49, %v3036_v59  ;;  %5065 = vpow2.f32 %v3030_v36  ;;  %v7313_v59 = vld [vmem:[%s7875_s17 + $0x38] sm:$0xff]  ;;  %v7345_v49 = vld [vmem:[%s7875_s17 + $0x10] sm:$0xff] }
0x21a3   :  { %v7339_v36 = vld [vmem:[%s7875_s17 + $0x18] sm:$0xff]  ;;  %7944 = vst [vmem:[#allocation30_spill] sm:$0xff] %v7345_v49 }
0x21a4   :  { %v3039_v28 = vrot.slane %v3038_v54, 1  ;;  %7943 = vst [vmem:[#allocation29_spill] sm:$0xff] %v7339_v36 }
0x21a6   :  { %v3040_v53 = vadd.f32 %v3039_v28, %v3038_v54  ;;  %v7351_v54 = vld [vmem:[%s7875_s17 + $0x8] sm:$0xff] }
0x21a7   :  { %v5064_v5 = vpop.eup %5063  ;;  %7945 = vst [vmem:[#allocation25_spill] sm:$0xff] %v7351_v54 }
0x21a8   :  { %v5066_v33 = vpop.eup %5065  ;;  %5067 = vrcp.f32 %v3040_v53  ;;  %v3041_v55 = vsel %vm428_vm2, %v5064_v5, 0.0 }
0x21a9   :  { %v3042_v62 = vsel %vm428_vm2, %v5066_v33, 0.0 }
0x21aa   :  { %v3043_v1 = vadd.f32 %v3042_v62, %v3041_v55 }
0x21ac   :  { %v3044_v7 = vrot.slane %v3043_v1, 4 }
0x21ae   :  { %v5068_v16 = vpop.eup %5067  ;;  %v3045_v25 = vadd.f32 %v3044_v7, %v3043_v1 }
0x21af   :  { %v7266_v19 = vmul.f32 %v5068_v16, %v5060_v37  ;;  %v7268_v30 = vmul.f32 %v5068_v16, %v5062_v21 }
0x21b0   :  { %v3046_v35 = vrot.slane %v3045_v25, 2 }
0x21b1   :  { %4740 = vst.msk [vmem:[%s7880_s22 + $0x80] sm:$0xff] %vm428_vm2, %v7266_v19  ;;  %4736 = vmatmul.msk.f32.vlgmr.msra.gmra.mxu0 %vm428_vm2, %v7266_v19 }
0x21b2   :  { %4741 = vst.msk [vmem:[%s7880_s22 + $0x88] sm:$0xff] %vm428_vm2, %v7268_v30  ;;  %v3047_v55 = vadd.f32 %v3046_v35, %v3045_v25 }
0x21b4   :  { %v3048_v37 = vrot.slane %v3047_v55, 1 }
0x21b6   :  { %v3049_v21 = vadd.f32 %v3048_v37, %v3047_v55 }
0x21b8   :  { %5069 = vrcp.f32 %v3049_v21 }
0x21b9   :  { %4737 = vmatmul.msk.f32.gmra.mxu0 %vm428_vm2, %v7268_v30 }
0x21be   :  { %v5070_v6 = vpop.eup %5069 }
0x21bf   :  { %v7284_v9 = vmul.f32 %v5070_v6, %v5066_v33  ;;  %v7286_v61 = vmul.f32 %v5070_v6, %v5064_v5 }
0x21c1   :  { %4743 = vst.msk [vmem:[%s7880_s22 + $0x98] sm:$0xff] %vm428_vm2, %v7284_v9  ;;  %4738 = vmatmul.msk.f32.gmra.mxu0 %vm428_vm2, %v7286_v61 }
0x21c2   :  { %4742 = vst.msk [vmem:[%s7880_s22 + $0x90] sm:$0xff] %vm428_vm2, %v7286_v61  ;;  %3365 = vmatpush.msrb.mxu0 %v7284_v9 }
0x21c4   :  { %3366 = vmatpush.msrb.mxu0 %v7286_v61 }
0x21c6   :  { %3367 = vmatpush.msrb.mxu0 %v7268_v30 }
0x21c8   :  { %3368 = vmatpush.msrb.mxu0 %v7266_v19 }
0x21c9   :  { %4739 = vmatmul.msk.f32.gmra.mxu0 %vm428_vm2, %v7284_v9 }
0x21ca   :  { %4769 = vmatpush.msk.msra.mxu0 %vm432_vm1, %v6987_v22  ;;  %v7325_v22 = vld [vmem:[%s7875_s17 + $0x28] sm:$0xff] }
0x21d1   :  { %4751 = vmatmul.msk.f32.vlgmr.msrb.gmra.mxu0 %vm278_vm0, %v6991_v44  ;;  %v7331_v44 = vld [vmem:[%s7875_s17 + $0x20] sm:$0xff] }
0x21d2   :  { %3870 = vmatpush.msrb.mxu0 %v7313_v59 }
0x21d4   :  { %3871 = vmatpush.msrb.mxu0 %v7319_v13 }
0x21d6   :  { %3872 = vmatpush.msrb.mxu0 %v7325_v22 }
0x21d8   :  { %3873 = vmatpush.msrb.mxu0 %v7331_v44 }
0x21d9   :  { %4752 = vmatmul.msk.f32.gmra.mxu0 %vm278_vm0, %v6999_v50  ;;  %v7357_v50 = vld [vmem:[%s7875_s17] sm:$0xff] }
0x21da   :  { %3874 = vmatpush.msrb.mxu0 %v7339_v36  ;;  %7946 = vst [vmem:[#allocation31_spill] sm:$0xff] %v7357_v50 }
0x21dc   :  { %3875 = vmatpush.msrb.mxu0 %v7345_v49 }
0x21de   :  { %3876 = vmatpush.msrb.mxu0 %v7351_v54 }
0x21e0   :  { %3877 = vmatpush.msrb.mxu0 %v7357_v50 }
0x21e1   :  { %4753 = vmatmul.msk.f32.gmra.mxu0 %vm278_vm0, %v7007_v52 }
0x21e9   :  { %4754 = vmatmul.msk.f32.gmra.mxu0 %vm278_vm0, %v7011_v42 }
0x222e   :  { %v3085_v28 = vpop.f32.mrf.mxu0 }
0x222f   :  { %v3097_v33 = vmul.f32 %v3085_v28, %v5894_v45 }
0x2231   :  { %v3101_v1 = vsel %vm278_vm0, %v3097_v33, 0.0 }
0x2236   :  { %v3088_v53 = vpop.f32.mrf.mxu0 }
0x2237   :  { %v3098_v5 = vmul.f32 %v3088_v53, %v5899_v57 }
0x2239   :  { %v3102_v62 = vsel %vm278_vm0, %v3098_v5, 0.0 }
0x223a   :  { %v3103_v7 = vadd.f32 %v3102_v62, %v3101_v1 }
0x223c   :  { %v3104_v25 = vrot.slane %v3103_v7, 4 }
0x223e   :  { %v3091_v16 = vpop.f32.mrf.mxu0  ;;  %v3105_v55 = vadd.f32 %v3104_v25, %v3103_v7  ;;  %v3131_v25 = vpop.permute.xlu1 %3130 }
0x223f   :  { %v3099_v35 = vmul.f32 %v3091_v16, %v5904_v23 }
0x2240   :  { %v3106_v6 = vrot.slane %v3105_v55, 2 }
0x2241   :  { %v3110_v42 = vsel %vm278_vm0, %v3099_v35, 0.0 }
0x2242   :  { %v3107_v5 = vadd.f32 %v3106_v6, %v3105_v55  ;;  %v7408_v55 = vld [vmem:[%s7872_s14] ss:$0 sm:$0xff] }
0x2244   :  { %v3108_v33 = vrot.slane %v3107_v5, 1 }
0x2246   :  { %v3094_v52 = vpop.f32.mrf.mxu0  ;;  %v3109_v49 = vadd.f32 %v3108_v33, %v3107_v5 }
0x2247   :  { %v3100_v37 = vmul.f32 %v3094_v52, %v5910_v38 }
0x2249   :  { %v3111_v21 = vsel %vm278_vm0, %v3100_v37, 0.0 }
0x224a   :  { %v3112_v53 = vadd.f32 %v3111_v21, %v3110_v42 }
0x224c   :  { %v3113_v28 = vrot.slane %v3112_v53, 4 }
0x224e   :  { %v3114_v50 = vadd.f32 %v3113_v28, %v3112_v53 }
0x2250   :  { %v3115_v54 = vrot.slane %v3114_v50, 2 }
0x2252   :  { %v3116_v62 = vadd.f32 %v3115_v54, %v3114_v50  ;;  %v7384_v54 = vld [vmem:[%s7877_s19 + $0x18] sm:$0xff] }
0x2254   :  { %v3117_v1 = vrot.slane %v3116_v62, 1 }
0x2256   :  { %v3118_v36 = vadd.f32 %v3117_v1, %v3116_v62 }
0x2258   :  { %v3126_v7 = vsel %vm753_vm3, %v3118_v36, %v3109_v49  ;;  %v7390_v36 = vld [vmem:[%s7877_s19 + $0x10] sm:$0xff]  ;;  %v7402_v49 = vld [vmem:[%s7877_s19] sm:$0xff] }
0x2259   :  { %3127 = vrot.lane.b32.xlu0 %v3126_v7, %s5606_s1 }
0x22cb   :  { %v7374_v16 = vpop.permute.xlu0 %3127 }
0x22cc   :  { %v3133_v35 = vsel %vm278_vm0, %v6923_v26, %v7374_v16  ;;  %v7396_v26 = vld [vmem:[%s7877_s19 + $0x8] sm:$0xff] }
0x22cd   :  { %v3134_v52 = vsel %vm759_vm4, %v3133_v35, %v3131_v25 }
0x22ce   :  { %4744 = vmatmul.msk.f32.vlgmr.msra.gmra.mxu1 %vm764_vm5, %v3134_v52 }
0x22cf   :  { %3307 = vmatpush.msra.mxu1 %v7384_v54 }
0x22d1   :  { %3308 = vmatpush.msra.mxu1 %v7390_v36 }
0x22d3   :  { %3309 = vmatpush.msra.mxu1 %v7396_v26 }
0x22d5   :  { %3310 = vmatpush.msra.mxu1 %v7402_v49 }
0x234b   :  { %v3155_v50 = vpop.f32.mrf.mxu1 }
0x234c   :  { %v3156_v37 = vadd.f32 %v7408_v55, %v3155_v50 }
0x234e   :  { %5071 = vtanh.f32 %v3156_v37  ;;  %v4745_v21 = vmul.f32 -1.442695, %v3156_v37 }
0x2350   :  { %5073 = vpow2.f32 %v4745_v21 }
0x2354   :  { %v5072_v42 = vpop.eup %5071 }
0x2355   :  { %3180 = vrot.lane.b32.xlu2 %v5072_v42, %s5613_s21 }
0x2356   :  { %v5074_v6 = vpop.eup %5073 }
0x2357   :  { %v3161_v53 = vadd.f32 1.0, %v5074_v6 }
0x2359   :  { %5075 = vrcp.f32 %v3161_v53  ;;  %v3173_v7 = vand.u32 2147483648, %v3161_v53  ;;  %vm3167_vm9 = vweird.f32 %v3161_v53  ;;  %v3171_v25 = vand.u32 2147483647, %v3161_v53 }
0x235b   :  { %v3174_v52 = vor.u32 1.1754944e-38, %v3173_v7  ;;  %vm3172_vm11 = vcmp.eq.f32.partialorder %v3171_v25, 8.507059e+37 }
0x235f   :  { %v5076_v28 = vpop.eup %5075 }
0x2360   :  { %v3163_v5 = vmul.f32 %v5076_v28, %v3161_v53  ;;  %vm3168_vm8 = vweird.f32 %v5076_v28 }
0x2361   :  { %vm3169_vm10 = vmor %vm3167_vm9, %vm3168_vm8 }
0x2362   :  { %v3164_v33 = vsub.f32 1.0, %v3163_v5 }
0x2364   :  { %v3165_v62 = vmul.f32 %v5076_v28, %v3164_v33 }
0x2366   :  { %v3166_v1 = vadd.f32 %v5076_v28, %v3165_v62 }
0x2368   :  { %v3170_v35 = vsel %vm3169_vm10, %v5076_v28, %v3166_v1 }
0x2369   :  { %v3175_v42 = vsel %vm3172_vm11, %v3174_v52, %v3170_v35 }
0x236a   :  { %v3178_v21 = vmul.f32 %v3175_v42, %v7042_v39 }
0x23af   :  { %v3181_v50 = vpop.permute.xlu2 %3180 }
0x23b0   :  { %v3183_v37 = vmul.f32 %v3181_v50, %v3175_v42 }
0x23b2   :  { %3185 = vrot.lane.b32.xlu0 %v3183_v37, %s5606_s1 }
0x23ba   :  { %3199 = vrot.lane.b32.xlu0 %v7062_v63, %s5613_s21  ;;  %v7430_v63 = vld [vmem:[%s7874_s16] ss:$0 sm:$0xff] }
0x23bb   :  { %7948 = vst [vmem:[#allocation34_spill] sm:$0xff] %v7430_v63 }
0x2424   :  { %v3186_v6 = vpop.permute.xlu0 %3185 }
0x2425   :  { %v7416_v5 = vadd.f32 %v3186_v6, %v3178_v21 }
0x2427   :  { %7947 = vst [vmem:[#allocation32_spill] sm:$0xff] %v7416_v5  ;;  %5077 = vtanh.f32 %v7416_v5 }
0x242c   :  { %v3200_v62 = vpop.permute.xlu0 %3199 }
0x242d   :  { %v5078_v53 = vpop.eup %5077 }
0x242e   :  { %3191 = vrot.lane.b32.xlu1 %v5078_v53, %s5613_s21 }
0x24a0   :  { %v3192_v28 = vpop.permute.xlu1 %3191 }
0x24a1   :  { %v3194_v33 = vmul.f32 %v3192_v28, %v3175_v42 }
0x24a3   :  { %3196 = vrot.lane.b32.xlu2 %v3194_v33, %s5606_s1 }
0x24fd   :  { %v3197_v1 = vpop.permute.xlu2 %3196 }
0x24fe   :  { %v3202_v7 = vsel %vm278_vm0, %v3197_v1, %v3200_v62 }
0x24ff   :  { %4746 = vmatmul.msk.f32.vlgmr.msrb.gmra.mxu1 %vm759_vm4, %v3202_v7 }
0x2500   :  { %3394 = vmatpush.msrb.mxu1 %v7284_v9 }
0x2502   :  { %3395 = vmatpush.msrb.mxu1 %v7286_v61 }
0x2504   :  { %3396 = vmatpush.msrb.mxu1 %v7268_v30 }
0x2506   :  { %3397 = vmatpush.msrb.mxu1 %v7266_v19 }
0x257c   :  { %v3223_v39 = vpop.f32.mrf.mxu1 }
0x257d   :  { %v3224_v25 = vadd.f32 %v7430_v63, %v3223_v39 }
0x257f   :  { %5079 = vtanh.f32 %v3224_v25  ;;  %v4747_v52 = vmul.f32 -1.442695, %v3224_v25 }
0x2581   :  { %5081 = vpow2.f32 %v4747_v52 }
0x2585   :  { %v5080_v35 = vpop.eup %5079 }
0x2586   :  { %3248 = vrot.lane.b32.xlu1 %v5080_v35, %s5613_s21 }
0x2587   :  { %v5082_v50 = vpop.eup %5081 }
0x2588   :  { %v3229_v42 = vadd.f32 1.0, %v5082_v50 }
0x258a   :  { %5083 = vrcp.f32 %v3229_v42  ;;  %v3241_v62 = vand.u32 2147483648, %v3229_v42  ;;  %vm3235_vm13 = vweird.f32 %v3229_v42  ;;  %v3239_v1 = vand.u32 2147483647, %v3229_v42 }
0x258c   :  { %v3242_v39 = vor.u32 1.1754944e-38, %v3241_v62  ;;  %vm3240_vm15 = vcmp.eq.f32.partialorder %v3239_v1, 8.507059e+37  ;;  %v7459_v62 = vld [vmem:[#allocation16 + $0x18] sm:$0xff]  ;;  %v7462_v1 = vld [vmem:[#allocation16 + $0x10] sm:$0xff] }
0x2590   :  { %v5084_v37 = vpop.eup %5083 }
0x2591   :  { %v3231_v21 = vmul.f32 %v5084_v37, %v3229_v42  ;;  %vm3236_vm12 = vweird.f32 %v5084_v37 }
0x2592   :  { %vm3237_vm14 = vmor %vm3235_vm13, %vm3236_vm12 }
0x2593   :  { %v3232_v6 = vsub.f32 1.0, %v3231_v21 }
0x2595   :  { %v3233_v53 = vmul.f32 %v5084_v37, %v3232_v6  ;;  %v7449_v6 = vld [vmem:[#allocation16 + $0x30] sm:$0xff] }
0x2597   :  { %v3234_v28 = vadd.f32 %v5084_v37, %v3233_v53  ;;  %v7452_v53 = vld [vmem:[#allocation16 + $0x28] sm:$0xff] }
0x2599   :  { %v3238_v7 = vsel %vm3237_vm14, %v5084_v37, %v3234_v28  ;;  %v7455_v28 = vld [vmem:[#allocation16 + $0x20] sm:$0xff] }
0x259a   :  { %v3243_v35 = vsel %vm3240_vm15, %v3242_v39, %v3238_v7  ;;  %v7465_v7 = vld [vmem:[#allocation16 + $0x8] sm:$0xff] }
0x259b   :  { %v3246_v52 = vmul.f32 %v3243_v35, %v7057_v51  ;;  %v7446_v51 = vld [vmem:[#allocation16 + $0x38] sm:$0xff] }
0x25f8   :  { %v3249_v63 = vpop.permute.xlu1 %3248 }
0x25f9   :  { %v3251_v25 = vmul.f32 %v3249_v63, %v3243_v35  ;;  %v3370_v63 = vpop.f32.mrf.mxu0 }
0x25fa   :  { %4765 = vmatmul.msk.f32.vlgmr.msra.gmra.mxu3 %vm428_vm2, %v3370_v63 }
0x25fb   :  { %3253 = vrot.lane.b32.xlu2 %v3251_v25, %s5606_s1  ;;  %3805 = vmatpush.msra.mxu3 %v7446_v51 }
0x25fd   :  { %3806 = vmatpush.msra.mxu3 %v7449_v6 }
0x25ff   :  { %3807 = vmatpush.msra.mxu3 %v7452_v53 }
0x2601   :  { %3808 = vmatpush.msra.mxu3 %v7455_v28 }
0x2603   :  { %3809 = vmatpush.msra.mxu3 %v7459_v62 }
0x2605   :  { %3810 = vmatpush.msra.mxu3 %v7462_v1 }
0x2607   :  { %3811 = vmatpush.msra.mxu3 %v7465_v7 }
0x2655   :  { %v3254_v50 = vpop.permute.xlu2 %3253 }
0x2656   :  { %v7436_v5 = vadd.f32 %v3254_v50, %v3246_v52 }
0x2658   :  { %5085 = vtanh.f32 %v7436_v5 }
0x265e   :  { %v5086_v21 = vpop.eup %5085 }
0x265f   :  { %3259 = vrot.lane.b32.xlu0 %v5086_v21, %s5613_s21 }
0x2667   :  { %3721 = vrot.lane.b32.xlu0 %v3194_v33, %s5614_s2  ;;  %v3373_v33 = vpop.f32.mrf.mxu0 }
0x2668   :  { %4766 = vmatmul.msk.f32.gmra.mxu3 %vm428_vm2, %v3373_v33 }
0x266f   :  { %v3376_v39 = vpop.f32.mrf.mxu0 }
0x2670   :  { %4767 = vmatmul.msk.f32.gmra.mxu3 %vm428_vm2, %v3376_v39 }
0x2677   :  { %v3379_v25 = vpop.f32.mrf.mxu0 }
0x2678   :  { %4768 = vmatmul.msk.f32.gmra.mxu3 %vm428_vm2, %v3379_v25 }
0x26d1   :  { %v3260_v42 = vpop.permute.xlu0 %3259 }
0x26d2   :  { %v7441_v37 = vmul.f32 %v3260_v42, %v3243_v35  ;;  %v7468_v35 = vld [vmem:[#allocation16] sm:$0xff] }
0x26d3   :  { %3812 = vmatpush.msra.mxu3 %v7468_v35 }
0x26d4   :  { %3264 = vrot.lane.b32.xlu1 %v7441_v37, %s5606_s1 }
0x2746   :  { %v3265_v52 = vpop.permute.xlu1 %3264 }
0x2747   :  { %v3267_v50 = vsel %vm278_vm0, %v3265_v52, %v7374_v16  ;;  %v7489_v16 = vld [vmem:[%s7876_s18] ss:$0 sm:$0xff] }
0x2748   :  { %4748 = vmatmul.msk.f32.vlgmr.msrb.gmra.mxu2 %vm759_vm4, %v3267_v50 }
0x2749   :  { %4778 = vmatpush.msk.msrb.mxu2 %vm432_vm1, %v7084_v56 }
0x2750   :  { %4760 = vmatmul.msk.f32.vlgmr.msra.gmra.mxu2 %vm428_vm2, %v7266_v19 }
0x2758   :  { %4761 = vmatmul.msk.f32.gmra.mxu2 %vm428_vm2, %v7268_v30 }
0x2760   :  { %4762 = vmatmul.msk.f32.gmra.mxu2 %vm428_vm2, %v7286_v61 }
0x2768   :  { %4763 = vmatmul.msk.f32.gmra.mxu2 %vm428_vm2, %v7284_v9 }
0x27cb   :  { %v3288_v21 = vpop.f32.mrf.mxu2 }
0x27cc   :  { %v3289_v56 = vadd.f32 %v7489_v16, %v3288_v21 }
0x27ce   :  { %5087 = vtanh.f32 %v3289_v56 }
0x27d4   :  { %v5088_v42 = vpop.eup %5087 }
0x27d5   :  { %4749 = vmatmul.msk.f32.vlgmr.msra.gmra.mxu1 %vm278_vm0, %v5088_v42 }
0x27d6   :  { %3576 = vmatpush.msra.mxu1 %v7101_v3 }
0x27d8   :  { %3577 = vmatpush.msra.mxu1 %v7107_v29 }
0x27da   :  { %3578 = vmatpush.msra.mxu1 %v7113_v48 }
0x27dc   :  { %3579 = vmatpush.msra.mxu1 %v7119_v60 }
0x27dd   :  { %4755 = vmatmul.msk.f32.vlgmr.msrb.gmra.mxu1 %vm278_vm0, %v7122_v46 }
0x27de   :  { %3936 = vmatpush.msrb.mxu1 %v7126_v11  ;;  %v3350_v11 = vpop.f32.mrf.mxu3 }
0x27df   :  { %v3351_v30 = vadd.f32 %v7163_v17, %v3350_v11 }
0x27e0   :  { %3937 = vmatpush.msrb.mxu1 %v7129_v32 }
0x27e1   :  { %v3536_v9 = vperm.slane %v3351_v30, 0 }
0x27e2   :  { %3938 = vmatpush.msrb.mxu1 %v7132_v4  ;;  %v3428_v4 = vpop.f32.mrf.mxu2 }
0x27e3   :  { %v3540_v39 = vadd.f32 %v3536_v9, %v5894_v45 }
0x27e4   :  { %3939 = vmatpush.msrb.mxu1 %v7135_v12 }
0x27e5   :  { %4756 = vmatmul.msk.f32.gmra.mxu1 %vm278_vm0, %v7138_v10 }
0x27e6   :  { %v3469_v32 = vpop.f32.mrf.mxu3 }
0x27e7   :  { %v3470_v12 = vadd.f32 %v3469_v32, %v3428_v4 }
0x27ed   :  { %4757 = vmatmul.msk.f32.gmra.mxu1 %vm278_vm0, %v7142_v24  ;;  %v3431_v24 = vpop.f32.mrf.mxu2 }
0x27ee   :  { %v3472_v10 = vpop.f32.mrf.mxu3 }
0x27ef   :  { %v3473_v61 = vadd.f32 %v3472_v10, %v3431_v24 }
0x27f5   :  { %4758 = vmatmul.msk.f32.gmra.mxu1 %vm278_vm0, %v7146_v43  ;;  %v3434_v25 = vpop.f32.mrf.mxu2 }
0x27f6   :  { %v3475_v52 = vpop.f32.mrf.mxu3 }
0x27f7   :  { %v3476_v42 = vadd.f32 %v3475_v52, %v3434_v25 }
0x27fd   :  { %v3437_v4 = vpop.f32.mrf.mxu2 }
0x2852   :  { %v7509_v3 = vpop.f32.mrf.mxu1 }
0x285a   :  { %v3399_v29 = vpop.f32.mrf.mxu1 }
0x285b   :  { %4770 = vmatmul.msk.f32.vlgmr.msra.gmra.mxu0 %vm428_vm2, %v3399_v29 }
0x285c   :  { %4802 = vmatpush.msk.msra.mxu0 %vm432_vm1, %v7153_v41 }
0x2862   :  { %v3402_v48 = vpop.f32.mrf.mxu1 }
0x2863   :  { %4771 = vmatmul.msk.f32.gmra.mxu0 %vm428_vm2, %v3402_v48  ;;  %v3535_v48 = vrot.slane %v3351_v30, 1 }
0x2865   :  { %v3537_v24 = vperm.slane %v3535_v48, 0 }
0x2867   :  { %v3543_v25 = vadd.f32 %v3537_v24, %v5910_v38 }
0x286a   :  { %v3405_v60 = vpop.f32.mrf.mxu1 }
0x286b   :  { %4772 = vmatmul.msk.f32.gmra.mxu0 %vm428_vm2, %v3405_v60  ;;  %v3541_v60 = vadd.f32 %v3536_v9, %v5899_v57  ;;  %v3542_v9 = vadd.f32 %v3537_v24, %v5904_v23 }
0x2872   :  { %v3408_v46 = vpop.f32.mrf.mxu1 }
0x2873   :  { %4773 = vmatmul.msk.f32.gmra.mxu0 %vm428_vm2, %v3408_v46 }
0x28d8   :  { %v3510_v43 = vpop.f32.mrf.mxu0 }
0x28d9   :  { %v3522_v19 = vadd.f32 %v3510_v43, %v3470_v12  ;;  %v3478_v12 = vpop.f32.mrf.mxu3  ;;  %v5323_v43 = vld [vmem:[%s7865_s7] sm:$0xf] }
0x28db   :  { %v3526_v41 = vadd.f32 %v7166_v15, %v3522_v19  ;;  %v3479_v19 = vadd.f32 %v3478_v12, %v3437_v4 }
0x28dd   :  { %5089 = vtanh.f32 %v3526_v41 }
0x28e0   :  { %v3513_v63 = vpop.f32.mrf.mxu0 }
0x28e1   :  { %v3523_v33 = vadd.f32 %v3513_v63, %v3473_v61 }
0x28e3   :  { %v5090_v50 = vpop.eup %5089  ;;  %v3527_v21 = vadd.f32 %v7166_v15, %v3523_v33 }
0x28e4   :  { %v3544_v56 = vadd.f32 %v5090_v50, %v3540_v39 }
0x28e5   :  { %5091 = vtanh.f32 %v3527_v21 }
0x28e6   :  { %5093 = vtanh.f32 %v3544_v56 }
0x28e8   :  { %v3516_v29 = vpop.f32.mrf.mxu0 }
0x28e9   :  { %v3524_v17 = vadd.f32 %v3516_v29, %v3476_v42  ;;  %v7534_v42 = vld [vmem:[#allocation2 + $0xc] sm:$0x3] }
0x28eb   :  { %v5092_v46 = vpop.eup %5091  ;;  %v3528_v11 = vadd.f32 %v7166_v15, %v3524_v17 }
0x28ec   :  { %v5094_v32 = vpop.eup %5093  ;;  %v3545_v10 = vadd.f32 %v5092_v46, %v3541_v60 }
0x28ed   :  { %5095 = vtanh.f32 %v3528_v11  ;;  %4774 = vmatmul.msk.f32.vlgmr.msra.gmra.mxu1 %vm278_vm0, %v5094_v32 }
0x28ee   :  { %5097 = vtanh.f32 %v3545_v10  ;;  %4807 = vmatpush.msk.msra.mxu1 %vm432_vm1, %v5323_v43 }
0x28f0   :  { %v3519_v30 = vpop.f32.mrf.mxu0 }
0x28f1   :  { %v3525_v41 = vadd.f32 %v3519_v30, %v3479_v19 }
0x28f3   :  { %v5096_v61 = vpop.eup %5095  ;;  %v3529_v63 = vadd.f32 %v7166_v15, %v3525_v41 }
0x28f4   :  { %v5098_v33 = vpop.eup %5097  ;;  %v3546_v39 = vadd.f32 %v5096_v61, %v3542_v9 }
0x28f5   :  { %5099 = vtanh.f32 %v3529_v63  ;;  %4775 = vmatmul.msk.f32.gmra.mxu1 %vm278_vm0, %v5098_v33 }
0x28f6   :  { %5101 = vtanh.f32 %v3546_v39 }
0x28fb   :  { %v5100_v52 = vpop.eup %5099 }
0x28fc   :  { %v5102_v50 = vpop.eup %5101  ;;  %v3547_v21 = vadd.f32 %v5100_v52, %v3543_v25 }
0x28fd   :  { %4776 = vmatmul.msk.f32.gmra.mxu1 %vm278_vm0, %v5102_v50 }
0x28fe   :  { %5103 = vtanh.f32 %v3547_v21 }
0x2904   :  { %v5104_v56 = vpop.eup %5103 }
0x2905   :  { %4777 = vmatmul.msk.f32.gmra.mxu1 %vm278_vm0, %v5104_v56 }
0x290d   :  { %4793 = vmatmul.msk.f32.vlgmr.msrb.gmra.mxu1 %vm278_vm0, %v7534_v42 }
0x290e   :  { %4324 = vmatpush.msrb.mxu1 %v7189_v20 }
0x2910   :  { %4325 = vmatpush.msrb.mxu1 %v7195_v47 }
0x2912   :  { %4326 = vmatpush.msrb.mxu1 %v7201_v8 }
0x2914   :  { %4327 = vmatpush.msrb.mxu1 %v7207_v2 }
0x2916   :  { %4328 = vmatpush.msrb.mxu1 %v7213_v40 }
0x2918   :  { %4329 = vmatpush.msrb.mxu1 %v7219_v58 }
0x291a   :  { %4330 = vmatpush.msrb.mxu1 %v7225_v34 }
0x291c   :  { %4331 = vmatpush.msrb.mxu1 %v7231_v27 }
0x291e   :  { %4332 = vmatpush.msrb.mxu1 %v7237_v14 }
0x2920   :  { %4333 = vmatpush.msrb.mxu1 %v7243_v18 }
0x2922   :  { %4334 = vmatpush.msrb.mxu1 %v7249_v0 }
0x2924   :  { %4335 = vmatpush.msrb.mxu1 %v7255_v31 }
0x296a   :  { %v3581_v15 = vpop.f32.mrf.mxu1 }
0x296b   :  { %v3593_v47 = vsel %vm428_vm2, %v3581_v15, -inf }
0x2972   :  { %v3584_v20 = vpop.f32.mrf.mxu1 }
0x2973   :  { %v3594_v8 = vsel %vm428_vm2, %v3584_v20, -inf }
0x2974   :  { %v3595_v2 = vmax.f32 %v3593_v47, %v3594_v8 }
0x2976   :  { %v3596_v40 = vrot.slane %v3595_v2, 4 }
0x2978   :  { %v3597_v58 = vmax.f32 %v3595_v2, %v3596_v40 }
0x297a   :  { %v3598_v34 = vrot.slane %v3597_v58, 2  ;;  %v3587_v29 = vpop.f32.mrf.mxu1 }
0x297b   :  { %v3602_v0 = vsel %vm428_vm2, %v3587_v29, -inf }
0x297c   :  { %v3599_v27 = vmax.f32 %v3597_v58, %v3598_v34 }
0x297e   :  { %v3600_v17 = vrot.slane %v3599_v27, 1 }
0x2980   :  { %v3601_v14 = vmax.f32 %v3599_v27, %v3600_v17 }
0x2982   :  { %v3611_v48 = vsub.f32 %v3581_v15, %v3601_v14  ;;  %v3612_v18 = vsub.f32 %v3584_v20, %v3601_v14  ;;  %v3590_v60 = vpop.f32.mrf.mxu1 }
0x2983   :  { %v3603_v31 = vsel %vm428_vm2, %v3590_v60, -inf }
0x2984   :  { %v3615_v46 = vmul.f32 1.442695, %v3611_v48  ;;  %v3617_v11 = vmul.f32 1.442695, %v3612_v18  ;;  %v3604_v32 = vmax.f32 %v3602_v0, %v3603_v31 }
0x2986   :  { %5105 = vpow2.f32 %v3615_v46  ;;  %v3605_v4 = vrot.slane %v3604_v32, 4 }
0x2987   :  { %5107 = vpow2.f32 %v3617_v11 }
0x2988   :  { %v3606_v12 = vmax.f32 %v3604_v32, %v3605_v4  ;;  %v5324_v4 = vld [vmem:[#allocation13] sm:$0xf] }
0x298a   :  { %v3607_v10 = vrot.slane %v3606_v12, 2 }
0x298c   :  { %v5106_v24 = vpop.eup %5105  ;;  %v3608_v43 = vmax.f32 %v3606_v12, %v3607_v10  ;;  %v5325_v12 = vld [vmem:[#allocation5] sm:$0xff]  ;;  %v5326_v10 = vld [vmem:[#allocation5 + $0x8] sm:$0xff] }
0x298d   :  { %v5108_v19 = vpop.eup %5107  ;;  %v3623_v30 = vsel %vm428_vm2, %v5106_v24, 0.0 }
0x298e   :  { %v3624_v41 = vsel %vm428_vm2, %v5108_v19, 0.0  ;;  %v3609_v9 = vrot.slane %v3608_v43, 1 }
0x298f   :  { %v3625_v61 = vadd.f32 %v3624_v41, %v3623_v30  ;;  %v7952_v30 = vld [vmem:[#allocation31_spill] sm:$0xff] }
0x2990   :  { %v3610_v63 = vmax.f32 %v3608_v43, %v3609_v9  ;;  %v7950_v43 = vld [vmem:[#allocation30_spill] sm:$0xff]  ;;  %v5327_v41 = vld [vmem:[#allocation5 + $0x10] sm:$0xff] }
0x2991   :  { %v3626_v33 = vrot.slane %v3625_v61, 4 }
0x2992   :  { %v3613_v39 = vsub.f32 %v3587_v29, %v3610_v63  ;;  %v3614_v25 = vsub.f32 %v3590_v60, %v3610_v63 }
0x2993   :  { %v3627_v52 = vadd.f32 %v3626_v33, %v3625_v61 }
0x2994   :  { %v3619_v50 = vmul.f32 1.442695, %v3613_v39  ;;  %v3621_v21 = vmul.f32 1.442695, %v3614_v25 }
0x2995   :  { %v3628_v56 = vrot.slane %v3627_v52, 2 }
0x2996   :  { %5109 = vpow2.f32 %v3619_v50 }
0x2997   :  { %v3629_v15 = vadd.f32 %v3628_v56, %v3627_v52  ;;  %5111 = vpow2.f32 %v3621_v21 }
0x2999   :  { %v3630_v20 = vrot.slane %v3629_v15, 1 }
0x299b   :  { %v3631_v47 = vadd.f32 %v3630_v20, %v3629_v15 }
0x299c   :  { %v5110_v8 = vpop.eup %5109 }
0x299d   :  { %v5112_v2 = vpop.eup %5111  ;;  %5113 = vrcp.f32 %v3631_v47  ;;  %v3632_v40 = vsel %vm428_vm2, %v5110_v8, 0.0 }
0x299e   :  { %v3633_v58 = vsel %vm428_vm2, %v5112_v2, 0.0 }
0x299f   :  { %v3634_v34 = vadd.f32 %v3633_v58, %v3632_v40 }
0x29a1   :  { %v3635_v27 = vrot.slane %v3634_v34, 4 }
0x29a3   :  { %v5114_v29 = vpop.eup %5113  ;;  %v3636_v17 = vadd.f32 %v3635_v27, %v3634_v34 }
0x29a4   :  { %v7558_v14 = vmul.f32 %v5114_v29, %v5106_v24  ;;  %v7560_v48 = vmul.f32 %v5114_v29, %v5108_v19  ;;  %v7949_v24 = vld [vmem:[#allocation29_spill] sm:$0xff] }
0x29a5   :  { %v3637_v18 = vrot.slane %v3636_v17, 2  ;;  %v7951_v19 = vld [vmem:[#allocation25_spill] sm:$0xff] }
0x29a6   :  { %4783 = vst.msk [vmem:[%s7880_s22 + $0xa0] sm:$0xff] %vm428_vm2, %v7558_v14  ;;  %4779 = vmatmul.msk.f32.vlgmr.msrb.gmra.mxu2 %vm428_vm2, %v7558_v14 }
0x29a7   :  { %4784 = vst.msk [vmem:[%s7880_s22 + $0xa8] sm:$0xff] %vm428_vm2, %v7560_v48  ;;  %v3638_v60 = vadd.f32 %v3637_v18, %v3636_v17 }
0x29a9   :  { %v3639_v0 = vrot.slane %v3638_v60, 1 }
0x29ab   :  { %v3640_v31 = vadd.f32 %v3639_v0, %v3638_v60 }
0x29ad   :  { %5115 = vrcp.f32 %v3640_v31 }
0x29ae   :  { %4780 = vmatmul.msk.f32.gmra.mxu2 %vm428_vm2, %v7560_v48 }
0x29b3   :  { %v5116_v46 = vpop.eup %5115 }
0x29b4   :  { %v7576_v11 = vmul.f32 %v5116_v46, %v5112_v2  ;;  %v7578_v32 = vmul.f32 %v5116_v46, %v5110_v8  ;;  %v3722_v46 = vpop.permute.xlu0 %3721 }
0x29b6   :  { %4786 = vst.msk [vmem:[%s7880_s22 + $0xb8] sm:$0xff] %vm428_vm2, %v7576_v11  ;;  %4781 = vmatmul.msk.f32.gmra.mxu2 %vm428_vm2, %v7578_v32 }
0x29b7   :  { %4785 = vst.msk [vmem:[%s7880_s22 + $0xb0] sm:$0xff] %vm428_vm2, %v7578_v32  ;;  %3956 = vmatpush.msra.mxu2 %v7576_v11 }
0x29b9   :  { %3957 = vmatpush.msra.mxu2 %v7578_v32 }
0x29bb   :  { %3958 = vmatpush.msra.mxu2 %v7560_v48 }
0x29bd   :  { %3959 = vmatpush.msra.mxu2 %v7558_v14 }
0x29be   :  { %4782 = vmatmul.msk.f32.gmra.mxu2 %vm428_vm2, %v7576_v11 }
0x29bf   :  { %4812 = vmatpush.msk.msrb.mxu2 %vm432_vm1, %v5324_v4  ;;  %v7953_v4 = vld [vmem:[#allocation28_spill] sm:$0xff] }
0x29c6   :  { %4794 = vmatmul.msk.f32.vlgmr.msra.gmra.mxu2 %vm278_vm0, %v5325_v12 }
0x29c7   :  { %4461 = vmatpush.msra.mxu2 %v7313_v59  ;;  %v5328_v59 = vld [vmem:[#allocation5 + $0x18] sm:$0xff] }
0x29c9   :  { %4462 = vmatpush.msra.mxu2 %v7319_v13 }
0x29cb   :  { %4463 = vmatpush.msra.mxu2 %v7325_v22 }
0x29cd   :  { %4464 = vmatpush.msra.mxu2 %v7331_v44 }
0x29ce   :  { %4795 = vmatmul.msk.f32.gmra.mxu2 %vm278_vm0, %v5326_v10 }
0x29cf   :  { %4465 = vmatpush.msra.mxu2 %v7949_v24 }
0x29d1   :  { %4466 = vmatpush.msra.mxu2 %v7950_v43 }
0x29d3   :  { %4467 = vmatpush.msra.mxu2 %v7951_v19 }
0x29d5   :  { %4468 = vmatpush.msra.mxu2 %v7952_v30 }
0x29d6   :  { %4796 = vmatmul.msk.f32.gmra.mxu2 %vm278_vm0, %v5327_v41 }
0x29de   :  { %4797 = vmatmul.msk.f32.gmra.mxu2 %vm278_vm0, %v5328_v59 }
0x2a29   :  { %v3676_v13 = vpop.f32.mrf.mxu2 }
0x2a2a   :  { %v3688_v9 = vmul.f32 %v3676_v13, %v5894_v45 }
0x2a2c   :  { %v3692_v63 = vsel %vm278_vm0, %v3688_v9, 0.0 }
0x2a31   :  { %v3679_v22 = vpop.f32.mrf.mxu2 }
0x2a32   :  { %v3689_v44 = vmul.f32 %v3679_v22, %v5899_v57 }
0x2a34   :  { %v3693_v61 = vsel %vm278_vm0, %v3689_v44, 0.0 }
0x2a35   :  { %v3694_v33 = vadd.f32 %v3693_v61, %v3692_v63 }
0x2a37   :  { %v3695_v25 = vrot.slane %v3694_v33, 4 }
0x2a39   :  { %v3682_v39 = vpop.f32.mrf.mxu2  ;;  %v3696_v50 = vadd.f32 %v3695_v25, %v3694_v33 }
0x2a3a   :  { %v3690_v52 = vmul.f32 %v3682_v39, %v5904_v23  ;;  %v7954_v39 = vld [vmem:[#allocation32_spill] sm:$0xff] }
0x2a3b   :  { %v3697_v47 = vrot.slane %v3696_v50, 2 }
0x2a3c   :  { %v3701_v15 = vsel %vm278_vm0, %v3690_v52, 0.0 }
0x2a3d   :  { %v3698_v58 = vadd.f32 %v3697_v47, %v3696_v50 }
0x2a3f   :  { %v3699_v27 = vrot.slane %v3698_v58, 1 }
0x2a41   :  { %v3685_v21 = vpop.f32.mrf.mxu2  ;;  %v3700_v18 = vadd.f32 %v3699_v27, %v3698_v58 }
0x2a42   :  { %v3691_v56 = vmul.f32 %v3685_v21, %v5910_v38 }
0x2a44   :  { %v3702_v20 = vsel %vm278_vm0, %v3691_v56, 0.0 }
0x2a45   :  { %v3703_v8 = vadd.f32 %v3702_v20, %v3701_v15 }
0x2a47   :  { %v3704_v2 = vrot.slane %v3703_v8, 4 }
0x2a49   :  { %v3705_v40 = vadd.f32 %v3704_v2, %v3703_v8  ;;  %v7955_v2 = vld [vmem:[#allocation34_spill] sm:$0xff] }
0x2a4b   :  { %v3706_v34 = vrot.slane %v3705_v40, 2 }
0x2a4d   :  { %v3707_v29 = vadd.f32 %v3706_v34, %v3705_v40 }
0x2a4f   :  { %v3708_v17 = vrot.slane %v3707_v29, 1 }
0x2a51   :  { %v3709_v60 = vadd.f32 %v3708_v17, %v3707_v29 }
0x2a53   :  { %v3717_v0 = vsel %vm753_vm3, %v3709_v60, %v3700_v18 }
0x2a54   :  { %3718 = vrot.lane.b32.xlu2 %v3717_v0, %s5606_s1 }
0x2aae   :  { %v7621_v31 = vpop.permute.xlu2 %3718 }
0x2aaf   :  { %v3724_v12 = vsel %vm278_vm0, %v7953_v4, %v7621_v31 }
0x2ab0   :  { %v3725_v10 = vsel %vm759_vm4, %v3724_v12, %v3722_v46 }
0x2ab1   :  { %4787 = vmatmul.msk.f32.vlgmr.msrb.gmra.mxu3 %vm764_vm5, %v3725_v10 }
0x2ab2   :  { %3898 = vmatpush.msrb.mxu3 %v7384_v54 }
0x2ab4   :  { %3899 = vmatpush.msrb.mxu3 %v7390_v36 }
0x2ab6   :  { %3900 = vmatpush.msrb.mxu3 %v7396_v26 }
0x2ab8   :  { %3901 = vmatpush.msrb.mxu3 %v7402_v49 }
0x2b34   :  { %v3746_v24 = vpop.f32.mrf.mxu3 }
0x2b35   :  { %v3747_v43 = vadd.f32 %v7408_v55, %v3746_v24 }
0x2b37   :  { %5117 = vtanh.f32 %v3747_v43  ;;  %v4788_v30 = vmul.f32 -1.442695, %v3747_v43 }
0x2b39   :  { %5119 = vpow2.f32 %v4788_v30 }
0x2b3d   :  { %v5118_v19 = vpop.eup %5117 }
0x2b3e   :  { %3771 = vrot.lane.b32.xlu1 %v5118_v19, %s5613_s21 }
0x2b3f   :  { %v5120_v41 = vpop.eup %5119 }
0x2b40   :  { %v3752_v59 = vadd.f32 1.0, %v5120_v41 }
0x2b42   :  { %5121 = vrcp.f32 %v3752_v59  ;;  %v3764_v26 = vand.u32 2147483648, %v3752_v59  ;;  %vm3758_vm7 = vweird.f32 %v3752_v59  ;;  %v3762_v49 = vand.u32 2147483647, %v3752_v59 }
0x2b44   :  { %v3765_v9 = vor.u32 1.1754944e-38, %v3764_v26  ;;  %vm3763_vm9 = vcmp.eq.f32.partialorder %v3762_v49, 8.507059e+37  ;;  %v5337_v49 = vld [vmem:[#allocation7 + $0x18] sm:$0xff] }
0x2b48   :  { %v5122_v13 = vpop.eup %5121 }
0x2b49   :  { %v3754_v54 = vmul.f32 %v5122_v13, %v3752_v59  ;;  %vm3759_vm6 = vweird.f32 %v5122_v13 }
0x2b4a   :  { %vm3760_vm8 = vmor %vm3758_vm7, %vm3759_vm6 }
0x2b4b   :  { %v3755_v22 = vsub.f32 1.0, %v3754_v54 }
0x2b4d   :  { %v3756_v36 = vmul.f32 %v5122_v13, %v3755_v22 }
0x2b4f   :  { %v3757_v44 = vadd.f32 %v5122_v13, %v3756_v36 }
0x2b51   :  { %v3761_v55 = vsel %vm3760_vm8, %v5122_v13, %v3757_v44  ;;  %v3961_v44 = vpop.f32.mrf.mxu2  ;;  %vm951_vm8 = vcmask 123904  }
0x2b52   :  { %v3766_v63 = vsel %vm3763_vm9, %v3765_v9, %v3761_v55  ;;  %4808 = vmatmul.msk.f32.vlgmr.msra.gmra.mxu1 %vm428_vm2, %v3961_v44 }
0x2b53   :  { %v3769_v25 = vmul.f32 %v3766_v63, %v7954_v39  ;;  %4396 = vmatpush.msra.mxu1 %v7446_v51  ;;  %v3941_v39 = vpop.f32.mrf.mxu1 }
0x2b55   :  { %4397 = vmatpush.msra.mxu1 %v7449_v6 }
0x2b57   :  { %4398 = vmatpush.msra.mxu1 %v7452_v53 }
0x2b59   :  { %4399 = vmatpush.msra.mxu1 %v7455_v28  ;;  %v5329_v28 = vld [vmem:[%s7870_s12] sm:$0xf] }
0x2b5b   :  { %4400 = vmatpush.msra.mxu1 %v7459_v62 }
0x2b5d   :  { %4401 = vmatpush.msra.mxu1 %v7462_v1 }
0x2b5f   :  { %4402 = vmatpush.msra.mxu1 %v7465_v7 }
0x2b61   :  { %4403 = vmatpush.msra.mxu1 %v7468_v35  ;;  %v5330_v35 = vld [vmem:[%s7869_s11 + $0x18] sm:$0xff] }
0x2bb0   :  { %v3772_v61 = vpop.permute.xlu1 %3771 }
0x2bb1   :  { %v3774_v33 = vmul.f32 %v3772_v61, %v3766_v63 }
0x2bb3   :  { %3776 = vrot.lane.b32.xlu2 %v3774_v33, %s5606_s1 }
0x2bbb   :  { %3790 = vrot.lane.b32.xlu2 %v7441_v37, %s5613_s21 }
0x2c0d   :  { %v3777_v52 = vpop.permute.xlu2 %3776 }
0x2c0e   :  { %v7638_v50 = vadd.f32 %v3777_v52, %v3769_v25  ;;  %v4060_v25 = vpop.f32.mrf.mxu1 }
0x2c10   :  { %5123 = vtanh.f32 %v7638_v50 }
0x2c15   :  { %v3791_v20 = vpop.permute.xlu2 %3790 }
0x2c16   :  { %v5124_v21 = vpop.eup %5123 }
0x2c17   :  { %3782 = vrot.lane.b32.xlu0 %v5124_v21, %s5613_s21 }
0x2c89   :  { %v3783_v56 = vpop.permute.xlu0 %3782 }
0x2c8a   :  { %v3785_v15 = vmul.f32 %v3783_v56, %v3766_v63 }
0x2c8c   :  { %3787 = vrot.lane.b32.xlu1 %v3785_v15, %s5606_s1 }
0x2cfe   :  { %v3788_v47 = vpop.permute.xlu1 %3787 }
0x2cff   :  { %v3793_v8 = vsel %vm278_vm0, %v3788_v47, %v3791_v20 }
0x2d00   :  { %4789 = vmatmul.msk.f32.vlgmr.msra.gmra.mxu3 %vm759_vm4, %v3793_v8  ;;  %v5338_v8 = vld [vmem:[%s7917_s27] ss:$0 sm:$0xff]  ;;  %s4518_s27 = sshll.u32 %s7960_s9, 4  ;;  %s4519_s27 = int_to_ptr.hbm [resolvable:$true] %s4518_s27 }
0x2d01   :  { %3985 = vmatpush.msra.mxu3 %v7576_v11 }
0x2d03   :  { %3986 = vmatpush.msra.mxu3 %v7578_v32 }
0x2d05   :  { %3987 = vmatpush.msra.mxu3 %v7560_v48 }
0x2d07   :  { %3988 = vmatpush.msra.mxu3 %v7558_v14 }
0x2d83   :  { %v3814_v37 = vpop.f32.mrf.mxu3 }
0x2d84   :  { %v3815_v40 = vadd.f32 %v7955_v2, %v3814_v37  ;;  %v3942_v37 = vadd.f32 %v5338_v8, %v3941_v39  ;;  %v5339_v2 = vld [vmem:[#allocation14] ss:$0 sm:$0xff] }
0x2d86   :  { %5125 = vtanh.f32 %v3815_v40  ;;  %v4790_v34 = vmul.f32 -1.442695, %v3815_v40 }
0x2d88   :  { %5127 = vpow2.f32 %v4790_v34 }
0x2d8c   :  { %v5126_v58 = vpop.eup %5125 }
0x2d8d   :  { %3839 = vrot.lane.b32.xlu0 %v5126_v58, %s5613_s21  ;;  %v4127_v58 = vperm.slane %v3942_v37, 0 }
0x2d8e   :  { %v5128_v27 = vpop.eup %5127 }
0x2d8f   :  { %v3820_v29 = vadd.f32 1.0, %v5128_v27 }
0x2d91   :  { %5129 = vrcp.f32 %v3820_v29  ;;  %v3832_v4 = vand.u32 2147483648, %v3820_v29  ;;  %vm3826_vm11 = vweird.f32 %v3820_v29  ;;  %v3830_v12 = vand.u32 2147483647, %v3820_v29 }
0x2d93   :  { %v3833_v24 = vor.u32 1.1754944e-38, %v3832_v4  ;;  %vm3831_vm13 = vcmp.eq.f32.partialorder %v3830_v12, 8.507059e+37 }
0x2d97   :  { %v5130_v17 = vpop.eup %5129 }
0x2d98   :  { %v3822_v18 = vmul.f32 %v5130_v17, %v3820_v29  ;;  %vm3827_vm10 = vweird.f32 %v5130_v17 }
0x2d99   :  { %vm3828_vm12 = vmor %vm3826_vm11, %vm3827_vm10 }
0x2d9a   :  { %v3823_v60 = vsub.f32 1.0, %v3822_v18 }
0x2d9c   :  { %v3824_v0 = vmul.f32 %v5130_v17, %v3823_v60 }
0x2d9e   :  { %v3825_v46 = vadd.f32 %v5130_v17, %v3824_v0 }
0x2da0   :  { %v3829_v10 = vsel %vm3828_vm12, %v5130_v17, %v3825_v46  ;;  %v4131_v17 = vadd.f32 %v4127_v58, %v5894_v45 }
0x2da1   :  { %v3834_v19 = vsel %vm3831_vm13, %v3833_v24, %v3829_v10 }
0x2da2   :  { %v3837_v41 = vmul.f32 %v3834_v19, %v7436_v5  ;;  %v3964_v5 = vpop.f32.mrf.mxu2 }
0x2da3   :  { %4809 = vmatmul.msk.f32.gmra.mxu1 %vm428_vm2, %v3964_v5 }
0x2daa   :  { %v3967_v26 = vpop.f32.mrf.mxu2 }
0x2dab   :  { %4810 = vmatmul.msk.f32.gmra.mxu1 %vm428_vm2, %v3967_v26 }
0x2db2   :  { %v3970_v51 = vpop.f32.mrf.mxu2 }
0x2db3   :  { %4811 = vmatmul.msk.f32.gmra.mxu1 %vm428_vm2, %v3970_v51 }
0x2dff   :  { %v3840_v43 = vpop.permute.xlu0 %3839 }
0x2e00   :  { %v3842_v30 = vmul.f32 %v3840_v43, %v3834_v19  ;;  %v4126_v43 = vrot.slane %v3942_v37, 1 }
0x2e02   :  { %3844 = vrot.lane.b32.xlu1 %v3842_v30, %s5606_s1  ;;  %v4128_v5 = vperm.slane %v4126_v43, 0 }
0x2e20   :  { %v4063_v56 = vpop.f32.mrf.mxu1 }
0x2e28   :  { %v4066_v60 = vpop.f32.mrf.mxu1 }
0x2e74   :  { %v3845_v59 = vpop.permute.xlu1 %3844 }
0x2e75   :  { %v7653_v13 = vadd.f32 %v3845_v59, %v3837_v41 }
0x2e77   :  { %5131 = vtanh.f32 %v7653_v13 }
0x2e7d   :  { %v5132_v54 = vpop.eup %5131 }
0x2e7e   :  { %3850 = vrot.lane.b32.xlu2 %v5132_v54, %s5613_s21 }
0x2e86   :  { %4312 = vrot.lane.b32.xlu2 %v3785_v15, %s5614_s2 }
0x2ed8   :  { %v3851_v22 = vpop.permute.xlu2 %3850 }
0x2ed9   :  { %v7658_v36 = vmul.f32 %v3851_v22, %v3834_v19  ;;  %v4132_v19 = vadd.f32 %v4127_v58, %v5899_v57  ;;  %v4069_v22 = vpop.f32.mrf.mxu1 }
0x2edb   :  { %3855 = vrot.lane.b32.xlu0 %v7658_v36, %s5606_s1 }
0x2f4d   :  { %v3856_v6 = vpop.permute.xlu0 %3855 }
0x2f4e   :  { %v3858_v53 = vsel %vm278_vm0, %v3856_v6, %v7621_v31  ;;  %v5336_v31 = vld [vmem:[#allocation7 + $0x10] sm:$0xff] }
0x2f4f   :  { %4791 = vmatmul.msk.f32.vlgmr.msrb.gmra.mxu0 %vm759_vm4, %v3858_v53  ;;  %v4133_v53 = vadd.f32 %v4128_v5, %v5904_v23 }
0x2f50   :  { %4821 = vmatpush.msk.msrb.mxu0 %vm432_vm1, %v5329_v28 }
0x2f57   :  { %4803 = vmatmul.msk.f32.vlgmr.msra.gmra.mxu0 %vm428_vm2, %v7558_v14  ;;  %v5331_v14 = vld [vmem:[%s7869_s11 + $0x10] sm:$0xff] }
0x2f5f   :  { %4804 = vmatmul.msk.f32.gmra.mxu0 %vm428_vm2, %v7560_v48  ;;  %v5332_v48 = vld [vmem:[%s7869_s11 + $0x8] sm:$0xff] }
0x2f67   :  { %4805 = vmatmul.msk.f32.gmra.mxu0 %vm428_vm2, %v7578_v32  ;;  %v5335_v32 = vld [vmem:[#allocation7 + $0x8] sm:$0xff] }
0x2f6f   :  { %4806 = vmatmul.msk.f32.gmra.mxu0 %vm428_vm2, %v7576_v11  ;;  %v5334_v11 = vld [vmem:[#allocation7] sm:$0xff] }
0x2fcc   :  { %v3879_v62 = vpop.f32.mrf.mxu0 }
0x2fcd   :  { %v3880_v1 = vadd.f32 %v7489_v16, %v3879_v62  ;;  %v5333_v16 = vld [vmem:[%s7869_s11] sm:$0xff] }
0x2fcf   :  { %5133 = vtanh.f32 %v3880_v1 }
0x2fd4   :  { %v4019_v52 = vpop.f32.mrf.mxu0 }
0x2fd5   :  { %v5134_v7 = vpop.eup %5133  ;;  %v4061_v21 = vadd.f32 %v4060_v25, %v4019_v52 }
0x2fd6   :  { %4792 = vmatmul.msk.f32.vlgmr.msrb.gmra.mxu3 %vm278_vm0, %v5134_v7 }
0x2fd7   :  { %4167 = vmatpush.msrb.mxu3 %v5330_v35  ;;  %v4134_v35 = vadd.f32 %v4128_v5, %v5910_v38 }
0x2fd9   :  { %4168 = vmatpush.msrb.mxu3 %v5331_v14 }
0x2fdb   :  { %4169 = vmatpush.msrb.mxu3 %v5332_v48 }
0x2fdc   :  { %v4022_v15 = vpop.f32.mrf.mxu0 }
0x2fdd   :  { %4170 = vmatpush.msrb.mxu3 %v5333_v16  ;;  %v4064_v34 = vadd.f32 %v4063_v56, %v4022_v15 }
0x2fde   :  { %4798 = vmatmul.msk.f32.vlgmr.msra.gmra.mxu3 %vm278_vm0, %v5334_v11 }
0x2fe4   :  { %v4025_v18 = vpop.f32.mrf.mxu0 }
0x2fe5   :  { %v4067_v12 = vadd.f32 %v4066_v60, %v4025_v18 }
0x2fe6   :  { %4799 = vmatmul.msk.f32.gmra.mxu3 %vm278_vm0, %v5335_v32 }
0x2fec   :  { %v4028_v54 = vpop.f32.mrf.mxu0 }
0x2fed   :  { %v4070_v26 = vadd.f32 %v4069_v22, %v4028_v54 }
0x2fee   :  { %4800 = vmatmul.msk.f32.gmra.mxu3 %vm278_vm0, %v5336_v31 }
0x2ff6   :  { %4801 = vmatmul.msk.f32.gmra.mxu3 %vm278_vm0, %v5337_v49 }
0x3059   :  { %v7707_v55 = vpop.f32.mrf.mxu3 }
0x3061   :  { %v3990_v9 = vpop.f32.mrf.mxu3 }
0x3062   :  { %4813 = vmatmul.msk.f32.vlgmr.msrb.gmra.mxu2 %vm428_vm2, %v3990_v9 }
0x3069   :  { %v3993_v61 = vpop.f32.mrf.mxu3 }
0x306a   :  { %4814 = vmatmul.msk.f32.gmra.mxu2 %vm428_vm2, %v3993_v61 }
0x3071   :  { %v3996_v63 = vpop.f32.mrf.mxu3 }
0x3072   :  { %4815 = vmatmul.msk.f32.gmra.mxu2 %vm428_vm2, %v3996_v63 }
0x3079   :  { %v3999_v33 = vpop.f32.mrf.mxu3 }
0x307a   :  { %4816 = vmatmul.msk.f32.gmra.mxu2 %vm428_vm2, %v3999_v33 }
0x30e5   :  { %v4101_v20 = vpop.f32.mrf.mxu2 }
0x30e6   :  { %v4113_v47 = vadd.f32 %v4101_v20, %v4061_v21 }
0x30e8   :  { %v4117_v40 = vadd.f32 %v5339_v2, %v4113_v47 }
0x30ea   :  { %5135 = vtanh.f32 %v4117_v40 }
0x30ed   :  { %v4104_v27 = vpop.f32.mrf.mxu2 }
0x30ee   :  { %v4114_v29 = vadd.f32 %v4104_v27, %v4064_v34 }
0x30f0   :  { %v5136_v0 = vpop.eup %5135  ;;  %v4118_v46 = vadd.f32 %v5339_v2, %v4114_v29 }
0x30f1   :  { %v4135_v4 = vadd.f32 %v5136_v0, %v4131_v17 }
0x30f2   :  { %5137 = vtanh.f32 %v4118_v46 }
0x30f3   :  { %5139 = vtanh.f32 %v4135_v4 }
0x30f5   :  { %v4107_v10 = vpop.f32.mrf.mxu2 }
0x30f6   :  { %v4115_v24 = vadd.f32 %v4107_v10, %v4067_v12 }
0x30f8   :  { %v5138_v30 = vpop.eup %5137  ;;  %v4119_v41 = vadd.f32 %v5339_v2, %v4115_v24 }
0x30f9   :  { %v5140_v59 = vpop.eup %5139  ;;  %v4136_v44 = vadd.f32 %v5138_v30, %v4132_v19 }
0x30fa   :  { %5141 = vtanh.f32 %v4119_v41  ;;  %4817 = vmatmul.msk.f32.vlgmr.msrb.gmra.mxu3 %vm278_vm0, %v5140_v59 }
0x30fb   :  { %5143 = vtanh.f32 %v4136_v44 }
0x30fd   :  { %v4110_v51 = vpop.f32.mrf.mxu2 }
0x30fe   :  { %v4116_v6 = vadd.f32 %v4110_v51, %v4070_v26 }
0x3100   :  { %v5142_v28 = vpop.eup %5141  ;;  %v4120_v62 = vadd.f32 %v5339_v2, %v4116_v6 }
0x3101   :  { %v5144_v1 = vpop.eup %5143  ;;  %v4137_v7 = vadd.f32 %v5142_v28, %v4133_v53 }
0x3102   :  { %5145 = vtanh.f32 %v4120_v62  ;;  %4818 = vmatmul.msk.f32.gmra.mxu3 %vm278_vm0, %v5144_v1 }
0x3103   :  { %5147 = vtanh.f32 %v4137_v7 }
0x3108   :  { %v5146_v14 = vpop.eup %5145 }
0x3109   :  { %v5148_v48 = vpop.eup %5147  ;;  %v4138_v16 = vadd.f32 %v5146_v14, %v4134_v35 }
0x310a   :  { %4819 = vmatmul.msk.f32.gmra.mxu3 %vm278_vm0, %v5148_v48 }
0x310b   :  { %5149 = vtanh.f32 %v4138_v16 }
0x3111   :  { %v5150_v11 = vpop.eup %5149 }
0x3112   :  { %4820 = vmatmul.msk.f32.gmra.mxu3 %vm278_vm0, %v5150_v11 }
0x317d   :  { %v4172_v32 = vpop.f32.mrf.mxu3 }
0x317e   :  { %v4184_v49 = vsel %vm428_vm2, %v4172_v32, -inf }
0x3185   :  { %v4175_v31 = vpop.f32.mrf.mxu3 }
0x3186   :  { %v4185_v9 = vsel %vm428_vm2, %v4175_v31, -inf }
0x3187   :  { %v4186_v61 = vmax.f32 %v4184_v49, %v4185_v9 }
0x3189   :  { %v4187_v63 = vrot.slane %v4186_v61, 4 }
0x318b   :  { %v4188_v33 = vmax.f32 %v4186_v61, %v4187_v63 }
0x318d   :  { %v4189_v39 = vrot.slane %v4188_v33, 2  ;;  %v4178_v25 = vpop.f32.mrf.mxu3 }
0x318e   :  { %v4193_v8 = vsel %vm428_vm2, %v4178_v25, -inf }
0x318f   :  { %v4190_v52 = vmax.f32 %v4188_v33, %v4189_v39 }
0x3191   :  { %v4191_v21 = vrot.slane %v4190_v52, 1 }
0x3193   :  { %v4192_v56 = vmax.f32 %v4190_v52, %v4191_v21 }
0x3195   :  { %v4202_v15 = vsub.f32 %v4172_v32, %v4192_v56  ;;  %v4203_v20 = vsub.f32 %v4175_v31, %v4192_v56  ;;  %v4181_v47 = vpop.f32.mrf.mxu3 }
0x3196   :  { %v4194_v37 = vsel %vm428_vm2, %v4181_v47, -inf }
0x3197   :  { %v4206_v2 = vmul.f32 1.442695, %v4202_v15  ;;  %v4208_v40 = vmul.f32 1.442695, %v4203_v20  ;;  %v4195_v58 = vmax.f32 %v4193_v8, %v4194_v37 }
0x3199   :  { %5151 = vpow2.f32 %v4206_v2  ;;  %v4196_v34 = vrot.slane %v4195_v58, 4 }
0x319a   :  { %5153 = vpow2.f32 %v4208_v40 }
0x319b   :  { %v4197_v27 = vmax.f32 %v4195_v58, %v4196_v34 }
0x319d   :  { %v4198_v29 = vrot.slane %v4197_v27, 2 }
0x319f   :  { %v5152_v17 = vpop.eup %5151  ;;  %v4199_v18 = vmax.f32 %v4197_v27, %v4198_v29 }
0x31a0   :  { %v5154_v60 = vpop.eup %5153  ;;  %v4214_v0 = vsel %vm428_vm2, %v5152_v17, 0.0 }
0x31a1   :  { %v4215_v46 = vsel %vm428_vm2, %v5154_v60, 0.0  ;;  %v4200_v4 = vrot.slane %v4199_v18, 1 }
0x31a2   :  { %v4216_v12 = vadd.f32 %v4215_v46, %v4214_v0 }
0x31a3   :  { %v4201_v10 = vmax.f32 %v4199_v18, %v4200_v4  ;;  %v4313_v4 = vpop.permute.xlu2 %4312 }
0x31a4   :  { %v4217_v24 = vrot.slane %v4216_v12, 4 }
0x31a5   :  { %v4204_v43 = vsub.f32 %v4178_v25, %v4201_v10  ;;  %v4205_v19 = vsub.f32 %v4181_v47, %v4201_v10 }
0x31a6   :  { %v4218_v30 = vadd.f32 %v4217_v24, %v4216_v12  ;;  %v5340_v24 = vld [vmem:[%s7877_s19 + $0x18] sm:$0xff] }
0x31a7   :  { %v4210_v41 = vmul.f32 1.442695, %v4204_v43  ;;  %v4212_v59 = vmul.f32 1.442695, %v4205_v19  ;;  %v5341_v43 = vld [vmem:[%s7877_s19 + $0x10] sm:$0xff]  ;;  %v5342_v19 = vld [vmem:[%s7877_s19 + $0x8] sm:$0xff] }
0x31a8   :  { %v4219_v54 = vrot.slane %v4218_v30, 2 }
0x31a9   :  { %5155 = vpow2.f32 %v4210_v41  ;;  %v5344_v41 = vld [vmem:[%s7872_s14] ss:$0 sm:$0xff] }
0x31aa   :  { %v4220_v22 = vadd.f32 %v4219_v54, %v4218_v30  ;;  %5157 = vpow2.f32 %v4212_v59 }
0x31ac   :  { %v4221_v44 = vrot.slane %v4220_v22, 1 }
0x31ae   :  { %v4222_v5 = vadd.f32 %v4221_v44, %v4220_v22 }
0x31af   :  { %v5156_v26 = vpop.eup %5155 }
0x31b0   :  { %v5158_v51 = vpop.eup %5157  ;;  %5159 = vrcp.f32 %v4222_v5  ;;  %v4223_v6 = vsel %vm428_vm2, %v5156_v26, 0.0 }
0x31b1   :  { %v4224_v53 = vsel %vm428_vm2, %v5158_v51, 0.0 }
0x31b2   :  { %v4225_v28 = vadd.f32 %v4224_v53, %v4223_v6 }
0x31b4   :  { %v4226_v62 = vrot.slane %v4225_v28, 4 }
0x31b6   :  { %v5160_v1 = vpop.eup %5159  ;;  %v4227_v7 = vadd.f32 %v4226_v62, %v4225_v28 }
0x31b7   :  { %v4234_v35 = vmul.f32 %v5160_v1, %v5152_v17  ;;  %v4235_v14 = vmul.f32 %v5160_v1, %v5154_v60 }
0x31b8   :  { %v4228_v48 = vrot.slane %v4227_v7, 2 }
0x31b9   :  { %4826 = vst.msk [vmem:[%s7880_s22 + $0xc0] sm:$0xff] %vm428_vm2, %v4234_v35  ;;  %4822 = vmatmul.msk.f32.vlgmr.msrb.gmra.mxu0 %vm428_vm2, %v4234_v35 }
0x31ba   :  { %v4229_v16 = vadd.f32 %v4228_v48, %v4227_v7  ;;  %4827 = vst.msk [vmem:[%s7880_s22 + $0xc8] sm:$0xff] %vm428_vm2, %v4235_v14 }
0x31bc   :  { %v4230_v11 = vrot.slane %v4229_v16, 1 }
0x31be   :  { %v4231_v32 = vadd.f32 %v4230_v11, %v4229_v16 }
0x31c0   :  { %5161 = vrcp.f32 %v4231_v32 }
0x31c1   :  { %4823 = vmatmul.msk.f32.gmra.mxu0 %vm428_vm2, %v4235_v14 }
0x31c6   :  { %v5162_v31 = vpop.eup %5161 }
0x31c7   :  { %v4236_v49 = vmul.f32 %v5162_v31, %v5156_v26  ;;  %v4237_v9 = vmul.f32 %v5162_v31, %v5158_v51 }
0x31c9   :  { %4824 = vmatmul.msk.f32.gmra.mxu0 %vm428_vm2, %v4236_v49  ;;  %4828 = vst.msk [vmem:[%s7880_s22 + $0xd0] sm:$0xff] %vm428_vm2, %v4236_v49 }
0x31ca   :  { %4829 = vst.msk [vmem:[%s7880_s22 + $0xd8] sm:$0xff] %vm428_vm2, %v4237_v9 }
0x31d1   :  { %4825 = vmatmul.msk.f32.gmra.mxu0 %vm428_vm2, %v4237_v9 }
0x3236   :  { %v4267_v61 = vpop.f32.mrf.mxu0 }
0x3237   :  { %v4279_v39 = vmul.f32 %v4267_v61, %v5894_v45 }
0x3239   :  { %v4283_v52 = vsel %vm278_vm0, %v4279_v39, 0.0 }
0x323e   :  { %v4270_v63 = vpop.f32.mrf.mxu0 }
0x323f   :  { %v4280_v33 = vmul.f32 %v4270_v63, %v5899_v57 }
0x3241   :  { %v4284_v25 = vsel %vm278_vm0, %v4280_v33, 0.0 }
0x3242   :  { %v4285_v21 = vadd.f32 %v4284_v25, %v4283_v52 }
0x3244   :  { %v4286_v15 = vrot.slane %v4285_v21, 4 }
0x3246   :  { %v4273_v56 = vpop.f32.mrf.mxu0  ;;  %v4287_v47 = vadd.f32 %v4286_v15, %v4285_v21 }
0x3247   :  { %v4281_v20 = vmul.f32 %v4273_v56, %v5904_v23 }
0x3248   :  { %v4288_v57 = vrot.slane %v4287_v47, 2 }
0x3249   :  { %v4292_v2 = vsel %vm278_vm0, %v4281_v20, 0.0 }
0x324a   :  { %v4289_v27 = vadd.f32 %v4288_v57, %v4287_v47 }
0x324c   :  { %v4290_v17 = vrot.slane %v4289_v27, 1 }
0x324e   :  { %v4276_v8 = vpop.f32.mrf.mxu0  ;;  %v4291_v0 = vadd.f32 %v4290_v17, %v4289_v27  ;;  %v7801_v17 = vld [vmem:[%s7878_s20] ss:$0 sm:$0xff] }
0x324f   :  { %v4282_v37 = vmul.f32 %v4276_v8, %v5910_v38 }
0x3251   :  { %v4293_v40 = vsel %vm278_vm0, %v4282_v37, 0.0 }
0x3252   :  { %v4294_v58 = vadd.f32 %v4293_v40, %v4292_v2 }
0x3254   :  { %v4295_v45 = vrot.slane %v4294_v58, 4 }
0x3256   :  { %v4296_v34 = vadd.f32 %v4295_v45, %v4294_v58 }
0x3258   :  { %v4297_v29 = vrot.slane %v4296_v34, 2 }
0x325a   :  { %v4298_v18 = vadd.f32 %v4297_v29, %v4296_v34 }
0x325c   :  { %v4299_v60 = vrot.slane %v4298_v18, 1 }
0x325e   :  { %v4300_v46 = vadd.f32 %v4299_v60, %v4298_v18  ;;  %v7956_v18 = vld [vmem:[#allocation27_spill] sm:$0xff] }
0x325f   :  { %v949_v60 = vadd.f32 %v7801_v17, %v7956_v18 }
0x3260   :  { %v4308_v23 = vsel %vm753_vm3, %v4300_v46, %v4291_v0  ;;  %v7957_v46 = vld [vmem:[#allocation33_spill] sm:$0xff] }
0x3261   :  { %4309 = vrot.lane.b32.xlu1 %v4308_v23, %s5606_s1  ;;  %v952_v0 = vsel %vm951_vm8, %v949_v60, -inf  ;;  %v2131_v23 = vadd.f32 %v7801_v17, %v7957_v46 }
0x32d3   :  { %v7762_v38 = vpop.permute.xlu1 %4309 }
0x32d4   :  { %v4315_v12 = vsel %vm278_vm0, %v7534_v42, %v7762_v38  ;;  %v5343_v42 = vld [vmem:[%s7877_s19] sm:$0xff] }
0x32d5   :  { %v4316_v10 = vsel %vm759_vm4, %v4315_v12, %v4313_v4  ;;  %v2133_v4 = vsel %vm951_vm8, %v2131_v23, -inf }
0x32d6   :  { %4830 = vmatmul.msk.f32.vlgmr.msrb.gmra.mxu1 %vm764_vm5, %v4316_v10 }
0x32d7   :  { %4489 = vmatpush.msrb.mxu1 %v5340_v24 }
0x32d9   :  { %4490 = vmatpush.msrb.mxu1 %v5341_v43 }
0x32db   :  { %4491 = vmatpush.msrb.mxu1 %v5342_v19 }
0x32dd   :  { %4492 = vmatpush.msrb.mxu1 %v5343_v42 }
0x3353   :  { %v4337_v30 = vpop.f32.mrf.mxu1 }
0x3354   :  { %v4338_v59 = vadd.f32 %v5344_v41, %v4337_v30 }
0x3356   :  { %5163 = vtanh.f32 %v4338_v59  ;;  %v4831_v22 = vmul.f32 -1.442695, %v4338_v59 }
0x3358   :  { %5165 = vpow2.f32 %v4831_v22 }
0x335c   :  { %v5164_v54 = vpop.eup %5163 }
0x335d   :  { %4362 = vrot.lane.b32.xlu0 %v5164_v54, %s5613_s21 }
0x335e   :  { %v5166_v44 = vpop.eup %5165 }
0x335f   :  { %v4343_v5 = vadd.f32 1.0, %v5166_v44 }
0x3361   :  { %5167 = vrcp.f32 %v4343_v5  ;;  %v4355_v62 = vand.u32 2147483648, %v4343_v5  ;;  %vm4349_vm2 = vweird.f32 %v4343_v5  ;;  %v4353_v1 = vand.u32 2147483647, %v4343_v5 }
0x3363   :  { %v4356_v35 = vor.u32 1.1754944e-38, %v4355_v62  ;;  %vm4354_vm5 = vcmp.eq.f32.partialorder %v4353_v1, 8.507059e+37 }
0x3367   :  { %v5168_v26 = vpop.eup %5167 }
0x3368   :  { %v4345_v51 = vmul.f32 %v5168_v26, %v4343_v5  ;;  %vm4350_vm1 = vweird.f32 %v5168_v26 }
0x3369   :  { %vm4351_vm3 = vmor %vm4349_vm2, %vm4350_vm1 }
0x336a   :  { %v4346_v6 = vsub.f32 1.0, %v4345_v51 }
0x336c   :  { %v4347_v53 = vmul.f32 %v5168_v26, %v4346_v6 }
0x336e   :  { %v4348_v28 = vadd.f32 %v5168_v26, %v4347_v53 }
0x3370   :  { %v4352_v7 = vsel %vm4351_vm3, %v5168_v26, %v4348_v28  ;;  %v3313_v26 = vadd.f32 %v7801_v17, %v7509_v3  ;;  %v7958_v28 = vld [vmem:[#allocation24_spill] sm:$0xff] }
0x3371   :  { %v4357_v48 = vsel %vm4354_vm5, %v4356_v35, %v4352_v7  ;;  %v7819_v62 = vadd.f32 %v7801_v17, %v7958_v28 }
0x3372   :  { %v4360_v11 = vmul.f32 %v4357_v48, %v7638_v50  ;;  %v5345_v50 = vld [vmem:[%s7874_s16] ss:$0 sm:$0xff]  ;;  %v3315_v51 = vsel %vm951_vm8, %v3313_v26, -inf }
0x3373   :  { %v1542_v1 = vsel %vm951_vm8, %v7819_v62, -inf }
0x33cf   :  { %v4363_v14 = vpop.permute.xlu0 %4362 }
0x33d0   :  { %v4365_v16 = vmul.f32 %v4363_v14, %v4357_v48 }
0x33d2   :  { %4367 = vrot.lane.b32.xlu1 %v4365_v16, %s5606_s1 }
0x33da   :  { %4381 = vrot.lane.b32.xlu1 %v7658_v36, %s5613_s21 }
0x3444   :  { %v4368_v32 = vpop.permute.xlu1 %4367 }
0x3445   :  { %v4370_v31 = vadd.f32 %v4368_v32, %v4360_v11 }
0x3447   :  { %5169 = vtanh.f32 %v4370_v31 }
0x344c   :  { %v4382_v63 = vpop.permute.xlu1 %4381 }
0x344d   :  { %v5170_v49 = vpop.eup %5169 }
0x344e   :  { %4373 = vrot.lane.b32.xlu2 %v5170_v49, %s5613_s21 }
0x34a8   :  { %v4374_v9 = vpop.permute.xlu2 %4373 }
0x34a9   :  { %v4376_v61 = vmul.f32 %v4374_v9, %v4357_v48 }
0x34ab   :  { %4378 = vrot.lane.b32.xlu0 %v4376_v61, %s5606_s1 }
0x351d   :  { %v4379_v33 = vpop.permute.xlu0 %4378 }
0x351e   :  { %v4384_v39 = vsel %vm278_vm0, %v4379_v33, %v4382_v63 }
0x351f   :  { %4832 = vmatmul.msk.f32.vlgmr.msra.gmra.mxu1 %vm759_vm4, %v4384_v39 }
0x359c   :  { %v4405_v25 = vpop.f32.mrf.mxu1 }
0x359d   :  { %v4406_v36 = vadd.f32 %v5345_v50, %v4405_v25 }
0x359f   :  { %5171 = vtanh.f32 %v4406_v36  ;;  %v4833_v21 = vmul.f32 -1.442695, %v4406_v36 }
0x35a1   :  { %5173 = vpow2.f32 %v4833_v21 }
0x35a5   :  { %v5172_v52 = vpop.eup %5171 }
0x35a6   :  { %4430 = vrot.lane.b32.xlu2 %v5172_v52, %s5613_s21 }
0x35a7   :  { %v5174_v56 = vpop.eup %5173 }
0x35a8   :  { %v4411_v15 = vadd.f32 1.0, %v5174_v56 }
0x35aa   :  { %5175 = vrcp.f32 %v4411_v15  ;;  %v4423_v40 = vand.u32 2147483648, %v4411_v15  ;;  %vm4417_vm15 = vweird.f32 %v4411_v15  ;;  %v4421_v57 = vand.u32 2147483647, %v4411_v15 }
0x35ac   :  { %v4424_v45 = vor.u32 1.1754944e-38, %v4423_v40  ;;  %vm4422_vm7 = vcmp.eq.f32.partialorder %v4421_v57, 8.507059e+37 }
0x35b0   :  { %v5176_v20 = vpop.eup %5175 }
0x35b1   :  { %v4413_v47 = vmul.f32 %v5176_v20, %v4411_v15  ;;  %vm4418_vm14 = vweird.f32 %v5176_v20 }
0x35b2   :  { %vm4419_vm6 = vmor %vm4417_vm15, %vm4418_vm14 }
0x35b3   :  { %v4414_v8 = vsub.f32 1.0, %v4413_v47 }
0x35b5   :  { %v4415_v37 = vmul.f32 %v5176_v20, %v4414_v8 }
0x35b7   :  { %v4416_v2 = vadd.f32 %v5176_v20, %v4415_v37 }
0x35b9   :  { %v4420_v58 = vsel %vm4419_vm6, %v5176_v20, %v4416_v2  ;;  %v7959_v20 = vld [vmem:[#allocation26_spill] sm:$0xff] }
0x35ba   :  { %v4425_v27 = vsel %vm4422_vm7, %v4424_v45, %v4420_v58  ;;  %v2722_v47 = vadd.f32 %v7801_v17, %v7959_v20 }
0x35bb   :  { %v4428_v12 = vmul.f32 %v4425_v27, %v7653_v13 }
0x35bc   :  { %v2724_v8 = vsel %vm951_vm8, %v2722_v47, -inf }
0x3600   :  { %v4431_v34 = vpop.permute.xlu2 %4430 }
0x3601   :  { %v4433_v29 = vmul.f32 %v4431_v34, %v4425_v27 }
0x3603   :  { %4435 = vrot.lane.b32.xlu0 %v4433_v29, %s5606_s1 }
0x362d   :  { %953 = vmax.xlane.f32.xlu0 %v952_v0 }
0x3635   :  { %2134 = vmax.xlane.f32.xlu0 %v2133_v4 }
0x3675   :  { %v4436_v10 = vpop.permute.xlu0 %4435 }
0x3676   :  { %v4438_v24 = vadd.f32 %v4436_v10, %v4428_v12 }
0x3678   :  { %5177 = vtanh.f32 %v4438_v24 }
0x367e   :  { %v5178_v43 = vpop.eup %5177 }
0x367f   :  { %4441 = vrot.lane.b32.xlu1 %v5178_v43, %s5613_s21 }
0x36a0   :  { %v954_v19 = vpop.xlane.xlu0 %953 }
0x36a1   :  { %v955_v42 = vsub.f32 %v949_v60, %v954_v19 }
0x36a3   :  { %v956_v30 = vmul.f32 1.442695, %v955_v42 }
0x36a5   :  { %5179 = vpow2.f32 %v956_v30 }
0x36a8   :  { %v2135_v41 = vpop.xlane.xlu0 %2134 }
0x36a9   :  { %v2136_v59 = vsub.f32 %v2131_v23, %v2135_v41 }
0x36ab   :  { %v5180_v54 = vpop.eup %5179  ;;  %v2137_v22 = vmul.f32 1.442695, %v2136_v59 }
0x36ac   :  { %v958_v44 = vsel %vm951_vm8, %v5180_v54, 0.0 }
0x36ad   :  { %5181 = vpow2.f32 %v2137_v22  ;;  %959 = vadd.xlane.f32.xlu1 %v958_v44 }
0x36b3   :  { %v5182_v5 = vpop.eup %5181 }
0x36b4   :  { %v2139_v13 = vsel %vm951_vm8, %v5182_v5, 0.0 }
0x36b5   :  { %2140 = vadd.xlane.f32.xlu1 %v2139_v13 }
0x36bd   :  { %3316 = vmax.xlane.f32.xlu1 %v3315_v51 }
0x36f1   :  { %v4442_v6 = vpop.permute.xlu1 %4441 }
0x36f2   :  { %v4444_v53 = vmul.f32 %v4442_v6, %v4425_v27  ;;  %v5346_v27 = vld [vmem:[%s7876_s18] ss:$0 sm:$0xff]  ;;  %s5615_s18 = smov [#allocation17]  }
0x36f3   :  { %s4516_s4 = sshll.u32 %s5615_s18, 4  ;;  %s4517_s4 = int_to_ptr.vmem [resolvable:$true] %s4516_s4 }
0x36f4   :  { %4446 = vrot.lane.b32.xlu2 %v4444_v53, %s5606_s1 }
0x371d   :  { %1543 = vmax.xlane.f32.xlu2 %v1542_v1 }
0x3720   :  { %v960_v7 = vpop.xlane.xlu1 %959 }
0x3721   :  { %5183 = vlog2.f32 %v960_v7 }
0x3727   :  { %v5184_v35 = vpop.eup %5183 }
0x3728   :  { %v962_v14 = vmul.f32 0.6931472, %v5184_v35  ;;  %v2141_v3 = vpop.xlane.xlu1 %2140 }
0x3729   :  { %5185 = vlog2.f32 %v2141_v3 }
0x372a   :  { %v963_v48 = vadd.f32 %v962_v14, %v954_v19 }
0x372c   :  { %v964_v16 = vsub.f32 %v949_v60, %v963_v48 }
0x372e   :  { %965 = vst.msk [vmem:[#allocation17] sm:$0x3] %vm951_vm8, %v964_v16 }
0x372f   :  { %v5186_v11 = vpop.eup %5185 }
0x3730   :  { %v2143_v32 = vmul.f32 0.6931472, %v5186_v11  ;;  %v3317_v31 = vpop.xlane.xlu1 %3316 }
0x3731   :  { %v3318_v49 = vsub.f32 %v3313_v26, %v3317_v31 }
0x3732   :  { %v2144_v9 = vadd.f32 %v2143_v32, %v2135_v41 }
0x3733   :  { %v3319_v61 = vmul.f32 1.442695, %v3318_v49 }
0x3734   :  { %v2145_v63 = vsub.f32 %v2131_v23, %v2144_v9 }
0x3735   :  { %5187 = vpow2.f32 %v3319_v61 }
0x3736   :  { %2147 = vst.msk [vmem:[#allocation17 + $0x4] sm:$0x3] %vm951_vm8, %v2145_v63 }
0x373b   :  { %v5188_v33 = vpop.eup %5187 }
0x373c   :  { %v3321_v39 = vsel %vm951_vm8, %v5188_v33, 0.0 }
0x373d   :  { %3322 = vadd.xlane.f32.xlu1 %v3321_v39 }
0x374e   :  { %v4447_v25 = vpop.permute.xlu2 %4446 }
0x374f   :  { %v4449_v50 = vsel %vm278_vm0, %v4447_v25, %v7762_v38  ;;  %v3904_v38 = vadd.f32 %v7801_v17, %v7707_v55 }
0x3750   :  { %4834 = vmatmul.msk.f32.vlgmr.msra.gmra.mxu2 %vm759_vm4, %v4449_v50 }
0x3751   :  { %v3906_v37 = vsel %vm951_vm8, %v3904_v38, -inf }
0x3790   :  { %v1544_v36 = vpop.xlane.xlu2 %1543 }
0x3791   :  { %v1545_v52 = vsub.f32 %v7819_v62, %v1544_v36 }
0x3793   :  { %v1546_v21 = vmul.f32 1.442695, %v1545_v52 }
0x3795   :  { %5189 = vpow2.f32 %v1546_v21 }
0x379b   :  { %v5190_v56 = vpop.eup %5189 }
0x379c   :  { %v1548_v15 = vsel %vm951_vm8, %v5190_v56, 0.0 }
0x379d   :  { %1549 = vadd.xlane.f32.xlu2 %v1548_v15 }
0x37a5   :  { %2725 = vmax.xlane.f32.xlu2 %v2724_v8 }
0x37ad   :  { %3907 = vmax.xlane.f32.xlu2 %v3906_v37 }
0x37b0   :  { %v3323_v2 = vpop.xlane.xlu1 %3322 }
0x37b1   :  { %5191 = vlog2.f32 %v3323_v2 }
0x37b7   :  { %v5192_v40 = vpop.eup %5191 }
0x37b8   :  { %v3325_v57 = vmul.f32 0.6931472, %v5192_v40 }
0x37ba   :  { %v3326_v58 = vadd.f32 %v3325_v57, %v3317_v31 }
0x37bc   :  { %v3327_v45 = vsub.f32 %v3313_v26, %v3326_v58 }
0x37be   :  { %3329 = vst.msk [vmem:[#allocation17 + $0x8] sm:$0x3] %vm951_vm8, %v3327_v45 }
0x37d3   :  { %v4470_v34 = vpop.f32.mrf.mxu2 }
0x37d4   :  { %v4471_v29 = vadd.f32 %v5346_v27, %v4470_v34 }
0x37d6   :  { %5193 = vtanh.f32 %v4471_v29 }
0x37dc   :  { %v5194_v18 = vpop.eup %5193 }
0x37dd   :  { %4835 = vmatmul.msk.f32.vlgmr.msrb.gmra.mxu1 %vm278_vm0, %v5194_v18 }
0x3810   :  { %v1550_v55 = vpop.xlane.xlu2 %1549 }
0x3811   :  { %5195 = vlog2.f32 %v1550_v55 }
0x3817   :  { %v5196_v60 = vpop.eup %5195 }
0x3818   :  { %v1552_v0 = vmul.f32 0.6931472, %v5196_v60  ;;  %v2726_v46 = vpop.xlane.xlu2 %2725 }
0x3819   :  { %v2727_v23 = vsub.f32 %v2722_v47, %v2726_v46 }
0x381a   :  { %v1553_v4 = vadd.f32 %v1552_v0, %v1544_v36 }
0x381b   :  { %v2728_v12 = vmul.f32 1.442695, %v2727_v23 }
0x381c   :  { %v1554_v10 = vsub.f32 %v7819_v62, %v1553_v4 }
0x381d   :  { %5197 = vpow2.f32 %v2728_v12 }
0x381e   :  { %1556 = vst.msk [vmem:[#allocation17 + $0x2] sm:$0x3] %vm951_vm8, %v1554_v10 }
0x3820   :  { %v3908_v24 = vpop.xlane.xlu2 %3907 }
0x3821   :  { %v3909_v43 = vsub.f32 %v3904_v38, %v3908_v24 }
0x3823   :  { %v5198_v19 = vpop.eup %5197  ;;  %v3910_v42 = vmul.f32 1.442695, %v3909_v43 }
0x3824   :  { %v2730_v30 = vsel %vm951_vm8, %v5198_v19, 0.0 }
0x3825   :  { %5199 = vpow2.f32 %v3910_v42  ;;  %2731 = vadd.xlane.f32.xlu0 %v2730_v30 }
0x382b   :  { %v5200_v41 = vpop.eup %5199 }
0x382c   :  { %v3912_v59 = vsel %vm951_vm8, %v5200_v41, 0.0 }
0x382d   :  { %3913 = vadd.xlane.f32.xlu2 %v3912_v59 }
0x385a   :  { %v4494_v54 = vpop.f32.mrf.mxu1 }
0x385b   :  { %v4495_v22 = vadd.f32 %v7801_v17, %v4494_v54 }
0x385d   :  { %v4497_v44 = vsel %vm951_vm8, %v4495_v22, -inf }
0x385e   :  { %4498 = vmax.xlane.f32.xlu0 %v4497_v44 }
0x3898   :  { %v2732_v5 = vpop.xlane.xlu0 %2731 }
0x3899   :  { %5201 = vlog2.f32 %v2732_v5 }
0x389f   :  { %v5202_v13 = vpop.eup %5201 }
0x38a0   :  { %v2734_v26 = vmul.f32 0.6931472, %v5202_v13  ;;  %v3914_v51 = vpop.xlane.xlu2 %3913 }
0x38a1   :  { %5203 = vlog2.f32 %v3914_v51 }
0x38a2   :  { %v2735_v6 = vadd.f32 %v2734_v26, %v2726_v46 }
0x38a4   :  { %v2736_v53 = vsub.f32 %v2722_v47, %v2735_v6 }
0x38a6   :  { %2738 = vst.msk [vmem:[#allocation17 + $0x6] sm:$0x3] %vm951_vm8, %v2736_v53 }
0x38a7   :  { %v5204_v28 = vpop.eup %5203 }
0x38a8   :  { %v3916_v62 = vmul.f32 0.6931472, %v5204_v28 }
0x38aa   :  { %v3917_v1 = vadd.f32 %v3916_v62, %v3908_v24 }
0x38ac   :  { %v3918_v7 = vsub.f32 %v3904_v38, %v3917_v1 }
0x38ae   :  { %3920 = vst.msk [vmem:[#allocation17 + $0xa] sm:$0x3] %vm951_vm8, %v3918_v7 }
0x38d1   :  { %v4499_v17 = vpop.xlane.xlu0 %4498 }
0x38d2   :  { %v4500_v35 = vsub.f32 %v4495_v22, %v4499_v17 }
0x38d4   :  { %v4501_v14 = vmul.f32 1.442695, %v4500_v35 }
0x38d6   :  { %5205 = vpow2.f32 %v4501_v14 }
0x38dc   :  { %v5206_v3 = vpop.eup %5205 }
0x38dd   :  { %v4503_v48 = vsel %vm951_vm8, %v5206_v3, 0.0 }
0x38de   :  { %4504 = vadd.xlane.f32.xlu0 %v4503_v48 }
0x3951   :  { %v4505_v16 = vpop.xlane.xlu0 %4504 }
0x3952   :  { %5207 = vlog2.f32 %v4505_v16 }
0x3958   :  { %v5208_v11 = vpop.eup %5207 }
0x3959   :  { %v4507_v32 = vmul.f32 0.6931472, %v5208_v11 }
0x395b   :  { %v4508_v31 = vadd.f32 %v4507_v32, %v4499_v17 }
0x395d   :  { %v4509_v49 = vsub.f32 %v4495_v22, %v4508_v31 }
0x395f   :  { %4511 = vst.msk [vmem:[#allocation17 + $0xc] sm:$0x3] %vm951_vm8, %v4509_v49 }
0x3960   :  { %4524 = dma.vmem_to_hbm [thread:$0]  %s4517_s4, 224, %s4519_s27, [#allocation4], %s5606_s1, %s5606_s1, %s5607_s6  }
0x3961   :  { %5597 = dma.done.wait [#allocation4], 224  }
0x3962   :  { %5598 = vsyncadd [#allocation4], 4294967072 }
0x3963   :  { %4533 = vsyncpa [#allocation3], 1 }
0x3964   :  { %4534 = vsyncpa [#allocation6], 1 }
0x3965   :  { %4535 = vsyncpa [#allocation9], 1 }
0x3966   :  { %4536 = vsyncpa [#allocation12], 1 }
0x3967   :  { %4537 = vsyncpa [#allocation15], 1 }
0x3968   :  { %4538 = vsyncpa [#allocation4], 1 }

</bundles_post_ra>
